<compile_context>
chip_gen: v7x
topology: tpu7x:2x2x1
jax: 0.10.0
libtpu: 0.0.40
codegen_flags: <defaults>
</compile_context>

<pallas_src>
import functools

import jax
import jax.numpy as jnp
from jax.experimental import pallas as pl
from jax.experimental.pallas import tpu as pltpu


# ----------------------------- Pallas kernels ------------------------------

def _stem_conv_kernel(x_ref, wc_ref, cb_ref, wl_ref, bl_ref, o_ref):
    # Fused stem: 1x1 conv (BN scale folded into bf16 weights offline) +
    # BN shift + LeakyReLU(0.1), then positional linear residual y + (y@Wl+bl).
    # TODO(synk): train-mode BatchNorm (batch statistics) not reproduced; this
    # uses eval-mode running-stats semantics folded to an affine transform.
    xb = x_ref[...].astype(jnp.bfloat16)
    y = jnp.dot(xb, wc_ref[...], preferred_element_type=jnp.float32) + cb_ref[...]
    y = jnp.where(y > 0, y, 0.1 * y)                        # (TM, c2) f32
    e = jnp.dot(y.astype(jnp.bfloat16), wl_ref[...],
                preferred_element_type=jnp.float32) + bl_ref[...]
    o_ref[...] = y + e


def _stem_linear_kernel(x_ref, wl_ref, bl_ref, o_ref):
    # No-conv path (c1 == c2): out = x + (x @ Wl + bl)
    x = x_ref[...]
    e = jnp.dot(x.astype(jnp.bfloat16), wl_ref[...],
                preferred_element_type=jnp.float32) + bl_ref[...]
    o_ref[...] = x + e


def _layers_kernel(x_ref, wqkv_ref, bqkv_ref, wo_ref, bo_ref, wff_ref, o_ref,
                   *, num_heads, seq_len, batch_block):
    # One grid step = one (batch block, layer) pair.  The activation lives in
    # the output VMEM block across the whole (inner, 'arbitrary') layer axis.
    layer = pl.program_id(1)

    @pl.when(layer == 0)
    def _():
        o_ref[...] = x_ref[...]

    x = o_ref[...]                                          # (nb*L, E) f32
    rows, emb = x.shape
    hd = emb // num_heads

    xb = x.astype(jnp.bfloat16)
    # qkv = x @ [Wq*s | Wk | Wv] + [bq*s | bk | bv]   (attention scale folded
    # into the Q columns offline).  M = nb*L rows feed the MXU.
    qkv = jnp.dot(xb, wqkv_ref[0],
                  preferred_element_type=jnp.float32) + bqkv_ref[0]   # (rows, 3E)
    q = qkv[:, :emb]
    k = qkv[:, emb:2 * emb]
    v = qkv[:, 2 * emb:]

    # Per-batch-element, per-head softmax attention.  nb and num_heads are
    # small so the loops are unrolled; scores/probs never leave VMEM/vregs.
    # TODO(synk): for large L replace this with a KV-tiled online-softmax loop
    # (m/l/acc scratch) so only one (L, tk) score tile is live (v7x 64 MiB VMEM).
    outs = []
    for n in range(batch_block):
        r = slice(n * seq_len, (n + 1) * seq_len)
        heads = []
        for hix in range(num_heads):
            c = slice(hix * hd, (hix + 1) * hd)
            qh = q[r, c].astype(jnp.bfloat16)               # (L, hd)
            kh = k[r, c].astype(jnp.bfloat16)               # (L, hd)
            vh = v[r, c].astype(jnp.bfloat16)               # (L, hd)
            s = jax.lax.dot_general(qh, kh, (((1,), (1,)), ((), ())),
                                    preferred_element_type=jnp.float32)  # (L, L)
            m = jnp.max(s, axis=-1, keepdims=True)
            p = jnp.exp(s - m)
            p = p * pl.reciprocal(jnp.sum(p, axis=-1, keepdims=True), approx=True)
            heads.append(jnp.dot(p.astype(jnp.bfloat16), vh,
                                 preferred_element_type=jnp.float32))
        outs.append(jnp.concatenate(heads, axis=-1))        # (L, E)
    attn = outs[0] if batch_block == 1 else jnp.concatenate(outs, axis=0)

    x1 = (jnp.dot(attn.astype(jnp.bfloat16), wo_ref[0],
                  preferred_element_type=jnp.float32) + bo_ref[0] + x)
    x2 = jnp.dot(x1.astype(jnp.bfloat16), wff_ref[0],
                 preferred_element_type=jnp.float32) + x1
    o_ref[...] = x2


# ----------------------------- kernel wrappers ------------------------------

def _round_up(x, m):
    return (x + m - 1) // m * m


def _stem_row_tile(M, cap=2048):
    # Fat row tiles amortize the ~0.35us/step grid overhead; the ragged final
    # tile (if any) is handled by Pallas boundary masking, not jnp.pad.
    return min(cap, _round_up(M, 8))


def _pick_batch_block(batch, seq_len, target_rows=256):
    # Smallest divisor nb of `batch` whose row block nb*seq_len is a multiple
    # of 8 sublanes and gives the projection matmuls >= target_rows rows.
    for nb in range(1, batch + 1):
        rows = nb * seq_len
        if batch % nb == 0 and rows % 8 == 0 and rows >= target_rows:
            return nb
    return batch          # whole batch in one block: always layout-legal


def pallas_stem_conv(x_flat, conv_w, conv_b, lin_w, lin_b):
    """x_flat: (M, c1) f32; conv_w: (c1, c2) bf16 (BN scale folded); lin_w bf16."""
    M, c1 = x_flat.shape
    c2 = conv_w.shape[1]
    tm = _stem_row_tile(M)
    return pl.pallas_call(
        _stem_conv_kernel,
        out_shape=jax.ShapeDtypeStruct((M, c2), jnp.float32),
        grid=(pl.cdiv(M, tm),),
        in_specs=[
            pl.BlockSpec((tm, c1), lambda i: (i, 0)),
            pl.BlockSpec((c1, c2), lambda i: (0, 0)),
            pl.BlockSpec((1, c2), lambda i: (0, 0)),
            pl.BlockSpec((c2, c2), lambda i: (0, 0)),
            pl.BlockSpec((1, c2), lambda i: (0, 0)),
        ],
        out_specs=pl.BlockSpec((tm, c2), lambda i: (i, 0)),
        compiler_params=pltpu.CompilerParams(
            dimension_semantics=("parallel",),
            vmem_limit_bytes=64 * 1024 * 1024),
    )(x_flat, conv_w, conv_b, lin_w, lin_b)


def pallas_stem_linear(x_flat, lin_w, lin_b):
    """x_flat: (M, c2) f32; lin_w: (c2, c2) bf16."""
    M, c2 = x_flat.shape
    tm = _stem_row_tile(M)
    return pl.pallas_call(
        _stem_linear_kernel,
        out_shape=jax.ShapeDtypeStruct((M, c2), jnp.float32),
        grid=(pl.cdiv(M, tm),),
        in_specs=[
            pl.BlockSpec((tm, c2), lambda i: (i, 0)),
            pl.BlockSpec((c2, c2), lambda i: (0, 0)),
            pl.BlockSpec((1, c2), lambda i: (0, 0)),
        ],
        out_specs=pl.BlockSpec((tm, c2), lambda i: (i, 0)),
        compiler_params=pltpu.CompilerParams(
            dimension_semantics=("parallel",),
            vmem_limit_bytes=64 * 1024 * 1024),
    )(x_flat, lin_w, lin_b)


def pallas_transformer_layers(x2d, wqkv, bqkv, wo, bo, wff, *, num_heads,
                              seq_len, batch):
    """x2d: (batch*seq_len, E) f32.  All layers in ONE pallas_call."""
    M, E = x2d.shape
    assert M == batch * seq_len and E % num_heads == 0
    num_layers = wqkv.shape[0]
    nb = _pick_batch_block(batch, seq_len)
    rb = nb * seq_len
    kern = functools.partial(_layers_kernel, num_heads=num_heads,
                             seq_len=seq_len, batch_block=nb)
    return pl.pallas_call(
        kern,
        out_shape=jax.ShapeDtypeStruct((M, E), jnp.float32),
        grid=(batch // nb, num_layers),
        in_specs=[
            pl.BlockSpec((rb, E), lambda b, l: (b, 0)),          # read @ layer 0
            pl.BlockSpec((1, E, 3 * E), lambda b, l: (l, 0, 0)),
            pl.BlockSpec((1, 1, 3 * E), lambda b, l: (l, 0, 0)),
            pl.BlockSpec((1, E, E), lambda b, l: (l, 0, 0)),
            pl.BlockSpec((1, 1, E), lambda b, l: (l, 0, 0)),
            pl.BlockSpec((1, E, E), lambda b, l: (l, 0, 0)),
        ],
        # Constant block index across the layer axis -> VMEM-resident
        # activation, written back to HBM once per batch block.
        out_specs=pl.BlockSpec((rb, E), lambda b, l: (b, 0)),
        compiler_params=pltpu.CompilerParams(
            dimension_semantics=("parallel", "arbitrary"),
            vmem_limit_bytes=64 * 1024 * 1024),
    )(x2d, wqkv, bqkv, wo, bo, wff)


# ----------------------------- parameters ------------------------------

def init_params(key, c1, c2, num_heads, num_layers):
    """Same parameter structure as the PyTorch module (unfused, f32)."""
    keys = list(jax.random.split(key, 8 + 16 * num_layers))
    it = iter(keys)
    nxt = lambda: next(it)
    p = {}
    if c1 != c2:
        p["conv_w"] = 0.1 * jax.random.normal(nxt(), (c1, c2), jnp.float32)
        gamma = 1.0 + 0.1 * jax.random.normal(nxt(), (c2,), jnp.float32)
        beta = 0.1 * jax.random.normal(nxt(), (c2,), jnp.float32)
        rmean = 0.1 * jax.random.normal(nxt(), (c2,), jnp.float32)
        rvar = 1.0 + 0.1 * jnp.abs(jax.random.normal(nxt(), (c2,), jnp.float32))
        scale = gamma / jnp.sqrt(rvar + 1e-5)
        p["bn_scale"] = scale
        p["bn_shift"] = beta - rmean * scale
    p["lin_w"] = 0.1 * jax.random.normal(nxt(), (c2, c2), jnp.float32)
    p["lin_b"] = 0.1 * jax.random.normal(nxt(), (c2,), jnp.float32)

    layers = []
    for _ in range(num_layers):
        layers.append({
            "q_w": 0.1 * jax.random.normal(nxt(), (c2, c2), jnp.float32),
            "k_w": 0.1 * jax.random.normal(nxt(), (c2, c2), jnp.float32),
            "v_w": 0.1 * jax.random.normal(nxt(), (c2, c2), jnp.float32),
            "in_q_w": 0.1 * jax.random.normal(nxt(), (c2, c2), jnp.float32),
            "in_q_b": 0.1 * jax.random.normal(nxt(), (c2,), jnp.float32),
            "in_k_w": 0.1 * jax.random.normal(nxt(), (c2, c2), jnp.float32),
            "in_k_b": 0.1 * jax.random.normal(nxt(), (c2,), jnp.float32),
            "in_v_w": 0.1 * jax.random.normal(nxt(), (c2, c2), jnp.float32),
            "in_v_b": 0.1 * jax.random.normal(nxt(), (c2,), jnp.float32),
            "out_w": 0.1 * jax.random.normal(nxt(), (c2, c2), jnp.float32),
            "out_b": 0.1 * jax.random.normal(nxt(), (c2,), jnp.float32),
            "fc1_w": 0.1 * jax.random.normal(nxt(), (c2, c2), jnp.float32),
            "fc2_w": 0.1 * jax.random.normal(nxt(), (c2, c2), jnp.float32),
        })
    p["layers"] = layers
    return p


def fuse_params(p, num_heads):
    """Offline folding: q/k/v pre-proj into MHA in_proj, fc1@fc2, BN scale into
    conv weight, 1/sqrt(hd) into the Q columns; bf16 cast of MXU weights.
    Per-layer tensors are stacked along a leading num_layers axis."""
    f = {}
    if "conv_w" in p:
        f["conv_w"] = (p["conv_w"] * p["bn_scale"][None, :]).astype(jnp.bfloat16)
        f["conv_b"] = p["bn_shift"].reshape(1, -1)
    f["lin_w"] = p["lin_w"].astype(jnp.bfloat16)
    f["lin_b"] = p["lin_b"].reshape(1, -1)

    E = p["lin_w"].shape[0]
    scale = float(E // num_heads) ** -0.5
    wqkv, bqkv, wo, bo, wff = [], [], [], [], []
    for lp in p["layers"]:
        wq = (lp["q_w"] @ lp["in_q_w"]) * scale
        wk = lp["k_w"] @ lp["in_k_w"]
        wv = lp["v_w"] @ lp["in_v_w"]
        bq = lp["in_q_b"] * scale
        wqkv.append(jnp.concatenate([wq, wk, wv], axis=1).astype(jnp.bfloat16))
        bqkv.append(jnp.concatenate([bq, lp["in_k_b"], lp["in_v_b"]]).reshape(1, -1))
        wo.append(lp["out_w"].astype(jnp.bfloat16))
        bo.append(lp["out_b"].reshape(1, -1))
        wff.append((lp["fc1_w"] @ lp["fc2_w"]).astype(jnp.bfloat16))
    f["wqkv"] = jnp.stack(wqkv)        # (num_layers, E, 3E) bf16
    f["bqkv"] = jnp.stack(bqkv)        # (num_layers, 1, 3E) f32
    f["wo"] = jnp.stack(wo)            # (num_layers, E, E)  bf16
    f["bo"] = jnp.stack(bo)            # (num_layers, 1, E)  f32
    f["wff"] = jnp.stack(wff)          # (num_layers, E, E)  bf16
    return f


# ----------------------------- model forward ------------------------------

def transformer_block_forward(x, fused, c2, num_heads):
    """x: NCHW (b, c1, w, h) float32. Returns (b, c2, w, h)."""
    b, c1, w, h = x.shape
    L = w * h
    # Single NCHW -> channels-last transpose; row m = n*L + (wi*h + hi), which
    # matches torch's flatten(2) token ordering per batch element.
    x_flat = x.transpose(0, 2, 3, 1).reshape(b * L, c1)
    if "conv_w" in fused:
        y = pallas_stem_conv(x_flat, fused["conv_w"], fused["conv_b"],
                             fused["lin_w"], fused["lin_b"])
    else:
        y = pallas_stem_linear(x_flat, fused["lin_w"], fused["lin_b"])
    y = pallas_transformer_layers(y, fused["wqkv"], fused["bqkv"], fused["wo"],
                                  fused["bo"], fused["wff"],
                                  num_heads=num_heads, seq_len=L, batch=b)
    # (b*L, E) -> (b, c2, w, h); single output transpose.
    return y.reshape(b, L, c2).transpose(0, 2, 1).reshape(b, c2, w, h)


# ----------------------------- main ------------------------------

if __name__ == "__main__":
    b, c1, c2 = 2, 4, 32
    w = h = 16                      # L = 256 tokens per image
    num_heads = 4
    num_layers = 2

    key = jax.random.PRNGKey(0)
    kx, kp = jax.random.split(key)
    x = jax.random.normal(kx, (b, c1, w, h), jnp.float32)
    params = init_params(kp, c1, c2, num_heads, num_layers)
    fused = fuse_params(params, num_heads)

    fwd = jax.jit(functools.partial(transformer_block_forward,
                                    c2=c2, num_heads=num_heads))
    out = jax.block_until_ready(fwd(x, fused))
    assert out.shape == (b, c2, w, h), out.shape
    assert bool(jnp.all(jnp.isfinite(out)))
    print("KERNEL_OK")
</pallas_src>

<mosaic_0001>
module attributes {stable_mosaic.version = 11 : i64} {
  func.func @_stem_conv_kernel(%arg0: i32, %arg1: memref<512x4xf32, #tpu.memory_space<vmem>>, %arg2: memref<4x32xbf16, #tpu.memory_space<vmem>>, %arg3: memref<1x32xf32, #tpu.memory_space<vmem>>, %arg4: memref<32x32xbf16, #tpu.memory_space<vmem>>, %arg5: memref<1x32xf32, #tpu.memory_space<vmem>>, %arg6: memref<512x32xf32, #tpu.memory_space<vmem>>) attributes {dimension_semantics = [#tpu.dimension_semantics<parallel>], iteration_bounds = array<i64: 1>, scalar_prefetch = 0 : i64, scratch_operands = 0 : i64, tpu.core_type = #tpu.core_type<tc>, window_params = [{transform_indices = @transform_0, window_bounds = array<i64: 512, 4>}, {pipeline_mode = #tpu.pipeline_mode<synchronous>, transform_indices = @transform_1, window_bounds = array<i64: 4, 32>}, {pipeline_mode = #tpu.pipeline_mode<synchronous>, transform_indices = @transform_2, window_bounds = array<i64: 1, 32>}, {pipeline_mode = #tpu.pipeline_mode<synchronous>, transform_indices = @transform_3, window_bounds = array<i64: 32, 32>}, {pipeline_mode = #tpu.pipeline_mode<synchronous>, transform_indices = @transform_4, window_bounds = array<i64: 1, 32>}, {transform_indices = @transform_5, window_bounds = array<i64: 512, 32>}]} {
    %c0 = arith.constant 0 : index
    %c0_0 = arith.constant 0 : index
    %0 = vector.load %arg1[%c0, %c0_0] : memref<512x4xf32, #tpu.memory_space<vmem>>, vector<512x4xf32>
    %1 = arith.truncf %0 : vector<512x4xf32> to vector<512x4xbf16>
    %c0_1 = arith.constant 0 : index
    %c0_2 = arith.constant 0 : index
    %2 = vector.load %arg2[%c0_1, %c0_2] : memref<4x32xbf16, #tpu.memory_space<vmem>>, vector<4x32xbf16>
    %cst = arith.constant dense<0.000000e+00> : vector<512x32xf32>
    %3 = tpu.matmul %1, %2, %cst {dimension_numbers = #tpu.dot_dimension_numbers<[1], [0], [0], [1], [0, 0, 1, 1], [], []>} : vector<512x4xbf16>, vector<4x32xbf16>, vector<512x32xf32> -> vector<512x32xf32>
    %c0_3 = arith.constant 0 : index
    %c0_4 = arith.constant 0 : index
    %4 = vector.load %arg3[%c0_3, %c0_4] : memref<1x32xf32, #tpu.memory_space<vmem>>, vector<1x32xf32>
    %5 = vector.broadcast %4 : vector<1x32xf32> to vector<512x32xf32>
    %6 = arith.addf %3, %5 : vector<512x32xf32>
    %cst_5 = arith.constant 0.000000e+00 : f32
    %7 = vector.broadcast %cst_5 : f32 to vector<512x32xf32>
    %8 = arith.cmpf ogt, %6, %7 : vector<512x32xf32>
    %cst_6 = arith.constant 1.000000e-01 : f32
    %9 = vector.broadcast %cst_6 : f32 to vector<512x32xf32>
    %10 = arith.mulf %9, %6 : vector<512x32xf32>
    %11 = arith.select %8, %6, %10 : vector<512x32xi1>, vector<512x32xf32>
    %12 = arith.truncf %11 : vector<512x32xf32> to vector<512x32xbf16>
    %c0_7 = arith.constant 0 : index
    %c0_8 = arith.constant 0 : index
    %13 = vector.load %arg4[%c0_7, %c0_8] : memref<32x32xbf16, #tpu.memory_space<vmem>>, vector<32x32xbf16>
    %cst_9 = arith.constant dense<0.000000e+00> : vector<512x32xf32>
    %14 = tpu.matmul %12, %13, %cst_9 {dimension_numbers = #tpu.dot_dimension_numbers<[1], [0], [0], [1], [0, 0, 1, 1], [], []>} : vector<512x32xbf16>, vector<32x32xbf16>, vector<512x32xf32> -> vector<512x32xf32>
    %c0_10 = arith.constant 0 : index
    %c0_11 = arith.constant 0 : index
    %15 = vector.load %arg5[%c0_10, %c0_11] : memref<1x32xf32, #tpu.memory_space<vmem>>, vector<1x32xf32>
    %16 = vector.broadcast %15 : vector<1x32xf32> to vector<512x32xf32>
    %17 = arith.addf %14, %16 : vector<512x32xf32>
    %18 = arith.addf %11, %17 : vector<512x32xf32>
    %c0_12 = arith.constant 0 : index
    %c0_13 = arith.constant 0 : index
    %19 = vector.load %arg6[%c0_12, %c0_13] : memref<512x32xf32, #tpu.memory_space<vmem>>, vector<512x32xf32>
    tpu.vector_store %arg6[%c0_12, %c0_13], %18 {strides = array<i32>} : memref<512x32xf32, #tpu.memory_space<vmem>>, vector<512x32xf32>,
    return
  }
  func.func @transform_0(%arg0: i32) -> (i32, i32) {
    %c0_i32 = arith.constant 0 : i32
    %c0_i32_0 = arith.constant 0 : i32
    return %arg0, %c0_i32 : i32, i32
  }
  func.func @transform_1(%arg0: i32) -> (i32, i32) {
    %c0_i32 = arith.constant 0 : i32
    %c0_i32_0 = arith.constant 0 : i32
    %c0_i32_1 = arith.constant 0 : i32
    return %c0_i32, %c0_i32_0 : i32, i32
  }
  func.func @transform_2(%arg0: i32) -> (i32, i32) {
    %c0_i32 = arith.constant 0 : i32
    %c0_i32_0 = arith.constant 0 : i32
    %c0_i32_1 = arith.constant 0 : i32
    return %c0_i32, %c0_i32_0 : i32, i32
  }
  func.func @transform_3(%arg0: i32) -> (i32, i32) {
    %c0_i32 = arith.constant 0 : i32
    %c0_i32_0 = arith.constant 0 : i32
    %c0_i32_1 = arith.constant 0 : i32
    return %c0_i32, %c0_i32_0 : i32, i32
  }
  func.func @transform_4(%arg0: i32) -> (i32, i32) {
    %c0_i32 = arith.constant 0 : i32
    %c0_i32_0 = arith.constant 0 : i32
    %c0_i32_1 = arith.constant 0 : i32
    return %c0_i32, %c0_i32_0 : i32, i32
  }
  func.func @transform_5(%arg0: i32) -> (i32, i32) {
    %c0_i32 = arith.constant 0 : i32
    %c0_i32_0 = arith.constant 0 : i32
    return %arg0, %c0_i32 : i32, i32
  }
}

module attributes {stable_mosaic.version = 11 : i64} {
  func.func @_layers_kernel(%arg0: i32, %arg1: i32, %arg2: memref<256x32xf32, #tpu.memory_space<vmem>>, %arg3: memref<1x32x96xbf16, #tpu.memory_space<vmem>>, %arg4: memref<1x1x96xf32, #tpu.memory_space<vmem>>, %arg5: memref<1x32x32xbf16, #tpu.memory_space<vmem>>, %arg6: memref<1x1x32xf32, #tpu.memory_space<vmem>>, %arg7: memref<1x32x32xbf16, #tpu.memory_space<vmem>>, %arg8: memref<256x32xf32, #tpu.memory_space<vmem>>) attributes {dimension_semantics = [#tpu.dimension_semantics<parallel>, #tpu.dimension_semantics<arbitrary>], iteration_bounds = array<i64: 2, 2>, scalar_prefetch = 0 : i64, scratch_operands = 0 : i64, tpu.core_type = #tpu.core_type<tc>, window_params = [{transform_indices = @transform_0, window_bounds = array<i64: 256, 32>}, {transform_indices = @transform_1, window_bounds = array<i64: 1, 32, 96>}, {transform_indices = @transform_2, window_bounds = array<i64: 1, 1, 96>}, {transform_indices = @transform_3, window_bounds = array<i64: 1, 32, 32>}, {transform_indices = @transform_4, window_bounds = array<i64: 1, 1, 32>}, {transform_indices = @transform_5, window_bounds = array<i64: 1, 32, 32>}, {transform_indices = @transform_6, window_bounds = array<i64: 256, 32>}]} {
    %c0_i32 = arith.constant 0 : i32
    %0 = arith.cmpi eq, %arg1, %c0_i32 : i32
    %1 = arith.extui %0 : i1 to i32
    %c0_i32_0 = arith.constant 0 : i32
    %2 = arith.cmpi ne, %1, %c0_i32_0 : i32
    scf.if %2 {
      %c0_37 = arith.constant 0 : index
      %c0_38 = arith.constant 0 : index
      %107 = vector.load %arg2[%c0_37, %c0_38] : memref<256x32xf32, #tpu.memory_space<vmem>>, vector<256x32xf32>
      %c0_39 = arith.constant 0 : index
      %c0_40 = arith.constant 0 : index
      %108 = vector.load %arg8[%c0_39, %c0_40] : memref<256x32xf32, #tpu.memory_space<vmem>>, vector<256x32xf32>
      tpu.vector_store %arg8[%c0_39, %c0_40], %107 {strides = array<i32>} : memref<256x32xf32, #tpu.memory_space<vmem>>, vector<256x32xf32>,
    } else {
    }
    %c0 = arith.constant 0 : index
    %c0_1 = arith.constant 0 : index
    %3 = vector.load %arg8[%c0, %c0_1] : memref<256x32xf32, #tpu.memory_space<vmem>>, vector<256x32xf32>
    %4 = arith.truncf %3 : vector<256x32xf32> to vector<256x32xbf16>
    %c0_2 = arith.constant 0 : index
    %c0_3 = arith.constant 0 : index
    %c0_4 = arith.constant 0 : index
    %5 = vector.load %arg3[%c0_2, %c0_3, %c0_4] : memref<1x32x96xbf16, #tpu.memory_space<vmem>>, vector<1x32x96xbf16>
    %6 = vector.shape_cast %5 : vector<1x32x96xbf16> to vector<32x96xbf16>
    %cst = arith.constant dense<0.000000e+00> : vector<256x96xf32>
    %7 = tpu.matmul %4, %6, %cst {dimension_numbers = #tpu.dot_dimension_numbers<[1], [0], [0], [1], [0, 0, 1, 1], [], []>} : vector<256x32xbf16>, vector<32x96xbf16>, vector<256x96xf32> -> vector<256x96xf32>
    %c0_5 = arith.constant 0 : index
    %c0_6 = arith.constant 0 : index
    %c0_7 = arith.constant 0 : index
    %8 = vector.load %arg4[%c0_5, %c0_6, %c0_7] : memref<1x1x96xf32, #tpu.memory_space<vmem>>, vector<1x1x96xf32>
    %9 = vector.shape_cast %8 : vector<1x1x96xf32> to vector<1x96xf32>
    %10 = vector.broadcast %9 : vector<1x96xf32> to vector<256x96xf32>
    %11 = arith.addf %7, %10 : vector<256x96xf32>
    %12 = vector.extract_strided_slice %11 {offsets = [0, 0], sizes = [256, 32], strides = [1, 1]} : vector<256x96xf32> to vector<256x32xf32>
    %13 = vector.extract_strided_slice %11 {offsets = [0, 32], sizes = [256, 32], strides = [1, 1]} : vector<256x96xf32> to vector<256x32xf32>
    %14 = vector.extract_strided_slice %11 {offsets = [0, 64], sizes = [256, 32], strides = [1, 1]} : vector<256x96xf32> to vector<256x32xf32>
    %15 = vector.extract_strided_slice %12 {offsets = [0, 0], sizes = [256, 8], strides = [1, 1]} : vector<256x32xf32> to vector<256x8xf32>
    %16 = arith.truncf %15 : vector<256x8xf32> to vector<256x8xbf16>
    %17 = vector.extract_strided_slice %13 {offsets = [0, 0], sizes = [256, 8], strides = [1, 1]} : vector<256x32xf32> to vector<256x8xf32>
    %18 = arith.truncf %17 : vector<256x8xf32> to vector<256x8xbf16>
    %19 = vector.extract_strided_slice %14 {offsets = [0, 0], sizes = [256, 8], strides = [1, 1]} : vector<256x32xf32> to vector<256x8xf32>
    %20 = arith.truncf %19 : vector<256x8xf32> to vector<256x8xbf16>
    %cst_8 = arith.constant dense<0.000000e+00> : vector<256x256xf32>
    %21 = tpu.matmul %16, %18, %cst_8 {dimension_numbers = #tpu.dot_dimension_numbers<[1], [1], [0], [0], [0, 0, 1, 0], [], []>} : vector<256x8xbf16>, vector<256x8xbf16>, vector<256x256xf32> -> vector<256x256xf32>
    %cst_9 = arith.constant dense<0xFF800000> : vector<256xf32>
    %22 = vector.multi_reduction <maximumf>, %21, %cst_9 [1] : vector<256x256xf32> to vector<256xf32>
    %23 = vector.shape_cast %22 : vector<256xf32> to vector<256x1xf32>
    %24 = vector.broadcast %23 : vector<256x1xf32> to vector<256x256xf32>
    %25 = arith.subf %21, %24 : vector<256x256xf32>
    %26 = math.exp %25 : vector<256x256xf32>
    %cst_10 = arith.constant dense<0.000000e+00> : vector<256xf32>
    %27 = vector.multi_reduction <add>, %26, %cst_10 [1] : vector<256x256xf32> to vector<256xf32>
    %28 = vector.shape_cast %27 : vector<256xf32> to vector<256x1xf32>
    %29 = tpu.reciprocal %28 {approx = true} : vector<256x1xf32> -> vector<256x1xf32>
    %30 = vector.broadcast %29 : vector<256x1xf32> to vector<256x256xf32>
    %31 = arith.mulf %26, %30 : vector<256x256xf32>
    %32 = arith.truncf %31 : vector<256x256xf32> to vector<256x256xbf16>
    %cst_11 = arith.constant dense<0.000000e+00> : vector<256x8xf32>
    %33 = tpu.matmul %32, %20, %cst_11 {dimension_numbers = #tpu.dot_dimension_numbers<[1], [0], [0], [1], [0, 0, 1, 1], [], []>} : vector<256x256xbf16>, vector<256x8xbf16>, vector<256x8xf32> -> vector<256x8xf32>
    %34 = vector.extract_strided_slice %12 {offsets = [0, 8], sizes = [256, 8], strides = [1, 1]} : vector<256x32xf32> to vector<256x8xf32>
    %35 = arith.truncf %34 : vector<256x8xf32> to vector<256x8xbf16>
    %36 = vector.extract_strided_slice %13 {offsets = [0, 8], sizes = [256, 8], strides = [1, 1]} : vector<256x32xf32> to vector<256x8xf32>
    %37 = arith.truncf %36 : vector<256x8xf32> to vector<256x8xbf16>
    %38 = vector.extract_strided_slice %14 {offsets = [0, 8], sizes = [256, 8], strides = [1, 1]} : vector<256x32xf32> to vector<256x8xf32>
    %39 = arith.truncf %38 : vector<256x8xf32> to vector<256x8xbf16>
    %cst_12 = arith.constant dense<0.000000e+00> : vector<256x256xf32>
    %40 = tpu.matmul %35, %37, %cst_12 {dimension_numbers = #tpu.dot_dimension_numbers<[1], [1], [0], [0], [0, 0, 1, 0], [], []>} : vector<256x8xbf16>, vector<256x8xbf16>, vector<256x256xf32> -> vector<256x256xf32>
    %cst_13 = arith.constant dense<0xFF800000> : vector<256xf32>
    %41 = vector.multi_reduction <maximumf>, %40, %cst_13 [1] : vector<256x256xf32> to vector<256xf32>
    %42 = vector.shape_cast %41 : vector<256xf32> to vector<256x1xf32>
    %43 = vector.broadcast %42 : vector<256x1xf32> to vector<256x256xf32>
    %44 = arith.subf %40, %43 : vector<256x256xf32>
    %45 = math.exp %44 : vector<256x256xf32>
    %cst_14 = arith.constant dense<0.000000e+00> : vector<256xf32>
    %46 = vector.multi_reduction <add>, %45, %cst_14 [1] : vector<256x256xf32> to vector<256xf32>
    %47 = vector.shape_cast %46 : vector<256xf32> to vector<256x1xf32>
    %48 = tpu.reciprocal %47 {approx = true} : vector<256x1xf32> -> vector<256x1xf32>
    %49 = vector.broadcast %48 : vector<256x1xf32> to vector<256x256xf32>
    %50 = arith.mulf %45, %49 : vector<256x256xf32>
    %51 = arith.truncf %50 : vector<256x256xf32> to vector<256x256xbf16>
    %cst_15 = arith.constant dense<0.000000e+00> : vector<256x8xf32>
    %52 = tpu.matmul %51, %39, %cst_15 {dimension_numbers = #tpu.dot_dimension_numbers<[1], [0], [0], [1], [0, 0, 1, 1], [], []>} : vector<256x256xbf16>, vector<256x8xbf16>, vector<256x8xf32> -> vector<256x8xf32>
    %53 = vector.extract_strided_slice %12 {offsets = [0, 16], sizes = [256, 8], strides = [1, 1]} : vector<256x32xf32> to vector<256x8xf32>
    %54 = arith.truncf %53 : vector<256x8xf32> to vector<256x8xbf16>
    %55 = vector.extract_strided_slice %13 {offsets = [0, 16], sizes = [256, 8], strides = [1, 1]} : vector<256x32xf32> to vector<256x8xf32>
    %56 = arith.truncf %55 : vector<256x8xf32> to vector<256x8xbf16>
    %57 = vector.extract_strided_slice %14 {offsets = [0, 16], sizes = [256, 8], strides = [1, 1]} : vector<256x32xf32> to vector<256x8xf32>
    %58 = arith.truncf %57 : vector<256x8xf32> to vector<256x8xbf16>
    %cst_16 = arith.constant dense<0.000000e+00> : vector<256x256xf32>
    %59 = tpu.matmul %54, %56, %cst_16 {dimension_numbers = #tpu.dot_dimension_numbers<[1], [1], [0], [0], [0, 0, 1, 0], [], []>} : vector<256x8xbf16>, vector<256x8xbf16>, vector<256x256xf32> -> vector<256x256xf32>
    %cst_17 = arith.constant dense<0xFF800000> : vector<256xf32>
    %60 = vector.multi_reduction <maximumf>, %59, %cst_17 [1] : vector<256x256xf32> to vector<256xf32>
    %61 = vector.shape_cast %60 : vector<256xf32> to vector<256x1xf32>
    %62 = vector.broadcast %61 : vector<256x1xf32> to vector<256x256xf32>
    %63 = arith.subf %59, %62 : vector<256x256xf32>
    %64 = math.exp %63 : vector<256x256xf32>
    %cst_18 = arith.constant dense<0.000000e+00> : vector<256xf32>
    %65 = vector.multi_reduction <add>, %64, %cst_18 [1] : vector<256x256xf32> to vector<256xf32>
    %66 = vector.shape_cast %65 : vector<256xf32> to vector<256x1xf32>
    %67 = tpu.reciprocal %66 {approx = true} : vector<256x1xf32> -> vector<256x1xf32>
    %68 = vector.broadcast %67 : vector<256x1xf32> to vector<256x256xf32>
    %69 = arith.mulf %64, %68 : vector<256x256xf32>
    %70 = arith.truncf %69 : vector<256x256xf32> to vector<256x256xbf16>
    %cst_19 = arith.constant dense<0.000000e+00> : vector<256x8xf32>
    %71 = tpu.matmul %70, %58, %cst_19 {dimension_numbers = #tpu.dot_dimension_numbers<[1], [0], [0], [1], [0, 0, 1, 1], [], []>} : vector<256x256xbf16>, vector<256x8xbf16>, vector<256x8xf32> -> vector<256x8xf32>
    %72 = vector.extract_strided_slice %12 {offsets = [0, 24], sizes = [256, 8], strides = [1, 1]} : vector<256x32xf32> to vector<256x8xf32>
    %73 = arith.truncf %72 : vector<256x8xf32> to vector<256x8xbf16>
    %74 = vector.extract_strided_slice %13 {offsets = [0, 24], sizes = [256, 8], strides = [1, 1]} : vector<256x32xf32> to vector<256x8xf32>
    %75 = arith.truncf %74 : vector<256x8xf32> to vector<256x8xbf16>
    %76 = vector.extract_strided_slice %14 {offsets = [0, 24], sizes = [256, 8], strides = [1, 1]} : vector<256x32xf32> to vector<256x8xf32>
    %77 = arith.truncf %76 : vector<256x8xf32> to vector<256x8xbf16>
    %cst_20 = arith.constant dense<0.000000e+00> : vector<256x256xf32>
    %78 = tpu.matmul %73, %75, %cst_20 {dimension_numbers = #tpu.dot_dimension_numbers<[1], [1], [0], [0], [0, 0, 1, 0], [], []>} : vector<256x8xbf16>, vector<256x8xbf16>, vector<256x256xf32> -> vector<256x256xf32>
    %cst_21 = arith.constant dense<0xFF800000> : vector<256xf32>
    %79 = vector.multi_reduction <maximumf>, %78, %cst_21 [1] : vector<256x256xf32> to vector<256xf32>
    %80 = vector.shape_cast %79 : vector<256xf32> to vector<256x1xf32>
    %81 = vector.broadcast %80 : vector<256x1xf32> to vector<256x256xf32>
    %82 = arith.subf %78, %81 : vector<256x256xf32>
    %83 = math.exp %82 : vector<256x256xf32>
    %cst_22 = arith.constant dense<0.000000e+00> : vector<256xf32>
    %84 = vector.multi_reduction <add>, %83, %cst_22 [1] : vector<256x256xf32> to vector<256xf32>
    %85 = vector.shape_cast %84 : vector<256xf32> to vector<256x1xf32>
    %86 = tpu.reciprocal %85 {approx = true} : vector<256x1xf32> -> vector<256x1xf32>
    %87 = vector.broadcast %86 : vector<256x1xf32> to vector<256x256xf32>
    %88 = arith.mulf %83, %87 : vector<256x256xf32>
    %89 = arith.truncf %88 : vector<256x256xf32> to vector<256x256xbf16>
    %cst_23 = arith.constant dense<0.000000e+00> : vector<256x8xf32>
    %90 = tpu.matmul %89, %77, %cst_23 {dimension_numbers = #tpu.dot_dimension_numbers<[1], [0], [0], [1], [0, 0, 1, 1], [], []>} : vector<256x256xbf16>, vector<256x8xbf16>, vector<256x8xf32> -> vector<256x8xf32>
    %91 = tpu.concatenate %33, %52, %71, %90 in 1 : vector<256x8xf32>, vector<256x8xf32>, vector<256x8xf32>, vector<256x8xf32> -> vector<256x32xf32>
    %92 = arith.truncf %91 : vector<256x32xf32> to vector<256x32xbf16>
    %c0_24 = arith.constant 0 : index
    %c0_25 = arith.constant 0 : index
    %c0_26 = arith.constant 0 : index
    %93 = vector.load %arg5[%c0_24, %c0_25, %c0_26] : memref<1x32x32xbf16, #tpu.memory_space<vmem>>, vector<1x32x32xbf16>
    %94 = vector.shape_cast %93 : vector<1x32x32xbf16> to vector<32x32xbf16>
    %cst_27 = arith.constant dense<0.000000e+00> : vector<256x32xf32>
    %95 = tpu.matmul %92, %94, %cst_27 {dimension_numbers = #tpu.dot_dimension_numbers<[1], [0], [0], [1], [0, 0, 1, 1], [], []>} : vector<256x32xbf16>, vector<32x32xbf16>, vector<256x32xf32> -> vector<256x32xf32>
    %c0_28 = arith.constant 0 : index
    %c0_29 = arith.constant 0 : index
    %c0_30 = arith.constant 0 : index
    %96 = vector.load %arg6[%c0_28, %c0_29, %c0_30] : memref<1x1x32xf32, #tpu.memory_space<vmem>>, vector<1x1x32xf32>
    %97 = vector.shape_cast %96 : vector<1x1x32xf32> to vector<1x32xf32>
    %98 = vector.broadcast %97 : vector<1x32xf32> to vector<256x32xf32>
    %99 = arith.addf %95, %98 : vector<256x32xf32>
    %100 = arith.addf %99, %3 : vector<256x32xf32>
    %101 = arith.truncf %100 : vector<256x32xf32> to vector<256x32xbf16>
    %c0_31 = arith.constant 0 : index
    %c0_32 = arith.constant 0 : index
    %c0_33 = arith.constant 0 : index
    %102 = vector.load %arg7[%c0_31, %c0_32, %c0_33] : memref<1x32x32xbf16, #tpu.memory_space<vmem>>, vector<1x32x32xbf16>
    %103 = vector.shape_cast %102 : vector<1x32x32xbf16> to vector<32x32xbf16>
    %cst_34 = arith.constant dense<0.000000e+00> : vector<256x32xf32>
    %104 = tpu.matmul %101, %103, %cst_34 {dimension_numbers = #tpu.dot_dimension_numbers<[1], [0], [0], [1], [0, 0, 1, 1], [], []>} : vector<256x32xbf16>, vector<32x32xbf16>, vector<256x32xf32> -> vector<256x32xf32>
    %105 = arith.addf %104, %100 : vector<256x32xf32>
    %c0_35 = arith.constant 0 : index
    %c0_36 = arith.constant 0 : index
    %106 = vector.load %arg8[%c0_35, %c0_36] : memref<256x32xf32, #tpu.memory_space<vmem>>, vector<256x32xf32>
    tpu.vector_store %arg8[%c0_35, %c0_36], %105 {strides = array<i32>} : memref<256x32xf32, #tpu.memory_space<vmem>>, vector<256x32xf32>,
    return
  }
  func.func @transform_0(%arg0: i32, %arg1: i32) -> (i32, i32) {
    %c0_i32 = arith.constant 0 : i32
    %c0_i32_0 = arith.constant 0 : i32
    return %arg0, %c0_i32 : i32, i32
  }
  func.func @transform_1(%arg0: i32, %arg1: i32) -> (i32, i32, i32) {
    %c0_i32 = arith.constant 0 : i32
    %c0_i32_0 = arith.constant 0 : i32
    %c0_i32_1 = arith.constant 0 : i32
    return %arg1, %c0_i32, %c0_i32_0 : i32, i32, i32
  }
  func.func @transform_2(%arg0: i32, %arg1: i32) -> (i32, i32, i32) {
    %c0_i32 = arith.constant 0 : i32
    %c0_i32_0 = arith.constant 0 : i32
    %c0_i32_1 = arith.constant 0 : i32
    return %arg1, %c0_i32, %c0_i32_0 : i32, i32, i32
  }
  func.func @transform_3(%arg0: i32, %arg1: i32) -> (i32, i32, i32) {
    %c0_i32 = arith.constant 0 : i32
    %c0_i32_0 = arith.constant 0 : i32
    %c0_i32_1 = arith.constant 0 : i32
    return %arg1, %c0_i32, %c0_i32_0 : i32, i32, i32
  }
  func.func @transform_4(%arg0: i32, %arg1: i32) -> (i32, i32, i32) {
    %c0_i32 = arith.constant 0 : i32
    %c0_i32_0 = arith.constant 0 : i32
    %c0_i32_1 = arith.constant 0 : i32
    return %arg1, %c0_i32, %c0_i32_0 : i32, i32, i32
  }
  func.func @transform_5(%arg0: i32, %arg1: i32) -> (i32, i32, i32) {
    %c0_i32 = arith.constant 0 : i32
    %c0_i32_0 = arith.constant 0 : i32
    %c0_i32_1 = arith.constant 0 : i32
    return %arg1, %c0_i32, %c0_i32_0 : i32, i32, i32
  }
  func.func @transform_6(%arg0: i32, %arg1: i32) -> (i32, i32) {
    %c0_i32 = arith.constant 0 : i32
    %c0_i32_0 = arith.constant 0 : i32
    return %arg0, %c0_i32 : i32, i32
  }
}

</mosaic_0001>

<bundles_post_ra>
// kernel: transformer_block_forward.2
= control target key start
LH: loop header
LB: loop body
LE: loop exit
PB: predicated region body
PF: predicated region fallthrough
CT: control target
= control target key end

     0   :  { %10 = vsyncpa [#allocation3], 0  ;;  %s2421_s0 = inlined_call_operand.hbm [shape: f32[512,4], index: 0, kind: input, shape index: {}]   ;;  %s2422_s1 = inlined_call_operand.hbm [shape: bf16[4,32], index: 1, kind: input, shape index: {}]   ;;  %s2423_s2 = inlined_call_operand.hbm [shape: f32[1,32], index: 2, kind: input, shape index: {}]   ;;  %s2424_s3 = inlined_call_operand.hbm [shape: bf16[32,32], index: 3, kind: input, shape index: {}]   ;;  %s2425_s4 = inlined_call_operand.hbm [shape: f32[1,32], index: 4, kind: input, shape index: {}]   ;;  %s2426_s5 = inlined_call_operand.hbm [shape: f32[512,32], index: 5, kind: output, shape index: {}]  }
   0x1   :  { %11 = vsyncpa [#allocation6], 0 }
   0x2   :  { %12 = vsyncpa [#allocation9], 0 }
   0x3   :  { %13 = vsyncpa [#allocation4], 0  ;;  %s1780_s18 = smov [#allocation5]   ;;  %s1781_s20 = smov [#allocation8]  }
   0x4   :  { %s32_s19 = sshll.u32 %s1780_s18, 4  ;;  %s51_s21 = sshll.u32 %s1781_s20, 4  ;;  %s33_s19 = int_to_ptr.vmem [resolvable:$true] %s32_s19  ;;  %s1820_s21 = int_to_ptr.vmem [resolvable:$true] %s51_s21 }
   0x5   :  { %s1640_s24 = scalar_lea.hbm %s2422_s1, 32 }
   0x6   :  { %p1641_p0 = scmp.ne.s32.totalorder %s2422_s1, %s1640_s24  ;;  %p1644_p1 = scmp.lt.u32.totalorder %s1640_s24, %s2422_s1 }
   0x8   :  { %p1646_p2 = pnand %p1644_p1, %p1641_p0 }
   0xa   :  { %1649 = shalt.err (!%p1646_p2)
}
   0xb   :  { %s1650_s29 = scalar_lea.vmem %s33_s19, 32  ;;  %p1655_p4 = scmp.lt.s32.totalorder %s33_s19, %s33_s19 }
   0xc   :  { %p1651_p3 = scmp.ne.s32.totalorder %s33_s19, %s1650_s29  ;;  %p1656_p5 = scmp.lt.s32.totalorder %s1650_s29, %s1650_s29 }
   0xe   :  { %p1657_p6 = por %p1656_p5, %p1655_p4 }
  0x10   :  { %p1658_p7 = pnand %p1657_p6, %p1651_p3 }
  0x12   :  { %1661 = shalt.err (!%p1658_p7)
}
  0x13   :  { %35 = dma.hbm_to_vmem [thread:$0]  %s2422_s1, 32, %s33_s19, [#allocation6]  }
  0x14   :  { %s1662_s9 = scalar_lea.hbm %s2424_s3, 256 }
  0x15   :  { %p1663_p8 = scmp.ne.s32.totalorder %s2424_s3, %s1662_s9  ;;  %p1666_p9 = scmp.lt.u32.totalorder %s1662_s9, %s2424_s3 }
  0x17   :  { %p1668_p10 = pnand %p1666_p9, %p1663_p8 }
  0x19   :  { %1671 = shalt.err (!%p1668_p10)
}
  0x1a   :  { %s1672_s14 = scalar_lea.vmem %s1820_s21, 256  ;;  %p1677_p12 = scmp.lt.s32.totalorder %s1820_s21, %s1820_s21 }
  0x1b   :  { %p1673_p11 = scmp.ne.s32.totalorder %s1820_s21, %s1672_s14  ;;  %p1678_p13 = scmp.lt.s32.totalorder %s1672_s14, %s1672_s14 }
  0x1d   :  { %p1679_p0 = por %p1678_p13, %p1677_p12 }
  0x1f   :  { %p1680_p1 = pnand %p1679_p0, %p1673_p11 }
  0x21   :  { %1683 = shalt.err (!%p1680_p1)
}
  0x22   :  { %s1782_s1 = smov 64   ;;  %s1783_s15 = smov 4  }
  0x23   :  { %57 = dma.hbm_to_vmem [thread:$0]  %s2424_s3, 256, %s1820_s21, [#allocation9], %s1782_s1, %s1782_s1, %s1783_s15  }
  0x24   :  { %s1784_s18 = smov [#allocation2]   ;;  %s1684_s23 = scalar_lea.hbm %s2421_s0, 8192 }
  0x25   :  { %s19_s19 = sshll.u32 %s1784_s18, 4  ;;  %p1685_p2 = scmp.ne.s32.totalorder %s2421_s0, %s1684_s23  ;;  %s20_s19 = int_to_ptr.vmem [resolvable:$true] %s19_s19 }
  0x26   :  { %p1688_p3 = scmp.lt.u32.totalorder %s1684_s23, %s2421_s0 }
  0x28   :  { %p1690_p4 = pnand %p1688_p3, %p1685_p2 }
  0x2a   :  { %1693 = shalt.err (!%p1690_p4)
}
  0x2b   :  { %s1694_s28 = scalar_lea.vmem %s20_s19, 8192  ;;  %p1699_p6 = scmp.lt.s32.totalorder %s20_s19, %s20_s19 }
  0x2c   :  { %p1695_p5 = scmp.ne.s32.totalorder %s20_s19, %s1694_s28  ;;  %p1700_p7 = scmp.lt.s32.totalorder %s1694_s28, %s1694_s28 }
  0x2e   :  { %p1701_p8 = por %p1700_p7, %p1699_p6 }
  0x30   :  { %p1702_p9 = pnand %p1701_p8, %p1695_p5 }
  0x32   :  { %1705 = shalt.err (!%p1702_p9)
}
  0x33   :  { %s1785_s3 = smov 128   ;;  %s1786_s21 = smov 8  }
  0x34   :  { %25 = dma.hbm_to_vmem [thread:$0]  %s2421_s0, 8192, %s20_s19, [#allocation3], %s1785_s3, %s1785_s3, %s1786_s21  }
  0x35   :  { %s1787_s6 = smov [#allocation7]   ;;  %s1788_s8 = smov [#allocation10]  }
  0x36   :  { %s42_s7 = sshll.u32 %s1787_s6, 4  ;;  %s64_s9 = sshll.u32 %s1788_s8, 4  ;;  %s43_s7 = int_to_ptr.vmem [resolvable:$true] %s42_s7  ;;  %s65_s9 = int_to_ptr.vmem [resolvable:$true] %s64_s9 }
  0x37   :  { %s1706_s12 = scalar_lea.hbm %s2423_s2, 16 }
  0x38   :  { %p1707_p10 = scmp.ne.s32.totalorder %s2423_s2, %s1706_s12  ;;  %p1710_p11 = scmp.lt.u32.totalorder %s1706_s12, %s2423_s2 }
  0x3a   :  { %p1712_p12 = pnand %p1710_p11, %p1707_p10 }
  0x3c   :  { %1715 = shalt.err (!%p1712_p12)
}
  0x3d   :  { %s1716_s0 = scalar_lea.vmem %s43_s7, 16  ;;  %s1720_s16 = scalar_lea.vmem %s43_s7, 32 }
  0x3e   :  { %p1717_p13 = scmp.ne.s32.totalorder %s43_s7, %s1716_s0  ;;  %p1721_p0 = scmp.lt.s32.totalorder %s43_s7, %s43_s7 }
  0x3f   :  { %p1722_p1 = scmp.lt.s32.totalorder %s1720_s16, %s1716_s0 }
  0x41   :  { %p1723_p2 = por %p1722_p1, %p1721_p0 }
  0x43   :  { %p1724_p3 = pnand %p1723_p2, %p1717_p13 }
  0x45   :  { %1727 = shalt.err (!%p1724_p3)
}
  0x46   :  { %45 = dma.hbm_to_vmem [thread:$0]  %s2423_s2, 16, %s43_s7, [#allocation6]  }
  0x47   :  { %s1728_s22 = scalar_lea.hbm %s2425_s4, 16 }
  0x48   :  { %p1729_p4 = scmp.ne.s32.totalorder %s2425_s4, %s1728_s22  ;;  %p1732_p5 = scmp.lt.u32.totalorder %s1728_s22, %s2425_s4 }
  0x4a   :  { %p1734_p6 = pnand %p1732_p5, %p1729_p4 }
  0x4c   :  { %1737 = shalt.err (!%p1734_p6)
}
  0x4d   :  { %s1738_s27 = scalar_lea.vmem %s65_s9, 16  ;;  %s1742_s28 = scalar_lea.vmem %s65_s9, 32 }
  0x4e   :  { %p1739_p7 = scmp.ne.s32.totalorder %s65_s9, %s1738_s27  ;;  %p1743_p8 = scmp.lt.s32.totalorder %s65_s9, %s65_s9 }
  0x4f   :  { %p1744_p9 = scmp.lt.s32.totalorder %s1742_s28, %s1738_s27 }
  0x51   :  { %p1745_p10 = por %p1744_p9, %p1743_p8 }
  0x53   :  { %p1746_p11 = pnand %p1745_p10, %p1739_p7 }
  0x55   :  { %1749 = shalt.err (!%p1746_p11)
}
  0x56   :  { %67 = dma.hbm_to_vmem [thread:$0]  %s2425_s4, 16, %s65_s9, [#allocation9]  }
  0x57   :  { %1772 = dma.done.wait [#allocation3], 8192  }
  0x58   :  { %1773 = vsyncadd [#allocation3], 4294959104 }
  0x59   :  { %1774 = dma.done.wait [#allocation6], 48  }
  0x5a   :  { %1775 = vsyncadd [#allocation6], 4294967248 }
  0x5b   :  { %1776 = dma.done.wait [#allocation9], 272  }
  0x5c   :  { %1777 = vsyncadd [#allocation9], 4294967024  ;;  %vm285_vm0 = vcmask 1041408   ;;  %v180_v0 = vld [vmem:[#allocation5] sm:$0x3]  ;;  %v85_v2 = vld [vmem:[#allocation2 + $0x8] sm:$0xff] }
  0x5d   :  { %v84_v1 = vld [vmem:[#allocation2] sm:$0xff]  ;;  %vm188_vm1 = vcmask 31744   ;;  %1627 = vmatprep.subr.msk.bf16.mxu0 %vm285_vm0, %v180_v0  ;;  %v287_v3 = vsel %vm285_vm0, %v180_v0, 0  ;;  %v86_v5 = vld [vmem:[#allocation2 + $0x10] sm:$0xff]  ;;  %v87_v6 = vld [vmem:[#allocation2 + $0x18] sm:$0xff]  ;;  %vm825_vm6 = vcmask 261120  }
  0x5e   :  { %v148_v4 = vpack.c.bf16 %v85_v2, %v84_v1  ;;  %v88_v7 = vld [vmem:[#allocation2 + $0x20] sm:$0xff]  ;;  %1494 = vmatpush3.bf16.msra.mxu0 %v287_v3  ;;  %v149_v8 = vpack.c.bf16 %v87_v6, %v86_v5  ;;  %v89_v9 = vld [vmem:[#allocation2 + $0x28] sm:$0xff]  ;;  %v90_v11 = vld [vmem:[#allocation2 + $0x30] sm:$0xff]  ;;  %s1789_s4 = smov [#allocation11]  }
  0x5f   :  { %v150_v10 = vpack.c.bf16 %v89_v9, %v88_v7  ;;  %v91_v12 = vld [vmem:[#allocation2 + $0x38] sm:$0xff]  ;;  %v92_v13 = vld [vmem:[#allocation2 + $0x40] sm:$0xff]  ;;  %v93_v14 = vld [vmem:[#allocation2 + $0x48] sm:$0xff]  ;;  %s1344_s30 = sshll.u32 %s1789_s4, 4  ;;  %s1345_s30 = int_to_ptr.vmem [resolvable:$true] %s1344_s30 }
  0x60   :  { %1495 = vmatprep.mubr.msk.bf16.mxu0 %vm188_vm1, %v148_v4  ;;  %v151_v15 = vpack.c.bf16 %v91_v12, %v90_v11  ;;  %v152_v16 = vpack.c.bf16 %v93_v14, %v92_v13  ;;  %v94_v17 = vld [vmem:[#allocation2 + $0x50] sm:$0xff]  ;;  %v95_v18 = vld [vmem:[#allocation2 + $0x58] sm:$0xff]  ;;  %v96_v19 = vld [vmem:[#allocation2 + $0x60] sm:$0xff]  ;;  %s1750_s6 = scalar_lea.vmem %s1345_s30, 8192  ;;  %p1755_p13 = scmp.lt.s32.totalorder %s1345_s30, %s1345_s30 }
  0x61   :  { %1496 = vmatmul.mubr.msk.bf16.vlgmr.msra.gmra.mrb[0].mxu0 %vm188_vm1, %v149_v8  ;;  %v97_v20 = vld [vmem:[#allocation2 + $0x68] sm:$0xff]  ;;  %v153_v21 = vpack.c.bf16 %v95_v18, %v94_v17  ;;  %v98_v23 = vld [vmem:[#allocation2 + $0x70] sm:$0xff]  ;;  %v99_v24 = vld [vmem:[#allocation2 + $0x78] sm:$0xff]  ;;  %p1751_p12 = scmp.ne.s32.totalorder %s1345_s30, %s1750_s6  ;;  %p1756_p0 = scmp.lt.s32.totalorder %s1750_s6, %s1750_s6 }
  0x62   :  { %1499 = vmatprep.mubr.msk.bf16.mxu0 %vm188_vm1, %v150_v10  ;;  %v154_v22 = vpack.c.bf16 %v97_v20, %v96_v19  ;;  %v100_v25 = vld [vmem:[#allocation2 + $0x80] sm:$0xff]  ;;  %v101_v26 = vld [vmem:[#allocation2 + $0x88] sm:$0xff]  ;;  %v155_v27 = vpack.c.bf16 %v99_v24, %v98_v23  ;;  %v102_v29 = vld [vmem:[#allocation2 + $0x90] sm:$0xff] }
  0x63   :  { %v156_v28 = vpack.c.bf16 %v101_v26, %v100_v25  ;;  %v103_v30 = vld [vmem:[#allocation2 + $0x98] sm:$0xff]  ;;  %v104_v31 = vld [vmem:[#allocation2 + $0xa0] sm:$0xff]  ;;  %v105_v32 = vld [vmem:[#allocation2 + $0xa8] sm:$0xff]  ;;  %p1757_p1 = por %p1756_p0, %p1755_p13 }
  0x64   :  { %v157_v33 = vpack.c.bf16 %v103_v30, %v102_v29  ;;  %v158_v34 = vpack.c.bf16 %v105_v32, %v104_v31  ;;  %v106_v35 = vld [vmem:[#allocation2 + $0xb0] sm:$0xff]  ;;  %v107_v36 = vld [vmem:[#allocation2 + $0xb8] sm:$0xff]  ;;  %v108_v37 = vld [vmem:[#allocation2 + $0xc0] sm:$0xff] }
  0x65   :  { %v109_v38 = vld [vmem:[#allocation2 + $0xc8] sm:$0xff]  ;;  %v159_v39 = vpack.c.bf16 %v107_v36, %v106_v35  ;;  %v110_v41 = vld [vmem:[#allocation2 + $0xd0] sm:$0xff]  ;;  %v111_v42 = vld [vmem:[#allocation2 + $0xd8] sm:$0xff]  ;;  %p1758_p2 = pnand %p1757_p1, %p1751_p12 }
  0x66   :  { %v160_v40 = vpack.c.bf16 %v109_v38, %v108_v37  ;;  %v112_v43 = vld [vmem:[#allocation2 + $0xe0] sm:$0xff]  ;;  %v113_v44 = vld [vmem:[#allocation2 + $0xe8] sm:$0xff]  ;;  %v161_v45 = vpack.c.bf16 %v111_v42, %v110_v41  ;;  %v114_v47 = vld [vmem:[#allocation2 + $0xf0] sm:$0xff] }
  0x67   :  { %v162_v46 = vpack.c.bf16 %v113_v44, %v112_v43  ;;  %v115_v48 = vld [vmem:[#allocation2 + $0xf8] sm:$0xff]  ;;  %v116_v49 = vld [vmem:[#allocation2 + $0x100] sm:$0xff]  ;;  %v117_v50 = vld [vmem:[#allocation2 + $0x108] sm:$0xff] }
  0x68   :  { %v163_v51 = vpack.c.bf16 %v115_v48, %v114_v47  ;;  %v164_v52 = vpack.c.bf16 %v117_v50, %v116_v49  ;;  %v118_v53 = vld [vmem:[#allocation2 + $0x110] sm:$0xff]  ;;  %v119_v54 = vld [vmem:[#allocation2 + $0x118] sm:$0xff]  ;;  %v120_v55 = vld [vmem:[#allocation2 + $0x120] sm:$0xff] }
  0x69   :  { %1500 = vmatmul.mubr.msk.bf16.gmra.mrb[4].mxu0 %vm188_vm1, %v151_v15  ;;  %v121_v56 = vld [vmem:[#allocation2 + $0x128] sm:$0xff]  ;;  %v165_v57 = vpack.c.bf16 %v119_v54, %v118_v53  ;;  %v122_v59 = vld [vmem:[#allocation2 + $0x130] sm:$0xff]  ;;  %v123_v60 = vld [vmem:[#allocation2 + $0x138] sm:$0xff] }
  0x6a   :  { %1503 = vmatprep.mubr.msk.bf16.mxu0 %vm188_vm1, %v152_v16  ;;  %v166_v58 = vpack.c.bf16 %v121_v56, %v120_v55  ;;  %v124_v61 = vld [vmem:[#allocation2 + $0x140] sm:$0xff]  ;;  %v125_v62 = vld [vmem:[#allocation2 + $0x148] sm:$0xff]  ;;  %v167_v63 = vpack.c.bf16 %v123_v60, %v122_v59  ;;  %v126_v1 = vld [vmem:[#allocation2 + $0x150] sm:$0xff] }
  0x6b   :  { %v168_v0 = vpack.c.bf16 %v125_v62, %v124_v61  ;;  %v127_v2 = vld [vmem:[#allocation2 + $0x158] sm:$0xff]  ;;  %v128_v3 = vld [vmem:[#allocation2 + $0x160] sm:$0xff]  ;;  %v129_v4 = vld [vmem:[#allocation2 + $0x168] sm:$0xff] }
  0x6c   :  { %v169_v5 = vpack.c.bf16 %v127_v2, %v126_v1  ;;  %v170_v6 = vpack.c.bf16 %v129_v4, %v128_v3  ;;  %v130_v7 = vld [vmem:[#allocation2 + $0x170] sm:$0xff]  ;;  %v131_v8 = vld [vmem:[#allocation2 + $0x178] sm:$0xff]  ;;  %v132_v9 = vld [vmem:[#allocation2 + $0x180] sm:$0xff] }
  0x6d   :  { %v133_v10 = vld [vmem:[#allocation2 + $0x188] sm:$0xff]  ;;  %v171_v11 = vpack.c.bf16 %v131_v8, %v130_v7  ;;  %v134_v14 = vld [vmem:[#allocation2 + $0x190] sm:$0xff]  ;;  %v135_v15 = vld [vmem:[#allocation2 + $0x198] sm:$0xff] }
  0x6e   :  { %v172_v12 = vpack.c.bf16 %v133_v10, %v132_v9  ;;  %v1638_v13 = vld [vmem:[#allocation8] sm:$0xff]   ;;  %v1639_v16 = vld [vmem:[#allocation8 + $0x8] sm:$0xff]   ;;  %v173_v19 = vpack.c.bf16 %v135_v15, %v134_v14  ;;  %v1922_v36 = vld [vmem:[#allocation7] ss:$0 sm:$0xff] }
  0x6f   :  { %1559 = vmatprep.subr.bf16.mxu1 %v1638_v13  ;;  %v136_v17 = vld [vmem:[#allocation2 + $0x1a0] sm:$0xff]  ;;  %v137_v18 = vld [vmem:[#allocation2 + $0x1a8] sm:$0xff] }
  0x70   :  { %1560 = vmatpush3.bf16.msra.mxu1 %v1638_v13  ;;  %v174_v20 = vpack.c.bf16 %v137_v18, %v136_v17  ;;  %v140_v23 = vld [vmem:[#allocation2 + $0x1c0] sm:$0xff]  ;;  %v141_v24 = vld [vmem:[#allocation2 + $0x1c8] sm:$0xff] }
  0x71   :  { %1504 = vmatmul.mubr.msk.bf16.gmra.mrb[8].mxu0 %vm188_vm1, %v153_v21  ;;  %1561 = vmatprep.subr.bf16.mxu1 %v1639_v16  ;;  %v138_v21 = vld [vmem:[#allocation2 + $0x1b0] sm:$0xff]  ;;  %v176_v26 = vpack.c.bf16 %v141_v24, %v140_v23  ;;  %v144_v29 = vld [vmem:[#allocation2 + $0x1e0] sm:$0xff]  ;;  %v145_v30 = vld [vmem:[#allocation2 + $0x1e8] sm:$0xff] }
  0x72   :  { %1507 = vmatprep.mubr.msk.bf16.mxu0 %vm188_vm1, %v154_v22  ;;  %v139_v22 = vld [vmem:[#allocation2 + $0x1b8] sm:$0xff]  ;;  %v178_v32 = vpack.c.bf16 %v145_v30, %v144_v29 }
  0x73   :  { %v175_v25 = vpack.c.bf16 %v139_v22, %v138_v21 }
  0x74   :  { %1562 = vmatpush3.bf16.msra.mxu1 %v1639_v16 }
  0x79   :  { %1508 = vmatmul.mubr.msk.bf16.gmra.mrb[12].mxu0 %vm188_vm1, %v155_v27  ;;  %v142_v27 = vld [vmem:[#allocation2 + $0x1d0] sm:$0xff] }
  0x7a   :  { %1511 = vmatprep.mubr.msk.bf16.mxu0 %vm188_vm1, %v156_v28  ;;  %v143_v28 = vld [vmem:[#allocation2 + $0x1d8] sm:$0xff] }
  0x7b   :  { %v177_v31 = vpack.c.bf16 %v143_v28, %v142_v27 }
  0x81   :  { %1512 = vmatmul.mubr.msk.bf16.gmra.mrb[16].mxu0 %vm188_vm1, %v157_v33  ;;  %v146_v33 = vld [vmem:[#allocation2 + $0x1f0] sm:$0xff] }
  0x82   :  { %1515 = vmatprep.mubr.msk.bf16.mxu0 %vm188_vm1, %v158_v34  ;;  %v147_v34 = vld [vmem:[#allocation2 + $0x1f8] sm:$0xff] }
  0x83   :  { %v179_v35 = vpack.c.bf16 %v147_v34, %v146_v33 }
  0x89   :  { %1516 = vmatmul.mubr.msk.bf16.gmra.mrb[20].mxu0 %vm188_vm1, %v159_v39 }
  0x8a   :  { %1519 = vmatprep.mubr.msk.bf16.mxu0 %vm188_vm1, %v160_v40 }
  0x91   :  { %1520 = vmatmul.mubr.msk.bf16.gmra.mrb[24].mxu0 %vm188_vm1, %v161_v45 }
  0x92   :  { %1523 = vmatprep.mubr.msk.bf16.mxu0 %vm188_vm1, %v162_v46 }
  0x99   :  { %1524 = vmatmul.mubr.msk.bf16.gmra.mrb[28].mxu0 %vm188_vm1, %v163_v51 }
  0x9a   :  { %1527 = vmatprep.mubr.msk.bf16.mxu0 %vm188_vm1, %v164_v52 }
  0xa1   :  { %1528 = vmatmul.mubr.msk.bf16.gmra.mrb[32].mxu0 %vm188_vm1, %v165_v57 }
  0xa2   :  { %1531 = vmatprep.mubr.msk.bf16.mxu0 %vm188_vm1, %v166_v58 }
  0xa9   :  { %1532 = vmatmul.mubr.msk.bf16.gmra.mrb[36].mxu0 %vm188_vm1, %v167_v63 }
  0xaa   :  { %1535 = vmatprep.mubr.msk.bf16.mxu0 %vm188_vm1, %v168_v0 }
  0xb1   :  { %1536 = vmatmul.mubr.msk.bf16.gmra.mrb[40].mxu0 %vm188_vm1, %v169_v5 }
  0xb2   :  { %1539 = vmatprep.mubr.msk.bf16.mxu0 %vm188_vm1, %v170_v6 }
  0xb9   :  { %1540 = vmatmul.mubr.msk.bf16.gmra.mrb[44].mxu0 %vm188_vm1, %v171_v11 }
  0xba   :  { %1543 = vmatprep.mubr.msk.bf16.mxu0 %vm188_vm1, %v172_v12 }
  0xc1   :  { %1544 = vmatmul.mubr.msk.bf16.gmra.mrb[48].mxu0 %vm188_vm1, %v173_v19 }
  0xc2   :  { %1547 = vmatprep.mubr.msk.bf16.mxu0 %vm188_vm1, %v174_v20 }
  0xc9   :  { %1548 = vmatmul.mubr.msk.bf16.gmra.mrb[52].mxu0 %vm188_vm1, %v175_v25 }
  0xca   :  { %1551 = vmatprep.mubr.msk.bf16.mxu0 %vm188_vm1, %v176_v26 }
  0xd1   :  { %1552 = vmatmul.mubr.msk.bf16.gmra.mrb[56].mxu0 %vm188_vm1, %v177_v31 }
  0xd2   :  { %1555 = vmatprep.mubr.msk.bf16.mxu0 %vm188_vm1, %v178_v32 }
  0xd9   :  { %1556 = vmatmul.mubr.msk.bf16.gmra.mrb[60].mxu0 %vm188_vm1, %v179_v35 }
 0x134   :  { %v1497_v37 = vpop.f32.mrb[0].mxu0 }
 0x135   :  { %v332_v38 = vadd.f32 %v1497_v37, %v1922_v36  ;;  %v323_v39 = vpop.f32.mrb[1].mxu0 }
 0x136   :  { %v324_v40 = vadd.f32 %v1922_v36, %v323_v39  ;;  %v1498_v41 = vpop.f32.mrb[2].mxu0 }
 0x137   :  { %v335_v42 = vadd.f32 %v1498_v41, %v1922_v36  ;;  %v326_v43 = vpop.f32.mrb[3].mxu0  ;;  %v644_v46 = vmul.f32 0.1, %v332_v38  ;;  %vm580_vm4 = vcmp.gt.f32.partialorder %v332_v38, 0.0 }
 0x138   :  { %v642_v44 = vmul.f32 0.1, %v324_v40  ;;  %v327_v45 = vadd.f32 %v1922_v36, %v326_v43  ;;  %vm578_vm3 = vcmp.gt.f32.partialorder %v324_v40, 0.0 }
 0x139   :  { %vm581_vm2 = vcmp.gt.f32.partialorder %v335_v42, 0.0  ;;  %v645_v47 = vmul.f32 0.1, %v335_v42  ;;  %v1934_v53 = vsel %vm580_vm4, %v332_v38, %v644_v46 }
 0x13a   :  { %v643_v48 = vmul.f32 0.1, %v327_v45  ;;  %vm579_vm5 = vcmp.gt.f32.partialorder %v327_v45, 0.0  ;;  %v1930_v51 = vsel %vm578_vm3, %v324_v40, %v642_v44 }
 0x13b   :  { %v1928_v49 = vsel %vm581_vm2, %v335_v42, %v645_v47 }
 0x13c   :  { %v1501_v50 = vpop.f32.mrb[4].mxu0  ;;  %v1932_v52 = vsel %vm579_vm5, %v327_v45, %v643_v48  ;;  %v771_v57 = vpack.c.bf16 %v1928_v49, %v1934_v53 }
 0x13d   :  { %v348_v54 = vadd.f32 %v1501_v50, %v1922_v36  ;;  %v339_v55 = vpop.f32.mrb[5].mxu0  ;;  %v770_v56 = vpack.c.bf16 %v1932_v52, %v1930_v51 }
 0x13e   :  { %v340_v58 = vadd.f32 %v1922_v36, %v339_v55  ;;  %v1502_v59 = vpop.f32.mrb[6].mxu0 }
 0x13f   :  { %v351_v60 = vadd.f32 %v1502_v59, %v1922_v36  ;;  %v342_v61 = vpop.f32.mrb[7].mxu0  ;;  %1563 = vmatprep.mubr.msk.bf16.mxu1 %vm825_vm6, %v770_v56  ;;  %v648_v0 = vmul.f32 0.1, %v348_v54  ;;  %vm584_vm9 = vcmp.gt.f32.partialorder %v348_v54, 0.0 }
 0x140   :  { %v646_v62 = vmul.f32 0.1, %v340_v58  ;;  %v343_v63 = vadd.f32 %v1922_v36, %v342_v61  ;;  %1564 = vmatmul.mubr.msk.bf16.vlgmr.msra.gmra.mrb[0].mxu1 %vm825_vm6, %v771_v57  ;;  %vm582_vm7 = vcmp.gt.f32.partialorder %v340_v58, 0.0 }
 0x141   :  { %vm585_vm8 = vcmp.gt.f32.partialorder %v351_v60, 0.0  ;;  %v649_v1 = vmul.f32 0.1, %v351_v60  ;;  %v1952_v7 = vsel %vm584_vm9, %v348_v54, %v648_v0 }
 0x142   :  { %vm583_vm10 = vcmp.gt.f32.partialorder %v343_v63, 0.0  ;;  %v647_v2 = vmul.f32 0.1, %v343_v63  ;;  %v1948_v4 = vsel %vm582_vm7, %v340_v58, %v646_v62 }
 0x143   :  { %v1946_v3 = vsel %vm585_vm8, %v351_v60, %v649_v1 }
 0x144   :  { %v1950_v5 = vsel %vm583_vm10, %v343_v63, %v647_v2  ;;  %v1505_v6 = vpop.f32.mrb[8].mxu0  ;;  %v773_v11 = vpack.c.bf16 %v1946_v3, %v1952_v7 }
 0x145   :  { %v772_v8 = vpack.c.bf16 %v1950_v5, %v1948_v4  ;;  %v364_v9 = vadd.f32 %v1505_v6, %v1922_v36  ;;  %v355_v10 = vpop.f32.mrb[9].mxu0 }
 0x146   :  { %v356_v12 = vadd.f32 %v1922_v36, %v355_v10  ;;  %v1506_v13 = vpop.f32.mrb[10].mxu0 }
 0x147   :  { %v367_v14 = vadd.f32 %v1506_v13, %v1922_v36  ;;  %v358_v15 = vpop.f32.mrb[11].mxu0  ;;  %1567 = vmatprep.mubr.msk.bf16.mxu1 %vm825_vm6, %v772_v8  ;;  %v652_v18 = vmul.f32 0.1, %v364_v9  ;;  %vm588_vm13 = vcmp.gt.f32.partialorder %v364_v9, 0.0 }
 0x148   :  { %v650_v16 = vmul.f32 0.1, %v356_v12  ;;  %v359_v17 = vadd.f32 %v1922_v36, %v358_v15  ;;  %1568 = vmatmul.mubr.msk.bf16.gmra.mrb[4].mxu1 %vm825_vm6, %v773_v11  ;;  %vm586_vm11 = vcmp.gt.f32.partialorder %v356_v12, 0.0 }
 0x149   :  { %vm589_vm12 = vcmp.gt.f32.partialorder %v367_v14, 0.0  ;;  %v653_v19 = vmul.f32 0.1, %v367_v14  ;;  %v1970_v25 = vsel %vm588_vm13, %v364_v9, %v652_v18 }
 0x14a   :  { %vm587_vm14 = vcmp.gt.f32.partialorder %v359_v17, 0.0  ;;  %v651_v20 = vmul.f32 0.1, %v359_v17  ;;  %v1966_v22 = vsel %vm586_vm11, %v356_v12, %v650_v16 }
 0x14b   :  { %v1964_v21 = vsel %vm589_vm12, %v367_v14, %v653_v19 }
 0x14c   :  { %v1968_v23 = vsel %vm587_vm14, %v359_v17, %v651_v20  ;;  %v1509_v24 = vpop.f32.mrb[12].mxu0  ;;  %v775_v29 = vpack.c.bf16 %v1964_v21, %v1970_v25 }
 0x14d   :  { %v774_v26 = vpack.c.bf16 %v1968_v23, %v1966_v22  ;;  %v380_v27 = vadd.f32 %v1509_v24, %v1922_v36  ;;  %v371_v28 = vpop.f32.mrb[13].mxu0 }
 0x14e   :  { %v372_v30 = vadd.f32 %v1922_v36, %v371_v28  ;;  %v1510_v31 = vpop.f32.mrb[14].mxu0 }
 0x14f   :  { %v383_v32 = vadd.f32 %v1510_v31, %v1922_v36  ;;  %v374_v33 = vpop.f32.mrb[15].mxu0  ;;  %1571 = vmatprep.mubr.msk.bf16.mxu1 %vm825_vm6, %v774_v26  ;;  %v656_v37 = vmul.f32 0.1, %v380_v27  ;;  %vm592_vm1 = vcmp.gt.f32.partialorder %v380_v27, 0.0 }
 0x150   :  { %v654_v34 = vmul.f32 0.1, %v372_v30  ;;  %v375_v35 = vadd.f32 %v1922_v36, %v374_v33  ;;  %1572 = vmatmul.mubr.msk.bf16.gmra.mrb[8].mxu1 %vm825_vm6, %v775_v29  ;;  %vm590_vm15 = vcmp.gt.f32.partialorder %v372_v30, 0.0 }
 0x151   :  { %vm593_vm0 = vcmp.gt.f32.partialorder %v383_v32, 0.0  ;;  %v657_v38 = vmul.f32 0.1, %v383_v32  ;;  %v1988_v44 = vsel %vm592_vm1, %v380_v27, %v656_v37 }
 0x152   :  { %vm591_vm2 = vcmp.gt.f32.partialorder %v375_v35, 0.0  ;;  %v655_v39 = vmul.f32 0.1, %v375_v35  ;;  %v1984_v41 = vsel %vm590_vm15, %v372_v30, %v654_v34 }
 0x153   :  { %v1982_v40 = vsel %vm593_vm0, %v383_v32, %v657_v38 }
 0x154   :  { %v1986_v42 = vsel %vm591_vm2, %v375_v35, %v655_v39  ;;  %v1513_v43 = vpop.f32.mrb[16].mxu0  ;;  %v777_v48 = vpack.c.bf16 %v1982_v40, %v1988_v44 }
 0x155   :  { %v776_v45 = vpack.c.bf16 %v1986_v42, %v1984_v41  ;;  %v396_v46 = vadd.f32 %v1513_v43, %v1922_v36  ;;  %v387_v47 = vpop.f32.mrb[17].mxu0 }
 0x156   :  { %v388_v50 = vadd.f32 %v1922_v36, %v387_v47  ;;  %v1514_v54 = vpop.f32.mrb[18].mxu0 }
 0x157   :  { %v399_v55 = vadd.f32 %v1514_v54, %v1922_v36  ;;  %v390_v56 = vpop.f32.mrb[19].mxu0  ;;  %1575 = vmatprep.mubr.msk.bf16.mxu1 %vm825_vm6, %v776_v45  ;;  %v660_v59 = vmul.f32 0.1, %v396_v46  ;;  %vm596_vm5 = vcmp.gt.f32.partialorder %v396_v46, 0.0 }
 0x158   :  { %v658_v57 = vmul.f32 0.1, %v388_v50  ;;  %v391_v58 = vadd.f32 %v1922_v36, %v390_v56  ;;  %1576 = vmatmul.mubr.msk.bf16.gmra.mrb[12].mxu1 %vm825_vm6, %v777_v48  ;;  %vm594_vm3 = vcmp.gt.f32.partialorder %v388_v50, 0.0 }
 0x159   :  { %vm597_vm4 = vcmp.gt.f32.partialorder %v399_v55, 0.0  ;;  %v661_v60 = vmul.f32 0.1, %v399_v55  ;;  %v2006_v2 = vsel %vm596_vm5, %v396_v46, %v660_v59 }
 0x15a   :  { %vm595_vm7 = vcmp.gt.f32.partialorder %v391_v58, 0.0  ;;  %v659_v61 = vmul.f32 0.1, %v391_v58  ;;  %v2002_v63 = vsel %vm594_vm3, %v388_v50, %v658_v57 }
 0x15b   :  { %v2000_v62 = vsel %vm597_vm4, %v399_v55, %v661_v60 }
 0x15c   :  { %v2004_v0 = vsel %vm595_vm7, %v391_v58, %v659_v61  ;;  %v1517_v1 = vpop.f32.mrb[20].mxu0  ;;  %v779_v10 = vpack.c.bf16 %v2000_v62, %v2006_v2 }
 0x15d   :  { %v778_v6 = vpack.c.bf16 %v2004_v0, %v2002_v63  ;;  %v412_v8 = vadd.f32 %v1517_v1, %v1922_v36  ;;  %v403_v9 = vpop.f32.mrb[21].mxu0 }
 0x15e   :  { %v404_v11 = vadd.f32 %v1922_v36, %v403_v9  ;;  %v1518_v12 = vpop.f32.mrb[22].mxu0 }
 0x15f   :  { %v415_v13 = vadd.f32 %v1518_v12, %v1922_v36  ;;  %v406_v14 = vpop.f32.mrb[23].mxu0  ;;  %1579 = vmatprep.mubr.msk.bf16.mxu1 %vm825_vm6, %v778_v6  ;;  %v664_v17 = vmul.f32 0.1, %v412_v8  ;;  %vm600_vm10 = vcmp.gt.f32.partialorder %v412_v8, 0.0 }
 0x160   :  { %v662_v15 = vmul.f32 0.1, %v404_v11  ;;  %v407_v16 = vadd.f32 %v1922_v36, %v406_v14  ;;  %1580 = vmatmul.mubr.msk.bf16.gmra.mrb[16].mxu1 %vm825_vm6, %v779_v10  ;;  %vm598_vm8 = vcmp.gt.f32.partialorder %v404_v11, 0.0 }
 0x161   :  { %vm601_vm9 = vcmp.gt.f32.partialorder %v415_v13, 0.0  ;;  %v665_v18 = vmul.f32 0.1, %v415_v13  ;;  %v2024_v28 = vsel %vm600_vm10, %v412_v8, %v664_v17 }
 0x162   :  { %vm599_vm11 = vcmp.gt.f32.partialorder %v407_v16, 0.0  ;;  %v663_v19 = vmul.f32 0.1, %v407_v16  ;;  %v2020_v24 = vsel %vm598_vm8, %v404_v11, %v662_v15 }
 0x163   :  { %v2018_v20 = vsel %vm601_vm9, %v415_v13, %v665_v18 }
 0x164   :  { %v2022_v26 = vsel %vm599_vm11, %v407_v16, %v663_v19  ;;  %v1521_v27 = vpop.f32.mrb[24].mxu0  ;;  %v781_v32 = vpack.c.bf16 %v2018_v20, %v2024_v28 }
 0x165   :  { %v780_v29 = vpack.c.bf16 %v2022_v26, %v2020_v24  ;;  %v428_v30 = vadd.f32 %v1521_v27, %v1922_v36  ;;  %v419_v31 = vpop.f32.mrb[25].mxu0 }
 0x166   :  { %v420_v33 = vadd.f32 %v1922_v36, %v419_v31  ;;  %v1522_v34 = vpop.f32.mrb[26].mxu0 }
 0x167   :  { %v431_v35 = vadd.f32 %v1522_v34, %v1922_v36  ;;  %v422_v37 = vpop.f32.mrb[27].mxu0  ;;  %1583 = vmatprep.mubr.msk.bf16.mxu1 %vm825_vm6, %v780_v29  ;;  %v668_v43 = vmul.f32 0.1, %v428_v30  ;;  %vm604_vm14 = vcmp.gt.f32.partialorder %v428_v30, 0.0 }
 0x168   :  { %v666_v38 = vmul.f32 0.1, %v420_v33  ;;  %v423_v39 = vadd.f32 %v1922_v36, %v422_v37  ;;  %1584 = vmatmul.mubr.msk.bf16.gmra.mrb[20].mxu1 %vm825_vm6, %v781_v32  ;;  %vm602_vm12 = vcmp.gt.f32.partialorder %v420_v33, 0.0 }
 0x169   :  { %vm605_vm13 = vcmp.gt.f32.partialorder %v431_v35, 0.0  ;;  %v669_v45 = vmul.f32 0.1, %v431_v35  ;;  %v2042_v55 = vsel %vm604_vm14, %v428_v30, %v668_v43 }
 0x16a   :  { %vm603_vm15 = vcmp.gt.f32.partialorder %v423_v39, 0.0  ;;  %v667_v46 = vmul.f32 0.1, %v423_v39  ;;  %v2038_v48 = vsel %vm602_vm12, %v420_v33, %v666_v38 }
 0x16b   :  { %v2036_v47 = vsel %vm605_vm13, %v431_v35, %v669_v45 }
 0x16c   :  { %v2040_v50 = vsel %vm603_vm15, %v423_v39, %v667_v46  ;;  %v1525_v54 = vpop.f32.mrb[28].mxu0  ;;  %v783_v59 = vpack.c.bf16 %v2036_v47, %v2042_v55 }
 0x16d   :  { %v782_v56 = vpack.c.bf16 %v2040_v50, %v2038_v48  ;;  %v444_v57 = vadd.f32 %v1525_v54, %v1922_v36  ;;  %v435_v58 = vpop.f32.mrb[29].mxu0 }
 0x16e   :  { %v436_v60 = vadd.f32 %v1922_v36, %v435_v58  ;;  %v1526_v61 = vpop.f32.mrb[30].mxu0 }
 0x16f   :  { %v447_v1 = vadd.f32 %v1526_v61, %v1922_v36  ;;  %v438_v6 = vpop.f32.mrb[31].mxu0  ;;  %1587 = vmatprep.mubr.msk.bf16.mxu1 %vm825_vm6, %v782_v56  ;;  %v672_v10 = vmul.f32 0.1, %v444_v57  ;;  %vm608_vm2 = vcmp.gt.f32.partialorder %v444_v57, 0.0 }
 0x170   :  { %v670_v8 = vmul.f32 0.1, %v436_v60  ;;  %v439_v9 = vadd.f32 %v1922_v36, %v438_v6  ;;  %1588 = vmatmul.mubr.msk.bf16.gmra.mrb[24].mxu1 %vm825_vm6, %v783_v59  ;;  %vm606_vm0 = vcmp.gt.f32.partialorder %v436_v60, 0.0 }
 0x171   :  { %vm609_vm1 = vcmp.gt.f32.partialorder %v447_v1, 0.0  ;;  %v673_v11 = vmul.f32 0.1, %v447_v1  ;;  %v2060_v17 = vsel %vm608_vm2, %v444_v57, %v672_v10 }
 0x172   :  { %vm607_vm3 = vcmp.gt.f32.partialorder %v439_v9, 0.0  ;;  %v671_v12 = vmul.f32 0.1, %v439_v9  ;;  %v2056_v14 = vsel %vm606_vm0, %v436_v60, %v670_v8 }
 0x173   :  { %v2054_v13 = vsel %vm609_vm1, %v447_v1, %v673_v11 }
 0x174   :  { %v2058_v15 = vsel %vm607_vm3, %v439_v9, %v671_v12  ;;  %v1529_v16 = vpop.f32.mrb[32].mxu0  ;;  %v785_v29 = vpack.c.bf16 %v2054_v13, %v2060_v17 }
 0x175   :  { %v784_v18 = vpack.c.bf16 %v2058_v15, %v2056_v14  ;;  %v460_v19 = vadd.f32 %v1529_v16, %v1922_v36  ;;  %v451_v27 = vpop.f32.mrb[33].mxu0 }
 0x176   :  { %v452_v30 = vadd.f32 %v1922_v36, %v451_v27  ;;  %v1530_v31 = vpop.f32.mrb[34].mxu0 }
 0x177   :  { %v463_v32 = vadd.f32 %v1530_v31, %v1922_v36  ;;  %v454_v33 = vpop.f32.mrb[35].mxu0  ;;  %1591 = vmatprep.mubr.msk.bf16.mxu1 %vm825_vm6, %v784_v18  ;;  %v676_v37 = vmul.f32 0.1, %v460_v19  ;;  %vm612_vm7 = vcmp.gt.f32.partialorder %v460_v19, 0.0 }
 0x178   :  { %v674_v34 = vmul.f32 0.1, %v452_v30  ;;  %v455_v35 = vadd.f32 %v1922_v36, %v454_v33  ;;  %1592 = vmatmul.mubr.msk.bf16.gmra.mrb[28].mxu1 %vm825_vm6, %v785_v29  ;;  %vm610_vm4 = vcmp.gt.f32.partialorder %v452_v30, 0.0 }
 0x179   :  { %vm613_vm5 = vcmp.gt.f32.partialorder %v463_v32, 0.0  ;;  %v677_v38 = vmul.f32 0.1, %v463_v32  ;;  %v2078_v56 = vsel %vm612_vm7, %v460_v19, %v676_v37 }
 0x17a   :  { %vm611_vm8 = vcmp.gt.f32.partialorder %v455_v35, 0.0  ;;  %v675_v39 = vmul.f32 0.1, %v455_v35  ;;  %v2074_v45 = vsel %vm610_vm4, %v452_v30, %v674_v34 }
 0x17b   :  { %v2072_v43 = vsel %vm613_vm5, %v463_v32, %v677_v38 }
 0x17c   :  { %v2076_v46 = vsel %vm611_vm8, %v455_v35, %v675_v39  ;;  %v1533_v54 = vpop.f32.mrb[36].mxu0  ;;  %v787_v60 = vpack.c.bf16 %v2072_v43, %v2078_v56 }
 0x17d   :  { %v786_v57 = vpack.c.bf16 %v2076_v46, %v2074_v45  ;;  %v476_v58 = vadd.f32 %v1533_v54, %v1922_v36  ;;  %v467_v59 = vpop.f32.mrb[37].mxu0 }
 0x17e   :  { %v468_v61 = vadd.f32 %v1922_v36, %v467_v59  ;;  %v1534_v1 = vpop.f32.mrb[38].mxu0 }
 0x17f   :  { %v479_v6 = vadd.f32 %v1534_v1, %v1922_v36  ;;  %v470_v8 = vpop.f32.mrb[39].mxu0  ;;  %1595 = vmatprep.mubr.msk.bf16.mxu1 %vm825_vm6, %v786_v57  ;;  %v680_v11 = vmul.f32 0.1, %v476_v58  ;;  %vm616_vm11 = vcmp.gt.f32.partialorder %v476_v58, 0.0 }
 0x180   :  { %v678_v9 = vmul.f32 0.1, %v468_v61  ;;  %v471_v10 = vadd.f32 %v1922_v36, %v470_v8  ;;  %1596 = vmatmul.mubr.msk.bf16.gmra.mrb[32].mxu1 %vm825_vm6, %v787_v60  ;;  %vm614_vm9 = vcmp.gt.f32.partialorder %v468_v61, 0.0 }
 0x181   :  { %vm617_vm10 = vcmp.gt.f32.partialorder %v479_v6, 0.0  ;;  %v681_v12 = vmul.f32 0.1, %v479_v6  ;;  %v2096_v30 = vsel %vm616_vm11, %v476_v58, %v680_v11 }
 0x182   :  { %vm615_vm12 = vcmp.gt.f32.partialorder %v471_v10, 0.0  ;;  %v679_v16 = vmul.f32 0.1, %v471_v10  ;;  %v2092_v19 = vsel %vm614_vm9, %v468_v61, %v678_v9 }
 0x183   :  { %v2090_v18 = vsel %vm617_vm10, %v479_v6, %v681_v12 }
 0x184   :  { %v2094_v27 = vsel %vm615_vm12, %v471_v10, %v679_v16  ;;  %v1537_v29 = vpop.f32.mrb[40].mxu0  ;;  %v789_v34 = vpack.c.bf16 %v2090_v18, %v2096_v30 }
 0x185   :  { %v788_v31 = vpack.c.bf16 %v2094_v27, %v2092_v19  ;;  %v492_v32 = vadd.f32 %v1537_v29, %v1922_v36  ;;  %v483_v33 = vpop.f32.mrb[41].mxu0 }
 0x186   :  { %v484_v35 = vadd.f32 %v1922_v36, %v483_v33  ;;  %v1538_v37 = vpop.f32.mrb[42].mxu0 }
 0x187   :  { %v495_v38 = vadd.f32 %v1538_v37, %v1922_v36  ;;  %v486_v39 = vpop.f32.mrb[43].mxu0  ;;  %1599 = vmatprep.mubr.msk.bf16.mxu1 %vm825_vm6, %v788_v31  ;;  %v684_v58 = vmul.f32 0.1, %v492_v32  ;;  %vm620_vm15 = vcmp.gt.f32.partialorder %v492_v32, 0.0 }
 0x188   :  { %v682_v54 = vmul.f32 0.1, %v484_v35  ;;  %v487_v57 = vadd.f32 %v1922_v36, %v486_v39  ;;  %1600 = vmatmul.mubr.msk.bf16.gmra.mrb[36].mxu1 %vm825_vm6, %v789_v34  ;;  %vm618_vm13 = vcmp.gt.f32.partialorder %v484_v35, 0.0 }
 0x189   :  { %vm621_vm14 = vcmp.gt.f32.partialorder %v495_v38, 0.0  ;;  %v685_v59 = vmul.f32 0.1, %v495_v38  ;;  %v2114_v9 = vsel %vm620_vm15, %v492_v32, %v684_v58 }
 0x18a   :  { %vm619_vm0 = vcmp.gt.f32.partialorder %v487_v57, 0.0  ;;  %v683_v60 = vmul.f32 0.1, %v487_v57  ;;  %v2110_v1 = vsel %vm618_vm13, %v484_v35, %v682_v54 }
 0x18b   :  { %v2108_v61 = vsel %vm621_vm14, %v495_v38, %v685_v59 }
 0x18c   :  { %v2112_v6 = vsel %vm619_vm0, %v487_v57, %v683_v60  ;;  %v1541_v8 = vpop.f32.mrb[44].mxu0  ;;  %v791_v16 = vpack.c.bf16 %v2108_v61, %v2114_v9 }
 0x18d   :  { %v790_v10 = vpack.c.bf16 %v2112_v6, %v2110_v1  ;;  %v508_v11 = vadd.f32 %v1541_v8, %v1922_v36  ;;  %v499_v12 = vpop.f32.mrb[45].mxu0 }
 0x18e   :  { %v500_v29 = vadd.f32 %v1922_v36, %v499_v12  ;;  %v1542_v31 = vpop.f32.mrb[46].mxu0 }
 0x18f   :  { %v511_v33 = vadd.f32 %v1542_v31, %v1922_v36  ;;  %v502_v34 = vpop.f32.mrb[47].mxu0  ;;  %1603 = vmatprep.mubr.msk.bf16.mxu1 %vm825_vm6, %v790_v10  ;;  %v688_v37 = vmul.f32 0.1, %v508_v11  ;;  %vm624_vm3 = vcmp.gt.f32.partialorder %v508_v11, 0.0 }
 0x190   :  { %v686_v35 = vmul.f32 0.1, %v500_v29  ;;  %v503_v32 = vadd.f32 %v1922_v36, %v502_v34  ;;  %1604 = vmatmul.mubr.msk.bf16.gmra.mrb[40].mxu1 %vm825_vm6, %v791_v16  ;;  %vm622_vm1 = vcmp.gt.f32.partialorder %v500_v29, 0.0 }
 0x191   :  { %vm625_vm2 = vcmp.gt.f32.partialorder %v511_v33, 0.0  ;;  %v689_v38 = vmul.f32 0.1, %v511_v33  ;;  %v2132_v60 = vsel %vm624_vm3, %v508_v11, %v688_v37 }
 0x192   :  { %vm623_vm4 = vcmp.gt.f32.partialorder %v503_v32, 0.0  ;;  %v687_v39 = vmul.f32 0.1, %v503_v32  ;;  %v2128_v57 = vsel %vm622_vm1, %v500_v29, %v686_v35 }
 0x193   :  { %v2126_v54 = vsel %vm625_vm2, %v511_v33, %v689_v38  ;;  %2440 = vst [vmem:[#allocation17_spill] sm:$0xff] %v2128_v57 }
 0x194   :  { %2439 = vst [vmem:[#allocation16_spill] sm:$0xff] %v2126_v54  ;;  %v2130_v58 = vsel %vm623_vm4, %v503_v32, %v687_v39  ;;  %v1545_v59 = vpop.f32.mrb[48].mxu0  ;;  %v793_v16 = vpack.c.bf16 %v2126_v54, %v2132_v60 }
 0x195   :  { %2441 = vst [vmem:[#allocation18_spill] sm:$0xff] %v2130_v58  ;;  %v792_v8 = vpack.c.bf16 %v2130_v58, %v2128_v57  ;;  %v524_v10 = vadd.f32 %v1545_v59, %v1922_v36  ;;  %v515_v12 = vpop.f32.mrb[49].mxu0 }
 0x196   :  { %v516_v31 = vadd.f32 %v1922_v36, %v515_v12  ;;  %v1546_v33 = vpop.f32.mrb[50].mxu0 }
 0x197   :  { %v527_v29 = vadd.f32 %v1546_v33, %v1922_v36  ;;  %v518_v34 = vpop.f32.mrb[51].mxu0  ;;  %1607 = vmatprep.mubr.msk.bf16.mxu1 %vm825_vm6, %v792_v8  ;;  %v692_v32 = vmul.f32 0.1, %v524_v10  ;;  %vm628_vm8 = vcmp.gt.f32.partialorder %v524_v10, 0.0 }
 0x198   :  { %v690_v35 = vmul.f32 0.1, %v516_v31  ;;  %v519_v11 = vadd.f32 %v1922_v36, %v518_v34  ;;  %1608 = vmatmul.mubr.msk.bf16.gmra.mrb[44].mxu1 %vm825_vm6, %v793_v16  ;;  %vm626_vm5 = vcmp.gt.f32.partialorder %v516_v31, 0.0 }
 0x199   :  { %vm629_vm7 = vcmp.gt.f32.partialorder %v527_v29, 0.0  ;;  %v693_v37 = vmul.f32 0.1, %v527_v29  ;;  %v2150_v8 = vsel %vm628_vm8, %v524_v10, %v692_v32 }
 0x19a   :  { %vm627_vm9 = vcmp.gt.f32.partialorder %v519_v11, 0.0  ;;  %v691_v38 = vmul.f32 0.1, %v519_v11  ;;  %v2146_v59 = vsel %vm626_vm5, %v516_v31, %v690_v35  ;;  %2445 = vst [vmem:[#allocation22_spill] sm:$0xff] %v2150_v8 }
 0x19b   :  { %v2144_v39 = vsel %vm629_vm7, %v527_v29, %v693_v37  ;;  %2443 = vst [vmem:[#allocation20_spill] sm:$0xff] %v2146_v59 }
 0x19c   :  { %2442 = vst [vmem:[#allocation19_spill] sm:$0xff] %v2144_v39  ;;  %v2148_v12 = vsel %vm627_vm9, %v519_v11, %v691_v38  ;;  %v1549_v33 = vpop.f32.mrb[52].mxu0  ;;  %v795_v54 = vpack.c.bf16 %v2144_v39, %v2150_v8 }
 0x19d   :  { %2444 = vst [vmem:[#allocation21_spill] sm:$0xff] %v2148_v12  ;;  %v794_v34 = vpack.c.bf16 %v2148_v12, %v2146_v59  ;;  %v540_v16 = vadd.f32 %v1549_v33, %v1922_v36  ;;  %v531_v58 = vpop.f32.mrb[53].mxu0 }
 0x19e   :  { %v532_v57 = vadd.f32 %v1922_v36, %v531_v58  ;;  %v1550_v29 = vpop.f32.mrb[54].mxu0 }
 0x19f   :  { %v543_v31 = vadd.f32 %v1550_v29, %v1922_v36  ;;  %v534_v35 = vpop.f32.mrb[55].mxu0  ;;  %1611 = vmatprep.mubr.msk.bf16.mxu1 %vm825_vm6, %v794_v34  ;;  %v696_v32 = vmul.f32 0.1, %v540_v16  ;;  %vm632_vm12 = vcmp.gt.f32.partialorder %v540_v16, 0.0 }
 0x1a0   :  { %v694_v11 = vmul.f32 0.1, %v532_v57  ;;  %v535_v10 = vadd.f32 %v1922_v36, %v534_v35  ;;  %1612 = vmatmul.mubr.msk.bf16.gmra.mrb[48].mxu1 %vm825_vm6, %v795_v54  ;;  %vm630_vm10 = vcmp.gt.f32.partialorder %v532_v57, 0.0 }
 0x1a1   :  { %vm633_vm11 = vcmp.gt.f32.partialorder %v543_v31, 0.0  ;;  %v697_v37 = vmul.f32 0.1, %v543_v31  ;;  %v2168_v34 = vsel %vm632_vm12, %v540_v16, %v696_v32 }
 0x1a2   :  { %vm631_vm13 = vcmp.gt.f32.partialorder %v535_v10, 0.0  ;;  %v695_v38 = vmul.f32 0.1, %v535_v10  ;;  %v2164_v58 = vsel %vm630_vm10, %v532_v57, %v694_v11  ;;  %2449 = vst [vmem:[#allocation26_spill] sm:$0xff] %v2168_v34 }
 0x1a3   :  { %v2162_v33 = vsel %vm633_vm11, %v543_v31, %v697_v37  ;;  %2447 = vst [vmem:[#allocation24_spill] sm:$0xff] %v2164_v58 }
 0x1a4   :  { %2446 = vst [vmem:[#allocation23_spill] sm:$0xff] %v2162_v33  ;;  %v2166_v29 = vsel %vm631_vm13, %v535_v10, %v695_v38  ;;  %v1553_v12 = vpop.f32.mrb[56].mxu0  ;;  %v797_v59 = vpack.c.bf16 %v2162_v33, %v2168_v34 }
 0x1a5   :  { %2448 = vst [vmem:[#allocation25_spill] sm:$0xff] %v2166_v29  ;;  %v796_v35 = vpack.c.bf16 %v2166_v29, %v2164_v58  ;;  %v556_v54 = vadd.f32 %v1553_v12, %v1922_v36  ;;  %v547_v39 = vpop.f32.mrb[57].mxu0 }
 0x1a6   :  { %v548_v8 = vadd.f32 %v1922_v36, %v547_v39  ;;  %v1554_v31 = vpop.f32.mrb[58].mxu0 }
 0x1a7   :  { %v559_v57 = vadd.f32 %v1554_v31, %v1922_v36  ;;  %v550_v11 = vpop.f32.mrb[59].mxu0  ;;  %1615 = vmatprep.mubr.msk.bf16.mxu1 %vm825_vm6, %v796_v35  ;;  %v700_v32 = vmul.f32 0.1, %v556_v54  ;;  %vm636_vm0 = vcmp.gt.f32.partialorder %v556_v54, 0.0 }
 0x1a8   :  { %v698_v10 = vmul.f32 0.1, %v548_v8  ;;  %v551_v16 = vadd.f32 %v1922_v36, %v550_v11  ;;  %1616 = vmatmul.mubr.msk.bf16.gmra.mrb[52].mxu1 %vm825_vm6, %v797_v59  ;;  %vm634_vm14 = vcmp.gt.f32.partialorder %v548_v8, 0.0 }
 0x1a9   :  { %vm637_vm15 = vcmp.gt.f32.partialorder %v559_v57, 0.0  ;;  %v701_v12 = vmul.f32 0.1, %v559_v57  ;;  %v2186_v35 = vsel %vm636_vm0, %v556_v54, %v700_v32 }
 0x1aa   :  { %vm635_vm1 = vcmp.gt.f32.partialorder %v551_v16, 0.0  ;;  %v699_v37 = vmul.f32 0.1, %v551_v16  ;;  %v2182_v39 = vsel %vm634_vm14, %v548_v8, %v698_v10 }
 0x1ab   :  { %v2180_v38 = vsel %vm637_vm15, %v559_v57, %v701_v12 }
 0x1ac   :  { %v2184_v31 = vsel %vm635_vm1, %v551_v16, %v699_v37  ;;  %v1557_v29 = vpop.f32.mrb[60].mxu0  ;;  %v799_v58 = vpack.c.bf16 %v2180_v38, %v2186_v35 }
 0x1ad   :  { %2450 = vst [vmem:[#allocation27_spill] sm:$0xff] %v2184_v31  ;;  %v798_v11 = vpack.c.bf16 %v2184_v31, %v2182_v39  ;;  %v572_v59 = vadd.f32 %v1557_v29, %v1922_v36  ;;  %v563_v33 = vpop.f32.mrb[61].mxu0 }
 0x1ae   :  { %v564_v34 = vadd.f32 %v1922_v36, %v563_v33  ;;  %v1558_v57 = vpop.f32.mrb[62].mxu0 }
 0x1af   :  { %v575_v8 = vadd.f32 %v1558_v57, %v1922_v36  ;;  %v566_v10 = vpop.f32.mrb[63].mxu0  ;;  %1619 = vmatprep.mubr.msk.bf16.mxu1 %vm825_vm6, %v798_v11  ;;  %v704_v32 = vmul.f32 0.1, %v572_v59  ;;  %vm640_vm4 = vcmp.gt.f32.partialorder %v572_v59, 0.0  ;;  %v2212_v11 = vld [vmem:[#allocation10] ss:$0 sm:$0xff] }
 0x1b0   :  { %v702_v16 = vmul.f32 0.1, %v564_v34  ;;  %v567_v54 = vadd.f32 %v1922_v36, %v566_v10  ;;  %1620 = vmatmul.mubr.msk.bf16.gmra.mrb[56].mxu1 %vm825_vm6, %v799_v58  ;;  %vm638_vm2 = vcmp.gt.f32.partialorder %v564_v34, 0.0 }
 0x1b1   :  { %vm641_vm3 = vcmp.gt.f32.partialorder %v575_v8, 0.0  ;;  %v705_v29 = vmul.f32 0.1, %v575_v8  ;;  %v2204_v31 = vsel %vm640_vm4, %v572_v59, %v704_v32 }
 0x1b2   :  { %vm639_vm5 = vcmp.gt.f32.partialorder %v567_v54, 0.0  ;;  %v703_v12 = vmul.f32 0.1, %v567_v54  ;;  %v2200_v33 = vsel %vm638_vm2, %v564_v34, %v702_v16 }
 0x1b3   :  { %v2198_v37 = vsel %vm641_vm3, %v575_v8, %v705_v29 }
 0x1b4   :  { %v2202_v57 = vsel %vm639_vm5, %v567_v54, %v703_v12  ;;  %v801_v58 = vpack.c.bf16 %v2198_v37, %v2204_v31 }
 0x1b5   :  { %v800_v36 = vpack.c.bf16 %v2202_v57, %v2200_v33 }
 0x1b7   :  { %1623 = vmatprep.mubr.msk.bf16.mxu1 %vm825_vm6, %v800_v36 }
 0x1b8   :  { %1624 = vmatmul.mubr.msk.bf16.gmra.mrb[60].mxu1 %vm825_vm6, %v801_v58 }
 0x213   :  { %v1565_v8 = vpop.f32.mrb[0].mxu1 }
 0x214   :  { %v965_v34 = vadd.f32 %v1565_v8, %v2212_v11  ;;  %v956_v10 = vpop.f32.mrb[1].mxu1 }
 0x215   :  { %v957_v16 = vadd.f32 %v2212_v11, %v956_v10  ;;  %v1566_v59 = vpop.f32.mrb[2].mxu1 }
 0x216   :  { %v1213_v54 = vadd.f32 %v965_v34, %v1934_v53  ;;  %v968_v32 = vadd.f32 %v1566_v59, %v2212_v11  ;;  %v959_v29 = vpop.f32.mrb[3].mxu1 }
 0x217   :  { %v1211_v12 = vadd.f32 %v957_v16, %v1930_v51  ;;  %v960_v36 = vadd.f32 %v2212_v11, %v959_v29 }
 0x218   :  { %1277 = vst.msk [vmem:[#allocation11 + $0x10] sm:$0xff] %vm825_vm6, %v1213_v54  ;;  %v1214_v58 = vadd.f32 %v968_v32, %v1928_v49 }
 0x219   :  { %1275 = vst.msk [vmem:[#allocation11] sm:$0xff] %vm825_vm6, %v1211_v12  ;;  %v1212_v8 = vadd.f32 %v960_v36, %v1932_v52 }
 0x21a   :  { %1278 = vst.msk [vmem:[#allocation11 + $0x18] sm:$0xff] %vm825_vm6, %v1214_v58 }
 0x21b   :  { %1276 = vst.msk [vmem:[#allocation11 + $0x8] sm:$0xff] %vm825_vm6, %v1212_v8  ;;  %v1569_v53 = vpop.f32.mrb[4].mxu1 }
 0x21c   :  { %v981_v34 = vadd.f32 %v1569_v53, %v2212_v11  ;;  %v972_v10 = vpop.f32.mrb[5].mxu1 }
 0x21d   :  { %v973_v51 = vadd.f32 %v2212_v11, %v972_v10  ;;  %v1570_v16 = vpop.f32.mrb[6].mxu1 }
 0x21e   :  { %v1217_v59 = vadd.f32 %v981_v34, %v1952_v7  ;;  %v984_v54 = vadd.f32 %v1570_v16, %v2212_v11  ;;  %v975_v49 = vpop.f32.mrb[7].mxu1 }
 0x21f   :  { %v1215_v32 = vadd.f32 %v973_v51, %v1948_v4  ;;  %v976_v52 = vadd.f32 %v2212_v11, %v975_v49 }
 0x220   :  { %1281 = vst.msk [vmem:[#allocation11 + $0x30] sm:$0xff] %vm825_vm6, %v1217_v59  ;;  %v1218_v29 = vadd.f32 %v984_v54, %v1946_v3 }
 0x221   :  { %1279 = vst.msk [vmem:[#allocation11 + $0x20] sm:$0xff] %vm825_vm6, %v1215_v32  ;;  %v1216_v12 = vadd.f32 %v976_v52, %v1950_v5 }
 0x222   :  { %1282 = vst.msk [vmem:[#allocation11 + $0x38] sm:$0xff] %vm825_vm6, %v1218_v29 }
 0x223   :  { %1280 = vst.msk [vmem:[#allocation11 + $0x28] sm:$0xff] %vm825_vm6, %v1216_v12  ;;  %v1573_v7 = vpop.f32.mrb[8].mxu1 }
 0x224   :  { %v997_v36 = vadd.f32 %v1573_v7, %v2212_v11  ;;  %v988_v58 = vpop.f32.mrb[9].mxu1 }
 0x225   :  { %v989_v4 = vadd.f32 %v2212_v11, %v988_v58  ;;  %v1574_v8 = vpop.f32.mrb[10].mxu1 }
 0x226   :  { %v1221_v53 = vadd.f32 %v997_v36, %v1970_v25  ;;  %v1000_v34 = vadd.f32 %v1574_v8, %v2212_v11  ;;  %v991_v3 = vpop.f32.mrb[11].mxu1 }
 0x227   :  { %v1219_v10 = vadd.f32 %v989_v4, %v1966_v22  ;;  %v992_v5 = vadd.f32 %v2212_v11, %v991_v3 }
 0x228   :  { %1285 = vst.msk [vmem:[#allocation11 + $0x50] sm:$0xff] %vm825_vm6, %v1221_v53  ;;  %v1222_v51 = vadd.f32 %v1000_v34, %v1964_v21 }
 0x229   :  { %1283 = vst.msk [vmem:[#allocation11 + $0x40] sm:$0xff] %vm825_vm6, %v1219_v10  ;;  %v1220_v16 = vadd.f32 %v992_v5, %v1968_v23 }
 0x22a   :  { %1286 = vst.msk [vmem:[#allocation11 + $0x58] sm:$0xff] %vm825_vm6, %v1222_v51 }
 0x22b   :  { %1284 = vst.msk [vmem:[#allocation11 + $0x48] sm:$0xff] %vm825_vm6, %v1220_v16  ;;  %v1577_v25 = vpop.f32.mrb[12].mxu1 }
 0x22c   :  { %v1013_v59 = vadd.f32 %v1577_v25, %v2212_v11  ;;  %v1004_v54 = vpop.f32.mrb[13].mxu1 }
 0x22d   :  { %v1005_v22 = vadd.f32 %v2212_v11, %v1004_v54  ;;  %v1578_v49 = vpop.f32.mrb[14].mxu1 }
 0x22e   :  { %v1225_v32 = vadd.f32 %v1013_v59, %v1988_v44  ;;  %v1016_v52 = vadd.f32 %v1578_v49, %v2212_v11  ;;  %v1007_v21 = vpop.f32.mrb[15].mxu1 }
 0x22f   :  { %v1223_v29 = vadd.f32 %v1005_v22, %v1984_v41  ;;  %v1008_v23 = vadd.f32 %v2212_v11, %v1007_v21 }
 0x230   :  { %1289 = vst.msk [vmem:[#allocation11 + $0x70] sm:$0xff] %vm825_vm6, %v1225_v32  ;;  %v1226_v12 = vadd.f32 %v1016_v52, %v1982_v40 }
 0x231   :  { %1287 = vst.msk [vmem:[#allocation11 + $0x60] sm:$0xff] %vm825_vm6, %v1223_v29  ;;  %v1224_v7 = vadd.f32 %v1008_v23, %v1986_v42 }
 0x232   :  { %1290 = vst.msk [vmem:[#allocation11 + $0x78] sm:$0xff] %vm825_vm6, %v1226_v12 }
 0x233   :  { %1288 = vst.msk [vmem:[#allocation11 + $0x68] sm:$0xff] %vm825_vm6, %v1224_v7  ;;  %v1581_v44 = vpop.f32.mrb[16].mxu1 }
 0x234   :  { %v1029_v36 = vadd.f32 %v1581_v44, %v2212_v11  ;;  %v1020_v58 = vpop.f32.mrb[17].mxu1 }
 0x235   :  { %v1021_v41 = vadd.f32 %v2212_v11, %v1020_v58  ;;  %v1582_v4 = vpop.f32.mrb[18].mxu1 }
 0x236   :  { %v1229_v8 = vadd.f32 %v1029_v36, %v2006_v2  ;;  %v1032_v53 = vadd.f32 %v1582_v4, %v2212_v11  ;;  %v1023_v40 = vpop.f32.mrb[19].mxu1 }
 0x237   :  { %v1227_v34 = vadd.f32 %v1021_v41, %v2002_v63  ;;  %v1024_v42 = vadd.f32 %v2212_v11, %v1023_v40 }
 0x238   :  { %1293 = vst.msk [vmem:[#allocation11 + $0x90] sm:$0xff] %vm825_vm6, %v1229_v8  ;;  %v1230_v3 = vadd.f32 %v1032_v53, %v2000_v62 }
 0x239   :  { %1291 = vst.msk [vmem:[#allocation11 + $0x80] sm:$0xff] %vm825_vm6, %v1227_v34  ;;  %v1228_v10 = vadd.f32 %v1024_v42, %v2004_v0 }
 0x23a   :  { %1294 = vst.msk [vmem:[#allocation11 + $0x98] sm:$0xff] %vm825_vm6, %v1230_v3 }
 0x23b   :  { %1292 = vst.msk [vmem:[#allocation11 + $0x88] sm:$0xff] %vm825_vm6, %v1228_v10  ;;  %v1585_v2 = vpop.f32.mrb[20].mxu1 }
 0x23c   :  { %v1045_v5 = vadd.f32 %v1585_v2, %v2212_v11  ;;  %v1036_v51 = vpop.f32.mrb[21].mxu1 }
 0x23d   :  { %v1037_v63 = vadd.f32 %v2212_v11, %v1036_v51  ;;  %v1586_v16 = vpop.f32.mrb[22].mxu1 }
 0x23e   :  { %v1233_v25 = vadd.f32 %v1045_v5, %v2024_v28  ;;  %v1048_v59 = vadd.f32 %v1586_v16, %v2212_v11  ;;  %v1039_v62 = vpop.f32.mrb[23].mxu1 }
 0x23f   :  { %v1231_v54 = vadd.f32 %v1037_v63, %v2020_v24  ;;  %v1040_v0 = vadd.f32 %v2212_v11, %v1039_v62 }
 0x240   :  { %1297 = vst.msk [vmem:[#allocation11 + $0xb0] sm:$0xff] %vm825_vm6, %v1233_v25  ;;  %v1234_v22 = vadd.f32 %v1048_v59, %v2018_v20 }
 0x241   :  { %1295 = vst.msk [vmem:[#allocation11 + $0xa0] sm:$0xff] %vm825_vm6, %v1231_v54  ;;  %v1232_v49 = vadd.f32 %v1040_v0, %v2022_v26 }
 0x242   :  { %1298 = vst.msk [vmem:[#allocation11 + $0xb8] sm:$0xff] %vm825_vm6, %v1234_v22 }
 0x243   :  { %1296 = vst.msk [vmem:[#allocation11 + $0xa8] sm:$0xff] %vm825_vm6, %v1232_v49  ;;  %v1589_v28 = vpop.f32.mrb[24].mxu1 }
 0x244   :  { %v1061_v32 = vadd.f32 %v1589_v28, %v2212_v11  ;;  %v1052_v52 = vpop.f32.mrb[25].mxu1 }
 0x245   :  { %v1053_v24 = vadd.f32 %v2212_v11, %v1052_v52  ;;  %v1590_v21 = vpop.f32.mrb[26].mxu1 }
 0x246   :  { %v1237_v29 = vadd.f32 %v1061_v32, %v2042_v55  ;;  %v1064_v23 = vadd.f32 %v1590_v21, %v2212_v11  ;;  %v1055_v20 = vpop.f32.mrb[27].mxu1 }
 0x247   :  { %v1235_v12 = vadd.f32 %v1053_v24, %v2038_v48  ;;  %v1056_v26 = vadd.f32 %v2212_v11, %v1055_v20 }
 0x248   :  { %1301 = vst.msk [vmem:[#allocation11 + $0xd0] sm:$0xff] %vm825_vm6, %v1237_v29  ;;  %v1238_v7 = vadd.f32 %v1064_v23, %v2036_v47 }
 0x249   :  { %1299 = vst.msk [vmem:[#allocation11 + $0xc0] sm:$0xff] %vm825_vm6, %v1235_v12  ;;  %v1236_v44 = vadd.f32 %v1056_v26, %v2040_v50 }
 0x24a   :  { %1302 = vst.msk [vmem:[#allocation11 + $0xd8] sm:$0xff] %vm825_vm6, %v1238_v7 }
 0x24b   :  { %1300 = vst.msk [vmem:[#allocation11 + $0xc8] sm:$0xff] %vm825_vm6, %v1236_v44  ;;  %v1593_v55 = vpop.f32.mrb[28].mxu1 }
 0x24c   :  { %v1077_v36 = vadd.f32 %v1593_v55, %v2212_v11  ;;  %v1068_v58 = vpop.f32.mrb[29].mxu1 }
 0x24d   :  { %v1069_v48 = vadd.f32 %v2212_v11, %v1068_v58  ;;  %v1594_v41 = vpop.f32.mrb[30].mxu1  ;;  %v2451_v58 = vld [vmem:[#allocation17_spill] sm:$0xff] }
 0x24e   :  { %v1241_v4 = vadd.f32 %v1077_v36, %v2060_v17  ;;  %v1080_v8 = vadd.f32 %v1594_v41, %v2212_v11  ;;  %v1071_v47 = vpop.f32.mrb[31].mxu1  ;;  %v2452_v41 = vld [vmem:[#allocation16_spill] sm:$0xff] }
 0x24f   :  { %v1239_v53 = vadd.f32 %v1069_v48, %v2056_v14  ;;  %v1072_v50 = vadd.f32 %v2212_v11, %v1071_v47 }
 0x250   :  { %1305 = vst.msk [vmem:[#allocation11 + $0xf0] sm:$0xff] %vm825_vm6, %v1241_v4  ;;  %v1242_v40 = vadd.f32 %v1080_v8, %v2054_v13  ;;  %v2453_v8 = vld [vmem:[#allocation18_spill] sm:$0xff] }
 0x251   :  { %1303 = vst.msk [vmem:[#allocation11 + $0xe0] sm:$0xff] %vm825_vm6, %v1239_v53  ;;  %v1240_v34 = vadd.f32 %v1072_v50, %v2058_v15 }
 0x252   :  { %1306 = vst.msk [vmem:[#allocation11 + $0xf8] sm:$0xff] %vm825_vm6, %v1242_v40 }
 0x253   :  { %1304 = vst.msk [vmem:[#allocation11 + $0xe8] sm:$0xff] %vm825_vm6, %v1240_v34  ;;  %v1597_v17 = vpop.f32.mrb[32].mxu1 }
 0x254   :  { %v1093_v42 = vadd.f32 %v1597_v17, %v2212_v11  ;;  %v1084_v3 = vpop.f32.mrb[33].mxu1  ;;  %v2454_v17 = vld [vmem:[#allocation22_spill] sm:$0xff] }
 0x255   :  { %v1085_v14 = vadd.f32 %v2212_v11, %v1084_v3  ;;  %v1598_v10 = vpop.f32.mrb[34].mxu1 }
 0x256   :  { %v1245_v2 = vadd.f32 %v1093_v42, %v2078_v56  ;;  %v1096_v5 = vadd.f32 %v1598_v10, %v2212_v11  ;;  %v1087_v13 = vpop.f32.mrb[35].mxu1  ;;  %v2455_v10 = vld [vmem:[#allocation20_spill] sm:$0xff] }
 0x257   :  { %v1243_v51 = vadd.f32 %v1085_v14, %v2074_v45  ;;  %v1088_v15 = vadd.f32 %v2212_v11, %v1087_v13  ;;  %v2456_v13 = vld [vmem:[#allocation19_spill] sm:$0xff] }
 0x258   :  { %1309 = vst.msk [vmem:[#allocation11 + $0x110] sm:$0xff] %vm825_vm6, %v1245_v2  ;;  %v1246_v63 = vadd.f32 %v1096_v5, %v2072_v43 }
 0x259   :  { %1307 = vst.msk [vmem:[#allocation11 + $0x100] sm:$0xff] %vm825_vm6, %v1243_v51  ;;  %v1244_v16 = vadd.f32 %v1088_v15, %v2076_v46  ;;  %v2457_v15 = vld [vmem:[#allocation21_spill] sm:$0xff] }
 0x25a   :  { %1310 = vst.msk [vmem:[#allocation11 + $0x118] sm:$0xff] %vm825_vm6, %v1246_v63 }
 0x25b   :  { %1308 = vst.msk [vmem:[#allocation11 + $0x108] sm:$0xff] %vm825_vm6, %v1244_v16  ;;  %v1601_v56 = vpop.f32.mrb[36].mxu1 }
 0x25c   :  { %v1109_v25 = vadd.f32 %v1601_v56, %v2212_v11  ;;  %v1100_v59 = vpop.f32.mrb[37].mxu1 }
 0x25d   :  { %v1101_v45 = vadd.f32 %v2212_v11, %v1100_v59  ;;  %v1602_v62 = vpop.f32.mrb[38].mxu1 }
 0x25e   :  { %v1249_v54 = vadd.f32 %v1109_v25, %v2096_v30  ;;  %v1112_v0 = vadd.f32 %v1602_v62, %v2212_v11  ;;  %v1103_v43 = vpop.f32.mrb[39].mxu1  ;;  %v2458_v62 = vld [vmem:[#allocation26_spill] sm:$0xff] }
 0x25f   :  { %v1247_v22 = vadd.f32 %v1101_v45, %v2092_v19  ;;  %v1104_v46 = vadd.f32 %v2212_v11, %v1103_v43 }
 0x260   :  { %1313 = vst.msk [vmem:[#allocation11 + $0x130] sm:$0xff] %vm825_vm6, %v1249_v54  ;;  %v1250_v49 = vadd.f32 %v1112_v0, %v2090_v18 }
 0x261   :  { %1311 = vst.msk [vmem:[#allocation11 + $0x120] sm:$0xff] %vm825_vm6, %v1247_v22  ;;  %v1248_v28 = vadd.f32 %v1104_v46, %v2094_v27  ;;  %v2459_v22 = vld [vmem:[#allocation24_spill] sm:$0xff] }
 0x262   :  { %1314 = vst.msk [vmem:[#allocation11 + $0x138] sm:$0xff] %vm825_vm6, %v1250_v49 }
 0x263   :  { %1312 = vst.msk [vmem:[#allocation11 + $0x128] sm:$0xff] %vm825_vm6, %v1248_v28  ;;  %v1605_v30 = vpop.f32.mrb[40].mxu1  ;;  %v2460_v28 = vld [vmem:[#allocation23_spill] sm:$0xff] }
 0x264   :  { %v1125_v32 = vadd.f32 %v1605_v30, %v2212_v11  ;;  %v1116_v52 = vpop.f32.mrb[41].mxu1 }
 0x265   :  { %v1117_v19 = vadd.f32 %v2212_v11, %v1116_v52  ;;  %v1606_v24 = vpop.f32.mrb[42].mxu1 }
 0x266   :  { %v1253_v21 = vadd.f32 %v1125_v32, %v2114_v9  ;;  %v1128_v29 = vadd.f32 %v1606_v24, %v2212_v11  ;;  %v1119_v18 = vpop.f32.mrb[43].mxu1  ;;  %v2461_v32 = vld [vmem:[#allocation25_spill] sm:$0xff] }
 0x267   :  { %v1251_v23 = vadd.f32 %v1117_v19, %v2110_v1  ;;  %v1120_v27 = vadd.f32 %v2212_v11, %v1119_v18 }
 0x268   :  { %1317 = vst.msk [vmem:[#allocation11 + $0x150] sm:$0xff] %vm825_vm6, %v1253_v21  ;;  %v1254_v20 = vadd.f32 %v1128_v29, %v2108_v61 }
 0x269   :  { %1315 = vst.msk [vmem:[#allocation11 + $0x140] sm:$0xff] %vm825_vm6, %v1251_v23  ;;  %v1252_v12 = vadd.f32 %v1120_v27, %v2112_v6 }
 0x26a   :  { %1318 = vst.msk [vmem:[#allocation11 + $0x158] sm:$0xff] %vm825_vm6, %v1254_v20 }
 0x26b   :  { %1316 = vst.msk [vmem:[#allocation11 + $0x148] sm:$0xff] %vm825_vm6, %v1252_v12  ;;  %v1609_v9 = vpop.f32.mrb[44].mxu1 }
 0x26c   :  { %v1141_v26 = vadd.f32 %v1609_v9, %v2212_v11  ;;  %v1132_v7 = vpop.f32.mrb[45].mxu1 }
 0x26d   :  { %v1133_v1 = vadd.f32 %v2212_v11, %v1132_v7  ;;  %v1610_v44 = vpop.f32.mrb[46].mxu1  ;;  %v2462_v7 = vld [vmem:[#allocation27_spill] sm:$0xff] }
 0x26e   :  { %v1257_v55 = vadd.f32 %v1141_v26, %v2132_v60  ;;  %v1144_v36 = vadd.f32 %v1610_v44, %v2212_v11  ;;  %v1135_v61 = vpop.f32.mrb[47].mxu1 }
 0x26f   :  { %v1255_v48 = vadd.f32 %v1133_v1, %v2451_v58  ;;  %v1136_v6 = vadd.f32 %v2212_v11, %v1135_v61 }
 0x270   :  { %1321 = vst.msk [vmem:[#allocation11 + $0x170] sm:$0xff] %vm825_vm6, %v1257_v55  ;;  %v1258_v4 = vadd.f32 %v1144_v36, %v2452_v41 }
 0x271   :  { %1319 = vst.msk [vmem:[#allocation11 + $0x160] sm:$0xff] %vm825_vm6, %v1255_v48  ;;  %v1256_v47 = vadd.f32 %v1136_v6, %v2453_v8 }
 0x272   :  { %1322 = vst.msk [vmem:[#allocation11 + $0x178] sm:$0xff] %vm825_vm6, %v1258_v4 }
 0x273   :  { %1320 = vst.msk [vmem:[#allocation11 + $0x168] sm:$0xff] %vm825_vm6, %v1256_v47  ;;  %v1613_v60 = vpop.f32.mrb[48].mxu1 }
 0x274   :  { %v1157_v53 = vadd.f32 %v1613_v60, %v2212_v11  ;;  %v1148_v50 = vpop.f32.mrb[49].mxu1 }
 0x275   :  { %v1149_v40 = vadd.f32 %v2212_v11, %v1148_v50  ;;  %v1614_v34 = vpop.f32.mrb[50].mxu1 }
 0x276   :  { %v1261_v42 = vadd.f32 %v1157_v53, %v2454_v17  ;;  %v1160_v3 = vadd.f32 %v1614_v34, %v2212_v11  ;;  %v1151_v14 = vpop.f32.mrb[51].mxu1 }
 0x277   :  { %v1259_v2 = vadd.f32 %v1149_v40, %v2455_v10  ;;  %v1152_v5 = vadd.f32 %v2212_v11, %v1151_v14 }
 0x278   :  { %1325 = vst.msk [vmem:[#allocation11 + $0x190] sm:$0xff] %vm825_vm6, %v1261_v42  ;;  %v1262_v51 = vadd.f32 %v1160_v3, %v2456_v13 }
 0x279   :  { %1323 = vst.msk [vmem:[#allocation11 + $0x180] sm:$0xff] %vm825_vm6, %v1259_v2  ;;  %v1260_v63 = vadd.f32 %v1152_v5, %v2457_v15 }
 0x27a   :  { %1326 = vst.msk [vmem:[#allocation11 + $0x198] sm:$0xff] %vm825_vm6, %v1262_v51 }
 0x27b   :  { %1324 = vst.msk [vmem:[#allocation11 + $0x188] sm:$0xff] %vm825_vm6, %v1260_v63  ;;  %v1617_v16 = vpop.f32.mrb[52].mxu1 }
 0x27c   :  { %v1173_v56 = vadd.f32 %v1617_v16, %v2212_v11  ;;  %v1164_v25 = vpop.f32.mrb[53].mxu1 }
 0x27d   :  { %v1165_v59 = vadd.f32 %v2212_v11, %v1164_v25  ;;  %v1618_v45 = vpop.f32.mrb[54].mxu1 }
 0x27e   :  { %v1265_v54 = vadd.f32 %v1173_v56, %v2458_v62  ;;  %v1176_v0 = vadd.f32 %v1618_v45, %v2212_v11  ;;  %v1167_v43 = vpop.f32.mrb[55].mxu1 }
 0x27f   :  { %v1263_v46 = vadd.f32 %v1165_v59, %v2459_v22  ;;  %v1168_v49 = vadd.f32 %v2212_v11, %v1167_v43 }
 0x280   :  { %1329 = vst.msk [vmem:[#allocation11 + $0x1b0] sm:$0xff] %vm825_vm6, %v1265_v54  ;;  %v1266_v30 = vadd.f32 %v1176_v0, %v2460_v28 }
 0x281   :  { %1327 = vst.msk [vmem:[#allocation11 + $0x1a0] sm:$0xff] %vm825_vm6, %v1263_v46  ;;  %v1264_v52 = vadd.f32 %v1168_v49, %v2461_v32 }
 0x282   :  { %1330 = vst.msk [vmem:[#allocation11 + $0x1b8] sm:$0xff] %vm825_vm6, %v1266_v30 }
 0x283   :  { %1328 = vst.msk [vmem:[#allocation11 + $0x1a8] sm:$0xff] %vm825_vm6, %v1264_v52  ;;  %v1621_v19 = vpop.f32.mrb[56].mxu1 }
 0x284   :  { %v1189_v24 = vadd.f32 %v1621_v19, %v2212_v11  ;;  %v1180_v21 = vpop.f32.mrb[57].mxu1 }
 0x285   :  { %v1181_v29 = vadd.f32 %v2212_v11, %v1180_v21  ;;  %v1622_v18 = vpop.f32.mrb[58].mxu1 }
 0x286   :  { %v1269_v23 = vadd.f32 %v1189_v24, %v2186_v35  ;;  %v1192_v27 = vadd.f32 %v1622_v18, %v2212_v11  ;;  %v1183_v20 = vpop.f32.mrb[59].mxu1 }
 0x287   :  { %v1267_v12 = vadd.f32 %v1181_v29, %v2182_v39  ;;  %v1184_v9 = vadd.f32 %v2212_v11, %v1183_v20 }
 0x288   :  { %1333 = vst.msk [vmem:[#allocation11 + $0x1d0] sm:$0xff] %vm825_vm6, %v1269_v23  ;;  %v1270_v26 = vadd.f32 %v1192_v27, %v2180_v38 }
 0x289   :  { %1331 = vst.msk [vmem:[#allocation11 + $0x1c0] sm:$0xff] %vm825_vm6, %v1267_v12  ;;  %v1268_v1 = vadd.f32 %v1184_v9, %v2462_v7 }
 0x28a   :  { %1334 = vst.msk [vmem:[#allocation11 + $0x1d8] sm:$0xff] %vm825_vm6, %v1270_v26 }
 0x28b   :  { %1332 = vst.msk [vmem:[#allocation11 + $0x1c8] sm:$0xff] %vm825_vm6, %v1268_v1  ;;  %v1625_v35 = vpop.f32.mrb[60].mxu1 }
 0x28c   :  { %v1205_v44 = vadd.f32 %v1625_v35, %v2212_v11  ;;  %v1196_v55 = vpop.f32.mrb[61].mxu1 }
 0x28d   :  { %v1197_v39 = vadd.f32 %v2212_v11, %v1196_v55  ;;  %v1626_v36 = vpop.f32.mrb[62].mxu1 }
 0x28e   :  { %v1273_v61 = vadd.f32 %v1205_v44, %v2204_v31  ;;  %v1208_v58 = vadd.f32 %v1626_v36, %v2212_v11  ;;  %v1199_v38 = vpop.f32.mrb[63].mxu1 }
 0x28f   :  { %v1271_v48 = vadd.f32 %v1197_v39, %v2200_v33  ;;  %v1200_v6 = vadd.f32 %v2212_v11, %v1199_v38 }
 0x290   :  { %1337 = vst.msk [vmem:[#allocation11 + $0x1f0] sm:$0xff] %vm825_vm6, %v1273_v61  ;;  %v1274_v41 = vadd.f32 %v1208_v58, %v2198_v37 }
 0x291   :  { %1335 = vst.msk [vmem:[#allocation11 + $0x1e0] sm:$0xff] %vm825_vm6, %v1271_v48  ;;  %v1272_v4 = vadd.f32 %v1200_v6, %v2202_v57 }
 0x292   :  { %1338 = vst.msk [vmem:[#allocation11 + $0x1f8] sm:$0xff] %vm825_vm6, %v1274_v41 }
 0x293   :  { %1336 = vst.msk [vmem:[#allocation11 + $0x1e8] sm:$0xff] %vm825_vm6, %v1272_v4 }
 0x294   :  { %1761 = shalt.err (!%p1758_p2)
}
 0x295   :  { %s1762_s9 = scalar_lea.hbm %s2426_s5, 8192 }
 0x296   :  { %p1763_p3 = scmp.ne.s32.totalorder %s2426_s5, %s1762_s9  ;;  %p1766_p4 = scmp.lt.u32.totalorder %s1762_s9, %s2426_s5 }
 0x298   :  { %p1768_p5 = pnand %p1766_p4, %p1763_p3 }
 0x29a   :  { %1771 = shalt.err (!%p1768_p5)
}
 0x29b   :  { %1350 = dma.vmem_to_hbm [thread:$0]  %s1345_s30, 8192, %s2426_s5, [#allocation4], %s1785_s3, %s1785_s3, %s1786_s21  }
 0x29c   :  { %1778 = dma.done.wait [#allocation4], 8192  }
 0x29d   :  { %1779 = vsyncadd [#allocation4], 4294959104 }
 0x29e   :  { %1354 = vsyncpa [#allocation3], 1 }
 0x29f   :  { %1355 = vsyncpa [#allocation6], 1 }
 0x2a0   :  { %1356 = vsyncpa [#allocation9], 1 }
 0x2a1   :  { %1357 = vsyncpa [#allocation4], 1 }

// kernel: transformer_block_forward.3
= control target key start
LH: loop header
LB: loop body
LE: loop exit
PB: predicated region body
PF: predicated region fallthrough
CT: control target
= control target key end

     0   :  { %s14126_s0 = inlined_call_operand.hbm [shape: f32[512,32], index: 0, kind: input, shape index: {}]   ;;  %s14127_s1 = inlined_call_operand.hbm [shape: bf16[2,32,96], index: 1, kind: input, shape index: {}]   ;;  %s14128_s2 = inlined_call_operand.hbm [shape: f32[2,1,96], index: 2, kind: input, shape index: {}]   ;;  %s14129_s3 = inlined_call_operand.hbm [shape: bf16[2,32,32], index: 3, kind: input, shape index: {}]   ;;  %s14130_s4 = inlined_call_operand.hbm [shape: f32[2,1,32], index: 4, kind: input, shape index: {}]   ;;  %s14131_s5 = inlined_call_operand.hbm [shape: bf16[2,32,32], index: 5, kind: input, shape index: {}]   ;;  %s14132_s6 = inlined_call_operand.hbm [shape: f32[512,32], index: 6, kind: output, shape index: {}]  }
   0x1   :  { %14742 = sst [smem:[#allocation222_spill]] %s14126_s0 }
   0x2   :  { %14743 = sst [smem:[#allocation223_spill]] %s14127_s1 }
   0x3   :  { %14744 = sst [smem:[#allocation224_spill]] %s14129_s3 }
   0x4   :  { %14745 = sst [smem:[#allocation225_spill]] %s14132_s6 }
   0x5   :  { %11 = vsyncpa [#allocation3], 0 }
   0x6   :  { %13 = vsyncpa [#allocation3 + $0x1], 0 }
   0x7   :  { %14 = vsyncpa [#allocation6], 0 }
   0x8   :  { %16 = vsyncpa [#allocation6 + $0x1], 0 }
   0x9   :  { %17 = vsyncpa [#allocation9], 0 }
   0xa   :  { %19 = vsyncpa [#allocation9 + $0x1], 0 }
   0xb   :  { %20 = vsyncpa [#allocation12], 0 }
   0xc   :  { %22 = vsyncpa [#allocation12 + $0x1], 0 }
   0xd   :  { %23 = vsyncpa [#allocation4], 0 }
   0xe   :  { %25 = vsyncpa [#allocation4 + $0x1], 0  ;;  %s8908_s21 = smov 0   ;;  %s8910_s22 = smov 0  }
   0xf   :  { %s8912_s23 = smov 0   ;;  %s8914_s24 = smov 0  }
  0x10   :  { %s8916_s25 = smov 0   ;;  %s8918_s26 = smov 0  }
  0x11   :  { %s8920_s27 = smov 0   ;;  %s8922_s28 = smov 0  }
  0x12   :  { %s8924_s29 = smov 0   ;;  %s8926_s30 = smov 0  }
  0x13   :  { %s8928_s7 = smov 0  }
  0x14 LB: > { %14746 = sst [smem:[#allocation19_spill]] %s8809_s22  ;;  %s40_s8 = sadd.s32 1, %s8837_s29  ;;  %s8845_s7 = sphi %s8928_s7, %s31_s7   ;;  %s8841_s30 = sphi %s8926_s30, %s15921_s30   ;;  %s8837_s29 = sphi %s8924_s29, %s15925_s29   ;;  %s8833_s28 = sphi %s8922_s28, %s15919_s28   ;;  %s8829_s27 = sphi %s8920_s27, %s15924_s27   ;;  %s8825_s26 = sphi %s8918_s26, %s15918_s26   ;;  %s8821_s25 = sphi %s8916_s25, %s15923_s25   ;;  %s8817_s24 = sphi %s8914_s24, %s15922_s24   ;;  %s8813_s23 = sphi %s8912_s23, %s15916_s23   ;;  %s8809_s22 = sphi %s8910_s22, %s15915_s22   ;;  %s8805_s21 = sphi %s8908_s21, %s15914_s21  }
  0x15   : > { %14747 = sst [smem:[#allocation20_spill]] %s8813_s23  ;;  %p14138_p0 = scmp.eq.s32.totalorder %s8845_s7, 0 }
  0x16   : > { %14748 = sst [smem:[#allocation21_spill]] %s8817_s24  ;;  %p8965_p1 = scmp.ge.s32.totalorder %s40_s8, 2 }
  0x17   : > { %14749 = sst [smem:[#allocation22_spill]] %s8825_s26  ;;  %s76_s10 = sadd.s32 1, %s8813_s23 }
  0x18   : > { %14750 = sst [smem:[#allocation23_spill]] %s8829_s27  ;;  %p83_p2 = scmp.ne.s32.totalorder %s8813_s23, %s8809_s22 }
  0x19   : > { %14751 = sst [smem:[#allocation24_spill]] %s8833_s28  ;;  %s15927_s8 = smov (%p8965_p1, %s40_s8), 0 }
  0x1a   : > { %14752 = sst [smem:[#allocation25_spill]] %s8841_s30  ;;  %p85_p4 = por %p83_p2, %p14138_p0 }
  0x1b   : > { %s14753_s9 = scalar_select %p8965_p1, 1, 0 }
  0x1c   : > { %14754 = sst [smem:[#allocation26_spill]] %s15927_s8  ;;  %s73_s11 = ssub.s32 %s8837_s29, %s15927_s8 }
  0x1d   : > { %p14136_p5 = scmp.lt.s32.totalorder %s8845_s7, 4  ;;  %p74_p6 = scmp.eq.s32.totalorder %s73_s11, 0 }
  0x1e   : > { %s14137_s12 = sand.u32 1, %s8845_s7   ;;  %s8985_s13 = sand.u32 1, %s8813_s23  }
  0x1f   : > { %s8988_s14 = scalar_select %p74_p6, %s8813_s23, %s76_s10  }
  0x20   : > { %s8991_s15 = sshll.u32 %s8985_s13, 4  ;;  %s8994_s16 = sshll.u32 %s8837_s29, 8 }
  0x21   : > { %14755 = sst [smem:[#allocation27_spill]] %s8988_s14  ;;  %s268_s20 = scalar_lea.vmem [#allocation5], %s8991_s15 }
  0x22   : > { %s14756_s1 = sld [smem:[#allocation223_spill]]  ;;  %s275_s11 = sshll.u32 %s268_s20, 4  ;;  %s9009_s11 = int_to_ptr.vmem [resolvable:$true] %s275_s11 }
  0x23   : > { %p9005_p7 = pnand %p14136_p5, %p85_p4  ;;  %s9013_s8 = scalar_lea.sflag [#allocation6], %s14137_s12 }
  0x25   : > { %s14757_s10 = scalar_select %p9005_p7, 1, 0 }
  0x26   : > { %p9019_p9 = pneg %p9005_p7 }
  0x28   : > { %s9000_s19 = scalar_lea.hbm %s14756_s1, %s8994_s16  ;;  %s8536_s23 = scalar_lea.hbm %s14756_s1, 512 }
  0x29   : > { %s8531_s17 = scalar_lea.hbm %s9000_s19, 256  ;;  %p8537_p12 = scmp.lt.u32.totalorder %s9000_s19, %s14756_s1 }
  0x2a   : > { %p8532_p8 = scmp.ne.s32.totalorder %s9000_s19, %s8531_s17  ;;  %p8538_p13 = scmp.lt.u32.totalorder %s8536_s23, %s8531_s17 }
  0x2b   : > { %p8540_p4 = scmp.lt.u32.totalorder %s8531_s17, %s9000_s19 }
  0x2c   : > { %p8534_p10 = pnand %p9019_p9, %p8532_p8  ;;  %p8539_p2 = por %p8538_p13, %p8537_p12 }
  0x2e   : > { %p8535_p11 = pneg %p8534_p10  ;;  %p8541_p6 = por %p8540_p4, %p8539_p2 }
  0x30   : > { %p8542_p5 = pnand %p8541_p6, %p8535_p11 }
  0x32   : > { %8545 = shalt.err (!%p8542_p5)
}
  0x33   : > { %s8546_s12 = scalar_lea.vmem %s9009_s11, 256  ;;  %s8847_s14 = smov [#allocation5]  }
  0x34   : > { %p8547_p8 = scmp.ne.s32.totalorder %s9009_s11, %s8546_s12  ;;  %s8551_s20 = sshll.u32 %s8847_s14, 4  ;;  %s8552_s20 = int_to_ptr.vmem [resolvable:$false] %s8551_s20 }
  0x35   : > { %s8553_s6 = scalar_lea.vmem %s8552_s20, 512  ;;  %p8554_p0 = scmp.lt.s32.totalorder %s9009_s11, %s8552_s20 }
  0x36   : > { %p8549_p10 = pnand %p8547_p8, %p9019_p9  ;;  %p8555_p1 = scmp.lt.s32.totalorder %s8553_s6, %s8546_s12 }
  0x38   : > { %p8550_p3 = pneg %p8549_p10  ;;  %p8556_p12 = por %p8555_p1, %p8554_p0 }
  0x3a   : > { %p8557_p13 = pnand %p8556_p12, %p8550_p3 }
  0x3c   : > { %8560 = shalt.err (!%p8557_p13)
}
  0x3d   : > { %s14140_s23 = smov 64   ;;  %s14142_s28 = smov 4  }
  0x3e   : > { %7359 = dma.hbm_to_vmem [thread:$0]  (!%p9005_p7), %s9000_s19, 256, %s9009_s11, %s9013_s8, %s14140_s23, %s14140_s23, %s14142_s28  }
  0x3f   : > { %p6368_p0 = scmp.ge.s32.totalorder %s8845_s7, 1  ;;  %p359_p1 = scmp.lt.s32.totalorder %s8845_s7, 5 }
  0x40   : > { %s14761_s3 = sld [smem:[#allocation224_spill]]  ;;  %s306_s6 = scalar_lea.vmem [#allocation8], %s8991_s15 }
  0x41   : > { %p9048_p3 = pnand %p6368_p0, %p359_p1  ;;  %s313_s1 = sshll.u32 %s306_s6, 4  ;;  %s9059_s1 = int_to_ptr.vmem [resolvable:$true] %s313_s1 }
  0x42   : > { %s14762_s19 = sand.u32 1, %s8845_s7  }
  0x43   : > { %s14759_s12 = scalar_select %p9048_p3, 1, 0 }
  0x44   : > { %s9063_s11 = scalar_lea.sflag [#allocation9], %s14762_s19 }
  0x45   : > { %14760 = sst [smem:[#allocation28_spill]] %s14759_s12 }
  0x46   : > { %s9056_s20 = scalar_lea.hbm %s14761_s3, %s8994_s16  ;;  %s8566_s14 = scalar_lea.hbm %s14761_s3, 512 }
  0x47   : > { %s8561_s23 = scalar_lea.hbm %s9056_s20, 256  ;;  %p8567_p4 = scmp.lt.u32.totalorder %s9056_s20, %s14761_s3 }
  0x48   : > { %p8562_p5 = scmp.ne.s32.totalorder %s9056_s20, %s8561_s23  ;;  %p8568_p6 = scmp.lt.u32.totalorder %s8566_s14, %s8561_s23 }
  0x49   : > { %p8570_p10 = scmp.lt.u32.totalorder %s8561_s23, %s9056_s20 }
  0x4a   : > { %p8564_p11 = pnand %p8562_p5, %p9019_p9  ;;  %p8569_p8 = por %p8568_p6, %p8567_p4 }
  0x4c   : > { %p8565_p2 = pneg %p8564_p11  ;;  %p8571_p12 = por %p8570_p10, %p8569_p8 }
  0x4e   : > { %p8572_p13 = pnand %p8571_p12, %p8565_p2 }
  0x50   : > { %8575 = shalt.err (!%p8572_p13)
}
  0x51   : > { %s8576_s6 = scalar_lea.vmem %s9059_s1, 256  ;;  %s8850_s28 = smov [#allocation8]  }
  0x52   : > { %p8577_p0 = scmp.ne.s32.totalorder %s9059_s1, %s8576_s6  ;;  %s8581_s19 = sshll.u32 %s8850_s28, 4  ;;  %s8582_s19 = int_to_ptr.vmem [resolvable:$false] %s8581_s19 }
  0x53   : > { %s8583_s27 = scalar_lea.vmem %s8582_s19, 512  ;;  %p8584_p11 = scmp.lt.s32.totalorder %s9059_s1, %s8582_s19 }
  0x54   : > { %p8579_p1 = pnand %p8577_p0, %p9019_p9  ;;  %p8585_p3 = scmp.lt.s32.totalorder %s8583_s27, %s8576_s6 }
  0x56   : > { %p8580_p5 = pneg %p8579_p1  ;;  %p8586_p4 = por %p8585_p3, %p8584_p11 }
  0x58   : > { %p8587_p6 = pnand %p8586_p4, %p8580_p5 }
  0x5a   : > { %8590 = shalt.err (!%p8587_p6)
}
  0x5b   : > { %s14763_s23 = smov 4   ;;  %s14764_s12 = smov 64  }
  0x5c   : > { %7365 = dma.hbm_to_vmem [thread:$0]  (!%p9005_p7), %s9056_s20, 256, %s9059_s1, %s9063_s11, %s14764_s12, %s14764_s12, %s14763_s23  }
  0x5d   : > { %s9091_s17 = sadd.s32 4294967295, %s8845_s7   ;;  %s6351_s14 = sadd.s32 4294967294, %s8845_s7  }
  0x5e   : > { %14765 = sst [smem:[#allocation29_spill]] %s9091_s17  ;;  %s43_s6 = sadd.s32 1, %s8841_s30 }
  0x5f   : > { %s50_s28 = sadd.s32 1, %s8825_s26  ;;  %p14766_p3 = scmp.ne.s32.totalorder %s14753_s9, 0 }
  0x60   : > { %p57_p2 = scmp.ne.s32.totalorder %s8825_s26, %s8821_s25  ;;  %p63_p8 = scmp.ne.s32.totalorder %s8821_s25, %s8817_s24 }
  0x61   : > { %s15929_s6 = smov (!%p14766_p3, %s43_s6), %s8841_s30  ;;  %p64_p12 = scmp.eq.s32.totalorder %s9091_s17, 0 }
  0x62   : > { %p45_p10 = scmp.ge.s32.totalorder %s15929_s6, 2  ;;  %p14767_p13 = scmp.eq.s32.totalorder %s8845_s7, 0 }
  0x63   : > { %p217_p1 = scmp.eq.s32.totalorder %s9091_s17, 3  ;;  %p9116_p5 = por %p64_p12, %p63_p8 }
  0x64   : > { %p9106_p0 = por %p14767_p13, %p57_p2  ;;  %s15931_s6 = smov (%p45_p10, %s15929_s6), 0 }
  0x65   : > { %14769 = sst [smem:[#allocation30_spill]] %s15931_s6  ;;  %p14772_p11 = scmp.ne.s32.totalorder %s8809_s22, %s8805_s21 }
  0x66   : > { %s14770_s9 = scalar_select %p9116_p5, 1, 0 }
  0x67   : > { %p9123_p4 = por %p14772_p11, %p64_p12  ;;  %s47_s19 = ssub.s32 %s8841_s30, %s15931_s6 }
  0x68   : > { %14771 = sst [smem:[#allocation31_spill]] %s14770_s9  ;;  %p9129_p6 = por %p217_p1, %p57_p2 }
  0x69   : > { %s14773_s20 = scalar_select %p9123_p4, 1, 0 }
  0x6a   : > { %s14774_s27 = scalar_select %p9129_p6, 1, 0 }
  0x6b   : > { %p48_p3 = scmp.eq.s32.totalorder %s47_s19, 0  ;;  %p223_p13 = scmp.eq.s32.totalorder %s6351_s14, 3 }
  0x6c   : > { %s243_s3 = sand.u32 1, %s8825_s26   ;;  %s6500_s17 = sshll.u32 %s8841_s30, 12 }
  0x6d   : > { %s9136_s12 = scalar_select %p48_p3, %s8825_s26, %s50_s28  }
  0x6e   : > { %p9141_p10 = por %p223_p13, %p63_p8  ;;  %s6354_s21 = sshll.u32 %s243_s3, 8 }
  0x6f   : > { %14775 = sst [smem:[#allocation32_spill]] %s9136_s12  ;;  %s14778_s0 = sld [smem:[#allocation222_spill]] }
  0x70   : > { %s14776_s23 = scalar_select %p9141_p10, 1, 0 }
  0x71   : > { %p14779_p2 = scmp.lt.s32.totalorder %s8845_s7, 4  ;;  %s247_s28 = scalar_lea.vmem [#allocation2], %s6354_s21 }
  0x72   : > { %14777 = sst [smem:[#allocation33_spill]] %s14776_s23  ;;  %s254_s19 = sshll.u32 %s247_s28, 4  ;;  %s9158_s19 = int_to_ptr.vmem [resolvable:$true] %s254_s19 }
  0x73   : > { %p9154_p12 = pnand %p14779_p2, %p9106_p0  ;;  %s9160_s30 = scalar_lea.sflag [#allocation3], %s243_s3 }
  0x75   : > { %s9148_s6 = scalar_lea.hbm %s14778_s0, %s6500_s17  ;;  %p8593_p1 = pneg %p9154_p12 }
  0x76   : > { %s8591_s22 = scalar_lea.hbm %s9148_s6, 4096  ;;  %s8596_s9 = scalar_lea.hbm %s14778_s0, 8192 }
  0x77   : > { %p8592_p8 = scmp.ne.s32.totalorder %s9148_s6, %s8591_s22  ;;  %p8597_p0 = scmp.lt.u32.totalorder %s9148_s6, %s14778_s0 }
  0x78   : > { %p8598_p13 = scmp.lt.u32.totalorder %s8596_s9, %s8591_s22  ;;  %p8600_p10 = scmp.lt.u32.totalorder %s8591_s22, %s9148_s6 }
  0x79   : > { %p8594_p11 = pnand %p8593_p1, %p8592_p8 }
  0x7a   : > { %p8599_p2 = por %p8598_p13, %p8597_p0 }
  0x7b   : > { %p8595_p3 = pneg %p8594_p11 }
  0x7c   : > { %p8601_p6 = por %p8600_p10, %p8599_p2 }
  0x7e   : > { %p8602_p4 = pnand %p8601_p6, %p8595_p3 }
  0x80   : > { %8605 = shalt.err (!%p8602_p4)
}
  0x81   : > { %s8606_s3 = scalar_lea.vmem %s9158_s19, 4096  ;;  %s8851_s21 = smov [#allocation2]  }
  0x82   : > { %p8607_p8 = scmp.ne.s32.totalorder %s9158_s19, %s8606_s3  ;;  %s8611_s28 = sshll.u32 %s8851_s21, 4  ;;  %s8612_s28 = int_to_ptr.vmem [resolvable:$false] %s8611_s28 }
  0x83   : > { %s8613_s26 = scalar_lea.vmem %s8612_s28, 8192  ;;  %p8614_p7 = scmp.lt.s32.totalorder %s9158_s19, %s8612_s28 }
  0x84   : > { %p8609_p11 = pnand %p8607_p8, %p8593_p1  ;;  %p8615_p0 = scmp.lt.s32.totalorder %s8613_s26, %s8606_s3 }
  0x86   : > { %p8610_p5 = pneg %p8609_p11  ;;  %p8616_p13 = por %p8615_p0, %p8614_p7 }
  0x88   : > { %p8617_p10 = pnand %p8616_p13, %p8610_p5 }
  0x8a   : > { %8620 = shalt.err (!%p8617_p10)
}
  0x8b   : > { %s8852_s12 = smov 128   ;;  %s8853_s22 = smov 8  }
  0x8c   : > { %7356 = dma.hbm_to_vmem [thread:$0]  (!%p9154_p12), %s9148_s6, 4096, %s9158_s19, %s9160_s30, %s8852_s12, %s8852_s12, %s8853_s22  }
  0x8d   : > { %s6360_s17 = sshll.u32 %s8837_s29, 4  ;;  %s288_s1 = scalar_lea.vmem [#allocation7], %s8985_s13 }
  0x8e   : > { %s295_s9 = sshll.u32 %s288_s1, 4  ;;  %s293_s28 = scalar_lea.hbm %s14128_s2, %s6360_s17  ;;  %s296_s9 = int_to_ptr.vmem [resolvable:$true] %s295_s9 }
  0x8f   : > { %s8621_s26 = scalar_lea.hbm %s293_s28, 16  ;;  %s8626_s24 = scalar_lea.hbm %s14128_s2, 32 }
  0x90   : > { %p8622_p7 = scmp.ne.s32.totalorder %s293_s28, %s8621_s26  ;;  %p8627_p6 = scmp.lt.u32.totalorder %s293_s28, %s14128_s2 }
  0x91   : > { %p8628_p12 = scmp.lt.u32.totalorder %s8626_s24, %s8621_s26  ;;  %p8630_p3 = scmp.lt.u32.totalorder %s8621_s26, %s293_s28 }
  0x92   : > { %p8624_p5 = pnand %p8622_p7, %p9019_p9 }
  0x93   : > { %p8629_p1 = por %p8628_p12, %p8627_p6 }
  0x94   : > { %p8625_p4 = pneg %p8624_p5 }
  0x95   : > { %p8631_p2 = por %p8630_p3, %p8629_p1 }
  0x97   : > { %p8632_p8 = pnand %p8631_p2, %p8625_p4 }
  0x99   : > { %8635 = shalt.err (!%p8632_p8)
}
  0x9a   : > { %s8636_s6 = scalar_lea.vmem %s296_s9, 16  ;;  %s8854_s19 = smov [#allocation7]  }
  0x9b   : > { %p8637_p11 = scmp.ne.s32.totalorder %s296_s9, %s8636_s6  ;;  %s8641_s12 = sshll.u32 %s8854_s19, 4  ;;  %s8642_s12 = int_to_ptr.vmem [resolvable:$false] %s8641_s12 }
  0x9c   : > { %s8643_s0 = scalar_lea.vmem %s8642_s12, 32  ;;  %p8644_p10 = scmp.lt.s32.totalorder %s296_s9, %s8642_s12 }
  0x9d   : > { %p8639_p0 = pnand %p8637_p11, %p9019_p9  ;;  %p8645_p7 = scmp.lt.s32.totalorder %s8643_s0, %s8636_s6 }
  0x9f   : > { %p8640_p13 = pneg %p8639_p0  ;;  %p8646_p5 = por %p8645_p7, %p8644_p10 }
  0xa1   : > { %p8647_p6 = pnand %p8646_p5, %p8640_p13 }
  0xa3   : > { %8650 = shalt.err (!%p8647_p6)
}
  0xa4   : > { %p14781_p12 = scmp.ne.s32.totalorder %s14757_s10, 0  ;;  %s9213_s22 = scalar_lea.hbm %s14130_s4, %s6360_s17 }
  0xa5   : > { %s326_s1 = scalar_lea.vmem [#allocation10], %s8985_s13  ;;  %s8651_s21 = scalar_lea.hbm %s9213_s22, 16 }
  0xa6   : > { %7362 = dma.hbm_to_vmem [thread:$0]  (!%p14781_p12), %s293_s28, 16, %s296_s9, %s9013_s8  }
  0xa7   : > { %s333_s3 = sshll.u32 %s326_s1, 4  ;;  %p8652_p4 = scmp.ne.s32.totalorder %s9213_s22, %s8651_s21  ;;  %s334_s3 = int_to_ptr.vmem [resolvable:$true] %s333_s3 }
  0xa8   : > { %s8656_s9 = scalar_lea.hbm %s14130_s4, 32  ;;  %p8657_p2 = scmp.lt.u32.totalorder %s9213_s22, %s14130_s4 }
  0xa9   : > { %p8654_p1 = pnand %p8652_p4, %p9019_p9  ;;  %p8658_p8 = scmp.lt.u32.totalorder %s8656_s9, %s8651_s21 }
  0xaa   : > { %p8660_p0 = scmp.lt.u32.totalorder %s8651_s21, %s9213_s22 }
  0xab   : > { %p8655_p3 = pneg %p8654_p1  ;;  %p8659_p11 = por %p8658_p8, %p8657_p2 }
  0xad   : > { %p8661_p13 = por %p8660_p0, %p8659_p11 }
  0xaf   : > { %p8662_p10 = pnand %p8661_p13, %p8655_p3 }
  0xb1   : > { %8665 = shalt.err (!%p8662_p10)
}
  0xb2   : > { %s8666_s17 = scalar_lea.vmem %s334_s3, 16  ;;  %s8855_s30 = smov [#allocation10]  }
  0xb3   : > { %p8667_p7 = scmp.ne.s32.totalorder %s334_s3, %s8666_s17  ;;  %s8671_s6 = sshll.u32 %s8855_s30, 4  ;;  %s8672_s6 = int_to_ptr.vmem [resolvable:$false] %s8671_s6 }
  0xb4   : > { %s8673_s19 = scalar_lea.vmem %s8672_s6, 32  ;;  %p8674_p4 = scmp.lt.s32.totalorder %s334_s3, %s8672_s6 }
  0xb5   : > { %p8669_p5 = pnand %p8667_p7, %p9019_p9  ;;  %p8675_p1 = scmp.lt.s32.totalorder %s8673_s19, %s8666_s17 }
  0xb7   : > { %p8670_p6 = pneg %p8669_p5  ;;  %p8676_p12 = por %p8675_p1, %p8674_p4 }
  0xb9   : > { %p8677_p2 = pnand %p8676_p12, %p8670_p6 }
  0xbb   : > { %8680 = shalt.err (!%p8677_p2)
}
  0xbc   : > { %p14782_p8 = scmp.ne.s32.totalorder %s14757_s10, 0  ;;  %s9238_s24 = scalar_lea.hbm %s14131_s5, %s8994_s16 }
  0xbd   : > { %s344_s23 = scalar_lea.vmem [#allocation11], %s8991_s15  ;;  %s341_s21 = scalar_lea.sflag [#allocation12], %s8985_s13 }
  0xbe   : > { %7368 = dma.hbm_to_vmem [thread:$0]  (!%p14782_p8), %s9213_s22, 16, %s334_s3, %s9063_s11  }
  0xbf   : > { %s351_s1 = sshll.u32 %s344_s23, 4  ;;  %s8681_s26 = scalar_lea.hbm %s9238_s24, 256  ;;  %s9241_s1 = int_to_ptr.vmem [resolvable:$true] %s351_s1 }
  0xc0   : > { %p8682_p12 = scmp.ne.s32.totalorder %s9238_s24, %s8681_s26  ;;  %s8686_s3 = scalar_lea.hbm %s14131_s5, 512 }
  0xc1   : > { %p8687_p0 = scmp.lt.u32.totalorder %s9238_s24, %s14131_s5  ;;  %p8688_p13 = scmp.lt.u32.totalorder %s8686_s3, %s8681_s26 }
  0xc2   : > { %p8684_p3 = pnand %p8682_p12, %p9019_p9  ;;  %p8690_p7 = scmp.lt.u32.totalorder %s8681_s26, %s9238_s24 }
  0xc3   : > { %p8689_p10 = por %p8688_p13, %p8687_p0 }
  0xc4   : > { %p8685_p11 = pneg %p8684_p3 }
  0xc5   : > { %p8691_p5 = por %p8690_p7, %p8689_p10 }
  0xc7   : > { %p8692_p6 = pnand %p8691_p5, %p8685_p11 }
  0xc9   : > { %8695 = shalt.err (!%p8692_p6)
}
  0xca   : > { %s8696_s15 = scalar_lea.vmem %s9241_s1, 256  ;;  %s8856_s9 = smov [#allocation11]  }
  0xcb   : > { %p8697_p4 = scmp.ne.s32.totalorder %s9241_s1, %s8696_s15  ;;  %s8701_s28 = sshll.u32 %s8856_s9, 4  ;;  %s8702_s28 = int_to_ptr.vmem [resolvable:$false] %s8701_s28 }
  0xcc   : > { %s8703_s14 = scalar_lea.vmem %s8702_s28, 512  ;;  %p8704_p12 = scmp.lt.s32.totalorder %s9241_s1, %s8702_s28 }
  0xcd   : > { %p8699_p1 = pnand %p8697_p4, %p9019_p9  ;;  %p8705_p3 = scmp.lt.s32.totalorder %s8703_s14, %s8696_s15 }
  0xcf   : > { %p8700_p2 = pneg %p8699_p1  ;;  %p8706_p0 = por %p8705_p3, %p8704_p12 }
  0xd1   : > { %p8707_p13 = pnand %p8706_p0, %p8700_p2 }
  0xd3   : > { %8710 = shalt.err (!%p8707_p13)
}
  0xd4   : > { %s14783_s17 = smov 4   ;;  %s14784_s30 = smov 64  }
  0xd5   : > { %7371 = dma.hbm_to_vmem [thread:$0]  (!%p14782_p8), %s9238_s24, 256, %s9241_s1, %s341_s21, %s14784_s30, %s14784_s30, %s14783_s17  }
  0xd6   : > { %s14785_s18 = sld [smem:[#allocation28_spill]] }
  0xdc   : > { %p14786_p9 = scmp.ne.s32.totalorder %s14785_s18, 0 }
  0xde   : > { %363 = sbr.rel (%p14786_p9) target bundleno = 3957 (0xf75), region = 44 }
  0xe5   : > { %s14787_s6 = sld [smem:[#allocation31_spill]]  ;;  %s9273_s19 = sand.u32 1, %s8821_s25  }
  0xe6   : > { %s6369_s12 = sshll.u32 %s9273_s19, 8  ;;  %s366_s0 = scalar_lea.sflag [#allocation3], %s9273_s19 }
  0xe7   : > { %s9277_s10 = scalar_lea.vmem [#allocation2], %s6369_s12 }
  0xeb   : > { %p14788_p11 = scmp.ne.s32.totalorder %s14787_s6, 0 }
  0xed   : > { %8784 = dma.done.wait (%p14788_p11), %s366_s0, 4096  }
  0xee   : > { %8786 = vsyncadd (%p14788_p11), %s366_s0, 4294963200  ;;  %s14789_s13 = sld [smem:[#allocation29_spill]]  ;;  %s14790_s24 = sld [smem:[#allocation19_spill]] }
  0xef   : > { %p14791_p8 = scmp.ne.s32.totalorder %s14773_s20, 0 }
  0xf4   : > { %s374_s23 = sand.u32 1, %s14789_s13   ;;  %s9285_s1 = sand.u32 1, %s14790_s24  }
  0xf5   : > { %s9288_s21 = sshll.u32 %s9285_s1, 4  ;;  %s375_s26 = scalar_lea.sflag [#allocation6], %s374_s23 }
  0xf6   : > { %s378_s11 = scalar_lea.vmem [#allocation5], %s9288_s21 }
  0xf7   : > { %8788 = dma.done.wait (%p14791_p8), %s375_s26, 272  }
  0xf8   : > { %8790 = vsyncadd (%p14791_p8), %s375_s26, 4294967024  ;;  %s386_s22 = scalar_lea.vmem [#allocation7], %s9285_s1  ;;  %s392_s3 = scalar_lea.sflag [#allocation9], %s374_s23 }
  0xf9   : > { %s395_s16 = scalar_lea.vmem [#allocation8], %s9288_s21 }
  0xfa   : > { %8792 = dma.done.wait (%p14791_p8), %s392_s3, 272  }
  0xfb   : > { %8794 = vsyncadd (%p14791_p8), %s392_s3, 4294967024  ;;  %s403_s8 = scalar_lea.vmem [#allocation10], %s9285_s1  ;;  %s409_s15 = scalar_lea.sflag [#allocation12], %s9285_s1 }
  0xfc   : > { %s412_s9 = scalar_lea.vmem [#allocation11], %s9288_s21 }
  0xfd   : > { %8796 = dma.done.wait (%p14791_p8), %s409_s15, 256  }
  0xfe   : > { %8798 = vsyncadd (%p14791_p8), %s409_s15, 4294967040  ;;  %s9308_s28 = scalar_lea.vmem [#allocation13], %s6369_s12  ;;  %s14792_s14 = sld [smem:[#allocation23_spill]] }
 0x104   : > { %p6374_p10 = scmp.ne.s32.totalorder %s14792_s14, 0 }
 0x105   : > { %v471_v0 = vld [vmem:[%s9277_s10] sm:$0xff] (!%p6374_p10)  ;;  %vm503_vm0 = vcmask (!%p6374_p10), 261120   ;;  %v472_v1 = vld [vmem:[%s9277_s10 + $0x8] sm:$0xff] (!%p6374_p10)  ;;  %v473_v2 = vld [vmem:[%s9277_s10 + $0x10] sm:$0xff] (!%p6374_p10) }
 0x106   : > { %470 = sbr.rel (%p6374_p10) target bundleno = 278 (0x116), region = 72  ;;  %504 = vst.msk [vmem:[%s9308_s28] sm:$0xff] (!%p6374_p10), %vm503_vm0, %v471_v0  ;;  %505 = vst.msk [vmem:[%s9308_s28 + $0x8] sm:$0xff] (!%p6374_p10), %vm503_vm0, %v472_v1  ;;  %v474_v3 = vld [vmem:[%s9277_s10 + $0x18] sm:$0xff] (!%p6374_p10)  ;;  %v475_v4 = vld [vmem:[%s9277_s10 + $0x20] sm:$0xff] (!%p6374_p10) }
 0x107   : > { %506 = vst.msk [vmem:[%s9308_s28 + $0x10] sm:$0xff] (!%p6374_p10), %vm503_vm0, %v473_v2  ;;  %v476_v5 = vld [vmem:[%s9277_s10 + $0x28] sm:$0xff] (!%p6374_p10)  ;;  %507 = vst.msk [vmem:[%s9308_s28 + $0x18] sm:$0xff] (!%p6374_p10), %vm503_vm0, %v474_v3  ;;  %v477_v6 = vld [vmem:[%s9277_s10 + $0x30] sm:$0xff] (!%p6374_p10) }
 0x108   : > { %508 = vst.msk [vmem:[%s9308_s28 + $0x20] sm:$0xff] (!%p6374_p10), %vm503_vm0, %v475_v4  ;;  %509 = vst.msk [vmem:[%s9308_s28 + $0x28] sm:$0xff] (!%p6374_p10), %vm503_vm0, %v476_v5  ;;  %v478_v7 = vld [vmem:[%s9277_s10 + $0x38] sm:$0xff] (!%p6374_p10)  ;;  %v479_v8 = vld [vmem:[%s9277_s10 + $0x40] sm:$0xff] (!%p6374_p10) }
 0x109   : > { %510 = vst.msk [vmem:[%s9308_s28 + $0x30] sm:$0xff] (!%p6374_p10), %vm503_vm0, %v477_v6  ;;  %511 = vst.msk [vmem:[%s9308_s28 + $0x38] sm:$0xff] (!%p6374_p10), %vm503_vm0, %v478_v7  ;;  %v480_v9 = vld [vmem:[%s9277_s10 + $0x48] sm:$0xff] (!%p6374_p10)  ;;  %v481_v10 = vld [vmem:[%s9277_s10 + $0x50] sm:$0xff] (!%p6374_p10) }
 0x10a   : > { %512 = vst.msk [vmem:[%s9308_s28 + $0x40] sm:$0xff] (!%p6374_p10), %vm503_vm0, %v479_v8  ;;  %v482_v11 = vld [vmem:[%s9277_s10 + $0x58] sm:$0xff] (!%p6374_p10)  ;;  %513 = vst.msk [vmem:[%s9308_s28 + $0x48] sm:$0xff] (!%p6374_p10), %vm503_vm0, %v480_v9  ;;  %v483_v12 = vld [vmem:[%s9277_s10 + $0x60] sm:$0xff] (!%p6374_p10) }
 0x10b   : > { %514 = vst.msk [vmem:[%s9308_s28 + $0x50] sm:$0xff] (!%p6374_p10), %vm503_vm0, %v481_v10  ;;  %515 = vst.msk [vmem:[%s9308_s28 + $0x58] sm:$0xff] (!%p6374_p10), %vm503_vm0, %v482_v11  ;;  %v484_v13 = vld [vmem:[%s9277_s10 + $0x68] sm:$0xff] (!%p6374_p10)  ;;  %v485_v14 = vld [vmem:[%s9277_s10 + $0x70] sm:$0xff] (!%p6374_p10) }
 0x10c   : > { %516 = vst.msk [vmem:[%s9308_s28 + $0x60] sm:$0xff] (!%p6374_p10), %vm503_vm0, %v483_v12  ;;  %517 = vst.msk [vmem:[%s9308_s28 + $0x68] sm:$0xff] (!%p6374_p10), %vm503_vm0, %v484_v13  ;;  %v486_v15 = vld [vmem:[%s9277_s10 + $0x78] sm:$0xff] (!%p6374_p10)  ;;  %v487_v16 = vld [vmem:[%s9277_s10 + $0x80] sm:$0xff] (!%p6374_p10) }
 0x10d   : > { %518 = vst.msk [vmem:[%s9308_s28 + $0x70] sm:$0xff] %vm503_vm0, %v485_v14  ;;  %v488_v17 = vld [vmem:[%s9277_s10 + $0x88] sm:$0xff]  ;;  %519 = vst.msk [vmem:[%s9308_s28 + $0x78] sm:$0xff] %vm503_vm0, %v486_v15  ;;  %v489_v18 = vld [vmem:[%s9277_s10 + $0x90] sm:$0xff] }
 0x10e   : > { %520 = vst.msk [vmem:[%s9308_s28 + $0x80] sm:$0xff] %vm503_vm0, %v487_v16  ;;  %521 = vst.msk [vmem:[%s9308_s28 + $0x88] sm:$0xff] %vm503_vm0, %v488_v17  ;;  %v490_v19 = vld [vmem:[%s9277_s10 + $0x98] sm:$0xff]  ;;  %v491_v20 = vld [vmem:[%s9277_s10 + $0xa0] sm:$0xff] }
 0x10f   : > { %522 = vst.msk [vmem:[%s9308_s28 + $0x90] sm:$0xff] %vm503_vm0, %v489_v18  ;;  %523 = vst.msk [vmem:[%s9308_s28 + $0x98] sm:$0xff] %vm503_vm0, %v490_v19  ;;  %v492_v21 = vld [vmem:[%s9277_s10 + $0xa8] sm:$0xff]  ;;  %v493_v22 = vld [vmem:[%s9277_s10 + $0xb0] sm:$0xff] }
 0x110   : > { %524 = vst.msk [vmem:[%s9308_s28 + $0xa0] sm:$0xff] %vm503_vm0, %v491_v20  ;;  %v494_v23 = vld [vmem:[%s9277_s10 + $0xb8] sm:$0xff]  ;;  %525 = vst.msk [vmem:[%s9308_s28 + $0xa8] sm:$0xff] %vm503_vm0, %v492_v21  ;;  %v495_v24 = vld [vmem:[%s9277_s10 + $0xc0] sm:$0xff] }
 0x111   : > { %526 = vst.msk [vmem:[%s9308_s28 + $0xb0] sm:$0xff] %vm503_vm0, %v493_v22  ;;  %527 = vst.msk [vmem:[%s9308_s28 + $0xb8] sm:$0xff] %vm503_vm0, %v494_v23  ;;  %v496_v25 = vld [vmem:[%s9277_s10 + $0xc8] sm:$0xff]  ;;  %v497_v26 = vld [vmem:[%s9277_s10 + $0xd0] sm:$0xff] }
 0x112   : > { %528 = vst.msk [vmem:[%s9308_s28 + $0xc0] sm:$0xff] %vm503_vm0, %v495_v24  ;;  %529 = vst.msk [vmem:[%s9308_s28 + $0xc8] sm:$0xff] %vm503_vm0, %v496_v25  ;;  %v498_v27 = vld [vmem:[%s9277_s10 + $0xd8] sm:$0xff]  ;;  %v499_v28 = vld [vmem:[%s9277_s10 + $0xe0] sm:$0xff] }
 0x113   : > { %530 = vst.msk [vmem:[%s9308_s28 + $0xd0] sm:$0xff] %vm503_vm0, %v497_v26  ;;  %v500_v29 = vld [vmem:[%s9277_s10 + $0xe8] sm:$0xff]  ;;  %531 = vst.msk [vmem:[%s9308_s28 + $0xd8] sm:$0xff] %vm503_vm0, %v498_v27  ;;  %v501_v30 = vld [vmem:[%s9277_s10 + $0xf0] sm:$0xff] }
 0x114   : > { %532 = vst.msk [vmem:[%s9308_s28 + $0xe0] sm:$0xff] %vm503_vm0, %v499_v28  ;;  %533 = vst.msk [vmem:[%s9308_s28 + $0xe8] sm:$0xff] %vm503_vm0, %v500_v29  ;;  %v502_v31 = vld [vmem:[%s9277_s10 + $0xf8] sm:$0xff] }
 0x115   : > { %534 = vst.msk [vmem:[%s9308_s28 + $0xf0] sm:$0xff] %vm503_vm0, %v501_v30  ;;  %535 = vst.msk [vmem:[%s9308_s28 + $0xf8] sm:$0xff] %vm503_vm0, %v502_v31 }
 0x116 PF: > { %v7725_v32 = vld [vmem:[%s378_s11] sm:$0xff]   ;;  %v7726_v33 = vld [vmem:[%s378_s11 + $0x8] sm:$0xff]   ;;  %vm607_vm1 = vcmask 261120   ;;  %vm881_vm2 = vcmask 64512   ;;  %s8857_s20 = smov 88   ;;  %s8858_s17 = smov 96  }
 0x117   : > { %7199 = vmatprep.subr.bf16.mxu0 %v7725_v32  ;;  %v536_v34 = vld [vmem:[%s9308_s28] sm:$0xff]  ;;  %v537_v35 = vld [vmem:[%s9308_s28 + $0x8] sm:$0xff]  ;;  %v538_v37 = vld [vmem:[%s9308_s28 + $0x10] sm:$0xff]  ;;  %s8859_s30 = smov 80   ;;  %s8860_s18 = smov 120   ;;  %vm5530_vm3 = vcmask 130048  }
 0x118   : > { %7200 = vmatpush3.bf16.msra.mxu0 %v7725_v32  ;;  %v568_v36 = vpack.c.bf16 %v537_v35, %v536_v34  ;;  %v539_v38 = vld [vmem:[%s9308_s28 + $0x18] sm:$0xff]  ;;  %v540_v39 = vld [vmem:[%s9308_s28 + $0x20] sm:$0xff]  ;;  %v541_v40 = vld [vmem:[%s9308_s28 + $0x28] sm:$0xff]  ;;  %s8861_s6 = smov 112   ;;  %s8862_s12 = smov 72   ;;  %vm5563_vm4 = vcmask 195584  }
 0x119   : > { %7201 = vmatprep.subr.bf16.mxu0 %v7726_v33  ;;  %v569_v41 = vpack.c.bf16 %v539_v38, %v538_v37  ;;  %v570_v42 = vpack.c.bf16 %v541_v40, %v540_v39  ;;  %v542_v43 = vld [vmem:[%s9308_s28 + $0x30] sm:$0xff]  ;;  %v543_v44 = vld [vmem:[%s9308_s28 + $0x38] sm:$0xff]  ;;  %v552_v57 = vld [vmem:[%s9308_s28 + $0x80] sm:$0xff]  ;;  %s8863_s0 = smov 64   ;;  %s8864_s10 = smov 104  }
 0x11a   : > { %7203 = vmatprep.mubr.msk.bf16.mxu0 %vm607_vm1, %v568_v36  ;;  %v544_v45 = vld [vmem:[%s9308_s28 + $0x40] sm:$0xff]  ;;  %v545_v46 = vld [vmem:[%s9308_s28 + $0x48] sm:$0xff]  ;;  %v571_v47 = vpack.c.bf16 %v543_v44, %v542_v43  ;;  %v554_v61 = vld [vmem:[%s9308_s28 + $0x90] sm:$0xff]  ;;  %s8865_s13 = smov 56   ;;  %s8866_s24 = smov 48  }
 0x11b   : > { %v572_v48 = vpack.c.bf16 %v545_v46, %v544_v45  ;;  %v546_v49 = vld [vmem:[%s9308_s28 + $0x50] sm:$0xff]  ;;  %v547_v50 = vld [vmem:[%s9308_s28 + $0x58] sm:$0xff]  ;;  %v553_v58 = vld [vmem:[%s9308_s28 + $0x88] sm:$0xff]  ;;  %s8867_s23 = smov 40   ;;  %s8868_s26 = smov 8  }
 0x11c   : > { %7202 = vmatpush3.bf16.msra.mxu0 %v7726_v33  ;;  %v548_v51 = vld [vmem:[%s9308_s28 + $0x60] sm:$0xff]  ;;  %v549_v52 = vld [vmem:[%s9308_s28 + $0x68] sm:$0xff]  ;;  %v573_v53 = vpack.c.bf16 %v547_v50, %v546_v49  ;;  %v576_v60 = vpack.c.bf16 %v553_v58, %v552_v57  ;;  %v555_v62 = vld [vmem:[%s9308_s28 + $0x98] sm:$0xff]  ;;  %s8869_s11 = smov 16   ;;  %s15908_s1 = sld [smem:[#allocation24_spill]] }
 0x11d   : > { %v574_v54 = vpack.c.bf16 %v549_v52, %v548_v51  ;;  %v550_v55 = vld [vmem:[%s9308_s28 + $0x70] sm:$0xff]  ;;  %v551_v56 = vld [vmem:[%s9308_s28 + $0x78] sm:$0xff]  ;;  %v556_v63 = vld [vmem:[%s9308_s28 + $0xa0] sm:$0xff]  ;;  %v577_v1 = vpack.c.bf16 %v555_v62, %v554_v61  ;;  %s6163_s3 = sshll.u32 %s9308_s28, 4  ;;  %s15909_s15 = sld [smem:[#allocation225_spill]]  ;;  %s14058_s3 = int_to_ptr.vmem [resolvable:$true] %s6163_s3 }
 0x11e   : > { %v575_v59 = vpack.c.bf16 %v551_v56, %v550_v55  ;;  %v557_v0 = vld [vmem:[%s9308_s28 + $0xa8] sm:$0xff]  ;;  %v558_v3 = vld [vmem:[%s9308_s28 + $0xb0] sm:$0xff]  ;;  %v559_v4 = vld [vmem:[%s9308_s28 + $0xb8] sm:$0xff]  ;;  %s6150_s14 = scalar_lea.sflag [#allocation4], %s9273_s19  ;;  %p15910_p5 = scmp.ne.s32.totalorder %s14774_s27, 0 }
 0x11f   : > { %7204 = vmatmul.mubr.msk.bf16.vlgmr.msra.gmra.mrb[0].mxu0 %vm607_vm1, %v569_v41  ;;  %v578_v2 = vpack.c.bf16 %v557_v0, %v556_v63  ;;  %v560_v5 = vld [vmem:[%s9308_s28 + $0xc0] sm:$0xff]  ;;  %v561_v6 = vld [vmem:[%s9308_s28 + $0xc8] sm:$0xff]  ;;  %v579_v7 = vpack.c.bf16 %v559_v4, %v558_v3  ;;  %v562_v9 = vld [vmem:[%s9308_s28 + $0xd0] sm:$0xff] }
 0x120   : > { %7207 = vmatprep.mubr.msk.bf16.mxu0 %vm607_vm1, %v570_v42  ;;  %v580_v8 = vpack.c.bf16 %v561_v6, %v560_v5  ;;  %v563_v10 = vld [vmem:[%s9308_s28 + $0xd8] sm:$0xff]  ;;  %v564_v11 = vld [vmem:[%s9308_s28 + $0xe0] sm:$0xff]  ;;  %v565_v12 = vld [vmem:[%s9308_s28 + $0xe8] sm:$0xff] }
 0x121   : > { %v581_v13 = vpack.c.bf16 %v563_v10, %v562_v9  ;;  %v582_v14 = vpack.c.bf16 %v565_v12, %v564_v11  ;;  %v566_v15 = vld [vmem:[%s9308_s28 + $0xf0] sm:$0xff]  ;;  %v567_v16 = vld [vmem:[%s9308_s28 + $0xf8] sm:$0xff] }
 0x122   : > { %v583_v17 = vpack.c.bf16 %v567_v16, %v566_v15  ;;  %v9461_v19 = vld [vmem:[%s386_s22] ss:$0 sm:$0xff]  ;;  %s8870_s22 = smov 24   ;;  %s6504_s21 = sshll.u32 %s15908_s1, 12 }
 0x127   : > { %7208 = vmatmul.mubr.msk.bf16.gmra.mrb[4].mxu0 %vm607_vm1, %v571_v47 }
 0x128   : > { %7211 = vmatprep.mubr.msk.bf16.mxu0 %vm607_vm1, %v572_v48 }
 0x12f   : > { %7212 = vmatmul.mubr.msk.bf16.gmra.mrb[8].mxu0 %vm607_vm1, %v573_v53 }
 0x130   : > { %7215 = vmatprep.mubr.msk.bf16.mxu0 %vm607_vm1, %v574_v54 }
 0x137   : > { %7216 = vmatmul.mubr.msk.bf16.gmra.mrb[12].mxu0 %vm607_vm1, %v575_v59 }
 0x138   : > { %7219 = vmatprep.mubr.msk.bf16.mxu0 %vm607_vm1, %v576_v60 }
 0x13f   : > { %7220 = vmatmul.mubr.msk.bf16.gmra.mrb[16].mxu0 %vm607_vm1, %v577_v1 }
 0x140   : > { %7223 = vmatprep.mubr.msk.bf16.mxu0 %vm607_vm1, %v578_v2 }
 0x147   : > { %7224 = vmatmul.mubr.msk.bf16.gmra.mrb[20].mxu0 %vm607_vm1, %v579_v7 }
 0x148   : > { %7227 = vmatprep.mubr.msk.bf16.mxu0 %vm607_vm1, %v580_v8 }
 0x14f   : > { %7228 = vmatmul.mubr.msk.bf16.gmra.mrb[24].mxu0 %vm607_vm1, %v581_v13 }
 0x150   : > { %7231 = vmatprep.mubr.msk.bf16.mxu0 %vm607_vm1, %v582_v14 }
 0x157   : > { %7232 = vmatmul.mubr.msk.bf16.gmra.mrb[28].mxu0 %vm607_vm1, %v583_v17 }
 0x1f2   : > { %v7205_v18 = vpop.f32.mrb[0].mxu0 }
 0x1f3   : > { %v690_v20 = vpop.f32.mrb[1].mxu0  ;;  %v699_v22 = vadd.f32 %v7205_v18, %v9461_v19 }
 0x1f4   : > { %v7206_v21 = vpop.f32.mrb[2].mxu0  ;;  %v691_v25 = vadd.f32 %v9461_v19, %v690_v20 }
 0x1f5   : > { %v702_v23 = vadd.f32 %v7206_v21, %v9461_v19  ;;  %v693_v24 = vpop.f32.mrb[3].mxu0 }
 0x1f6   : > { %v694_v26 = vadd.f32 %v9461_v19, %v693_v24 }
 0x1f7   : > { %v9467_v27 = vpack.c.bf16 %v702_v23, %v699_v22 }
 0x1f8   : > { %v9469_v28 = vpack.c.bf16 %v694_v26, %v691_v25 }
 0x1f9   : > { %14793 = vst [vmem:[#allocation34_spill] sm:$0xff] %v9467_v27  ;;  %1926 = vrot.lane.b32.xlu0 %v9467_v27, %s8857_s20  ;;  %851 = vrot.lane.b32.xlu1 %v9467_v27, %s8858_s17 }
 0x1fa   : > { %14794 = vst [vmem:[#allocation35_spill] sm:$0xff] %v9469_v28  ;;  %6539 = vmatprep.mubr.msk.bf16.mxu1 %vm881_vm2, %v9469_v28  ;;  %v7209_v29 = vpop.f32.mrb[4].mxu0 }
 0x1fb   : > { %v715_v30 = vadd.f32 %v7209_v29, %v9461_v19  ;;  %v706_v31 = vpop.f32.mrb[5].mxu0 }
 0x1fc   : > { %v707_v32 = vadd.f32 %v9461_v19, %v706_v31  ;;  %v7210_v33 = vpop.f32.mrb[6].mxu0 }
 0x1fd   : > { %3000 = vrot.lane.b32.xlu0 %v9467_v27, %s8859_s30  ;;  %1894 = vrot.lane.b32.xlu1 %v9467_v27, %s8860_s18  ;;  %v718_v34 = vadd.f32 %v7210_v33, %v9461_v19  ;;  %v709_v35 = vpop.f32.mrb[7].mxu0 }
 0x1fe   : > { %v710_v36 = vadd.f32 %v9461_v19, %v709_v35 }
 0x1ff   : > { %v9485_v37 = vpack.c.bf16 %v718_v34, %v715_v30 }
 0x200   : > { %v9487_v38 = vpack.c.bf16 %v710_v36, %v707_v32 }
 0x201   : > { %14795 = vst [vmem:[#allocation36_spill] sm:$0xff] %v9485_v37  ;;  %2968 = vrot.lane.b32.xlu1 %v9467_v27, %s8861_s6  ;;  %849 = vrot.lane.b32.xlu0 %v9469_v28, %s8858_s17 }
 0x202   : > { %14796 = vst [vmem:[#allocation37_spill] sm:$0xff] %v9487_v38  ;;  %v7213_v39 = vpop.f32.mrb[8].mxu0 }
 0x203   : > { %v731_v40 = vadd.f32 %v7213_v39, %v9461_v19  ;;  %v722_v41 = vpop.f32.mrb[9].mxu0 }
 0x204   : > { %v723_v42 = vadd.f32 %v9461_v19, %v722_v41  ;;  %v7214_v43 = vpop.f32.mrb[10].mxu0 }
 0x205   : > { %4074 = vrot.lane.b32.xlu1 %v9467_v27, %s8862_s12  ;;  %1924 = vrot.lane.b32.xlu0 %v9469_v28, %s8857_s20  ;;  %v734_v44 = vadd.f32 %v7214_v43, %v9461_v19  ;;  %v725_v45 = vpop.f32.mrb[11].mxu0 }
 0x206   : > { %v726_v46 = vadd.f32 %v9461_v19, %v725_v45 }
 0x207   : > { %v9501_v47 = vpack.c.bf16 %v734_v44, %v731_v40 }
 0x208   : > { %v9503_v48 = vpack.c.bf16 %v726_v46, %v723_v42 }
 0x209   : > { %14797 = vst [vmem:[#allocation38_spill] sm:$0xff] %v9501_v47  ;;  %2998 = vrot.lane.b32.xlu1 %v9469_v28, %s8859_s30  ;;  %1892 = vrot.lane.b32.xlu0 %v9469_v28, %s8860_s18 }
 0x20a   : > { %14798 = vst [vmem:[#allocation39_spill] sm:$0xff] %v9503_v48  ;;  %v7217_v49 = vpop.f32.mrb[12].mxu0 }
 0x20b   : > { %v747_v50 = vadd.f32 %v7217_v49, %v9461_v19  ;;  %v738_v51 = vpop.f32.mrb[13].mxu0 }
 0x20c   : > { %v739_v52 = vadd.f32 %v9461_v19, %v738_v51  ;;  %v7218_v53 = vpop.f32.mrb[14].mxu0 }
 0x20d   : > { %4072 = vrot.lane.b32.xlu1 %v9469_v28, %s8862_s12  ;;  %2966 = vrot.lane.b32.xlu0 %v9469_v28, %s8861_s6  ;;  %v750_v54 = vadd.f32 %v7218_v53, %v9461_v19  ;;  %v741_v55 = vpop.f32.mrb[15].mxu0 }
 0x20e   : > { %v742_v56 = vadd.f32 %v9461_v19, %v741_v55 }
 0x20f   : > { %v9517_v57 = vpack.c.bf16 %v750_v54, %v747_v50 }
 0x210   : > { %v9519_v58 = vpack.c.bf16 %v742_v56, %v739_v52 }
 0x211   : > { %14799 = vst [vmem:[#allocation40_spill] sm:$0xff] %v9517_v57  ;;  %1898 = vrot.lane.b32.xlu1 %v9485_v37, %s8860_s18  ;;  %855 = vrot.lane.b32.xlu0 %v9485_v37, %s8858_s17 }
 0x212   : > { %14800 = vst [vmem:[#allocation41_spill] sm:$0xff] %v9519_v58  ;;  %v7221_v59 = vpop.f32.mrb[16].mxu0 }
 0x213   : > { %v763_v60 = vadd.f32 %v7221_v59, %v9461_v19  ;;  %v754_v61 = vpop.f32.mrb[17].mxu0 }
 0x214   : > { %v755_v62 = vadd.f32 %v9461_v19, %v754_v61  ;;  %v7222_v63 = vpop.f32.mrb[18].mxu0 }
 0x215   : > { %4078 = vrot.lane.b32.xlu1 %v9485_v37, %s8862_s12  ;;  %1930 = vrot.lane.b32.xlu0 %v9485_v37, %s8857_s20  ;;  %v766_v0 = vadd.f32 %v7222_v63, %v9461_v19  ;;  %v757_v1 = vpop.f32.mrb[19].mxu0 }
 0x216   : > { %v758_v2 = vadd.f32 %v9461_v19, %v757_v1 }
 0x217   : > { %v9533_v3 = vpack.c.bf16 %v766_v0, %v763_v60 }
 0x218   : > { %v9535_v4 = vpack.c.bf16 %v758_v2, %v755_v62 }
 0x219   : > { %14801 = vst [vmem:[#allocation42_spill] sm:$0xff] %v9533_v3  ;;  %3002 = vrot.lane.b32.xlu1 %v9487_v38, %s8859_s30  ;;  %3004 = vrot.lane.b32.xlu0 %v9485_v37, %s8859_s30 }
 0x21a   : > { %14802 = vst [vmem:[#allocation43_spill] sm:$0xff] %v9535_v4  ;;  %v7225_v5 = vpop.f32.mrb[20].mxu0 }
 0x21b   : > { %v779_v6 = vadd.f32 %v7225_v5, %v9461_v19  ;;  %v770_v7 = vpop.f32.mrb[21].mxu0 }
 0x21c   : > { %v771_v8 = vadd.f32 %v9461_v19, %v770_v7  ;;  %v7226_v9 = vpop.f32.mrb[22].mxu0 }
 0x21d   : > { %4076 = vrot.lane.b32.xlu1 %v9487_v38, %s8862_s12  ;;  %2972 = vrot.lane.b32.xlu0 %v9485_v37, %s8861_s6  ;;  %v782_v10 = vadd.f32 %v7226_v9, %v9461_v19  ;;  %v773_v11 = vpop.f32.mrb[23].mxu0 }
 0x21e   : > { %v774_v12 = vadd.f32 %v9461_v19, %v773_v11 }
 0x21f   : > { %v9549_v13 = vpack.c.bf16 %v782_v10, %v779_v6 }
 0x220   : > { %v9551_v14 = vpack.c.bf16 %v774_v12, %v771_v8 }
 0x221   : > { %14803 = vst [vmem:[#allocation44_spill] sm:$0xff] %v9549_v13  ;;  %1902 = vrot.lane.b32.xlu1 %v9501_v47, %s8860_s18  ;;  %853 = vrot.lane.b32.xlu0 %v9487_v38, %s8858_s17 }
 0x222   : > { %14804 = vst [vmem:[#allocation45_spill] sm:$0xff] %v9551_v14  ;;  %v7229_v15 = vpop.f32.mrb[24].mxu0 }
 0x223   : > { %v795_v16 = vadd.f32 %v7229_v15, %v9461_v19  ;;  %v786_v17 = vpop.f32.mrb[25].mxu0 }
 0x224   : > { %v787_v18 = vadd.f32 %v9461_v19, %v786_v17  ;;  %v7230_v20 = vpop.f32.mrb[26].mxu0 }
 0x225   : > { %3006 = vrot.lane.b32.xlu1 %v9503_v48, %s8859_s30  ;;  %1928 = vrot.lane.b32.xlu0 %v9487_v38, %s8857_s20  ;;  %v798_v21 = vadd.f32 %v7230_v20, %v9461_v19  ;;  %v789_v22 = vpop.f32.mrb[27].mxu0 }
 0x226   : > { %v790_v23 = vadd.f32 %v9461_v19, %v789_v22 }
 0x227   : > { %v9565_v24 = vpack.c.bf16 %v798_v21, %v795_v16 }
 0x228   : > { %v9567_v25 = vpack.c.bf16 %v790_v23, %v787_v18 }
 0x229   : > { %14805 = vst [vmem:[#allocation46_spill] sm:$0xff] %v9565_v24  ;;  %2974 = vrot.lane.b32.xlu1 %v9503_v48, %s8861_s6  ;;  %1896 = vrot.lane.b32.xlu0 %v9487_v38, %s8860_s18 }
 0x22a   : > { %14806 = vst [vmem:[#allocation47_spill] sm:$0xff] %v9567_v25  ;;  %v7233_v26 = vpop.f32.mrb[28].mxu0 }
 0x22b   : > { %v811_v29 = vadd.f32 %v7233_v26, %v9461_v19  ;;  %v802_v30 = vpop.f32.mrb[29].mxu0 }
 0x22c   : > { %v803_v31 = vadd.f32 %v9461_v19, %v802_v30  ;;  %v7234_v32 = vpop.f32.mrb[30].mxu0 }
 0x22d   : > { %1906 = vrot.lane.b32.xlu1 %v9517_v57, %s8860_s18  ;;  %2970 = vrot.lane.b32.xlu0 %v9487_v38, %s8861_s6  ;;  %v814_v33 = vadd.f32 %v7234_v32, %v9461_v19  ;;  %v805_v34 = vpop.f32.mrb[31].mxu0 }
 0x22e   : > { %v806_v35 = vadd.f32 %v9461_v19, %v805_v34 }
 0x22f   : > { %v9581_v36 = vpack.c.bf16 %v814_v33, %v811_v29 }
 0x230   : > { %v9583_v39 = vpack.c.bf16 %v806_v35, %v803_v31 }
 0x231   : > { %14807 = vst [vmem:[#allocation48_spill] sm:$0xff] %v9581_v36  ;;  %3010 = vrot.lane.b32.xlu1 %v9519_v58, %s8859_s30  ;;  %859 = vrot.lane.b32.xlu0 %v9501_v47, %s8858_s17 }
 0x232   : > { %14808 = vst [vmem:[#allocation49_spill] sm:$0xff] %v9583_v39 }
 0x235   : > { %2978 = vrot.lane.b32.xlu1 %v9519_v58, %s8861_s6  ;;  %1934 = vrot.lane.b32.xlu0 %v9501_v47, %s8857_s20 }
 0x239   : > { %867 = vrot.lane.b32.xlu1 %v9533_v3, %s8858_s17  ;;  %3008 = vrot.lane.b32.xlu0 %v9501_v47, %s8859_s30 }
 0x23d   : > { %1942 = vrot.lane.b32.xlu1 %v9533_v3, %s8857_s20  ;;  %2976 = vrot.lane.b32.xlu0 %v9501_v47, %s8861_s6 }
 0x241   : > { %1910 = vrot.lane.b32.xlu1 %v9533_v3, %s8860_s18  ;;  %857 = vrot.lane.b32.xlu0 %v9503_v48, %s8858_s17 }
 0x245   : > { %3016 = vrot.lane.b32.xlu1 %v9533_v3, %s8859_s30  ;;  %1932 = vrot.lane.b32.xlu0 %v9503_v48, %s8857_s20 }
 0x249   : > { %1940 = vrot.lane.b32.xlu1 %v9535_v4, %s8857_s20  ;;  %1900 = vrot.lane.b32.xlu0 %v9503_v48, %s8860_s18 }
 0x24d   : > { %871 = vrot.lane.b32.xlu1 %v9549_v13, %s8858_s17  ;;  %863 = vrot.lane.b32.xlu0 %v9517_v57, %s8858_s17 }
 0x251   : > { %1946 = vrot.lane.b32.xlu1 %v9549_v13, %s8857_s20  ;;  %1938 = vrot.lane.b32.xlu0 %v9517_v57, %s8857_s20 }
 0x255   : > { %1914 = vrot.lane.b32.xlu1 %v9549_v13, %s8860_s18  ;;  %3012 = vrot.lane.b32.xlu0 %v9517_v57, %s8859_s30 }
 0x259   : > { %3020 = vrot.lane.b32.xlu1 %v9549_v13, %s8859_s30  ;;  %2980 = vrot.lane.b32.xlu0 %v9517_v57, %s8861_s6 }
 0x25d   : > { %869 = vrot.lane.b32.xlu1 %v9551_v14, %s8858_s17  ;;  %861 = vrot.lane.b32.xlu0 %v9519_v58, %s8858_s17 }
 0x261   : > { %1944 = vrot.lane.b32.xlu1 %v9551_v14, %s8857_s20  ;;  %1936 = vrot.lane.b32.xlu0 %v9519_v58, %s8857_s20 }
 0x265   : > { %875 = vrot.lane.b32.xlu1 %v9565_v24, %s8858_s17  ;;  %1904 = vrot.lane.b32.xlu0 %v9519_v58, %s8860_s18 }
 0x269   : > { %1950 = vrot.lane.b32.xlu1 %v9565_v24, %s8857_s20  ;;  %2984 = vrot.lane.b32.xlu0 %v9533_v3, %s8861_s6 }
 0x26b   : > { %v9645_v19 = vpop.permute.xlu0 %1926  ;;  %v9647_v40 = vpop.permute.xlu1 %851 }
 0x26d   : > { %1918 = vrot.lane.b32.xlu1 %v9565_v24, %s8860_s18  ;;  %4090 = vrot.lane.b32.xlu0 %v9533_v3, %s8862_s12 }
 0x26f   : > { %v9653_v41 = vpop.permute.xlu0 %3000  ;;  %v9655_v42 = vpop.permute.xlu1 %1894 }
 0x271   : > { %3024 = vrot.lane.b32.xlu1 %v9565_v24, %s8859_s30  ;;  %865 = vrot.lane.b32.xlu0 %v9535_v4, %s8858_s17 }
 0x273   : > { %v9661_v43 = vpop.permute.xlu1 %2968  ;;  %v9663_v44 = vpop.permute.xlu0 %849 }
 0x274   : > { %14809 = vst [vmem:[#allocation50_spill] sm:$0xff] %v9661_v43 }
 0x275   : > { %873 = vrot.lane.b32.xlu1 %v9567_v25, %s8858_s17  ;;  %1908 = vrot.lane.b32.xlu0 %v9535_v4, %s8860_s18 }
 0x277   : > { %v9669_v45 = vpop.permute.xlu1 %4074  ;;  %v9671_v46 = vpop.permute.xlu0 %1924 }
 0x278   : > { %14810 = vst [vmem:[#allocation51_spill] sm:$0xff] %v9669_v45 }
 0x279   : > { %1948 = vrot.lane.b32.xlu1 %v9567_v25, %s8857_s20  ;;  %3014 = vrot.lane.b32.xlu0 %v9535_v4, %s8859_s30 }
 0x27b   : > { %v9677_v49 = vpop.permute.xlu1 %2998  ;;  %v9679_v50 = vpop.permute.xlu0 %1892 }
 0x27d   : > { %879 = vrot.lane.b32.xlu1 %v9581_v36, %s8858_s17  ;;  %2982 = vrot.lane.b32.xlu0 %v9535_v4, %s8861_s6 }
 0x27f   : > { %v9685_v51 = vpop.permute.xlu1 %4072  ;;  %v9687_v52 = vpop.permute.xlu0 %2966 }
 0x280   : > { %14811 = vst [vmem:[#allocation52_spill] sm:$0xff] %v9685_v51  ;;  %14812 = vst [vmem:[#allocation53_spill] sm:$0xff] %v9687_v52 }
 0x281   : > { %1954 = vrot.lane.b32.xlu1 %v9581_v36, %s8857_s20  ;;  %4088 = vrot.lane.b32.xlu0 %v9535_v4, %s8862_s12 }
 0x283   : > { %v9693_v53 = vpop.permute.xlu1 %1898  ;;  %v9695_v54 = vpop.permute.xlu0 %855 }
 0x285   : > { %1922 = vrot.lane.b32.xlu1 %v9581_v36, %s8860_s18  ;;  %2988 = vrot.lane.b32.xlu0 %v9549_v13, %s8861_s6 }
 0x287   : > { %v9701_v55 = vpop.permute.xlu1 %4078  ;;  %v9703_v56 = vpop.permute.xlu0 %1930 }
 0x288   : > { %14813 = vst [vmem:[#allocation54_spill] sm:$0xff] %v9701_v55 }
 0x289   : > { %3028 = vrot.lane.b32.xlu1 %v9581_v36, %s8859_s30  ;;  %4094 = vrot.lane.b32.xlu0 %v9549_v13, %s8862_s12 }
 0x28b   : > { %v9709_v59 = vpop.permute.xlu1 %3002  ;;  %v9711_v60 = vpop.permute.xlu0 %3004 }
 0x28d   : > { %877 = vrot.lane.b32.xlu1 %v9583_v39, %s8858_s17  ;;  %1912 = vrot.lane.b32.xlu0 %v9551_v14, %s8860_s18  ;;  %s8871_s17 = smov [#allocation13]  }
 0x28f   : > { %v9717_v61 = vpop.permute.xlu1 %4076  ;;  %v9719_v62 = vpop.permute.xlu0 %2972 }
 0x290   : > { %14814 = vst [vmem:[#allocation55_spill] sm:$0xff] %v9717_v61  ;;  %14815 = vst [vmem:[#allocation56_spill] sm:$0xff] %v9719_v62 }
 0x291   : > { %1952 = vrot.lane.b32.xlu1 %v9583_v39, %s8857_s20  ;;  %3018 = vrot.lane.b32.xlu0 %v9551_v14, %s8859_s30  ;;  %s8711_s20 = scalar_lea.vmem %s14058_s3, 4096 }
 0x292   : > { %p8712_p7 = scmp.ne.s32.totalorder %s14058_s3, %s8711_s20 }
 0x293   : > { %v9725_v63 = vpop.permute.xlu1 %1902  ;;  %v9727_v0 = vpop.permute.xlu0 %853 }
 0x294   : > { %p8713_p6 = pnand %p8712_p7, %p15910_p5 }
 0x295   : > { %4080 = vrot.lane.b32.xlu1 %v9503_v48, %s8862_s12  ;;  %2986 = vrot.lane.b32.xlu0 %v9551_v14, %s8861_s6 }
 0x296   : > { %p8714_p4 = pneg %p8713_p6 }
 0x297   : > { %v9733_v1 = vpop.permute.xlu1 %3006  ;;  %v9735_v2 = vpop.permute.xlu0 %1928 }
 0x299   : > { %4082 = vrot.lane.b32.xlu1 %v9501_v47, %s8862_s12  ;;  %4092 = vrot.lane.b32.xlu0 %v9551_v14, %s8862_s12 }
 0x29b   : > { %v9741_v5 = vpop.permute.xlu1 %2974  ;;  %v9743_v6 = vpop.permute.xlu0 %1896 }
 0x29c   : > { %14816 = vst [vmem:[#allocation57_spill] sm:$0xff] %v9741_v5 }
 0x29d   : > { %4098 = vrot.lane.b32.xlu1 %v9565_v24, %s8862_s12  ;;  %1916 = vrot.lane.b32.xlu0 %v9567_v25, %s8860_s18 }
 0x29f   : > { %v9749_v7 = vpop.permute.xlu1 %1906  ;;  %v9751_v8 = vpop.permute.xlu0 %2970 }
 0x2a0   : > { %14817 = vst [vmem:[#allocation58_spill] sm:$0xff] %v9749_v7  ;;  %14818 = vst [vmem:[#allocation59_spill] sm:$0xff] %v9751_v8 }
 0x2a1   : > { %1701 = vrot.lane.b32.xlu1 %v9533_v3, %s8863_s0  ;;  %3022 = vrot.lane.b32.xlu0 %v9567_v25, %s8859_s30 }
 0x2a3   : > { %v9757_v9 = vpop.permute.xlu1 %3010  ;;  %v9759_v10 = vpop.permute.xlu0 %859 }
 0x2a4   : > { %14819 = vst [vmem:[#allocation60_spill] sm:$0xff] %v9757_v9 }
 0x2a5   : > { %4084 = vrot.lane.b32.xlu1 %v9519_v58, %s8862_s12  ;;  %1920 = vrot.lane.b32.xlu0 %v9583_v39, %s8860_s18 }
 0x2a7   : > { %v9765_v11 = vpop.permute.xlu1 %2978  ;;  %v9767_v12 = vpop.permute.xlu0 %1934 }
 0x2a8   : > { %14820 = vst [vmem:[#allocation61_spill] sm:$0xff] %v9765_v11 }
 0x2a9   : > { %1703 = vrot.lane.b32.xlu1 %v9551_v14, %s8863_s0  ;;  %3026 = vrot.lane.b32.xlu0 %v9583_v39, %s8859_s30  ;;  %s8715_s30 = sshll.u32 %s8871_s17, 4  ;;  %s8716_s30 = int_to_ptr.vmem [resolvable:$false] %s8715_s30 }
 0x2aa   : > { %s8717_s18 = scalar_lea.vmem %s8716_s30, 8192  ;;  %p8718_p1 = scmp.lt.s32.totalorder %s14058_s3, %s8716_s30 }
 0x2ab   : > { %v868_v15 = vpop.permute.xlu1 %867  ;;  %v9773_v16 = vpop.permute.xlu0 %3008  ;;  %p8719_p2 = scmp.lt.s32.totalorder %s8717_s18, %s8711_s20 }
 0x2ac   : > { %14821 = vst [vmem:[#allocation62_spill] sm:$0xff] %v9773_v16 }
 0x2ad   : > { %1705 = vrot.lane.b32.xlu1 %v9549_v13, %s8863_s0  ;;  %2990 = vrot.lane.b32.xlu0 %v9567_v25, %s8861_s6  ;;  %p8720_p12 = por %p8719_p2, %p8718_p1 }
 0x2af   : > { %v9779_v17 = vpop.permute.xlu1 %1942  ;;  %v9781_v18 = vpop.permute.xlu0 %2976  ;;  %p8721_p3 = pnand %p8720_p12, %p8714_p4 }
 0x2b0   : > { %14822 = vst [vmem:[#allocation63_spill] sm:$0xff] %v9781_v18 }
 0x2b1   : > { %4102 = vrot.lane.b32.xlu1 %v9581_v36, %s8862_s12  ;;  %4096 = vrot.lane.b32.xlu0 %v9567_v25, %s8862_s12 }
 0x2b3   : > { %v9787_v20 = vpop.permute.xlu1 %1910  ;;  %v9789_v21 = vpop.permute.xlu0 %857 }
 0x2b4   : > { %14823 = vst [vmem:[#allocation64_spill] sm:$0xff] %v9787_v20 }
 0x2b5   : > { %2992 = vrot.lane.b32.xlu0 %v9565_v24, %s8861_s6 }
 0x2b7   : > { %v9793_v22 = vpop.permute.xlu1 %3016  ;;  %v9795_v23 = vpop.permute.xlu0 %1932 }
 0x2b9   : > { %1699 = vrot.lane.b32.xlu0 %v9535_v4, %s8863_s0 }
 0x2bb   : > { %v9799_v26 = vpop.permute.xlu1 %1940  ;;  %v9801_v29 = vpop.permute.xlu0 %1900 }
 0x2bd   : > { %1683 = vrot.lane.b32.xlu0 %v9469_v28, %s8863_s0 }
 0x2bf   : > { %v872_v30 = vpop.permute.xlu1 %871  ;;  %v9805_v31 = vpop.permute.xlu0 %863 }
 0x2c1   : > { %1685 = vrot.lane.b32.xlu0 %v9467_v27, %s8863_s0 }
 0x2c3   : > { %v9809_v32 = vpop.permute.xlu1 %1946  ;;  %v9811_v33 = vpop.permute.xlu0 %1938 }
 0x2c5   : > { %2994 = vrot.lane.b32.xlu0 %v9583_v39, %s8861_s6 }
 0x2c7   : > { %v9815_v34 = vpop.permute.xlu1 %1914  ;;  %v9817_v35 = vpop.permute.xlu0 %3012 }
 0x2c8   : > { %14824 = vst [vmem:[#allocation65_spill] sm:$0xff] %v9815_v34  ;;  %14825 = vst [vmem:[#allocation66_spill] sm:$0xff] %v9817_v35  ;;  %v931_v35 = vsel %vm881_vm2, %v9663_v44, 0 }
 0x2c9   : > { %4100 = vrot.lane.b32.xlu0 %v9583_v39, %s8862_s12 }
 0x2cb   : > { %v9821_v11 = vpop.permute.xlu1 %3020  ;;  %v9823_v18 = vpop.permute.xlu0 %2980 }
 0x2cc   : > { %14826 = vst [vmem:[#allocation67_spill] sm:$0xff] %v9823_v18 }
 0x2cd   : > { %1687 = vrot.lane.b32.xlu0 %v9487_v38, %s8863_s0 }
 0x2cf   : > { %v870_v5 = vpop.permute.xlu1 %869  ;;  %v862_v55 = vpop.permute.xlu0 %861 }
 0x2d1   : > { %1689 = vrot.lane.b32.xlu0 %v9485_v37, %s8863_s0 }
 0x2d3   : > { %v9829_v62 = vpop.permute.xlu1 %1944  ;;  %v9831_v61 = vpop.permute.xlu0 %1936 }
 0x2d5   : > { %2996 = vrot.lane.b32.xlu0 %v9581_v36, %s8861_s6 }
 0x2d7   : > { %v876_v8 = vpop.permute.xlu1 %875  ;;  %v9835_v45 = vpop.permute.xlu0 %1904 }
 0x2d8   : > { %14827 = vst [vmem:[#allocation68_spill] sm:$0xff] %v9835_v45 }
 0x2d9   : > { %4086 = vrot.lane.b32.xlu0 %v9517_v57, %s8862_s12 }
 0x2db   : > { %v9839_v18 = vpop.permute.xlu1 %1950  ;;  %v9841_v43 = vpop.permute.xlu0 %2984 }
 0x2dc   : > { %14828 = vst [vmem:[#allocation69_spill] sm:$0xff] %v9841_v43 }
 0x2dd   : > { %1707 = vrot.lane.b32.xlu0 %v9567_v25, %s8863_s0 }
 0x2df   : > { %v9845_v51 = vpop.permute.xlu1 %1918  ;;  %v9847_v52 = vpop.permute.xlu0 %4090 }
 0x2e0   : > { %14829 = vst [vmem:[#allocation70_spill] sm:$0xff] %v9845_v51  ;;  %14830 = vst [vmem:[#allocation71_spill] sm:$0xff] %v9847_v52  ;;  %v934_v52 = vsel %vm881_vm2, %v9647_v40, 0  ;;  %v940_v40 = vsel %vm881_vm2, %v9695_v54, 0 }
 0x2e3   : > { %v9849_v34 = vpop.permute.xlu1 %3024  ;;  %v866_v20 = vpop.permute.xlu0 %865 }
 0x2e4   : > { %7307 = vmatprep.subr.msk.bf16.mxu1 %vm881_vm2, %v866_v20 }
 0x2e5   : > { %6524 = vmatpush3.bf16.xpose.msra.mxu1 %v931_v35 }
 0x2e6   : > { %7308 = vmatprep.subr.msk.bf16.mxu1 %vm881_vm2, %v868_v15  ;;  %v937_v15 = vsel %vm881_vm2, %v9727_v0, 0 }
 0x2e7   : > { %v874_v7 = vpop.permute.xlu1 %873  ;;  %v9855_v43 = vpop.permute.xlu0 %1908 }
 0x2e8   : > { %14831 = vst [vmem:[#allocation72_spill] sm:$0xff] %v9855_v43 }
 0x2eb   : > { %v9857_v9 = vpop.permute.xlu0 %3014  ;;  %v9859_v45 = vpop.permute.xlu1 %1948 }
 0x2ed   : > { %6526 = vmatpush3.bf16.xpose.msra.mxu1 %v934_v52 }
 0x2ee   : > { %7309 = vmatprep.subr.msk.bf16.mxu1 %vm881_vm2, %v870_v5 }
 0x2ef   : > { %v9864_v20 = vpop.permute.xlu0 %2982  ;;  %v880_v51 = vpop.permute.xlu1 %879 }
 0x2f0   : > { %14832 = vst [vmem:[#allocation73_spill] sm:$0xff] %v9864_v20 }
 0x2f3   : > { %v9866_v44 = vpop.permute.xlu0 %4088  ;;  %v9873_v43 = vpop.permute.xlu1 %1954 }
 0x2f5   : > { %6528 = vmatpush3.bf16.xpose.msra.mxu1 %v937_v15 }
 0x2f6   : > { %7310 = vmatprep.subr.msk.bf16.mxu1 %vm881_vm2, %v872_v30  ;;  %v943_v30 = vsel %vm881_vm2, %v9789_v21, 0  ;;  %v949_v21 = vsel %vm881_vm2, %v862_v55, 0 }
 0x2f7   : > { %v9871_v35 = vpop.permute.xlu0 %2988  ;;  %v9879_v52 = vpop.permute.xlu1 %1922 }
 0x2f8   : > { %14833 = vst [vmem:[#allocation74_spill] sm:$0xff] %v9871_v35  ;;  %14835 = vst [vmem:[#allocation76_spill] sm:$0xff] %v9879_v52 }
 0x2fb   : > { %v9875_v16 = vpop.permute.xlu0 %4094  ;;  %v9886_v15 = vpop.permute.xlu1 %3028 }
 0x2fc   : > { %14834 = vst [vmem:[#allocation75_spill] sm:$0xff] %v9875_v16 }
 0x2fd   : > { %6530 = vmatpush3.bf16.xpose.msra.mxu1 %v940_v40 }
 0x2fe   : > { %7311 = vmatprep.subr.msk.bf16.mxu1 %vm881_vm2, %v874_v7  ;;  %v946_v7 = vsel %vm881_vm2, %v9759_v10, 0 }
 0x2ff   : > { %v9882_v5 = vpop.permute.xlu0 %1912  ;;  %v878_v54 = vpop.permute.xlu1 %877 }
 0x303   : > { %v9884_v0 = vpop.permute.xlu0 %3018  ;;  %v9900_v16 = vpop.permute.xlu1 %1952 }
 0x305   : > { %6532 = vmatpush3.bf16.xpose.msra.mxu1 %v943_v30 }
 0x306   : > { %7312 = vmatprep.subr.msk.bf16.mxu1 %vm881_vm2, %v876_v8 }
 0x307   : > { %v9891_v35 = vpop.permute.xlu0 %2986  ;;  %v9905_v8 = vpop.permute.xlu1 %4080 }
 0x308   : > { %14836 = vst [vmem:[#allocation77_spill] sm:$0xff] %v9891_v35 }
 0x30b   : > { %v9893_v40 = vpop.permute.xlu0 %4092  ;;  %v9912_v10 = vpop.permute.xlu1 %4082 }
 0x30d   : > { %6534 = vmatpush3.bf16.xpose.msra.mxu1 %v946_v7 }
 0x30e   : > { %7313 = vmatprep.subr.msk.bf16.mxu1 %vm881_vm2, %v878_v54  ;;  %v952_v54 = vsel %vm881_vm2, %v9805_v31, 0 }
 0x30f   : > { %v9898_v20 = vpop.permute.xlu0 %1916  ;;  %v9920_v55 = vpop.permute.xlu1 %4098 }
 0x313   : > { %v9902_v52 = vpop.permute.xlu0 %3022  ;;  %v1702_v31 = vpop.permute.xlu1 %1701 }
 0x315   : > { %6536 = vmatpush3.bf16.xpose.msra.mxu1 %v949_v21 }
 0x316   : > { %7314 = vmatprep.subr.msk.bf16.mxu1 %vm881_vm2, %v880_v51  ;;  %v2005_v51 = vsel %vm881_vm2, %v9671_v46, 0 }
 0x317   : > { %v9908_v30 = vpop.permute.xlu0 %1920  ;;  %v9940_v46 = vpop.permute.xlu1 %4084 }
 0x31b   : > { %v9910_v35 = vpop.permute.xlu0 %3026 }
 0x31d   : > { %6538 = vmatpush3.bf16.xpose.msra.mxu1 %v952_v54 }
 0x31e   : > { %7315 = vmatprep.subr.msk.bf16.mxu1 %vm881_vm2, %v9799_v26 }
 0x31f   : > { %v9918_v7 = vpop.permute.xlu0 %2990 }
 0x320   : > { %14837 = vst [vmem:[#allocation78_spill] sm:$0xff] %v9918_v7  ;;  %v2008_v7 = vsel %vm881_vm2, %v9645_v19, 0  ;;  %v2011_v19 = vsel %vm881_vm2, %v9735_v2, 0 }
 0x323   : > { %v9922_v21 = vpop.permute.xlu0 %4096 }
 0x324   : > { %6540 = vmatmul.mubr.msk.bf16.vlgmr.msra.gmra.mrb[0].mxu1 %vm881_vm2, %v9469_v28 }
 0x325   : > { %6541 = vmatprep.mubr.msk.bf16.mxu1 %vm881_vm2, %v9467_v27  ;;  %6684 = vmatpush3.bf16.xpose.msra.mxu1 %v2005_v51 }
 0x326   : > { %7316 = vmatprep.subr.msk.bf16.mxu1 %vm881_vm2, %v9779_v17 }
 0x327   : > { %v9932_v26 = vpop.permute.xlu0 %2992 }
 0x328   : > { %14838 = vst [vmem:[#allocation79_spill] sm:$0xff] %v9932_v26  ;;  %v1704_v26 = vpop.permute.xlu1 %1703 }
 0x32b   : > { %v1700_v54 = vpop.permute.xlu0 %1699 }
 0x32c   : > { %6542 = vmatmul.mubr.msk.bf16.gmra.mrb[4].mxu1 %vm881_vm2, %v9467_v27  ;;  %6571 = vmatprep.subr.bf16.mxu0 %v1700_v54  ;;  %v2017_v54 = vsel %vm881_vm2, %v9795_v23, 0 }
 0x32d   : > { %6543 = vmatprep.mubr.msk.bf16.mxu1 %vm881_vm2, %v9487_v38  ;;  %6686 = vmatpush3.bf16.xpose.msra.mxu1 %v2008_v7 }
 0x32e   : > { %7317 = vmatprep.subr.msk.bf16.mxu1 %vm881_vm2, %v9829_v62 }
 0x32f   : > { %v1684_v17 = vpop.permute.xlu0 %1683 }
 0x330   : > { %6572 = vmatpush3.bf16.msra.mxu0 %v1684_v17  ;;  %v2020_v17 = vsel %vm881_vm2, %v9767_v12, 0  ;;  %v2026_v12 = vsel %vm881_vm2, %v9811_v33, 0 }
 0x331   : > { %6573 = vmatprep.subr.bf16.mxu0 %v1702_v31  ;;  %v2014_v31 = vsel %vm881_vm2, %v9703_v56, 0 }
 0x333   : > { %v1686_v51 = vpop.permute.xlu0 %1685 }
 0x334   : > { %6544 = vmatmul.mubr.msk.bf16.gmra.mrb[8].mxu1 %vm881_vm2, %v9487_v38  ;;  %6574 = vmatpush3.bf16.msra.mxu0 %v1686_v51 }
 0x335   : > { %6545 = vmatprep.mubr.msk.bf16.mxu1 %vm881_vm2, %v9485_v37  ;;  %6575 = vmatprep.subr.bf16.mxu0 %v1704_v26  ;;  %v1706_v26 = vpop.permute.xlu1 %1705 }
 0x336   : > { %6688 = vmatpush3.bf16.xpose.msra.mxu1 %v2011_v19 }
 0x337   : > { %7318 = vmatprep.subr.msk.bf16.mxu1 %vm881_vm2, %v9809_v32  ;;  %v9952_v62 = vpop.permute.xlu0 %2994 }
 0x33b   : > { %v9954_v7 = vpop.permute.xlu0 %4100 }
 0x33c   : > { %6546 = vmatmul.mubr.msk.bf16.gmra.mrb[12].mxu1 %vm881_vm2, %v9485_v37 }
 0x33d   : > { %6547 = vmatprep.mubr.msk.bf16.mxu1 %vm881_vm2, %v9503_v48 }
 0x33e   : > { %6690 = vmatpush3.bf16.xpose.msra.mxu1 %v2014_v31 }
 0x33f   : > { %7319 = vmatprep.subr.msk.bf16.mxu1 %vm881_vm2, %v9859_v45  ;;  %v1688_v2 = vpop.permute.xlu0 %1687 }
 0x340   : > { %6576 = vmatpush3.bf16.msra.mxu0 %v1688_v2  ;;  %v14847_v2 = vld [vmem:[#allocation70_spill] sm:$0xff] }
 0x341   : > { %6577 = vmatprep.subr.bf16.mxu0 %v1706_v26 }
 0x343   : > { %v1690_v32 = vpop.permute.xlu0 %1689 }
 0x344   : > { %6548 = vmatmul.mubr.msk.bf16.gmra.mrb[16].mxu1 %vm881_vm2, %v9503_v48  ;;  %6578 = vmatpush3.bf16.msra.mxu0 %v1690_v32 }
 0x345   : > { %6549 = vmatprep.mubr.msk.bf16.mxu1 %vm881_vm2, %v9501_v47 }
 0x346   : > { %6692 = vmatpush3.bf16.xpose.msra.mxu1 %v2017_v54 }
 0x347   : > { %7320 = vmatprep.subr.msk.bf16.mxu1 %vm881_vm2, %v9839_v18  ;;  %v9972_v45 = vpop.permute.xlu0 %2996  ;;  %v2023_v18 = vsel %vm881_vm2, %v9831_v61, 0  ;;  %v3082_v61 = vsel %vm881_vm2, %v9653_v41, 0  ;;  %v3088_v41 = vsel %vm881_vm2, %v9711_v60, 0  ;;  %v14841_v60 = vld [vmem:[#allocation60_spill] sm:$0xff] }
 0x34b   : > { %v9974_v56 = vpop.permute.xlu0 %4086 }
 0x34c   : > { %6550 = vmatmul.mubr.msk.bf16.gmra.mrb[20].mxu1 %vm881_vm2, %v9501_v47 }
 0x34d   : > { %6551 = vmatprep.mubr.msk.bf16.mxu1 %vm881_vm2, %v9519_v58 }
 0x34e   : > { %6694 = vmatpush3.bf16.xpose.msra.mxu1 %v2020_v17 }
 0x34f   : > { %7321 = vmatprep.subr.msk.bf16.mxu1 %vm881_vm2, %v9900_v16  ;;  %v1708_v23 = vpop.permute.xlu0 %1707  ;;  %v14845_v16 = vld [vmem:[#allocation64_spill] sm:$0xff] }
 0x350   : > { %6579 = vmatprep.subr.bf16.mxu0 %v1708_v23 }
 0x354   : > { %6552 = vmatmul.mubr.msk.bf16.gmra.mrb[24].mxu1 %vm881_vm2, %v9519_v58 }
 0x355   : > { %6553 = vmatprep.mubr.msk.bf16.mxu1 %vm881_vm2, %v9517_v57 }
 0x356   : > { %6696 = vmatpush3.bf16.xpose.msra.mxu1 %v2023_v18 }
 0x357   : > { %7322 = vmatprep.subr.msk.bf16.mxu1 %vm881_vm2, %v9873_v43  ;;  %v3079_v43 = vsel %vm881_vm2, %v9677_v49, 0  ;;  %v3085_v49 = vsel %vm881_vm2, %v9709_v59, 0  ;;  %v14840_v59 = vld [vmem:[#allocation68_spill] sm:$0xff] }
 0x35c   : > { %6554 = vmatmul.mubr.msk.bf16.gmra.mrb[28].mxu1 %vm881_vm2, %v9517_v57 }
 0x35d   : > { %6555 = vmatprep.mubr.msk.bf16.mxu1 %vm881_vm2, %v9535_v4 }
 0x35e   : > { %6698 = vmatpush3.bf16.xpose.msra.mxu1 %v2026_v12 }
 0x35f   : > { %7323 = vmatprep.subr.msk.bf16.mxu1 %vm881_vm2, %v9857_v9 }
 0x364   : > { %6556 = vmatmul.mubr.msk.bf16.gmra.mrb[32].mxu1 %vm881_vm2, %v9535_v4 }
 0x365   : > { %6557 = vmatprep.mubr.msk.bf16.mxu1 %vm881_vm2, %v9533_v3 }
 0x36c   : > { %6558 = vmatmul.mubr.msk.bf16.gmra.mrb[36].mxu1 %vm881_vm2, %v9533_v3 }
 0x36d   : > { %6559 = vmatprep.mubr.msk.bf16.mxu1 %vm881_vm2, %v9551_v14 }
 0x374   : > { %6560 = vmatmul.mubr.msk.bf16.gmra.mrb[40].mxu1 %vm881_vm2, %v9551_v14 }
 0x375   : > { %6561 = vmatprep.mubr.msk.bf16.mxu1 %vm881_vm2, %v9549_v13 }
 0x37c   : > { %6562 = vmatmul.mubr.msk.bf16.gmra.mrb[44].mxu1 %vm881_vm2, %v9549_v13 }
 0x37d   : > { %6563 = vmatprep.mubr.msk.bf16.mxu1 %vm881_vm2, %v9567_v25 }
 0x384   : > { %6564 = vmatmul.mubr.msk.bf16.gmra.mrb[48].mxu1 %vm881_vm2, %v9567_v25 }
 0x385   : > { %6565 = vmatprep.mubr.msk.bf16.mxu1 %vm881_vm2, %v9565_v24 }
 0x38c   : > { %6566 = vmatmul.mubr.msk.bf16.gmra.mrb[52].mxu1 %vm881_vm2, %v9565_v24 }
 0x38d   : > { %6567 = vmatprep.mubr.msk.bf16.mxu1 %vm881_vm2, %v9583_v39 }
 0x394   : > { %6568 = vmatmul.mubr.msk.bf16.gmra.mrb[56].mxu1 %vm881_vm2, %v9583_v39 }
 0x395   : > { %6569 = vmatprep.mubr.msk.bf16.mxu1 %vm881_vm2, %v9581_v36 }
 0x39c   : > { %6570 = vmatmul.mubr.msk.bf16.gmra.mrb[60].mxu1 %vm881_vm2, %v9581_v36 }
 0x39d   : > { %6699 = vmatprep.mubr.msk.bf16.mxu1 %vm881_vm2, %v9679_v50 }
 0x3a4   : > { %6700 = vmatmul.mubr.msk.bf16.vlgmr.msra.gmra.mrb[64].mxu1 %vm881_vm2, %v9679_v50  ;;  %v14839_v50 = vld [vmem:[#allocation62_spill] sm:$0xff] }
 0x3a5   : > { %6844 = vmatpush3.bf16.xpose.msra.mxu1 %v3079_v43  ;;  %6701 = vmatprep.mubr.msk.bf16.mxu1 %vm881_vm2, %v9655_v42 }
 0x3a6   : > { %7324 = vmatprep.subr.msk.bf16.mxu1 %vm881_vm2, %v9793_v22  ;;  %v14846_v22 = vld [vmem:[#allocation65_spill] sm:$0xff] }
 0x3ac   : > { %6702 = vmatmul.mubr.msk.bf16.gmra.mrb[68].mxu1 %vm881_vm2, %v9655_v42  ;;  %v3091_v42 = vsel %vm881_vm2, %v9733_v1, 0  ;;  %v3097_v1 = vsel %vm881_vm2, %v14841_v60, 0 }
 0x3ad   : > { %6846 = vmatpush3.bf16.xpose.msra.mxu1 %v3082_v61  ;;  %6703 = vmatprep.mubr.msk.bf16.mxu1 %vm881_vm2, %v9743_v6 }
 0x3ae   : > { %7325 = vmatprep.subr.msk.bf16.mxu1 %vm881_vm2, %v9884_v0 }
 0x3b4   : > { %6704 = vmatmul.mubr.msk.bf16.gmra.mrb[72].mxu1 %vm881_vm2, %v9743_v6  ;;  %v14842_v6 = vld [vmem:[#allocation58_spill] sm:$0xff] }
 0x3b5   : > { %6848 = vmatpush3.bf16.xpose.msra.mxu1 %v3085_v49  ;;  %6705 = vmatprep.mubr.msk.bf16.mxu1 %vm881_vm2, %v9693_v53 }
 0x3b6   : > { %7326 = vmatprep.subr.msk.bf16.mxu1 %vm881_vm2, %v9821_v11  ;;  %v14844_v11 = vld [vmem:[#allocation72_spill] sm:$0xff] }
 0x3bc   : > { %6706 = vmatmul.mubr.msk.bf16.gmra.mrb[76].mxu1 %vm881_vm2, %v9693_v53  ;;  %v3094_v53 = vsel %vm881_vm2, %v14839_v50, 0 }
 0x3bd   : > { %6850 = vmatpush3.bf16.xpose.msra.mxu1 %v3088_v41  ;;  %6707 = vmatprep.mubr.msk.bf16.mxu1 %vm881_vm2, %v9801_v29 }
 0x3be   : > { %7327 = vmatprep.subr.msk.bf16.mxu1 %vm881_vm2, %v9902_v52 }
 0x3c4   : > { %6708 = vmatmul.mubr.msk.bf16.gmra.mrb[80].mxu1 %vm881_vm2, %v9801_v29 }
 0x3c5   : > { %6852 = vmatpush3.bf16.xpose.msra.mxu1 %v3091_v42  ;;  %6709 = vmatprep.mubr.msk.bf16.mxu1 %vm881_vm2, %v9725_v63  ;;  %v14848_v42 = vld [vmem:[#allocation76_spill] sm:$0xff] }
 0x3c6   : > { %7328 = vmatprep.subr.msk.bf16.mxu1 %vm881_vm2, %v9849_v34 }
 0x3cc   : > { %6710 = vmatmul.mubr.msk.bf16.gmra.mrb[84].mxu1 %vm881_vm2, %v9725_v63  ;;  %v14843_v63 = vld [vmem:[#allocation66_spill] sm:$0xff] }
 0x3cd   : > { %6854 = vmatpush3.bf16.xpose.msra.mxu1 %v3094_v53  ;;  %6711 = vmatprep.mubr.msk.bf16.mxu1 %vm881_vm2, %v14840_v59  ;;  %v3100_v9 = vsel %vm881_vm2, %v14843_v63, 0 }
 0x3ce   : > { %7329 = vmatprep.subr.msk.bf16.mxu1 %vm881_vm2, %v9910_v35 }
 0x3d4   : > { %6712 = vmatmul.mubr.msk.bf16.gmra.mrb[88].mxu1 %vm881_vm2, %v14840_v59 }
 0x3d5   : > { %6856 = vmatpush3.bf16.xpose.msra.mxu1 %v3097_v1  ;;  %6713 = vmatprep.mubr.msk.bf16.mxu1 %vm881_vm2, %v14842_v6 }
 0x3d6   : > { %7330 = vmatprep.subr.msk.bf16.mxu1 %vm881_vm2, %v9886_v15 }
 0x3dc   : > { %6714 = vmatmul.mubr.msk.bf16.gmra.mrb[92].mxu1 %vm881_vm2, %v14842_v6 }
 0x3dd   : > { %6858 = vmatpush3.bf16.xpose.msra.mxu1 %v3100_v9  ;;  %6715 = vmatprep.mubr.msk.bf16.mxu1 %vm881_vm2, %v14844_v11 }
 0x3de   : > { %7331 = vmatprep.subr.msk.bf16.mxu1 %vm881_vm2, %v9866_v44 }
 0x3e4   : > { %6716 = vmatmul.mubr.msk.bf16.gmra.mrb[96].mxu1 %vm881_vm2, %v14844_v11 }
 0x3e5   : > { %6717 = vmatprep.mubr.msk.bf16.mxu1 %vm881_vm2, %v14845_v16 }
 0x3ec   : > { %6718 = vmatmul.mubr.msk.bf16.gmra.mrb[100].mxu1 %vm881_vm2, %v14845_v16 }
 0x3ed   : > { %6719 = vmatprep.mubr.msk.bf16.mxu1 %vm881_vm2, %v9882_v5 }
 0x3f4   : > { %6720 = vmatmul.mubr.msk.bf16.gmra.mrb[104].mxu1 %vm881_vm2, %v9882_v5 }
 0x3f5   : > { %6721 = vmatprep.mubr.msk.bf16.mxu1 %vm881_vm2, %v14846_v22 }
 0x3f7   : > { %v10108_v29 = vpop.f32.mrb[0].mxu1 }
 0x3f8   : > { %v10110_v33 = vpop.f32.mrb[1].mxu1 }
 0x3f9   : > { %v10112_v34 = vpop.f32.mrb[2].mxu1  ;;  %v1171_v44 = vmax.f32 %v10108_v29, %v10110_v33 }
 0x3fa   : > { %v10116_v35 = vpop.f32.mrb[3].mxu1 }
 0x3fb   : > { %1172 = vmax.xlane.f32.xlu1 %v1171_v44  ;;  %v1174_v52 = vmax.f32 %v10112_v34, %v10116_v35 }
 0x3fc   : > { %6722 = vmatmul.mubr.msk.bf16.gmra.mrb[108].mxu1 %vm881_vm2, %v14846_v22 }
 0x3fd   : > { %6723 = vmatprep.mubr.msk.bf16.mxu1 %vm881_vm2, %v9898_v20  ;;  %1175 = vmax.xlane.f32.xlu0 %v1174_v52  ;;  %v14850_v52 = vld [vmem:[#allocation52_spill] sm:$0xff] }
 0x3ff   : > { %v10124_v5 = vpop.f32.mrb[4].mxu1 }
 0x400   : > { %v10126_v0 = vpop.f32.mrb[5].mxu1 }
 0x401   : > { %v10128_v15 = vpop.f32.mrb[6].mxu1  ;;  %v1177_v51 = vmax.f32 %v10124_v5, %v10126_v0 }
 0x402   : > { %v10132_v19 = vpop.f32.mrb[7].mxu1 }
 0x403   : > { %1178 = vmax.xlane.f32.xlu1 %v1177_v51  ;;  %v1180_v31 = vmax.f32 %v10128_v15, %v10132_v19  ;;  %v4153_v51 = vsel %vm881_vm2, %v14850_v52, 0 }
 0x404   : > { %6724 = vmatmul.mubr.msk.bf16.gmra.mrb[112].mxu1 %vm881_vm2, %v9898_v20 }
 0x405   : > { %6725 = vmatprep.mubr.msk.bf16.mxu1 %vm881_vm2, %v14847_v2 }
 0x407   : > { %1181 = vmax.xlane.f32.xlu1 %v1180_v31  ;;  %v10140_v26 = vpop.f32.mrb[8].mxu1  ;;  %v14851_v31 = vld [vmem:[#allocation50_spill] sm:$0xff] }
 0x408   : > { %v10142_v32 = vpop.f32.mrb[9].mxu1 }
 0x409   : > { %v10144_v54 = vpop.f32.mrb[10].mxu1  ;;  %v1183_v17 = vmax.f32 %v10140_v26, %v10142_v32 }
 0x40a   : > { %v10148_v23 = vpop.f32.mrb[11].mxu1 }
 0x40b   : > { %1184 = vmax.xlane.f32.xlu0 %v1183_v17  ;;  %v1186_v18 = vmax.f32 %v10144_v54, %v10148_v23 }
 0x40c   : > { %6726 = vmatmul.mubr.msk.bf16.gmra.mrb[116].mxu1 %vm881_vm2, %v14847_v2  ;;  %v14852_v2 = vld [vmem:[#allocation71_spill] sm:$0xff] }
 0x40d   : > { %6727 = vmatprep.mubr.msk.bf16.mxu1 %vm881_vm2, %v9908_v30  ;;  %1187 = vmax.xlane.f32.xlu1 %v1186_v18 }
 0x40f   : > { %v10156_v20 = vpop.f32.mrb[12].mxu1 }
 0x410   : > { %v10158_v12 = vpop.f32.mrb[13].mxu1 }
 0x411   : > { %v10160_v43 = vpop.f32.mrb[14].mxu1  ;;  %v1189_v61 = vmax.f32 %v10156_v20, %v10158_v12 }
 0x412   : > { %v10164_v49 = vpop.f32.mrb[15].mxu1 }
 0x413   : > { %1190 = vmax.xlane.f32.xlu1 %v1189_v61  ;;  %v1192_v41 = vmax.f32 %v10160_v43, %v10164_v49 }
 0x414   : > { %6728 = vmatmul.mubr.msk.bf16.gmra.mrb[120].mxu1 %vm881_vm2, %v9908_v30  ;;  %v14849_v30 = vld [vmem:[#allocation53_spill] sm:$0xff] }
 0x415   : > { %6729 = vmatprep.mubr.msk.bf16.mxu1 %vm881_vm2, %v14848_v42 }
 0x417   : > { %1193 = vmax.xlane.f32.xlu1 %v1192_v41  ;;  %v10172_v50 = vpop.f32.mrb[16].mxu1 }
 0x418   : > { %v10174_v53 = vpop.f32.mrb[17].mxu1 }
 0x419   : > { %v10176_v59 = vpop.f32.mrb[18].mxu1  ;;  %v1195_v60 = vmax.f32 %v10172_v50, %v10174_v53 }
 0x41a   : > { %v10180_v1 = vpop.f32.mrb[19].mxu1 }
 0x41b   : > { %1196 = vmax.xlane.f32.xlu0 %v1195_v60  ;;  %v1198_v6 = vmax.f32 %v10176_v59, %v10180_v1 }
 0x41c   : > { %6730 = vmatmul.mubr.msk.bf16.gmra.mrb[124].mxu1 %vm881_vm2, %v14848_v42 }
 0x41d   : > { %6859 = vmatprep.mubr.msk.bf16.mxu1 %vm881_vm2, %v14849_v30  ;;  %1199 = vmax.xlane.f32.xlu1 %v1198_v6  ;;  %v14853_v6 = vld [vmem:[#allocation51_spill] sm:$0xff] }
 0x41f   : > { %v10188_v63 = vpop.f32.mrb[20].mxu1 }
 0x420   : > { %v10190_v9 = vpop.f32.mrb[21].mxu1 }
 0x421   : > { %v10192_v11 = vpop.f32.mrb[22].mxu1  ;;  %v1201_v16 = vmax.f32 %v10188_v63, %v10190_v9 }
 0x422   : > { %v10196_v22 = vpop.f32.mrb[23].mxu1 }
 0x423   : > { %1202 = vmax.xlane.f32.xlu1 %v1201_v16  ;;  %v1204_v44 = vmax.f32 %v10192_v11, %v10196_v22  ;;  %v14854_v16 = vld [vmem:[#allocation59_spill] sm:$0xff] }
 0x424   : > { %6860 = vmatmul.mubr.msk.bf16.vlgmr.msra.gmra.mrb[128].mxu1 %vm881_vm2, %v14849_v30  ;;  %v4156_v30 = vsel %vm881_vm2, %v14853_v6, 0  ;;  %v14855_v6 = vld [vmem:[#allocation55_spill] sm:$0xff] }
 0x425   : > { %7004 = vmatpush3.bf16.xpose.msra.mxu1 %v4153_v51  ;;  %6861 = vmatprep.mubr.msk.bf16.mxu1 %vm881_vm2, %v14851_v31 }
 0x426   : > { %7332 = vmatprep.subr.msk.bf16.mxu1 %vm881_vm2, %v14852_v2 }
 0x427   : > { %1205 = vmax.xlane.f32.xlu1 %v1204_v44  ;;  %v10208_v17 = vpop.f32.mrb[24].mxu1 }
 0x428   : > { %v10210_v18 = vpop.f32.mrb[25].mxu1 }
 0x429   : > { %v10212_v61 = vpop.f32.mrb[26].mxu1  ;;  %v1207_v41 = vmax.f32 %v10208_v17, %v10210_v18 }
 0x42a   : > { %v10216_v42 = vpop.f32.mrb[27].mxu1 }
 0x42b   : > { %1208 = vmax.xlane.f32.xlu0 %v1207_v41  ;;  %v1210_v60 = vmax.f32 %v10212_v61, %v10216_v42 }
 0x42c   : > { %6862 = vmatmul.mubr.msk.bf16.gmra.mrb[132].mxu1 %vm881_vm2, %v14851_v31 }
 0x42d   : > { %7006 = vmatpush3.bf16.xpose.msra.mxu1 %v4156_v30  ;;  %6863 = vmatprep.mubr.msk.bf16.mxu1 %vm881_vm2, %v14854_v16  ;;  %v4159_v30 = vsel %vm881_vm2, %v14855_v6, 0 }
 0x42e   : > { %7333 = vmatprep.subr.msk.bf16.mxu1 %vm881_vm2, %v9893_v40  ;;  %1211 = vmax.xlane.f32.xlu1 %v1210_v60  ;;  %v14856_v40 = vld [vmem:[#allocation56_spill] sm:$0xff]  ;;  %v14857_v60 = vld [vmem:[#allocation75_spill] sm:$0xff] }
 0x42f   : > { %v10228_v44 = vpop.f32.mrb[28].mxu1 }
 0x430   : > { %v10230_v52 = vpop.f32.mrb[29].mxu1 }
 0x431   : > { %v10232_v51 = vpop.f32.mrb[30].mxu1  ;;  %v1213_v2 = vmax.f32 %v10228_v44, %v10230_v52 }
 0x432   : > { %v10236_v41 = vpop.f32.mrb[31].mxu1 }
 0x433   : > { %1214 = vmax.xlane.f32.xlu0 %v1213_v2  ;;  %v1216_v31 = vmax.f32 %v10232_v51, %v10236_v41 }
 0x434   : > { %6864 = vmatmul.mubr.msk.bf16.gmra.mrb[136].mxu1 %vm881_vm2, %v14854_v16 }
 0x435   : > { %7008 = vmatpush3.bf16.xpose.msra.mxu1 %v4159_v30  ;;  %6865 = vmatprep.mubr.msk.bf16.mxu1 %vm881_vm2, %v14856_v40  ;;  %v14862_v30 = vld [vmem:[#allocation54_spill] sm:$0xff] }
 0x436   : > { %7334 = vmatprep.subr.msk.bf16.mxu1 %vm881_vm2, %v14857_v60  ;;  %1217 = vmax.xlane.f32.xlu1 %v1216_v31  ;;  %v4162_v3 = vsel %vm881_vm2, %v14862_v30, 0  ;;  %v14863_v31 = vld [vmem:[#allocation57_spill] sm:$0xff] }
 0x437   : > { %v10248_v25 = vpop.f32.mrb[32].mxu1 }
 0x438   : > { %14858 = vst [vmem:[#allocation62_spill] sm:$0xff] %v10248_v25  ;;  %v10250_v2 = vpop.f32.mrb[33].mxu1 }
 0x439   : > { %14859 = vst [vmem:[#allocation68_spill] sm:$0xff] %v10250_v2  ;;  %v1219_v13 = vmax.f32 %v10248_v25, %v10250_v2  ;;  %v10254_v14 = vpop.f32.mrb[34].mxu1 }
 0x43a   : > { %14860 = vst [vmem:[#allocation60_spill] sm:$0xff] %v10254_v14  ;;  %v10256_v6 = vpop.f32.mrb[35].mxu1 }
 0x43b   : > { %14861 = vst [vmem:[#allocation58_spill] sm:$0xff] %v10256_v6  ;;  %v1222_v16 = vmax.f32 %v10254_v14, %v10256_v6  ;;  %1220 = vmax.xlane.f32.xlu0 %v1219_v13 }
 0x43c   : > { %6866 = vmatmul.mubr.msk.bf16.gmra.mrb[140].mxu1 %vm881_vm2, %v14856_v40  ;;  %v4165_v40 = vsel %vm881_vm2, %v9905_v8, 0 }
 0x43d   : > { %7010 = vmatpush3.bf16.xpose.msra.mxu1 %v4162_v3  ;;  %6867 = vmatprep.mubr.msk.bf16.mxu1 %vm881_vm2, %v14863_v31 }
 0x43e   : > { %7335 = vmatprep.subr.msk.bf16.mxu1 %vm881_vm2, %v9922_v21  ;;  %1223 = vmax.xlane.f32.xlu1 %v1222_v16  ;;  %v14868_v21 = vld [vmem:[#allocation63_spill] sm:$0xff] }
 0x43f   : > { %v10268_v60 = vpop.f32.mrb[36].mxu1 }
 0x440   : > { %14864 = vst [vmem:[#allocation66_spill] sm:$0xff] %v10268_v60  ;;  %v10270_v4 = vpop.f32.mrb[37].mxu1 }
 0x441   : > { %14865 = vst [vmem:[#allocation72_spill] sm:$0xff] %v10270_v4  ;;  %v1225_v13 = vmax.f32 %v10268_v60, %v10270_v4  ;;  %v10274_v6 = vpop.f32.mrb[38].mxu1 }
 0x442   : > { %14866 = vst [vmem:[#allocation64_spill] sm:$0xff] %v10274_v6  ;;  %v10276_v30 = vpop.f32.mrb[39].mxu1 }
 0x443   : > { %14867 = vst [vmem:[#allocation65_spill] sm:$0xff] %v10276_v30  ;;  %v1228_v3 = vmax.f32 %v10274_v6, %v10276_v30  ;;  %1226 = vmax.xlane.f32.xlu0 %v1225_v13 }
 0x444   : > { %6868 = vmatmul.mubr.msk.bf16.gmra.mrb[144].mxu1 %vm881_vm2, %v14863_v31 }
 0x445   : > { %7012 = vmatpush3.bf16.xpose.msra.mxu1 %v4165_v40  ;;  %6869 = vmatprep.mubr.msk.bf16.mxu1 %vm881_vm2, %v14868_v21  ;;  %v4168_v40 = vsel %vm881_vm2, %v9912_v10, 0 }
 0x446   : > { %7336 = vmatprep.subr.msk.bf16.mxu1 %vm881_vm2, %v9920_v55  ;;  %1229 = vmax.xlane.f32.xlu1 %v1228_v3  ;;  %v14873_v55 = vld [vmem:[#allocation61_spill] sm:$0xff] }
 0x447   : > { %v10288_v16 = vpop.f32.mrb[40].mxu1 }
 0x448   : > { %14869 = vst [vmem:[#allocation70_spill] sm:$0xff] %v10288_v16  ;;  %v10290_v4 = vpop.f32.mrb[41].mxu1 }
 0x449   : > { %14870 = vst [vmem:[#allocation76_spill] sm:$0xff] %v10290_v4  ;;  %v1231_v13 = vmax.f32 %v10288_v16, %v10290_v4  ;;  %v10294_v30 = vpop.f32.mrb[42].mxu1 }
 0x44a   : > { %14871 = vst [vmem:[#allocation53_spill] sm:$0xff] %v10294_v30  ;;  %v10296_v8 = vpop.f32.mrb[43].mxu1 }
 0x44b   : > { %14872 = vst [vmem:[#allocation52_spill] sm:$0xff] %v10296_v8  ;;  %v1234_v31 = vmax.f32 %v10294_v30, %v10296_v8  ;;  %1232 = vmax.xlane.f32.xlu1 %v1231_v13 }
 0x44c   : > { %6870 = vmatmul.mubr.msk.bf16.gmra.mrb[148].mxu1 %vm881_vm2, %v14868_v21 }
 0x44d   : > { %7014 = vmatpush3.bf16.xpose.msra.mxu1 %v4168_v40  ;;  %6871 = vmatprep.mubr.msk.bf16.mxu1 %vm881_vm2, %v14873_v55  ;;  %v4171_v40 = vsel %vm881_vm2, %v9940_v46, 0 }
 0x44e   : > { %7337 = vmatprep.subr.msk.bf16.mxu1 %vm881_vm2, %v9954_v7  ;;  %1235 = vmax.xlane.f32.xlu0 %v1234_v31  ;;  %v4103_v7 = vpop.permute.xlu1 %4102  ;;  %v14878_v31 = vld [vmem:[#allocation67_spill] sm:$0xff] }
 0x44f   : > { %v10308_v3 = vpop.f32.mrb[44].mxu1 }
 0x450   : > { %14874 = vst [vmem:[#allocation50_spill] sm:$0xff] %v10308_v3  ;;  %v10310_v4 = vpop.f32.mrb[45].mxu1 }
 0x451   : > { %14875 = vst [vmem:[#allocation71_spill] sm:$0xff] %v10310_v4  ;;  %v1237_v13 = vmax.f32 %v10308_v3, %v10310_v4  ;;  %v10314_v8 = vpop.f32.mrb[46].mxu1 }
 0x452   : > { %14876 = vst [vmem:[#allocation51_spill] sm:$0xff] %v10314_v8  ;;  %v10316_v10 = vpop.f32.mrb[47].mxu1 }
 0x453   : > { %14877 = vst [vmem:[#allocation59_spill] sm:$0xff] %v10316_v10  ;;  %v1240_v21 = vmax.f32 %v10314_v8, %v10316_v10  ;;  %1238 = vmax.xlane.f32.xlu1 %v1237_v13 }
 0x454   : > { %6872 = vmatmul.mubr.msk.bf16.gmra.mrb[152].mxu1 %vm881_vm2, %v14873_v55 }
 0x455   : > { %7016 = vmatpush3.bf16.xpose.msra.mxu1 %v4171_v40  ;;  %6873 = vmatprep.mubr.msk.bf16.mxu1 %vm881_vm2, %v14878_v31  ;;  %v4174_v40 = vsel %vm881_vm2, %v9974_v56, 0 }
 0x456   : > { %7338 = vmatprep.subr.msk.bf16.mxu1 %vm881_vm2, %v4103_v7  ;;  %1241 = vmax.xlane.f32.xlu0 %v1240_v21  ;;  %v14883_v21 = vld [vmem:[#allocation73_spill] sm:$0xff] }
 0x457   : > { %v10327_v4 = vpop.f32.mrb[48].mxu1 }
 0x458   : > { %14879 = vst [vmem:[#allocation55_spill] sm:$0xff] %v10327_v4  ;;  %v10329_v3 = vpop.f32.mrb[49].mxu1 }
 0x459   : > { %14880 = vst [vmem:[#allocation56_spill] sm:$0xff] %v10329_v3  ;;  %v1243_v13 = vmax.f32 %v10327_v4, %v10329_v3  ;;  %v10333_v10 = vpop.f32.mrb[50].mxu1 }
 0x45a   : > { %14881 = vst [vmem:[#allocation75_spill] sm:$0xff] %v10333_v10  ;;  %v10335_v46 = vpop.f32.mrb[51].mxu1 }
 0x45b   : > { %14882 = vst [vmem:[#allocation54_spill] sm:$0xff] %v10335_v46  ;;  %v1246_v55 = vmax.f32 %v10333_v10, %v10335_v46  ;;  %1244 = vmax.xlane.f32.xlu0 %v1243_v13 }
 0x45c   : > { %6874 = vmatmul.mubr.msk.bf16.gmra.mrb[156].mxu1 %vm881_vm2, %v14878_v31  ;;  %v14888_v31 = vld [vmem:[#allocation69_spill] sm:$0xff] }
 0x45d   : > { %7018 = vmatpush3.bf16.xpose.msra.mxu1 %v4174_v40  ;;  %6875 = vmatprep.mubr.msk.bf16.mxu1 %vm881_vm2, %v14883_v21 }
 0x45e   : > { %1247 = vmax.xlane.f32.xlu1 %v1246_v55 }
 0x45f   : > { %v10345_v7 = vpop.f32.mrb[52].mxu1 }
 0x460   : > { %14884 = vst [vmem:[#allocation57_spill] sm:$0xff] %v10345_v7  ;;  %v10347_v3 = vpop.f32.mrb[53].mxu1 }
 0x461   : > { %14885 = vst [vmem:[#allocation63_spill] sm:$0xff] %v10347_v3  ;;  %v1249_v4 = vmax.f32 %v10345_v7, %v10347_v3  ;;  %v10351_v46 = vpop.f32.mrb[54].mxu1 }
 0x462   : > { %14886 = vst [vmem:[#allocation61_spill] sm:$0xff] %v10351_v46  ;;  %v10353_v13 = vpop.f32.mrb[55].mxu1 }
 0x463   : > { %14887 = vst [vmem:[#allocation67_spill] sm:$0xff] %v10353_v13  ;;  %v1252_v56 = vmax.f32 %v10351_v46, %v10353_v13  ;;  %1250 = vmax.xlane.f32.xlu1 %v1249_v4 }
 0x464   : > { %6876 = vmatmul.mubr.msk.bf16.gmra.mrb[160].mxu1 %vm881_vm2, %v14883_v21  ;;  %v14893_v21 = vld [vmem:[#allocation77_spill] sm:$0xff] }
 0x465   : > { %6877 = vmatprep.mubr.msk.bf16.mxu1 %vm881_vm2, %v14888_v31  ;;  %1253 = vmax.xlane.f32.xlu0 %v1252_v56 }
 0x467   : > { %v10361_v55 = vpop.f32.mrb[56].mxu1 }
 0x468   : > { %14889 = vst [vmem:[#allocation73_spill] sm:$0xff] %v10361_v55  ;;  %v10363_v40 = vpop.f32.mrb[57].mxu1 }
 0x469   : > { %14890 = vst [vmem:[#allocation69_spill] sm:$0xff] %v10363_v40  ;;  %v10367_v7 = vpop.f32.mrb[58].mxu1  ;;  %v14924_v2 = vmax.f32 %v10361_v55, %v10363_v40 }
 0x46a   : > { %14891 = vst [vmem:[#allocation80_spill] sm:$0xff] %v10367_v7  ;;  %v10369_v10 = vpop.f32.mrb[59].mxu1 }
 0x46b   : > { %14892 = vst [vmem:[#allocation81_spill] sm:$0xff] %v10369_v10  ;;  %v1258_v4 = vmax.f32 %v10367_v7, %v10369_v10 }
 0x46c   : > { %6878 = vmatmul.mubr.msk.bf16.gmra.mrb[164].mxu1 %vm881_vm2, %v14888_v31  ;;  %v14898_v31 = vld [vmem:[#allocation74_spill] sm:$0xff] }
 0x46d   : > { %6879 = vmatprep.mubr.msk.bf16.mxu1 %vm881_vm2, %v14893_v21 }
 0x46f   : > { %v10377_v56 = vpop.f32.mrb[60].mxu1 }
 0x470   : > { %14894 = vst [vmem:[#allocation77_spill] sm:$0xff] %v10377_v56  ;;  %v10379_v13 = vpop.f32.mrb[61].mxu1 }
 0x471   : > { %14895 = vst [vmem:[#allocation82_spill] sm:$0xff] %v10379_v13  ;;  %v10383_v46 = vpop.f32.mrb[62].mxu1 }
 0x472   : > { %14896 = vst [vmem:[#allocation83_spill] sm:$0xff] %v10383_v46  ;;  %v10385_v8 = vpop.f32.mrb[63].mxu1 }
 0x473   : > { %14897 = vst [vmem:[#allocation84_spill] sm:$0xff] %v10385_v8 }
 0x474   : > { %6880 = vmatmul.mubr.msk.bf16.gmra.mrb[168].mxu1 %vm881_vm2, %v14893_v21  ;;  %1709 = vrot.lane.b32.xlu1 %v9565_v24, %s8863_s0  ;;  %v14903_v24 = vld [vmem:[#allocation78_spill] sm:$0xff] }
 0x475   : > { %6881 = vmatprep.mubr.msk.bf16.mxu1 %vm881_vm2, %v14898_v31 }
 0x477   : > { %v10395_v7 = vpop.f32.mrb[64].mxu1 }
 0x478   : > { %14899 = vst [vmem:[#allocation74_spill] sm:$0xff] %v10395_v7  ;;  %1711 = vrot.lane.b32.xlu1 %v9583_v39, %s8863_s0  ;;  %v10399_v3 = vpop.f32.mrb[65].mxu1 }
 0x479   : > { %14900 = vst [vmem:[#allocation85_spill] sm:$0xff] %v10399_v3  ;;  %v10403_v10 = vpop.f32.mrb[66].mxu1 }
 0x47a   : > { %14901 = vst [vmem:[#allocation86_spill] sm:$0xff] %v10403_v10  ;;  %v10405_v16 = vpop.f32.mrb[67].mxu1 }
 0x47b   : > { %14902 = vst [vmem:[#allocation87_spill] sm:$0xff] %v10405_v16  ;;  %1691 = vrot.lane.b32.xlu0 %v9503_v48, %s8863_s0 }
 0x47c   : > { %6882 = vmatmul.mubr.msk.bf16.gmra.mrb[172].mxu1 %vm881_vm2, %v14898_v31 }
 0x47d   : > { %6883 = vmatprep.mubr.msk.bf16.mxu1 %vm881_vm2, %v14903_v24 }
 0x47f   : > { %1693 = vrot.lane.b32.xlu0 %v9501_v47, %s8863_s0  ;;  %v10417_v30 = vpop.f32.mrb[68].mxu1  ;;  %v14908_v47 = vld [vmem:[#allocation79_spill] sm:$0xff] }
 0x480   : > { %14904 = vst [vmem:[#allocation78_spill] sm:$0xff] %v10417_v30  ;;  %v10419_v39 = vpop.f32.mrb[69].mxu1 }
 0x481   : > { %14905 = vst [vmem:[#allocation88_spill] sm:$0xff] %v10419_v39  ;;  %v10423_v21 = vpop.f32.mrb[70].mxu1 }
 0x482   : > { %14906 = vst [vmem:[#allocation89_spill] sm:$0xff] %v10423_v21  ;;  %v10425_v60 = vpop.f32.mrb[71].mxu1 }
 0x483   : > { %14907 = vst [vmem:[#allocation90_spill] sm:$0xff] %v10425_v60  ;;  %4040 = vrot.lane.b32.xlu0 %v9469_v28, %s8864_s10 }
 0x484   : > { %6884 = vmatmul.mubr.msk.bf16.gmra.mrb[176].mxu1 %vm881_vm2, %v14903_v24 }
 0x485   : > { %6885 = vmatprep.mubr.msk.bf16.mxu1 %vm881_vm2, %v14908_v47 }
 0x487   : > { %v10435_v14 = vpop.f32.mrb[72].mxu1 }
 0x488   : > { %14909 = vst [vmem:[#allocation79_spill] sm:$0xff] %v10435_v14  ;;  %v10437_v6 = vpop.f32.mrb[73].mxu1 }
 0x489   : > { %14910 = vst [vmem:[#allocation91_spill] sm:$0xff] %v10437_v6  ;;  %v10441_v25 = vpop.f32.mrb[74].mxu1 }
 0x48a   : > { %14911 = vst [vmem:[#allocation92_spill] sm:$0xff] %v10441_v25  ;;  %v10443_v31 = vpop.f32.mrb[75].mxu1 }
 0x48b   : > { %14912 = vst [vmem:[#allocation93_spill] sm:$0xff] %v10443_v31 }
 0x48c   : > { %6886 = vmatmul.mubr.msk.bf16.gmra.mrb[180].mxu1 %vm881_vm2, %v14908_v47 }
 0x48d   : > { %6887 = vmatprep.mubr.msk.bf16.mxu1 %vm881_vm2, %v9952_v62 }
 0x48f   : > { %v10451_v24 = vpop.f32.mrb[76].mxu1 }
 0x490   : > { %14913 = vst [vmem:[#allocation94_spill] sm:$0xff] %v10451_v24  ;;  %v10453_v60 = vpop.f32.mrb[77].mxu1 }
 0x491   : > { %14914 = vst [vmem:[#allocation95_spill] sm:$0xff] %v10453_v60  ;;  %v10457_v6 = vpop.f32.mrb[78].mxu1 }
 0x492   : > { %14915 = vst [vmem:[#allocation96_spill] sm:$0xff] %v10457_v6  ;;  %v10459_v14 = vpop.f32.mrb[79].mxu1  ;;  %v1173_v6 = vpop.xlane.xlu1 %1172 }
 0x493   : > { %14916 = vst [vmem:[#allocation97_spill] sm:$0xff] %v10459_v14 }
 0x494   : > { %6888 = vmatmul.mubr.msk.bf16.gmra.mrb[184].mxu1 %vm881_vm2, %v9952_v62 }
 0x495   : > { %6889 = vmatprep.mubr.msk.bf16.mxu1 %vm881_vm2, %v9972_v45 }
 0x496   : > { %v1179_v40 = vpop.xlane.xlu1 %1178 }
 0x497   : > { %v10467_v47 = vpop.f32.mrb[80].mxu1 }
 0x498   : > { %14917 = vst [vmem:[#allocation98_spill] sm:$0xff] %v10467_v47  ;;  %v10469_v31 = vpop.f32.mrb[81].mxu1 }
 0x499   : > { %14918 = vst [vmem:[#allocation99_spill] sm:$0xff] %v10469_v31  ;;  %v10473_v60 = vpop.f32.mrb[82].mxu1 }
 0x49a   : > { %14919 = vst [vmem:[#allocation100_spill] sm:$0xff] %v10473_v60  ;;  %v10475_v24 = vpop.f32.mrb[83].mxu1 }
 0x49b   : > { %14920 = vst [vmem:[#allocation101_spill] sm:$0xff] %v10475_v24 }
 0x49c   : > { %6890 = vmatmul.mubr.msk.bf16.gmra.mrb[188].mxu1 %vm881_vm2, %v9972_v45  ;;  %1259 = vmax.xlane.f32.xlu1 %v1258_v4 }
 0x49f   : > { %v10481_v62 = vpop.f32.mrb[84].mxu1 }
 0x4a0   : > { %14921 = vst [vmem:[#allocation102_spill] sm:$0xff] %v10481_v62  ;;  %v10483_v14 = vpop.f32.mrb[85].mxu1 }
 0x4a1   : > { %14922 = vst [vmem:[#allocation103_spill] sm:$0xff] %v10483_v14  ;;  %v10487_v25 = vpop.f32.mrb[86].mxu1 }
 0x4a2   : > { %14923 = vst [vmem:[#allocation104_spill] sm:$0xff] %v10487_v25  ;;  %1256 = vmax.xlane.f32.xlu0 %v14924_v2  ;;  %v10492_v31 = vpop.f32.mrb[87].mxu1  ;;  %v1182_v25 = vpop.xlane.xlu1 %1181 }
 0x4a3   : > { %14925 = vst [vmem:[#allocation105_spill] sm:$0xff] %v10492_v31 }
 0x4a7   : > { %v10496_v45 = vpop.f32.mrb[88].mxu1 }
 0x4a8   : > { %14926 = vst [vmem:[#allocation106_spill] sm:$0xff] %v10496_v45  ;;  %v10498_v4 = vpop.f32.mrb[89].mxu1  ;;  %v1176_v45 = vpop.xlane.xlu0 %1175 }
 0x4a9   : > { %14927 = vst [vmem:[#allocation107_spill] sm:$0xff] %v10498_v4  ;;  %v10502_v24 = vpop.f32.mrb[90].mxu1  ;;  %v1270_v31 = vsub.f32 %v10116_v35, %v1176_v45 }
 0x4aa   : > { %14928 = vst [vmem:[#allocation108_spill] sm:$0xff] %v10502_v24  ;;  %v10504_v14 = vpop.f32.mrb[91].mxu1  ;;  %v1267_v24 = vsub.f32 %v10108_v29, %v1173_v6  ;;  %v1269_v29 = vsub.f32 %v10112_v34, %v1176_v45  ;;  %v1272_v34 = vsub.f32 %v10126_v0, %v1179_v40 }
 0x4ab   : > { %14929 = vst [vmem:[#allocation109_spill] sm:$0xff] %v10504_v14  ;;  %v10524_v14 = vpop.xlane.xlu1 %1187 }
 0x4ac   : > { %v1331_v60 = vmul.f32 1.442695, %v1267_v24 }
 0x4ad   : > { %1713 = vrot.lane.b32.xlu1 %v9581_v36, %s8863_s0 }
 0x4ae   : > { %7731 = vpow2.f32 %v1331_v60  ;;  %v1185_v60 = vpop.xlane.xlu0 %1184 }
 0x4af   : > { %v10510_v28 = vpop.f32.mrb[92].mxu1  ;;  %v10540_v62 = vpop.xlane.xlu1 %1190 }
 0x4b0   : > { %14930 = vst [vmem:[#allocation110_spill] sm:$0xff] %v10510_v28  ;;  %v10512_v55 = vpop.f32.mrb[93].mxu1  ;;  %v1268_v28 = vsub.f32 %v10110_v33, %v1173_v6  ;;  %v1335_v6 = vmul.f32 1.442695, %v1269_v29 }
 0x4b1   : > { %14931 = vst [vmem:[#allocation111_spill] sm:$0xff] %v10512_v55  ;;  %v10516_v47 = vpop.f32.mrb[94].mxu1 }
 0x4b2   : > { %14932 = vst [vmem:[#allocation112_spill] sm:$0xff] %v10516_v47  ;;  %v10518_v4 = vpop.f32.mrb[95].mxu1  ;;  %v1271_v47 = vsub.f32 %v10124_v5, %v1179_v40  ;;  %v1273_v5 = vsub.f32 %v10128_v15, %v1182_v25  ;;  %v1197_v0 = vpop.xlane.xlu0 %1196 }
 0x4b3   : > { %14933 = vst [vmem:[#allocation113_spill] sm:$0xff] %v10518_v4  ;;  %v10558_v35 = vpop.xlane.xlu1 %1193 }
 0x4b4   : > { %v1339_v29 = vmul.f32 1.442695, %v1271_v47 }
 0x4b7   : > { %v10522_v2 = vpop.f32.mrb[96].mxu1 }
 0x4b8   : > { %14934 = vst [vmem:[#allocation114_spill] sm:$0xff] %v10522_v2  ;;  %1695 = vrot.lane.b32.xlu0 %v9519_v58, %s8863_s0  ;;  %v10528_v36 = vpop.f32.mrb[97].mxu1  ;;  %v1333_v58 = vmul.f32 1.442695, %v1268_v28  ;;  %v1337_v28 = vmul.f32 1.442695, %v1270_v31 }
 0x4b9   : > { %14935 = vst [vmem:[#allocation115_spill] sm:$0xff] %v10528_v36  ;;  %v10533_v55 = vpop.f32.mrb[98].mxu1  ;;  %v1341_v2 = vmul.f32 1.442695, %v1272_v34  ;;  %v10580_v34 = vpop.eup %7731 }
 0x4ba   : > { %14936 = vst [vmem:[#allocation116_spill] sm:$0xff] %v10533_v55  ;;  %v10536_v4 = vpop.f32.mrb[99].mxu1  ;;  %7733 = vpow2.f32 %v1333_v58  ;;  %v1200_v58 = vpop.xlane.xlu1 %1199 }
 0x4bb   : > { %14937 = vst [vmem:[#allocation117_spill] sm:$0xff] %v10536_v4  ;;  %7735 = vpow2.f32 %v1335_v6  ;;  %v1275_v4 = vsub.f32 %v10140_v26, %v1185_v60  ;;  %v1284_v6 = vsub.f32 %v10174_v53, %v1197_v0 }
 0x4bc   : > { %1697 = vrot.lane.b32.xlu0 %v9517_v57, %s8863_s0  ;;  %7737 = vpow2.f32 %v1337_v28  ;;  %v1276_v28 = vsub.f32 %v10142_v32, %v1185_v60  ;;  %v1277_v32 = vsub.f32 %v10144_v54, %v10524_v14  ;;  %v1278_v60 = vsub.f32 %v10148_v23, %v10524_v14 }
 0x4bd   : > { %7739 = vpow2.f32 %v1339_v29  ;;  %v1283_v29 = vsub.f32 %v10172_v50, %v1197_v0  ;;  %v1286_v54 = vsub.f32 %v10180_v1, %v1200_v58  ;;  %v1279_v23 = vsub.f32 %v10156_v20, %v10540_v62  ;;  %v10630_v20 = vpop.xlane.xlu0 %1208 }
 0x4be   : > { %7741 = vpow2.f32 %v1341_v2  ;;  %v1347_v2 = vmul.f32 1.442695, %v1275_v4  ;;  %v1365_v4 = vmul.f32 1.442695, %v1284_v6  ;;  %v1351_v14 = vmul.f32 1.442695, %v1277_v32 }
 0x4bf   : > { %v10546_v36 = vpop.f32.mrb[100].mxu1  ;;  %v1363_v50 = vmul.f32 1.442695, %v1283_v29  ;;  %v1353_v29 = vmul.f32 1.442695, %v1278_v60  ;;  %v1280_v1 = vsub.f32 %v10158_v12, %v10540_v62  ;;  %v1281_v62 = vsub.f32 %v10160_v43, %v10558_v35 }
 0x4c0   : > { %14938 = vst [vmem:[#allocation118_spill] sm:$0xff] %v10546_v36  ;;  %4042 = vrot.lane.b32.xlu0 %v9467_v27, %s8864_s10  ;;  %v10550_v33 = vpop.f32.mrb[101].mxu1  ;;  %v1343_v36 = vmul.f32 1.442695, %v1273_v5  ;;  %v1355_v12 = vmul.f32 1.442695, %v1279_v23 }
 0x4c1   : > { %14939 = vst [vmem:[#allocation119_spill] sm:$0xff] %v10550_v33  ;;  %v10555_v24 = vpop.f32.mrb[102].mxu1  ;;  %v1274_v33 = vsub.f32 %v10132_v19, %v1182_v25  ;;  %v10576_v25 = vpop.xlane.xlu1 %1202 }
 0x4c2   : > { %14940 = vst [vmem:[#allocation120_spill] sm:$0xff] %v10555_v24  ;;  %v10560_v45 = vpop.f32.mrb[103].mxu1  ;;  %7743 = vpow2.f32 %v1343_v36 }
 0x4c3   : > { %14941 = vst [vmem:[#allocation121_spill] sm:$0xff] %v10560_v45  ;;  %v1345_v15 = vmul.f32 1.442695, %v1274_v33  ;;  %v1349_v33 = vmul.f32 1.442695, %v1276_v28 }
 0x4c4   : > { %v10585_v5 = vpop.eup %7733 }
 0x4c5   : > { %7745 = vpow2.f32 %v1345_v15  ;;  %v10592_v27 = vpop.eup %7735  ;;  %v1459_v53 = vadd.f32 %v10585_v5, %v10580_v34  ;;  %v10602_v0 = vpop.xlane.xlu1 %1205 }
 0x4c6   : > { %v10599_v36 = vpop.eup %7737  ;;  %7747 = vpow2.f32 %v1347_v2 }
 0x4c7   : > { %v10566_v31 = vpop.f32.mrb[104].mxu1  ;;  %7749 = vpow2.f32 %v1349_v33  ;;  %v10616_v6 = vpop.eup %7739  ;;  %v1462_v32 = vadd.f32 %v10599_v36, %v10592_v27  ;;  %v1369_v33 = vmul.f32 1.442695, %v1286_v54 }
 0x4c8   : > { %14942 = vst [vmem:[#allocation122_spill] sm:$0xff] %v10566_v31  ;;  %v10568_v40 = vpop.f32.mrb[105].mxu1  ;;  %7751 = vpow2.f32 %v1363_v50  ;;  %v1282_v50 = vsub.f32 %v10164_v49, %v10558_v35 }
 0x4c9   : > { %14943 = vst [vmem:[#allocation123_spill] sm:$0xff] %v10568_v40  ;;  %v10573_v47 = vpop.f32.mrb[106].mxu1  ;;  %v1285_v40 = vsub.f32 %v10176_v59, %v1200_v58  ;;  %7753 = vpow2.f32 %v1365_v4  ;;  %v10624_v60 = vpop.xlane.xlu1 %1211 }
 0x4ca   : > { %14944 = vst [vmem:[#allocation124_spill] sm:$0xff] %v10573_v47  ;;  %v10578_v19 = vpop.f32.mrb[107].mxu1  ;;  %7755 = vpow2.f32 %v1351_v14 }
 0x4cb   : > { %14945 = vst [vmem:[#allocation125_spill] sm:$0xff] %v10578_v19  ;;  %v1367_v2 = vmul.f32 1.442695, %v1285_v40  ;;  %7757 = vpow2.f32 %v1353_v29  ;;  %v1357_v40 = vmul.f32 1.442695, %v1280_v1 }
 0x4cc   : > { %v1359_v29 = vmul.f32 1.442695, %v1281_v62  ;;  %v1361_v1 = vmul.f32 1.442695, %v1282_v50 }
 0x4cd   : > { %7759 = vpow2.f32 %v1367_v2  ;;  %v10640_v43 = vpop.xlane.xlu1 %1217  ;;  %v10648_v2 = vpop.xlane.xlu0 %1214 }
 0x4ce   : > { %7761 = vpow2.f32 %v1369_v33  ;;  %v1287_v33 = vsub.f32 %v10188_v63, %v10576_v25 }
 0x4cf   : > { %v10595_v26 = vpop.f32.mrb[108].mxu1  ;;  %7763 = vpow2.f32 %v1355_v12 }
 0x4d0   : > { %14946 = vst [vmem:[#allocation126_spill] sm:$0xff] %v10595_v26  ;;  %v10604_v15 = vpop.f32.mrb[109].mxu1  ;;  %7765 = vpow2.f32 %v1357_v40  ;;  %v1288_v40 = vsub.f32 %v10190_v9, %v10576_v25  ;;  %v14954_v9 = vmax.f32 %v10377_v56, %v10379_v13 }
 0x4d1   : > { %14947 = vst [vmem:[#allocation127_spill] sm:$0xff] %v10604_v15  ;;  %1460 = vadd.xlane.f32.xlu1 %v1459_v53  ;;  %v10610_v28 = vpop.f32.mrb[110].mxu1  ;;  %v10622_v53 = vpop.eup %7741  ;;  %7767 = vpow2.f32 %v1359_v29 }
 0x4d2   : > { %14948 = vst [vmem:[#allocation128_spill] sm:$0xff] %v10610_v28  ;;  %v10614_v58 = vpop.f32.mrb[111].mxu1  ;;  %v10632_v59 = vpop.eup %7743  ;;  %v1465_v54 = vadd.f32 %v10622_v53, %v10616_v6  ;;  %7769 = vpow2.f32 %v1361_v1  ;;  %v1373_v1 = vmul.f32 1.442695, %v1288_v40 }
 0x4d3   : > { %14949 = vst [vmem:[#allocation129_spill] sm:$0xff] %v10614_v58  ;;  %v10638_v14 = vpop.eup %7745  ;;  %v10664_v50 = vpop.xlane.xlu1 %1223 }
 0x4d4   : > { %v10652_v58 = vpop.eup %7747  ;;  %v1468_v62 = vadd.f32 %v10638_v14, %v10632_v59  ;;  %v10670_v63 = vpop.xlane.xlu0 %1220 }
 0x4d5   : > { %1463 = vadd.xlane.f32.xlu1 %v1462_v32 }
 0x4d7   : > { %v10634_v4 = vpop.f32.mrb[112].mxu1  ;;  %v10687_v28 = vpop.xlane.xlu1 %1229 }
 0x4d8   : > { %14950 = vst [vmem:[#allocation130_spill] sm:$0xff] %v10634_v4  ;;  %v10642_v23 = vpop.f32.mrb[113].mxu1  ;;  %v1371_v4 = vmul.f32 1.442695, %v1287_v33  ;;  %v10701_v40 = vpop.xlane.xlu0 %1226 }
 0x4d9   : > { %14951 = vst [vmem:[#allocation131_spill] sm:$0xff] %v10642_v23  ;;  %1466 = vadd.xlane.f32.xlu1 %v1465_v54  ;;  %v10646_v35 = vpop.f32.mrb[114].mxu1  ;;  %v10660_v54 = vpop.eup %7749 }
 0x4da   : > { %14952 = vst [vmem:[#allocation132_spill] sm:$0xff] %v10646_v35  ;;  %v10650_v32 = vpop.f32.mrb[115].mxu1  ;;  %v10666_v49 = vpop.eup %7751  ;;  %v1471_v29 = vadd.f32 %v10660_v54, %v10652_v58  ;;  %v1290_v35 = vsub.f32 %v10196_v22, %v10602_v0  ;;  %7771 = vpow2.f32 %v1371_v4 }
 0x4db   : > { %14953 = vst [vmem:[#allocation133_spill] sm:$0xff] %v10650_v32  ;;  %v10668_v23 = vpop.eup %7753  ;;  %v1289_v32 = vsub.f32 %v10192_v11, %v10602_v0  ;;  %7773 = vpow2.f32 %v1373_v1 }
 0x4dc   : > { %v10672_v12 = vpop.eup %7755  ;;  %v1483_v26 = vadd.f32 %v10668_v23, %v10666_v49  ;;  %v10717_v24 = vpop.xlane.xlu0 %1235 }
 0x4dd   : > { %1469 = vadd.xlane.f32.xlu1 %v1468_v62  ;;  %v10683_v62 = vpop.eup %7757  ;;  %v1375_v19 = vmul.f32 1.442695, %v1289_v32 }
 0x4de   : > { %v10691_v11 = vpop.eup %7759 }
 0x4df   : > { %1262 = vmax.xlane.f32.xlu0 %v14954_v9  ;;  %v10679_v25 = vpop.f32.mrb[116].mxu1  ;;  %v10699_v31 = vpop.eup %7761  ;;  %7775 = vpow2.f32 %v1375_v19 }
 0x4e0   : > { %14955 = vst [vmem:[#allocation134_spill] sm:$0xff] %v10679_v25  ;;  %v10689_v33 = vpop.f32.mrb[117].mxu1  ;;  %v10705_v0 = vpop.eup %7763  ;;  %v1486_v45 = vadd.f32 %v10699_v31, %v10691_v11 }
 0x4e1   : > { %14956 = vst [vmem:[#allocation135_spill] sm:$0xff] %v10689_v33  ;;  %1472 = vadd.xlane.f32.xlu1 %v1471_v29  ;;  %v10695_v15 = vpop.f32.mrb[118].mxu1  ;;  %v1474_v29 = vadd.f32 %v10683_v62, %v10672_v12  ;;  %v10711_v9 = vpop.eup %7765  ;;  %v1377_v33 = vmul.f32 1.442695, %v1290_v35 }
 0x4e2   : > { %14957 = vst [vmem:[#allocation136_spill] sm:$0xff] %v10695_v15  ;;  %v10703_v22 = vpop.f32.mrb[119].mxu1  ;;  %v10713_v25 = vpop.xlane.xlu1 %1232  ;;  %v1477_v35 = vadd.f32 %v10711_v9, %v10705_v0 }
 0x4e3   : > { %14958 = vst [vmem:[#allocation137_spill] sm:$0xff] %v10703_v22  ;;  %1484 = vadd.xlane.f32.xlu0 %v1483_v26  ;;  %v10719_v4 = vpop.eup %7767  ;;  %v1291_v26 = vsub.f32 %v10208_v17, %v10630_v20  ;;  %7777 = vpow2.f32 %v1377_v33  ;;  %v1293_v33 = vsub.f32 %v10212_v61, %v10624_v60 }
 0x4e4   : > { %v10727_v1 = vpop.eup %7769 }
 0x4e5   : > { %1475 = vadd.xlane.f32.xlu1 %v1474_v29  ;;  %v1292_v29 = vsub.f32 %v10210_v18, %v10630_v20  ;;  %v1379_v13 = vmul.f32 1.442695, %v1291_v26  ;;  %v14963_v20 = vmax.f32 %v10395_v7, %v10399_v3  ;;  %v10756_v26 = vpop.eup %7771  ;;  %v1383_v18 = vmul.f32 1.442695, %v1293_v33 }
 0x4e6   : > { %v10731_v47 = vpop.xlane.xlu1 %1238  ;;  %v10758_v61 = vpop.eup %7773 }
 0x4e7   : > { %1487 = vadd.xlane.f32.xlu0 %v1486_v45  ;;  %v10723_v32 = vpop.f32.mrb[120].mxu1  ;;  %v10739_v45 = vpop.xlane.xlu0 %1241  ;;  %v1381_v19 = vmul.f32 1.442695, %v1292_v29  ;;  %7779 = vpow2.f32 %v1379_v13  ;;  %v14968_v13 = vmax.f32 %v10383_v46, %v10385_v8  ;;  %v1489_v33 = vadd.f32 %v10758_v61, %v10756_v26 }
 0x4e8   : > { %14959 = vst [vmem:[#allocation138_spill] sm:$0xff] %v10723_v32  ;;  %v10733_v22 = vpop.f32.mrb[121].mxu1 }
 0x4e9   : > { %14960 = vst [vmem:[#allocation139_spill] sm:$0xff] %v10733_v22  ;;  %1478 = vadd.xlane.f32.xlu1 %v1477_v35  ;;  %v10737_v17 = vpop.f32.mrb[122].mxu1  ;;  %v1480_v35 = vadd.f32 %v10727_v1, %v10719_v4  ;;  %v1294_v22 = vsub.f32 %v10216_v42, %v10624_v60  ;;  %7781 = vpow2.f32 %v1381_v19 }
 0x4ea   : > { %14961 = vst [vmem:[#allocation140_spill] sm:$0xff] %v10737_v17  ;;  %v10741_v15 = vpop.f32.mrb[123].mxu1  ;;  %v10771_v17 = vpop.eup %7775  ;;  %7783 = vpow2.f32 %v1383_v18 }
 0x4eb   : > { %14962 = vst [vmem:[#allocation141_spill] sm:$0xff] %v10741_v15  ;;  %2246 = vmax.xlane.f32.xlu0 %v14963_v20  ;;  %v10754_v32 = vpop.xlane.xlu1 %1247  ;;  %v10760_v56 = vpop.xlane.xlu0 %1244  ;;  %v14964_v20 = vmax.f32 %v10403_v10, %v10405_v16  ;;  %v1385_v29 = vmul.f32 1.442695, %v1294_v22 }
 0x4ed   : > { %1481 = vadd.xlane.f32.xlu1 %v1480_v35  ;;  %v10782_v19 = vpop.eup %7777  ;;  %7785 = vpow2.f32 %v1385_v29 }
 0x4ef   : > { %2249 = vmax.xlane.f32.xlu0 %v14964_v20  ;;  %v10765_v15 = vpop.f32.mrb[124].mxu1 }
 0x4f0   : > { %14965 = vst [vmem:[#allocation142_spill] sm:$0xff] %v10765_v15  ;;  %v10767_v42 = vpop.xlane.xlu1 %1250  ;;  %v10769_v60 = vpop.f32.mrb[125].mxu1  ;;  %v1492_v15 = vadd.f32 %v10782_v19, %v10771_v17 }
 0x4f1   : > { %14966 = vst [vmem:[#allocation143_spill] sm:$0xff] %v10769_v60  ;;  %v10775_v3 = vpop.f32.mrb[126].mxu1  ;;  %1265 = vmax.xlane.f32.xlu1 %v14968_v13  ;;  %v10796_v7 = vpop.eup %7779 }
 0x4f2   : > { %14967 = vst [vmem:[#allocation144_spill] sm:$0xff] %v10775_v3  ;;  %v10784_v22 = vpop.xlane.xlu0 %1253  ;;  %v10786_v20 = vpop.f32.mrb[127].mxu1 }
 0x4f3   : > { %14969 = vst [vmem:[#allocation145_spill] sm:$0xff] %v10786_v20  ;;  %1490 = vadd.xlane.f32.xlu0 %v1489_v33  ;;  %v10802_v33 = vpop.eup %7781 }
 0x4f4   : > { %v1710_v60 = vpop.permute.xlu1 %1709  ;;  %v1495_v18 = vadd.f32 %v10802_v33, %v10796_v7 }
 0x4f6   : > { %v1692_v13 = vpop.permute.xlu0 %1691 }
 0x4f7   : > { %6580 = vmatpush3.bf16.msra.mxu0 %v1692_v13  ;;  %1493 = vadd.xlane.f32.xlu0 %v1492_v15  ;;  %v10792_v16 = vpop.f32.mrb[128].mxu1  ;;  %v10811_v13 = vpop.eup %7783 }
 0x4f8   : > { %14970 = vst [vmem:[#allocation146_spill] sm:$0xff] %v10792_v16  ;;  %6581 = vmatprep.subr.bf16.mxu0 %v1710_v60  ;;  %v10794_v10 = vpop.f32.mrb[129].mxu1  ;;  %v1712_v3 = vpop.permute.xlu1 %1711  ;;  %v14974_v60 = vmax.f32 %v10417_v30, %v10419_v39  ;;  %v1297_v39 = vsub.f32 %v10232_v51, %v10640_v43 }
 0x4f9   : > { %14971 = vst [vmem:[#allocation147_spill] sm:$0xff] %v10794_v10  ;;  %v10800_v29 = vpop.f32.mrb[130].mxu1  ;;  %v10815_v10 = vpop.eup %7785 }
 0x4fa   : > { %14972 = vst [vmem:[#allocation148_spill] sm:$0xff] %v10800_v29  ;;  %v1694_v35 = vpop.permute.xlu0 %1693  ;;  %v10804_v20 = vpop.f32.mrb[131].mxu1 }
 0x4fb   : > { %14973 = vst [vmem:[#allocation149_spill] sm:$0xff] %v10804_v20  ;;  %6582 = vmatpush3.bf16.msra.mxu0 %v1694_v35  ;;  %2252 = vmax.xlane.f32.xlu0 %v14974_v60  ;;  %v1498_v60 = vadd.f32 %v10815_v10, %v10811_v13 }
 0x4fc   : > { %6583 = vmatprep.subr.bf16.mxu0 %v1712_v3 }
 0x4fe   : > { %v4041_v16 = vpop.permute.xlu0 %4040 }
 0x4ff   : > { %7019 = vmatprep.mubr.msk.bf16.mxu1 %vm881_vm2, %v4041_v16  ;;  %1496 = vadd.xlane.f32.xlu0 %v1495_v18  ;;  %v10818_v8 = vpop.f32.mrb[132].mxu1  ;;  %v1295_v18 = vsub.f32 %v10228_v44, %v10648_v2  ;;  %v14998_v44 = vld [vmem:[#allocation68_spill] sm:$0xff] }
 0x500   : > { %14975 = vst [vmem:[#allocation150_spill] sm:$0xff] %v10818_v8  ;;  %v10820_v15 = vpop.f32.mrb[133].mxu1  ;;  %7020 = vmatmul.mubr.msk.bf16.vlgmr.msra.gmra.mrb[192].mxu1 %vm881_vm2, %v4041_v16 }
 0x501   : > { %14976 = vst [vmem:[#allocation151_spill] sm:$0xff] %v10820_v15  ;;  %v10825_v35 = vpop.f32.mrb[134].mxu1  ;;  %v1296_v15 = vsub.f32 %v10230_v52, %v10648_v2  ;;  %v1391_v52 = vmul.f32 1.442695, %v1297_v39 }
 0x502   : > { %14977 = vst [vmem:[#allocation152_spill] sm:$0xff] %v10825_v35  ;;  %v10829_v20 = vpop.f32.mrb[135].mxu1  ;;  %4044 = vrot.lane.b32.xlu1 %v9487_v38, %s8864_s10  ;;  %v15044_v38 = vld [vmem:[#allocation64_spill] sm:$0xff] }
 0x503   : > { %14978 = vst [vmem:[#allocation153_spill] sm:$0xff] %v10829_v20  ;;  %1499 = vadd.xlane.f32.xlu0 %v1498_v60 }
 0x506   : > { %4046 = vrot.lane.b32.xlu1 %v9485_v37, %s8864_s10 }
 0x507   : > { %v10837_v16 = vpop.f32.mrb[136].mxu1 }
 0x508   : > { %14979 = vst [vmem:[#allocation154_spill] sm:$0xff] %v10837_v16  ;;  %v10839_v3 = vpop.f32.mrb[137].mxu1 }
 0x509   : > { %14980 = vst [vmem:[#allocation155_spill] sm:$0xff] %v10839_v3  ;;  %v10843_v8 = vpop.f32.mrb[138].mxu1 }
 0x50a   : > { %14981 = vst [vmem:[#allocation156_spill] sm:$0xff] %v10843_v8  ;;  %v10845_v29 = vpop.f32.mrb[139].mxu1 }
 0x50b   : > { %14982 = vst [vmem:[#allocation157_spill] sm:$0xff] %v10845_v29 }
 0x50f   : > { %v10849_v30 = vpop.f32.mrb[140].mxu1 }
 0x510   : > { %14983 = vst [vmem:[#allocation158_spill] sm:$0xff] %v10849_v30  ;;  %v10851_v60 = vpop.f32.mrb[141].mxu1 }
 0x511   : > { %14984 = vst [vmem:[#allocation159_spill] sm:$0xff] %v10851_v60  ;;  %v10855_v20 = vpop.f32.mrb[142].mxu1 }
 0x512   : > { %14985 = vst [vmem:[#allocation160_spill] sm:$0xff] %v10855_v20  ;;  %v10857_v35 = vpop.f32.mrb[143].mxu1  ;;  %v1387_v20 = vmul.f32 1.442695, %v1295_v18 }
 0x513   : > { %14986 = vst [vmem:[#allocation161_spill] sm:$0xff] %v10857_v35 }
 0x514   : > { %7787 = vpow2.f32 %v1387_v20  ;;  %v1300_v20 = vsub.f32 %v14998_v44, %v10670_v63 }
 0x516   : > { %v1397_v39 = vmul.f32 1.442695, %v1300_v20 }
 0x517   : > { %v10861_v3 = vpop.f32.mrb[144].mxu1 }
 0x518   : > { %14987 = vst [vmem:[#allocation162_spill] sm:$0xff] %v10861_v3  ;;  %v10863_v16 = vpop.f32.mrb[145].mxu1  ;;  %v1298_v3 = vsub.f32 %v10236_v41, %v10640_v43  ;;  %v14996_v43 = vld [vmem:[#allocation62_spill] sm:$0xff] }
 0x519   : > { %14988 = vst [vmem:[#allocation163_spill] sm:$0xff] %v10863_v16  ;;  %4048 = vrot.lane.b32.xlu0 %v9503_v48, %s8864_s10  ;;  %v10869_v29 = vpop.f32.mrb[146].mxu1  ;;  %v1389_v16 = vmul.f32 1.442695, %v1296_v15  ;;  %v1299_v15 = vsub.f32 %v14996_v43, %v10670_v63 }
 0x51a   : > { %14989 = vst [vmem:[#allocation164_spill] sm:$0xff] %v10869_v29  ;;  %v10873_v8 = vpop.f32.mrb[147].mxu1  ;;  %v1393_v18 = vmul.f32 1.442695, %v1298_v3  ;;  %v15006_v29 = vld [vmem:[#allocation92_spill] sm:$0xff] }
 0x51b   : > { %14990 = vst [vmem:[#allocation165_spill] sm:$0xff] %v10873_v8  ;;  %7789 = vpow2.f32 %v1389_v16 }
 0x51c   : > { %7791 = vpow2.f32 %v1391_v52  ;;  %v15001_v52 = vld [vmem:[#allocation90_spill] sm:$0xff] }
 0x51d   : > { %7793 = vpow2.f32 %v1393_v18  ;;  %v15002_v18 = vmax.f32 %v10423_v21, %v15001_v52 }
 0x51e   : > { %v10914_v43 = vpop.eup %7787 }
 0x51f   : > { %v10883_v60 = vpop.f32.mrb[148].mxu1 }
 0x520   : > { %14991 = vst [vmem:[#allocation166_spill] sm:$0xff] %v10883_v60  ;;  %v10885_v30 = vpop.f32.mrb[149].mxu1 }
 0x521   : > { %14992 = vst [vmem:[#allocation167_spill] sm:$0xff] %v10885_v30  ;;  %v10889_v48 = vpop.f32.mrb[150].mxu1  ;;  %v15007_v30 = vld [vmem:[#allocation93_spill] sm:$0xff] }
 0x522   : > { %14993 = vst [vmem:[#allocation168_spill] sm:$0xff] %v10889_v48  ;;  %v10891_v2 = vpop.f32.mrb[151].mxu1  ;;  %v15003_v48 = vld [vmem:[#allocation60_spill] sm:$0xff] }
 0x523   : > { %14994 = vst [vmem:[#allocation169_spill] sm:$0xff] %v10891_v2  ;;  %v1395_v2 = vmul.f32 1.442695, %v1299_v15  ;;  %v1301_v63 = vsub.f32 %v15003_v48, %v10664_v50 }
 0x525   : > { %v10918_v44 = vpop.eup %7789  ;;  %7795 = vpow2.f32 %v1395_v2  ;;  %v1399_v48 = vmul.f32 1.442695, %v1301_v63 }
 0x526   : > { %v10931_v15 = vpop.eup %7791  ;;  %v1501_v20 = vadd.f32 %v10918_v44, %v10914_v43  ;;  %7797 = vpow2.f32 %v1397_v39 }
 0x527   : > { %v10895_v41 = vpop.f32.mrb[152].mxu1  ;;  %7799 = vpow2.f32 %v1399_v48 }
 0x528   : > { %14995 = vst [vmem:[#allocation170_spill] sm:$0xff] %v10895_v41  ;;  %v10899_v35 = vpop.f32.mrb[153].mxu1 }
 0x529   : > { %14997 = vst [vmem:[#allocation62_spill] sm:$0xff] %v10899_v35  ;;  %v10905_v16 = vpop.f32.mrb[154].mxu1  ;;  %v15004_v35 = vld [vmem:[#allocation58_spill] sm:$0xff]  ;;  %v10922_v8 = vpop.xlane.xlu1 %1259 }
 0x52a   : > { %14999 = vst [vmem:[#allocation68_spill] sm:$0xff] %v10905_v16  ;;  %v10907_v3 = vpop.f32.mrb[155].mxu1  ;;  %2255 = vmax.xlane.f32.xlu1 %v15002_v18  ;;  %v1302_v41 = vsub.f32 %v15004_v35, %v10664_v50  ;;  %15005 = vst [vmem:[#allocation60_spill] sm:$0xff] %v10922_v8  ;;  %v15008_v18 = vmax.f32 %v15006_v29, %v15007_v30  ;;  %v10937_v50 = vpop.eup %7793 }
 0x52b   : > { %15000 = vst [vmem:[#allocation171_spill] sm:$0xff] %v10907_v3  ;;  %v1504_v37 = vadd.f32 %v10937_v50, %v10931_v15 }
 0x52c   : > { %v1401_v35 = vmul.f32 1.442695, %v1302_v41 }
 0x52d   : > { %v1714_v29 = vpop.permute.xlu1 %1713 }
 0x52e   : > { %2261 = vmax.xlane.f32.xlu1 %v15008_v18  ;;  %7801 = vpow2.f32 %v1401_v35  ;;  %v15015_v18 = vld [vmem:[#allocation79_spill] sm:$0xff] }
 0x52f   : > { %v10927_v60 = vpop.xlane.xlu0 %1256  ;;  %v10929_v51 = vpop.f32.mrb[156].mxu1 }
 0x530   : > { %15009 = vst [vmem:[#allocation58_spill] sm:$0xff] %v10927_v60  ;;  %15010 = vst [vmem:[#allocation172_spill] sm:$0xff] %v10929_v51  ;;  %v10933_v3 = vpop.f32.mrb[157].mxu1  ;;  %v10960_v2 = vpop.eup %7795 }
 0x531   : > { %15011 = vst [vmem:[#allocation173_spill] sm:$0xff] %v10933_v3  ;;  %v10941_v16 = vpop.f32.mrb[158].mxu1  ;;  %v15016_v3 = vld [vmem:[#allocation91_spill] sm:$0xff] }
 0x532   : > { %15012 = vst [vmem:[#allocation174_spill] sm:$0xff] %v10941_v16  ;;  %v10943_v30 = vpop.f32.mrb[159].mxu1  ;;  %1502 = vadd.xlane.f32.xlu1 %v1501_v20  ;;  %v15017_v20 = vmax.f32 %v15015_v18, %v15016_v3 }
 0x533   : > { %15013 = vst [vmem:[#allocation175_spill] sm:$0xff] %v10943_v30  ;;  %v1696_v63 = vpop.permute.xlu0 %1695  ;;  %v15022_v30 = vld [vmem:[#allocation95_spill] sm:$0xff] }
 0x534   : > { %6584 = vmatpush3.bf16.msra.mxu0 %v1696_v63 }
 0x535   : > { %6585 = vmatprep.subr.bf16.mxu0 %v1714_v29 }
 0x536   : > { %1505 = vadd.xlane.f32.xlu1 %v1504_v37  ;;  %v10964_v37 = vpop.eup %7797 }
 0x537   : > { %v1698_v41 = vpop.permute.xlu0 %1697  ;;  %v10949_v39 = vpop.f32.mrb[160].mxu1 }
 0x538   : > { %15014 = vst [vmem:[#allocation176_spill] sm:$0xff] %v10949_v39  ;;  %6586 = vmatpush3.bf16.msra.mxu0 %v1698_v41  ;;  %2258 = vmax.xlane.f32.xlu0 %v15017_v20  ;;  %v10954_v51 = vpop.f32.mrb[161].mxu1  ;;  %v15021_v20 = vld [vmem:[#allocation94_spill] sm:$0xff]  ;;  %v10973_v48 = vpop.eup %7799 }
 0x539   : > { %15018 = vst [vmem:[#allocation177_spill] sm:$0xff] %v10954_v51  ;;  %v10958_v63 = vpop.f32.mrb[162].mxu1  ;;  %v15023_v16 = vmax.f32 %v15021_v20, %v15022_v30  ;;  %v1507_v51 = vadd.f32 %v10964_v37, %v10960_v2  ;;  %v10977_v39 = vpop.eup %7801  ;;  %v15041_v30 = vld [vmem:[#allocation41_spill] sm:$0xff] }
 0x53a   : > { %15019 = vst [vmem:[#allocation178_spill] sm:$0xff] %v10958_v63  ;;  %v10962_v35 = vpop.f32.mrb[163].mxu1 }
 0x53b   : > { %15020 = vst [vmem:[#allocation179_spill] sm:$0xff] %v10962_v35  ;;  %v4043_v41 = vpop.permute.xlu0 %4042 }
 0x53c   : > { %7021 = vmatprep.mubr.msk.bf16.mxu1 %vm881_vm2, %v4043_v41  ;;  %2264 = vmax.xlane.f32.xlu0 %v15023_v16 }
 0x53d   : > { %7022 = vmatmul.mubr.msk.bf16.gmra.mrb[196].mxu1 %vm881_vm2, %v4043_v41  ;;  %v1510_v41 = vadd.f32 %v10977_v39, %v10973_v48 }
 0x53f   : > { %v10979_v3 = vpop.f32.mrb[164].mxu1 }
 0x540   : > { %15024 = vst [vmem:[#allocation180_spill] sm:$0xff] %v10979_v3  ;;  %1508 = vadd.xlane.f32.xlu0 %v1507_v51  ;;  %v10981_v29 = vpop.f32.mrb[165].mxu1  ;;  %v15029_v51 = vld [vmem:[#allocation38_spill] sm:$0xff] }
 0x541   : > { %15025 = vst [vmem:[#allocation181_spill] sm:$0xff] %v10981_v29  ;;  %v10985_v63 = vpop.f32.mrb[166].mxu1 }
 0x542   : > { %15026 = vst [vmem:[#allocation182_spill] sm:$0xff] %v10985_v63  ;;  %v10987_v16 = vpop.f32.mrb[167].mxu1 }
 0x543   : > { %15027 = vst [vmem:[#allocation183_spill] sm:$0xff] %v10987_v16 }
 0x544   : > { %1511 = vadd.xlane.f32.xlu0 %v1510_v41 }
 0x547   : > { %v10993_v20 = vpop.f32.mrb[168].mxu1  ;;  %4050 = vrot.lane.b32.xlu1 %v15029_v51, %s8864_s10 }
 0x548   : > { %15028 = vst [vmem:[#allocation184_spill] sm:$0xff] %v10993_v20  ;;  %v10997_v18 = vpop.f32.mrb[169].mxu1 }
 0x549   : > { %15030 = vst [vmem:[#allocation185_spill] sm:$0xff] %v10997_v18  ;;  %v11001_v29 = vpop.f32.mrb[170].mxu1 }
 0x54a   : > { %15031 = vst [vmem:[#allocation186_spill] sm:$0xff] %v11001_v29  ;;  %v11003_v3 = vpop.f32.mrb[171].mxu1  ;;  %v15040_v29 = vld [vmem:[#allocation66_spill] sm:$0xff] }
 0x54b   : > { %15032 = vst [vmem:[#allocation187_spill] sm:$0xff] %v11003_v3  ;;  %v1303_v51 = vsub.f32 %v15040_v29, %v10701_v40  ;;  %v15046_v29 = vld [vmem:[#allocation65_spill] sm:$0xff] }
 0x54c   : > { %v1306_v55 = vsub.f32 %v15046_v29, %v10687_v28 }
 0x54f   : > { %v11007_v52 = vpop.f32.mrb[172].mxu1 }
 0x550   : > { %15033 = vst [vmem:[#allocation188_spill] sm:$0xff] %v11007_v52  ;;  %v11009_v41 = vpop.f32.mrb[173].mxu1  ;;  %v1403_v52 = vmul.f32 1.442695, %v1303_v51 }
 0x551   : > { %15034 = vst [vmem:[#allocation189_spill] sm:$0xff] %v11009_v41  ;;  %v11013_v16 = vpop.f32.mrb[174].mxu1 }
 0x552   : > { %15035 = vst [vmem:[#allocation190_spill] sm:$0xff] %v11013_v16  ;;  %v11015_v63 = vpop.f32.mrb[175].mxu1 }
 0x553   : > { %15036 = vst [vmem:[#allocation191_spill] sm:$0xff] %v11015_v63  ;;  %v15043_v63 = vld [vmem:[#allocation72_spill] sm:$0xff] }
 0x554   : > { %v1304_v16 = vsub.f32 %v15043_v63, %v10701_v40 }
 0x556   : > { %v1405_v46 = vmul.f32 1.442695, %v1304_v16  ;;  %v1409_v16 = vmul.f32 1.442695, %v1306_v55 }
 0x557   : > { %v11019_v18 = vpop.f32.mrb[176].mxu1 }
 0x558   : > { %15037 = vst [vmem:[#allocation192_spill] sm:$0xff] %v11019_v18  ;;  %v11021_v20 = vpop.f32.mrb[177].mxu1 }
 0x559   : > { %15038 = vst [vmem:[#allocation193_spill] sm:$0xff] %v11021_v20  ;;  %v11025_v3 = vpop.f32.mrb[178].mxu1  ;;  %v1305_v20 = vsub.f32 %v15044_v38, %v10687_v28 }
 0x55a   : > { %15039 = vst [vmem:[#allocation194_spill] sm:$0xff] %v11025_v3  ;;  %4052 = vrot.lane.b32.xlu0 %v15041_v30, %s8864_s10  ;;  %v11031_v41 = vpop.f32.mrb[179].mxu1 }
 0x55b   : > { %15042 = vst [vmem:[#allocation66_spill] sm:$0xff] %v11031_v41  ;;  %v1407_v51 = vmul.f32 1.442695, %v1305_v20  ;;  %v15054_v20 = vld [vmem:[#allocation53_spill] sm:$0xff] }
 0x55e   : > { %v1461_v21 = vpop.xlane.xlu1 %1460 }
 0x55f   : > { %v11039_v18 = vpop.f32.mrb[180].mxu1  ;;  %7803 = vrcp.f32 %v1461_v21  ;;  %v15051_v21 = vld [vmem:[#allocation70_spill] sm:$0xff] }
 0x560   : > { %15045 = vst [vmem:[#allocation72_spill] sm:$0xff] %v11039_v18  ;;  %v11043_v30 = vpop.f32.mrb[181].mxu1  ;;  %7805 = vpow2.f32 %v1403_v52  ;;  %v1307_v35 = vsub.f32 %v15051_v21, %v10713_v25  ;;  %v15053_v52 = vld [vmem:[#allocation76_spill] sm:$0xff] }
 0x561   : > { %15047 = vst [vmem:[#allocation64_spill] sm:$0xff] %v11043_v30  ;;  %v11047_v41 = vpop.f32.mrb[182].mxu1  ;;  %v1308_v18 = vsub.f32 %v15053_v52, %v10713_v25 }
 0x562   : > { %15048 = vst [vmem:[#allocation65_spill] sm:$0xff] %v11047_v41  ;;  %v1464_v40 = vpop.xlane.xlu1 %1463  ;;  %v11049_v63 = vpop.f32.mrb[183].mxu1  ;;  %v15058_v41 = vld [vmem:[#allocation97_spill] sm:$0xff] }
 0x563   : > { %15049 = vst [vmem:[#allocation195_spill] sm:$0xff] %v11049_v63  ;;  %7807 = vrcp.f32 %v1464_v40  ;;  %v1309_v40 = vsub.f32 %v15054_v20, %v10717_v24  ;;  %v15057_v63 = vld [vmem:[#allocation96_spill] sm:$0xff] }
 0x564   : > { %7809 = vpow2.f32 %v1405_v46  ;;  %v15059_v25 = vmax.f32 %v15057_v63, %v15058_v41  ;;  %v15063_v41 = vld [vmem:[#allocation100_spill] sm:$0xff]  ;;  %v15064_v63 = vld [vmem:[#allocation101_spill] sm:$0xff] }
 0x565   : > { %7811 = vpow2.f32 %v1407_v51  ;;  %v1415_v8 = vmul.f32 1.442695, %v1309_v40 }
 0x566   : > { %v1467_v28 = vpop.xlane.xlu1 %1466  ;;  %7813 = vpow2.f32 %v1409_v16 }
 0x567   : > { %v11053_v29 = vpop.f32.mrb[184].mxu1  ;;  %7815 = vrcp.f32 %v1467_v28  ;;  %v1411_v28 = vmul.f32 1.442695, %v1307_v35 }
 0x568   : > { %15050 = vst [vmem:[#allocation196_spill] sm:$0xff] %v11053_v29  ;;  %v11057_v30 = vpop.f32.mrb[185].mxu1  ;;  %v15061_v29 = vld [vmem:[#allocation52_spill] sm:$0xff] }
 0x569   : > { %15052 = vst [vmem:[#allocation70_spill] sm:$0xff] %v11057_v30  ;;  %v11065_v55 = vpop.f32.mrb[186].mxu1  ;;  %v7804_v16 = vpop.eup %7803  ;;  %v1413_v30 = vmul.f32 1.442695, %v1308_v18  ;;  %v1310_v3 = vsub.f32 %v15061_v29, %v10717_v24  ;;  %v15065_v18 = vmax.f32 %v15063_v41, %v15064_v63 }
 0x56a   : > { %15055 = vst [vmem:[#allocation76_spill] sm:$0xff] %v11065_v55  ;;  %v1470_v51 = vpop.xlane.xlu1 %1469  ;;  %v11067_v38 = vpop.f32.mrb[187].mxu1 }
 0x56b   : > { %15056 = vst [vmem:[#allocation53_spill] sm:$0xff] %v11067_v38  ;;  %7817 = vrcp.f32 %v1470_v51  ;;  %2267 = vmax.xlane.f32.xlu1 %v15059_v25  ;;  %v11074_v52 = vpop.eup %7805  ;;  %v1587_v51 = vmul.f32 %v7804_v16, %v10580_v34  ;;  %v1588_v25 = vmul.f32 %v7804_v16, %v10585_v5 }
 0x56c   : > { %v11076_v20 = vpop.xlane.xlu0 %1262  ;;  %7819 = vpow2.f32 %v1411_v28 }
 0x56d   : > { %15060 = vst [vmem:[#allocation197_spill] sm:$0xff] %v11076_v20  ;;  %v7808_v46 = vpop.eup %7807  ;;  %7821 = vpow2.f32 %v1413_v30 }
 0x56e   : > { %v11080_v60 = vpop.eup %7809  ;;  %v1589_v21 = vmul.f32 %v7808_v46, %v10592_v27  ;;  %v1473_v38 = vpop.xlane.xlu1 %1472  ;;  %v1590_v55 = vmul.f32 %v7808_v46, %v10599_v36  ;;  %v1417_v27 = vmul.f32 1.442695, %v1310_v3  ;;  %7823 = vpow2.f32 %v1415_v8 }
 0x56f   : > { %v11086_v35 = vpop.f32.mrb[188].mxu1  ;;  %2273 = vmax.xlane.f32.xlu1 %v15065_v18  ;;  %v11093_v34 = vpop.eup %7811  ;;  %v1513_v46 = vadd.f32 %v11080_v60, %v11074_v52  ;;  %7825 = vrcp.f32 %v1473_v38 }
 0x570   : > { %15062 = vst [vmem:[#allocation52_spill] sm:$0xff] %v11086_v35  ;;  %v1485_v24 = vpop.xlane.xlu0 %1484  ;;  %v11091_v29 = vpop.f32.mrb[189].mxu1  ;;  %v1652_v40 = vpack.c.bf16 %v1590_v55, %v1588_v25  ;;  %v1651_v20 = vpack.c.bf16 %v1589_v21, %v1587_v51 }
 0x571   : > { %15066 = vst [vmem:[#allocation100_spill] sm:$0xff] %v11091_v29  ;;  %v11097_v36 = vpop.f32.mrb[190].mxu1  ;;  %v11101_v16 = vpop.eup %7813 }
 0x572   : > { %15067 = vst [vmem:[#allocation198_spill] sm:$0xff] %v11097_v36  ;;  %1763 = vmatprep.mubr.bf16.mxu0 %v1652_v40  ;;  %v1476_v28 = vpop.xlane.xlu1 %1475  ;;  %v11103_v18 = vpop.f32.mrb[191].mxu1  ;;  %v1516_v51 = vadd.f32 %v11101_v16, %v11093_v34 }
 0x573   : > { %15068 = vst [vmem:[#allocation199_spill] sm:$0xff] %v11103_v18  ;;  %v7816_v55 = vpop.eup %7815  ;;  %1764 = vmatmul.mubr.bf16.vlgmr.msra.gmra.mrb[32].mxu0 %v1651_v20  ;;  %1514 = vadd.xlane.f32.xlu1 %v1513_v46  ;;  %7827 = vrcp.f32 %v1476_v28  ;;  %v15069_v28 = vld [vmem:[#allocation98_spill] sm:$0xff] }
 0x574   : > { %v1488_v3 = vpop.xlane.xlu0 %1487  ;;  %7829 = vpow2.f32 %v1417_v27  ;;  %v1592_v8 = vmul.f32 %v7816_v55, %v10622_v53  ;;  %v1591_v5 = vmul.f32 %v7816_v55, %v10616_v6  ;;  %v15070_v27 = vld [vmem:[#allocation99_spill] sm:$0xff] }
 0x575   : > { %v7818_v21 = vpop.eup %7817  ;;  %v15071_v18 = vmax.f32 %v15069_v28, %v15070_v27 }
 0x576   : > { %v1479_v25 = vpop.xlane.xlu1 %1478  ;;  %v1594_v40 = vmul.f32 %v7818_v21, %v10638_v14  ;;  %v1593_v38 = vmul.f32 %v7818_v21, %v10632_v59  ;;  %v11118_v36 = vpop.eup %7819  ;;  %v15073_v21 = vld [vmem:[#allocation103_spill] sm:$0xff] }
 0x577   : > { %1517 = vadd.xlane.f32.xlu1 %v1516_v51  ;;  %7831 = vrcp.f32 %v1479_v25  ;;  %v11120_v14 = vpop.eup %7821 }
 0x578   : > { %v11113_v30 = vpop.xlane.xlu0 %2246  ;;  %v1654_v20 = vpack.c.bf16 %v1594_v40, %v1592_v8  ;;  %v1653_v46 = vpack.c.bf16 %v1593_v38, %v1591_v5  ;;  %7833 = vrcp.f32 %v1488_v3  ;;  %v11122_v59 = vpop.eup %7823  ;;  %v15072_v5 = vld [vmem:[#allocation102_spill] sm:$0xff]  ;;  %v1519_v8 = vadd.f32 %v11120_v14, %v11118_v36 }
 0x579   : > { %2270 = vmax.xlane.f32.xlu0 %v15071_v18  ;;  %v7826_v55 = vpop.eup %7825  ;;  %v15074_v51 = vmax.f32 %v15072_v5, %v15073_v21 }
 0x57a   : > { %1771 = vmatprep.mubr.bf16.mxu0 %v1654_v20  ;;  %v1482_v53 = vpop.xlane.xlu1 %1481  ;;  %v1596_v38 = vmul.f32 %v7826_v55, %v10660_v54 }
 0x57b   : > { %7835 = vrcp.f32 %v1482_v53  ;;  %1772 = vmatmul.mubr.bf16.gmra.mrb[36].mxu0 %v1653_v46  ;;  %v1595_v46 = vmul.f32 %v7826_v55, %v10652_v58 }
 0x57c   : > { %v11124_v6 = vpop.xlane.xlu0 %2249  ;;  %7837 = vrcp.f32 %v1485_v24 }
 0x57d   : > { %2276 = vmax.xlane.f32.xlu0 %v15074_v51  ;;  %v7828_v18 = vpop.eup %7827 }
 0x57e   : > { %v11129_v25 = vpop.xlane.xlu1 %1265  ;;  %v11131_v3 = vpop.eup %7829  ;;  %v1598_v20 = vmul.f32 %v7828_v18, %v10683_v62  ;;  %v1597_v24 = vmul.f32 %v7828_v18, %v10672_v12 }
 0x57f   : > { %v1522_v21 = vadd.f32 %v11131_v3, %v11122_v59 }
 0x580   : > { %v1491_v40 = vpop.xlane.xlu0 %1490  ;;  %v1656_v53 = vpack.c.bf16 %v1598_v20, %v1596_v38  ;;  %v1655_v29 = vpack.c.bf16 %v1597_v24, %v1595_v46 }
 0x581   : > { %1520 = vadd.xlane.f32.xlu0 %v1519_v8  ;;  %v7832_v35 = vpop.eup %7831  ;;  %7839 = vrcp.f32 %v1491_v40 }
 0x582   : > { %v4045_v51 = vpop.permute.xlu1 %4044  ;;  %v7834_v5 = vpop.eup %7833  ;;  %1779 = vmatprep.mubr.bf16.mxu0 %v1656_v53  ;;  %v1600_v12 = vmul.f32 %v7832_v35, %v10711_v9  ;;  %v1599_v8 = vmul.f32 %v7832_v35, %v10705_v0 }
 0x583   : > { %7023 = vmatprep.mubr.msk.bf16.mxu1 %vm881_vm2, %v4045_v51  ;;  %1780 = vmatmul.mubr.bf16.gmra.mrb[40].mxu0 %v1655_v29  ;;  %v1605_v0 = vmul.f32 %v7834_v5, %v10691_v11 }
 0x584   : > { %v1494_v63 = vpop.xlane.xlu0 %1493  ;;  %7024 = vmatmul.mubr.msk.bf16.gmra.mrb[200].mxu1 %vm881_vm2, %v4045_v51 }
 0x585   : > { %v7836_v54 = vpop.eup %7835  ;;  %1523 = vadd.xlane.f32.xlu0 %v1522_v21  ;;  %7841 = vrcp.f32 %v1494_v63  ;;  %v1606_v63 = vmul.f32 %v7834_v5, %v10699_v31 }
 0x586   : > { %v4047_v58 = vpop.permute.xlu1 %4046  ;;  %v1602_v62 = vmul.f32 %v7836_v54, %v10727_v1  ;;  %v1601_v55 = vmul.f32 %v7836_v54, %v10719_v4  ;;  %v7838_v18 = vpop.eup %7837 }
 0x587   : > { %7025 = vmatprep.mubr.msk.bf16.mxu1 %vm881_vm2, %v4047_v58  ;;  %v1604_v9 = vmul.f32 %v7838_v18, %v10668_v23  ;;  %v1603_v46 = vmul.f32 %v7838_v18, %v10666_v49  ;;  %v15077_v18 = vld [vmem:[#allocation71_spill] sm:$0xff] }
 0x588   : > { %v11148_v38 = vpop.xlane.xlu0 %2252  ;;  %4054 = vrot.lane.b32.xlu1 %v9517_v57, %s8864_s10  ;;  %v1658_v29 = vpack.c.bf16 %v1602_v62, %v1600_v12  ;;  %v1657_v21 = vpack.c.bf16 %v1601_v55, %v1599_v8  ;;  %v1312_v8 = vsub.f32 %v15077_v18, %v10731_v47 }
 0x589   : > { %v1660_v1 = vpack.c.bf16 %v1606_v63, %v1604_v9  ;;  %v1659_v23 = vpack.c.bf16 %v1605_v0, %v1603_v46  ;;  %v15078_v63 = vld [vmem:[#allocation51_spill] sm:$0xff]  ;;  %v15082_v46 = vld [vmem:[#allocation104_spill] sm:$0xff] }
 0x58a   : > { %1787 = vmatprep.mubr.bf16.mxu0 %v1658_v29  ;;  %v1421_v9 = vmul.f32 1.442695, %v1312_v8 }
 0x58b   : > { %1788 = vmatmul.mubr.bf16.gmra.mrb[44].mxu0 %v1657_v21  ;;  %v7840_v4 = vpop.eup %7839  ;;  %v1313_v21 = vsub.f32 %v15078_v63, %v10739_v45 }
 0x58c   : > { %v1497_v40 = vpop.xlane.xlu0 %1496  ;;  %7026 = vmatmul.mubr.msk.bf16.gmra.mrb[204].mxu1 %vm881_vm2, %v4047_v58  ;;  %1795 = vmatprep.mubr.bf16.mxu0 %v1660_v1  ;;  %v1608_v31 = vmul.f32 %v7840_v4, %v10758_v61  ;;  %v1607_v54 = vmul.f32 %v7840_v4, %v10756_v26  ;;  %v15075_v61 = vld [vmem:[#allocation43_spill] sm:$0xff] }
 0x58d   : > { %7843 = vrcp.f32 %v1497_v40  ;;  %v15079_v1 = vld [vmem:[#allocation59_spill] sm:$0xff] }
 0x58e   : > { %v1314_v40 = vsub.f32 %v15079_v1, %v10739_v45  ;;  %v15093_v1 = vld [vmem:[#allocation110_spill] sm:$0xff] }
 0x58f   : > { %v7842_v35 = vpop.eup %7841 }
 0x590   : > { %v1500_v20 = vpop.xlane.xlu0 %1499  ;;  %v1610_v24 = vmul.f32 %v7842_v35, %v10782_v19  ;;  %v1609_v11 = vmul.f32 %v7842_v35, %v10771_v17  ;;  %v15076_v19 = vld [vmem:[#allocation50_spill] sm:$0xff]  ;;  %v15081_v35 = vld [vmem:[#allocation56_spill] sm:$0xff] }
 0x591   : > { %7845 = vrcp.f32 %v1500_v20  ;;  %v1311_v12 = vsub.f32 %v15076_v19, %v10731_v47  ;;  %v1425_v47 = vmul.f32 1.442695, %v1314_v40  ;;  %v1316_v20 = vsub.f32 %v15081_v35, %v10760_v56  ;;  %v15094_v40 = vld [vmem:[#allocation111_spill] sm:$0xff] }
 0x592   : > { %v1662_v53 = vpack.c.bf16 %v1610_v24, %v1608_v31  ;;  %v1661_v49 = vpack.c.bf16 %v1609_v11, %v1607_v54  ;;  %v15083_v31 = vld [vmem:[#allocation105_spill] sm:$0xff] }
 0x593   : > { %1796 = vmatmul.mubr.bf16.gmra.mrb[48].mxu0 %v1659_v23  ;;  %v1419_v26 = vmul.f32 1.442695, %v1311_v12  ;;  %v15084_v24 = vmax.f32 %v15082_v46, %v15083_v31  ;;  %v15085_v23 = vld [vmem:[#allocation75_spill] sm:$0xff]  ;;  %v1429_v11 = vmul.f32 1.442695, %v1316_v20 }
 0x594   : > { %v4049_v51 = vpop.permute.xlu0 %4048  ;;  %1803 = vmatprep.mubr.bf16.mxu0 %v1662_v53  ;;  %v1317_v53 = vsub.f32 %v15085_v23, %v10754_v32  ;;  %v15096_v23 = vld [vmem:[#allocation42_spill] sm:$0xff] }
 0x595   : > { %7027 = vmatprep.mubr.msk.bf16.mxu1 %vm881_vm2, %v4049_v51  ;;  %7847 = vpow2.f32 %v1419_v26 }
 0x596   : > { %7028 = vmatmul.mubr.msk.bf16.gmra.mrb[208].mxu1 %vm881_vm2, %v4049_v51  ;;  %7849 = vpow2.f32 %v1421_v9  ;;  %v1431_v12 = vmul.f32 1.442695, %v1317_v53 }
 0x597   : > { %v7844_v5 = vpop.eup %7843 }
 0x598   : > { %v1612_v62 = vmul.f32 %v7844_v5, %v10802_v33  ;;  %v1611_v33 = vmul.f32 %v7844_v5, %v10796_v7  ;;  %v15086_v5 = vld [vmem:[#allocation54_spill] sm:$0xff] }
 0x599   : > { %v1318_v54 = vsub.f32 %v15086_v5, %v10754_v32 }
 0x59b   : > { %v7846_v58 = vpop.eup %7845  ;;  %4056 = vrot.lane.b32.xlu0 %v15075_v61, %s8864_s10  ;;  %1804 = vmatmul.mubr.bf16.gmra.mrb[52].mxu0 %v1661_v49  ;;  %v15088_v49 = vld [vmem:[#allocation109_spill] sm:$0xff]  ;;  %v1433_v18 = vmul.f32 1.442695, %v1318_v54 }
 0x59c   : > { %v1614_v55 = vmul.f32 %v7846_v58, %v10815_v10  ;;  %v1613_v29 = vmul.f32 %v7846_v58, %v10811_v13  ;;  %v1423_v10 = vmul.f32 1.442695, %v1313_v21  ;;  %v15080_v13 = vld [vmem:[#allocation55_spill] sm:$0xff]  ;;  %v15087_v58 = vld [vmem:[#allocation108_spill] sm:$0xff] }
 0x59d   : > { %v1315_v0 = vsub.f32 %v15080_v13, %v10760_v56  ;;  %v15089_v19 = vmax.f32 %v15087_v58, %v15088_v49 }
 0x59e   : > { %v1664_v17 = vpack.c.bf16 %v1614_v55, %v1612_v62  ;;  %v1663_v4 = vpack.c.bf16 %v1613_v29, %v1611_v33  ;;  %7851 = vpow2.f32 %v1423_v10  ;;  %v15091_v29 = vld [vmem:[#allocation107_spill] sm:$0xff]  ;;  %v15095_v33 = vmax.f32 %v15093_v1, %v15094_v40 }
 0x59f   : > { %7853 = vpow2.f32 %v1425_v47  ;;  %v11184_v45 = vpop.eup %7847  ;;  %v1427_v7 = vmul.f32 1.442695, %v1315_v0 }
 0x5a0   : > { %1811 = vmatprep.mubr.bf16.mxu0 %v1664_v17  ;;  %v11188_v51 = vpop.eup %7849  ;;  %v15090_v17 = vld [vmem:[#allocation106_spill] sm:$0xff] }
 0x5a1   : > { %7855 = vpow2.f32 %v1427_v7  ;;  %v1525_v62 = vadd.f32 %v11188_v51, %v11184_v45  ;;  %v15092_v26 = vmax.f32 %v15090_v17, %v15091_v29 }
 0x5a2   : > { %7857 = vpow2.f32 %v1429_v11 }
 0x5a3   : > { %1812 = vmatmul.mubr.bf16.gmra.mrb[56].mxu0 %v1663_v4  ;;  %7859 = vpow2.f32 %v1431_v12 }
 0x5a4   : > { %7861 = vpow2.f32 %v1433_v18 }
 0x5a8   : > { %v11195_v56 = vpop.eup %7851 }
 0x5a9   : > { %v11199_v55 = vpop.eup %7853 }
 0x5aa   : > { %v1528_v32 = vadd.f32 %v11199_v55, %v11195_v56 }
 0x5ab   : > { %v11210_v21 = vpop.eup %7855 }
 0x5ac   : > { %2279 = vmax.xlane.f32.xlu1 %v15084_v24  ;;  %v11212_v9 = vpop.eup %7857 }
 0x5ad   : > { %v11217_v10 = vpop.eup %7859  ;;  %v1531_v47 = vadd.f32 %v11212_v9, %v11210_v21 }
 0x5ae   : > { %v11221_v13 = vpop.eup %7861 }
 0x5af   : > { %v1534_v35 = vadd.f32 %v11221_v13, %v11217_v10 }
 0x5b0   : > { %2285 = vmax.xlane.f32.xlu1 %v15089_v19 }
 0x5b4   : > { %1526 = vadd.xlane.f32.xlu1 %v1525_v62 }
 0x5b7   : > { %v11203_v8 = vpop.xlane.xlu1 %2255 }
 0x5b8   : > { %1529 = vadd.xlane.f32.xlu1 %v1528_v32 }
 0x5ba   : > { %2282 = vmax.xlane.f32.xlu0 %v15092_v26 }
 0x5bb   : > { %v11208_v63 = vpop.xlane.xlu1 %2261 }
 0x5be   : > { %2288 = vmax.xlane.f32.xlu0 %v15095_v33 }
 0x5bf   : > { %v1503_v4 = vpop.xlane.xlu1 %1502 }
 0x5c0   : > { %7863 = vrcp.f32 %v1503_v4 }
 0x5c2   : > { %1532 = vadd.xlane.f32.xlu0 %v1531_v47 }
 0x5c3   : > { %v1506_v0 = vpop.xlane.xlu1 %1505 }
 0x5c4   : > { %7865 = vrcp.f32 %v1506_v0 }
 0x5c5   : > { %v11225_v20 = vpop.xlane.xlu0 %2258 }
 0x5c6   : > { %1535 = vadd.xlane.f32.xlu0 %v1534_v35 }
 0x5c7   : > { %v4051_v24 = vpop.permute.xlu1 %4050 }
 0x5c8   : > { %7029 = vmatprep.mubr.msk.bf16.mxu1 %vm881_vm2, %v4051_v24 }
 0x5c9   : > { %v11228_v7 = vpop.xlane.xlu0 %2264  ;;  %4058 = vrot.lane.b32.xlu1 %v15096_v23, %s8864_s10  ;;  %7030 = vmatmul.mubr.msk.bf16.gmra.mrb[212].mxu1 %vm881_vm2, %v4051_v24  ;;  %v15101_v24 = vld [vmem:[#allocation57_spill] sm:$0xff] }
 0x5ca   : > { %v7864_v53 = vpop.eup %7863 }
 0x5cb   : > { %v1616_v54 = vmul.f32 %v7864_v53, %v10918_v44  ;;  %v1615_v12 = vmul.f32 %v7864_v53, %v10914_v43  ;;  %v1319_v53 = vsub.f32 %v15101_v24, %v10767_v42 }
 0x5cd   : > { %v1509_v11 = vpop.xlane.xlu0 %1508 }
 0x5ce   : > { %v7866_v5 = vpop.eup %7865  ;;  %7867 = vrcp.f32 %v1509_v11  ;;  %v15102_v11 = vld [vmem:[#allocation45_spill] sm:$0xff] }
 0x5cf   : > { %v1618_v19 = vmul.f32 %v7866_v5, %v10937_v50  ;;  %v1617_v62 = vmul.f32 %v7866_v5, %v10931_v15  ;;  %v15104_v15 = vld [vmem:[#allocation61_spill] sm:$0xff] }
 0x5d0   : > { %v1321_v24 = vsub.f32 %v15104_v15, %v10784_v22  ;;  %v15110_v15 = vld [vmem:[#allocation113_spill] sm:$0xff] }
 0x5d1   : > { %v1512_v18 = vpop.xlane.xlu0 %1511  ;;  %v1666_v32 = vpack.c.bf16 %v1618_v19, %v1616_v54  ;;  %v1665_v26 = vpack.c.bf16 %v1617_v62, %v1615_v12  ;;  %v15103_v62 = vld [vmem:[#allocation63_spill] sm:$0xff] }
 0x5d2   : > { %7869 = vrcp.f32 %v1512_v18  ;;  %v1320_v18 = vsub.f32 %v15103_v62, %v10767_v42  ;;  %v15107_v42 = vld [vmem:[#allocation73_spill] sm:$0xff] }
 0x5d3   : > { %1819 = vmatprep.mubr.bf16.mxu0 %v1666_v32  ;;  %v11237_v33 = vpop.f32.mrb[192].mxu1 }
 0x5d4   : > { %15097 = vst [vmem:[#allocation98_spill] sm:$0xff] %v11237_v33  ;;  %1820 = vmatmul.mubr.bf16.gmra.mrb[60].mxu0 %v1665_v26  ;;  %v11239_v4 = vpop.f32.mrb[193].mxu1  ;;  %v1437_v44 = vmul.f32 1.442695, %v1320_v18  ;;  %v15114_v18 = vld [vmem:[#allocation81_spill] sm:$0xff] }
 0x5d5   : > { %15098 = vst [vmem:[#allocation99_spill] sm:$0xff] %v11239_v4  ;;  %v4053_v47 = vpop.permute.xlu0 %4052  ;;  %v11243_v50 = vpop.f32.mrb[194].mxu1 }
 0x5d6   : > { %15099 = vst [vmem:[#allocation50_spill] sm:$0xff] %v11243_v50  ;;  %v11245_v43 = vpop.f32.mrb[195].mxu1  ;;  %7031 = vmatprep.mubr.msk.bf16.mxu1 %vm881_vm2, %v4053_v47 }
 0x5d7   : > { %15100 = vst [vmem:[#allocation71_spill] sm:$0xff] %v11245_v43  ;;  %7032 = vmatmul.mubr.msk.bf16.gmra.mrb[216].mxu1 %vm881_vm2, %v4053_v47  ;;  %v1435_v47 = vmul.f32 1.442695, %v1319_v53  ;;  %v15105_v43 = vld [vmem:[#allocation67_spill] sm:$0xff] }
 0x5d8   : > { %v7868_v0 = vpop.eup %7867 }
 0x5d9   : > { %v1620_v5 = vmul.f32 %v7868_v0, %v10964_v37  ;;  %v1619_v19 = vmul.f32 %v7868_v0, %v10960_v2  ;;  %v1322_v37 = vsub.f32 %v15105_v43, %v10784_v22  ;;  %7871 = vpow2.f32 %v1435_v47  ;;  %v15112_v22 = vld [vmem:[#allocation60_spill] sm:$0xff] }
 0x5da   : > { %7873 = vpow2.f32 %v1437_v44  ;;  %v15113_v43 = vld [vmem:[#allocation80_spill] sm:$0xff] }
 0x5db   : > { %v1441_v2 = vmul.f32 1.442695, %v1322_v37  ;;  %v15115_v47 = vld [vmem:[#allocation116_spill] sm:$0xff] }
 0x5dc   : > { %v7870_v35 = vpop.eup %7869  ;;  %4060 = vrot.lane.b32.xlu0 %v15102_v11, %s8864_s10 }
 0x5dd   : > { %v1622_v54 = vmul.f32 %v7870_v35, %v10977_v39  ;;  %v1621_v12 = vmul.f32 %v7870_v35, %v10973_v48  ;;  %v1439_v39 = vmul.f32 1.442695, %v1321_v24  ;;  %v15106_v48 = vld [vmem:[#allocation58_spill] sm:$0xff]  ;;  %v15108_v35 = vld [vmem:[#allocation69_spill] sm:$0xff] }
 0x5de   : > { %v1323_v0 = vsub.f32 %v15107_v42, %v15106_v48  ;;  %v1324_v53 = vsub.f32 %v15108_v35, %v15106_v48  ;;  %v15116_v24 = vld [vmem:[#allocation117_spill] sm:$0xff] }
 0x5df   : > { %v1668_v32 = vpack.c.bf16 %v1622_v54, %v1620_v5  ;;  %v1667_v26 = vpack.c.bf16 %v1621_v12, %v1619_v19  ;;  %7875 = vpow2.f32 %v1439_v39  ;;  %v15109_v5 = vld [vmem:[#allocation112_spill] sm:$0xff]  ;;  %v1325_v12 = vsub.f32 %v15113_v43, %v15112_v22 }
 0x5e0   : > { %7877 = vpow2.f32 %v1441_v2  ;;  %v15111_v54 = vmax.f32 %v15109_v5, %v15110_v15  ;;  %v1443_v62 = vmul.f32 1.442695, %v1323_v0  ;;  %v15117_v37 = vmax.f32 %v15115_v47, %v15116_v24  ;;  %v15124_v24 = vld [vmem:[#allocation44_spill] sm:$0xff] }
 0x5e1   : > { %1827 = vmatprep.mubr.bf16.mxu0 %v1668_v32  ;;  %v1326_v32 = vsub.f32 %v15114_v18, %v15112_v22  ;;  %v1447_v2 = vmul.f32 1.442695, %v1325_v12  ;;  %v15119_v22 = vld [vmem:[#allocation115_spill] sm:$0xff] }
 0x5e2   : > { %1828 = vmatmul.mubr.bf16.gmra.mrb[64].mxu0 %v1667_v26  ;;  %v1445_v26 = vmul.f32 1.442695, %v1324_v53  ;;  %7879 = vpow2.f32 %v1443_v62 }
 0x5e3   : > { %v11272_v19 = vpop.eup %7871  ;;  %v1449_v0 = vmul.f32 1.442695, %v1326_v32  ;;  %v15121_v32 = vld [vmem:[#allocation118_spill] sm:$0xff] }
 0x5e4   : > { %v11276_v44 = vpop.eup %7873  ;;  %7881 = vpow2.f32 %v1445_v26  ;;  %v15122_v26 = vld [vmem:[#allocation119_spill] sm:$0xff] }
 0x5e5   : > { %v1537_v48 = vadd.f32 %v11276_v44, %v11272_v19  ;;  %7883 = vpow2.f32 %v1447_v2 }
 0x5e6   : > { %7885 = vpow2.f32 %v1449_v0 }
 0x5e9   : > { %v11283_v39 = vpop.eup %7875 }
 0x5ea   : > { %v11287_v42 = vpop.eup %7877 }
 0x5eb   : > { %v1540_v35 = vadd.f32 %v11287_v42, %v11283_v39 }
 0x5ec   : > { %v11298_v62 = vpop.eup %7879 }
 0x5ed   : > { %2291 = vmax.xlane.f32.xlu1 %v15111_v54  ;;  %v15118_v54 = vld [vmem:[#allocation114_spill] sm:$0xff] }
 0x5ee   : > { %v15120_v43 = vmax.f32 %v15118_v54, %v15119_v22  ;;  %v11300_v18 = vpop.eup %7881 }
 0x5ef   : > { %v1543_v0 = vadd.f32 %v11300_v18, %v11298_v62 }
 0x5f1   : > { %2297 = vmax.xlane.f32.xlu1 %v15117_v37  ;;  %v15123_v37 = vmax.f32 %v15121_v32, %v15122_v26 }
 0x5f5   : > { %1538 = vadd.xlane.f32.xlu1 %v1537_v48  ;;  %v11305_v48 = vpop.eup %7883 }
 0x5f8   : > { %v11291_v53 = vpop.xlane.xlu1 %2267 }
 0x5f9   : > { %1541 = vadd.xlane.f32.xlu1 %v1540_v35  ;;  %v11309_v35 = vpop.eup %7885 }
 0x5fa   : > { %v1546_v50 = vadd.f32 %v11309_v35, %v11305_v48 }
 0x5fb   : > { %2294 = vmax.xlane.f32.xlu0 %v15120_v43 }
 0x5fc   : > { %v11296_v12 = vpop.xlane.xlu1 %2273 }
 0x5ff   : > { %2300 = vmax.xlane.f32.xlu0 %v15123_v37 }
 0x600   : > { %v1515_v2 = vpop.xlane.xlu1 %1514 }
 0x601   : > { %7887 = vrcp.f32 %v1515_v2 }
 0x603   : > { %1544 = vadd.xlane.f32.xlu0 %v1543_v0 }
 0x604   : > { %v1518_v43 = vpop.xlane.xlu1 %1517 }
 0x605   : > { %7889 = vrcp.f32 %v1518_v43 }
 0x606   : > { %v11313_v4 = vpop.xlane.xlu0 %2270 }
 0x607   : > { %1547 = vadd.xlane.f32.xlu0 %v1546_v50 }
 0x608   : > { %v4055_v33 = vpop.permute.xlu1 %4054 }
 0x609   : > { %7033 = vmatprep.mubr.msk.bf16.mxu1 %vm881_vm2, %v4055_v33 }
 0x60a   : > { %v11316_v37 = vpop.xlane.xlu0 %2276  ;;  %4062 = vrot.lane.b32.xlu1 %v15124_v24, %s8864_s10  ;;  %7034 = vmatmul.mubr.msk.bf16.gmra.mrb[220].mxu1 %vm881_vm2, %v4055_v33 }
 0x60b   : > { %v7888_v2 = vpop.eup %7887 }
 0x60c   : > { %v1624_v26 = vmul.f32 %v7888_v2, %v11080_v60  ;;  %v1623_v50 = vmul.f32 %v7888_v2, %v11074_v52  ;;  %v15130_v2 = vld [vmem:[#allocation77_spill] sm:$0xff] }
 0x60e   : > { %v1521_v0 = vpop.xlane.xlu0 %1520 }
 0x60f   : > { %v7890_v47 = vpop.eup %7889  ;;  %7891 = vrcp.f32 %v1521_v0 }
 0x610   : > { %v11321_v43 = vpop.f32.mrb[196].mxu1  ;;  %v1626_v32 = vmul.f32 %v7890_v47, %v11101_v16  ;;  %v1625_v15 = vmul.f32 %v7890_v47, %v11093_v34  ;;  %v15129_v47 = vld [vmem:[#allocation197_spill] sm:$0xff] }
 0x611   : > { %15125 = vst [vmem:[#allocation51_spill] sm:$0xff] %v11321_v43  ;;  %v11327_v5 = vpop.f32.mrb[197].mxu1  ;;  %v1327_v0 = vsub.f32 %v15130_v2, %v15129_v47 }
 0x612   : > { %15126 = vst [vmem:[#allocation59_spill] sm:$0xff] %v11327_v5  ;;  %v1524_v33 = vpop.xlane.xlu0 %1523  ;;  %v11331_v54 = vpop.f32.mrb[198].mxu1  ;;  %v1670_v49 = vpack.c.bf16 %v1626_v32, %v1624_v26  ;;  %v1669_v58 = vpack.c.bf16 %v1625_v15, %v1623_v50  ;;  %v15131_v15 = vld [vmem:[#allocation47_spill] sm:$0xff]  ;;  %v15132_v50 = vld [vmem:[#allocation82_spill] sm:$0xff]  ;;  %v15134_v5 = vld [vmem:[#allocation84_spill] sm:$0xff] }
 0x613   : > { %15127 = vst [vmem:[#allocation55_spill] sm:$0xff] %v11331_v54  ;;  %7893 = vrcp.f32 %v1524_v33  ;;  %v11333_v40 = vpop.f32.mrb[199].mxu1  ;;  %v1328_v33 = vsub.f32 %v15132_v50, %v15129_v47  ;;  %v1451_v22 = vmul.f32 1.442695, %v1327_v0 }
 0x614   : > { %15128 = vst [vmem:[#allocation56_spill] sm:$0xff] %v11333_v40  ;;  %1835 = vmatprep.mubr.bf16.mxu0 %v1670_v49  ;;  %v15133_v40 = vld [vmem:[#allocation83_spill] sm:$0xff] }
 0x615   : > { %1836 = vmatmul.mubr.bf16.gmra.mrb[68].mxu0 %v1669_v58  ;;  %v1329_v2 = vsub.f32 %v15133_v40, %v11129_v25  ;;  %v1453_v54 = vmul.f32 1.442695, %v1328_v33  ;;  %7895 = vpow2.f32 %v1451_v22  ;;  %v15138_v40 = vld [vmem:[#allocation124_spill] sm:$0xff] }
 0x616   : > { %v4057_v52 = vpop.permute.xlu0 %4056 }
 0x617   : > { %7035 = vmatprep.mubr.msk.bf16.mxu1 %vm881_vm2, %v4057_v52  ;;  %7897 = vpow2.f32 %v1453_v54 }
 0x618   : > { %7036 = vmatmul.mubr.msk.bf16.gmra.mrb[224].mxu1 %vm881_vm2, %v4057_v52 }
 0x619   : > { %v7892_v34 = vpop.eup %7891 }
 0x61a   : > { %v1628_v32 = vmul.f32 %v7892_v34, %v11120_v14  ;;  %v1627_v49 = vmul.f32 %v7892_v34, %v11118_v36  ;;  %v1330_v14 = vsub.f32 %v15134_v5, %v11129_v25  ;;  %v15136_v34 = vld [vmem:[#allocation121_spill] sm:$0xff] }
 0x61c   : > { %v1457_v36 = vmul.f32 1.442695, %v1330_v14 }
 0x61d   : > { %v7894_v16 = vpop.eup %7893  ;;  %4064 = vrot.lane.b32.xlu0 %v15131_v15, %s8864_s10 }
 0x61e   : > { %v1630_v26 = vmul.f32 %v7894_v16, %v11131_v3  ;;  %v1629_v58 = vmul.f32 %v7894_v16, %v11122_v59  ;;  %v1455_v3 = vmul.f32 1.442695, %v1329_v2  ;;  %v15135_v59 = vld [vmem:[#allocation120_spill] sm:$0xff] }
 0x61f   : > { %v15137_v16 = vmax.f32 %v15135_v59, %v15136_v34  ;;  %v11356_v47 = vpop.eup %7895 }
 0x620   : > { %v1672_v52 = vpack.c.bf16 %v1630_v26, %v1628_v32  ;;  %v1671_v60 = vpack.c.bf16 %v1629_v58, %v1627_v49  ;;  %7899 = vpow2.f32 %v1455_v3  ;;  %v15139_v32 = vld [vmem:[#allocation125_spill] sm:$0xff]  ;;  %v15141_v49 = vld [vmem:[#allocation122_spill] sm:$0xff]  ;;  %v15142_v58 = vld [vmem:[#allocation123_spill] sm:$0xff] }
 0x621   : > { %7901 = vpow2.f32 %v1457_v36  ;;  %v11358_v0 = vpop.eup %7897  ;;  %v15140_v26 = vmax.f32 %v15138_v40, %v15139_v32  ;;  %v15143_v50 = vmax.f32 %v15141_v49, %v15142_v58  ;;  %v15146_v32 = vld [vmem:[#allocation46_spill] sm:$0xff] }
 0x622   : > { %1843 = vmatprep.mubr.bf16.mxu0 %v1672_v52  ;;  %v1549_v5 = vadd.f32 %v11358_v0, %v11356_v47 }
 0x623   : > { %1844 = vmatmul.mubr.bf16.gmra.mrb[72].mxu0 %v1671_v60 }
 0x62a   : > { %v11363_v25 = vpop.eup %7899 }
 0x62b   : > { %v11367_v54 = vpop.eup %7901 }
 0x62c   : > { %v1552_v22 = vadd.f32 %v11367_v54, %v11363_v25 }
 0x62e   : > { %2303 = vmax.xlane.f32.xlu1 %v15137_v16 }
 0x632   : > { %2309 = vmax.xlane.f32.xlu1 %v15140_v26 }
 0x636   : > { %1550 = vadd.xlane.f32.xlu1 %v1549_v5 }
 0x639   : > { %v11371_v60 = vpop.xlane.xlu1 %2279 }
 0x63a   : > { %1553 = vadd.xlane.f32.xlu1 %v1552_v22 }
 0x63c   : > { %2306 = vmax.xlane.f32.xlu0 %v15143_v50 }
 0x63d   : > { %v11376_v33 = vpop.xlane.xlu1 %2285 }
 0x641   : > { %v1527_v52 = vpop.xlane.xlu1 %1526 }
 0x642   : > { %7903 = vrcp.f32 %v1527_v52 }
 0x645   : > { %v1530_v2 = vpop.xlane.xlu1 %1529 }
 0x646   : > { %7905 = vrcp.f32 %v1530_v2  ;;  %v6587_v14 = vpop.f32.mrb[32].mxu0 }
 0x647   : > { %v6588_v3 = vpop.f32.mrb[33].mxu0  ;;  %v11378_v36 = vpop.xlane.xlu0 %2282 }
 0x648   : > { %v11380_v16 = vadd.f32 %v6588_v3, %v6587_v14  ;;  %v6590_v26 = vpop.f32.mrb[34].mxu0 }
 0x649   : > { %v6591_v5 = vpop.f32.mrb[35].mxu0  ;;  %v4059_v43 = vpop.permute.xlu1 %4058 }
 0x64a   : > { %15144 = vst [vmem:[#allocation104_spill] sm:$0xff] %v11380_v16  ;;  %v11382_v22 = vadd.f32 %v6591_v5, %v6590_v26  ;;  %7037 = vmatprep.mubr.msk.bf16.mxu1 %vm881_vm2, %v4059_v43 }
 0x64b   : > { %v11385_v50 = vpop.xlane.xlu0 %2288  ;;  %4066 = vrot.lane.b32.xlu1 %v15146_v32, %s8864_s10  ;;  %7038 = vmatmul.mubr.msk.bf16.gmra.mrb[228].mxu1 %vm881_vm2, %v4059_v43 }
 0x64c   : > { %15145 = vst [vmem:[#allocation105_spill] sm:$0xff] %v11382_v22  ;;  %v7904_v52 = vpop.eup %7903 }
 0x64d   : > { %v1632_v26 = vmul.f32 %v7904_v52, %v11188_v51  ;;  %v1631_v22 = vmul.f32 %v7904_v52, %v11184_v45 }
 0x64e   : > { %v6593_v2 = vpop.f32.mrb[36].mxu0 }
 0x64f   : > { %v6594_v40 = vpop.f32.mrb[37].mxu0  ;;  %v1533_v34 = vpop.xlane.xlu0 %1532 }
 0x650   : > { %v7906_v14 = vpop.eup %7905  ;;  %v11390_v3 = vadd.f32 %v6594_v40, %v6593_v2  ;;  %v6596_v16 = vpop.f32.mrb[38].mxu0  ;;  %7907 = vrcp.f32 %v1533_v34 }
 0x651   : > { %v6597_v59 = vpop.f32.mrb[39].mxu0  ;;  %v1634_v5 = vmul.f32 %v7906_v14, %v11199_v55  ;;  %v1633_v58 = vmul.f32 %v7906_v14, %v11195_v56 }
 0x652   : > { %15147 = vst [vmem:[#allocation75_spill] sm:$0xff] %v11390_v3  ;;  %v11396_v49 = vadd.f32 %v6597_v59, %v6596_v16  ;;  %2773 = vrot.lane.b32.xlu0 %v15075_v61, %s8865_s13  ;;  %v15156_v59 = vld [vmem:[#allocation85_spill] sm:$0xff] }
 0x653   : > { %v1536_v43 = vpop.xlane.xlu0 %1535  ;;  %v1674_v40 = vpack.c.bf16 %v1634_v5, %v1632_v26  ;;  %v1673_v2 = vpack.c.bf16 %v1633_v58, %v1631_v22 }
 0x654   : > { %15148 = vst [vmem:[#allocation54_spill] sm:$0xff] %v11396_v49  ;;  %7909 = vrcp.f32 %v1536_v43  ;;  %v15155_v43 = vld [vmem:[#allocation74_spill] sm:$0xff]  ;;  %v2342_v49 = vsub.f32 %v15156_v59, %v11113_v30 }
 0x655   : > { %1851 = vmatprep.mubr.bf16.mxu0 %v1674_v40  ;;  %v2341_v40 = vsub.f32 %v15155_v43, %v11113_v30 }
 0x656   : > { %1852 = vmatmul.mubr.bf16.gmra.mrb[76].mxu0 %v1673_v2  ;;  %v6599_v55 = vpop.f32.mrb[40].mxu0 }
 0x657   : > { %v4061_v51 = vpop.permute.xlu0 %4060  ;;  %v11400_v3 = vpop.f32.mrb[200].mxu1 }
 0x658   : > { %15149 = vst [vmem:[#allocation106_spill] sm:$0xff] %v11400_v3  ;;  %v11402_v45 = vpop.f32.mrb[201].mxu1  ;;  %7039 = vmatprep.mubr.msk.bf16.mxu1 %vm881_vm2, %v4061_v51  ;;  %v6600_v56 = vpop.f32.mrb[41].mxu0 }
 0x659   : > { %15150 = vst [vmem:[#allocation107_spill] sm:$0xff] %v11402_v45  ;;  %v11407_v34 = vpop.f32.mrb[202].mxu1  ;;  %7040 = vmatmul.mubr.msk.bf16.gmra.mrb[232].mxu1 %vm881_vm2, %v4061_v51  ;;  %v11410_v58 = vadd.f32 %v6600_v56, %v6599_v55  ;;  %v6602_v16 = vpop.f32.mrb[42].mxu0  ;;  %v2407_v45 = vmul.f32 1.442695, %v2342_v49 }
 0x65a   : > { %15151 = vst [vmem:[#allocation110_spill] sm:$0xff] %v11407_v34  ;;  %v11412_v22 = vpop.f32.mrb[203].mxu1  ;;  %v6603_v52 = vpop.f32.mrb[43].mxu0 }
 0x65b   : > { %15152 = vst [vmem:[#allocation57_spill] sm:$0xff] %v11410_v58  ;;  %15153 = vst [vmem:[#allocation63_spill] sm:$0xff] %v11412_v22  ;;  %v7908_v26 = vpop.eup %7907  ;;  %v11416_v5 = vadd.f32 %v6603_v52, %v6602_v16  ;;  %v2405_v52 = vmul.f32 1.442695, %v2341_v40 }
 0x65c   : > { %v1636_v55 = vmul.f32 %v7908_v26, %v11212_v9  ;;  %v1635_v58 = vmul.f32 %v7908_v26, %v11210_v21 }
 0x65d   : > { %15154 = vst [vmem:[#allocation61_spill] sm:$0xff] %v11416_v5  ;;  %7911 = vpow2.f32 %v2405_v52 }
 0x65e   : > { %v7910_v2 = vpop.eup %7909  ;;  %v6605_v22 = vpop.f32.mrb[44].mxu0  ;;  %7913 = vpow2.f32 %v2407_v45 }
 0x65f   : > { %v11422_v51 = vpop.f32.mrb[204].mxu1  ;;  %v1638_v56 = vmul.f32 %v7910_v2, %v11221_v13  ;;  %v1637_v14 = vmul.f32 %v7910_v2, %v11217_v10  ;;  %v6606_v5 = vpop.f32.mrb[45].mxu0 }
 0x660   : > { %15157 = vst [vmem:[#allocation67_spill] sm:$0xff] %v11422_v51  ;;  %v11428_v16 = vpop.f32.mrb[205].mxu1  ;;  %v11434_v9 = vadd.f32 %v6606_v5, %v6605_v22  ;;  %v6608_v13 = vpop.f32.mrb[46].mxu0  ;;  %v15172_v5 = vld [vmem:[#allocation128_spill] sm:$0xff] }
 0x661   : > { %15158 = vst [vmem:[#allocation58_spill] sm:$0xff] %v11428_v16  ;;  %v11432_v34 = vpop.f32.mrb[206].mxu1  ;;  %v1676_v30 = vpack.c.bf16 %v1638_v56, %v1636_v55  ;;  %v1675_v59 = vpack.c.bf16 %v1637_v14, %v1635_v58  ;;  %v6609_v21 = vpop.f32.mrb[47].mxu0 }
 0x662   : > { %15159 = vst [vmem:[#allocation73_spill] sm:$0xff] %v11432_v34  ;;  %15160 = vst [vmem:[#allocation69_spill] sm:$0xff] %v11434_v9  ;;  %v11436_v3 = vpop.f32.mrb[207].mxu1  ;;  %v11440_v26 = vadd.f32 %v6609_v21, %v6608_v13  ;;  %v15169_v13 = vld [vmem:[#allocation126_spill] sm:$0xff]  ;;  %v15170_v21 = vld [vmem:[#allocation127_spill] sm:$0xff] }
 0x663   : > { %15161 = vst [vmem:[#allocation60_spill] sm:$0xff] %v11436_v3  ;;  %1859 = vmatprep.mubr.bf16.mxu0 %v1676_v30 }
 0x664   : > { %15162 = vst [vmem:[#allocation80_spill] sm:$0xff] %v11440_v26  ;;  %1860 = vmatmul.mubr.bf16.gmra.mrb[80].mxu0 %v1675_v59 }
 0x666   : > { %v6611_v40 = vpop.f32.mrb[48].mxu0 }
 0x667   : > { %v6612_v2 = vpop.f32.mrb[49].mxu0  ;;  %v11458_v52 = vpop.eup %7911 }
 0x668   : > { %v11444_v49 = vadd.f32 %v6612_v2, %v6611_v40  ;;  %v6614_v58 = vpop.f32.mrb[50].mxu0  ;;  %v15171_v40 = vmax.f32 %v15169_v13, %v15170_v21  ;;  %v11463_v2 = vpop.eup %7913 }
 0x669   : > { %v11442_v55 = vpop.f32.mrb[208].mxu1  ;;  %v6615_v14 = vpop.f32.mrb[51].mxu0  ;;  %v2533_v45 = vadd.f32 %v11463_v2, %v11458_v52 }
 0x66a   : > { %15163 = vst [vmem:[#allocation81_spill] sm:$0xff] %v11442_v55  ;;  %15164 = vst [vmem:[#allocation197_spill] sm:$0xff] %v11444_v49  ;;  %v11446_v22 = vpop.f32.mrb[209].mxu1  ;;  %v11452_v30 = vadd.f32 %v6615_v14, %v6614_v58  ;;  %v15173_v49 = vld [vmem:[#allocation129_spill] sm:$0xff] }
 0x66b   : > { %15165 = vst [vmem:[#allocation77_spill] sm:$0xff] %v11446_v22  ;;  %v11450_v56 = vpop.f32.mrb[210].mxu1  ;;  %v15174_v9 = vmax.f32 %v15172_v5, %v15173_v49 }
 0x66c   : > { %15166 = vst [vmem:[#allocation82_spill] sm:$0xff] %v11450_v56  ;;  %15167 = vst [vmem:[#allocation83_spill] sm:$0xff] %v11452_v30  ;;  %v11454_v59 = vpop.f32.mrb[211].mxu1 }
 0x66d   : > { %15168 = vst [vmem:[#allocation84_spill] sm:$0xff] %v11454_v59 }
 0x66e   : > { %v6617_v10 = vpop.f32.mrb[52].mxu0 }
 0x66f   : > { %2312 = vmax.xlane.f32.xlu1 %v15171_v40  ;;  %v6618_v43 = vpop.f32.mrb[53].mxu0 }
 0x670   : > { %v11468_v58 = vadd.f32 %v6618_v43, %v6617_v10  ;;  %v6620_v14 = vpop.f32.mrb[54].mxu0 }
 0x671   : > { %2315 = vmax.xlane.f32.xlu0 %v15174_v9  ;;  %v6621_v30 = vpop.f32.mrb[55].mxu0  ;;  %v15179_v9 = vld [vmem:[#allocation35_spill] sm:$0xff] }
 0x672   : > { %15175 = vst [vmem:[#allocation74_spill] sm:$0xff] %v11468_v58  ;;  %v11472_v26 = vadd.f32 %v6621_v30, %v6620_v14 }
 0x674   : > { %15176 = vst [vmem:[#allocation85_spill] sm:$0xff] %v11472_v26 }
 0x675   : > { %2534 = vadd.xlane.f32.xlu0 %v2533_v45 }
 0x676   : > { %v6623_v59 = vpop.f32.mrb[56].mxu0 }
 0x677   : > { %v6624_v40 = vpop.f32.mrb[57].mxu0 }
 0x678   : > { %v11474_v56 = vadd.f32 %v6624_v40, %v6623_v59  ;;  %v6626_v3 = vpop.f32.mrb[58].mxu0  ;;  %v15180_v59 = vld [vmem:[#allocation86_spill] sm:$0xff] }
 0x679   : > { %v6627_v22 = vpop.f32.mrb[59].mxu0  ;;  %v2343_v14 = vsub.f32 %v15180_v59, %v11124_v6 }
 0x67a   : > { %15177 = vst [vmem:[#allocation126_spill] sm:$0xff] %v11474_v56  ;;  %v11476_v34 = vpop.xlane.xlu1 %2291  ;;  %v11478_v55 = vadd.f32 %v6627_v22, %v6626_v3  ;;  %v15181_v3 = vld [vmem:[#allocation87_spill] sm:$0xff] }
 0x67b   : > { %v2344_v22 = vsub.f32 %v15181_v3, %v11124_v6 }
 0x67c   : > { %15178 = vst [vmem:[#allocation127_spill] sm:$0xff] %v11478_v55  ;;  %v15182_v55 = vld [vmem:[#allocation34_spill] sm:$0xff] }
 0x67d   : > { %v2411_v58 = vmul.f32 1.442695, %v2344_v22 }
 0x67e   : > { %v11480_v43 = vpop.xlane.xlu1 %2297 }
 0x680   : > { %2757 = vrot.lane.b32.xlu1 %v15179_v9, %s8865_s13 }
 0x682   : > { %v1539_v10 = vpop.xlane.xlu1 %1538 }
 0x683   : > { %7915 = vrcp.f32 %v1539_v10  ;;  %v2409_v10 = vmul.f32 1.442695, %v2343_v14 }
 0x686   : > { %v1542_v30 = vpop.xlane.xlu1 %1541 }
 0x687   : > { %7917 = vrcp.f32 %v1542_v30 }
 0x688   : > { %v11484_v45 = vpop.xlane.xlu0 %2294  ;;  %7919 = vpow2.f32 %v2409_v10 }
 0x68a   : > { %v4063_v40 = vpop.permute.xlu1 %4062 }
 0x68b   : > { %2775 = vrot.lane.b32.xlu0 %v15096_v23, %s8865_s13  ;;  %7041 = vmatprep.mubr.msk.bf16.mxu1 %vm881_vm2, %v4063_v40 }
 0x68c   : > { %v11493_v56 = vpop.xlane.xlu0 %2300  ;;  %7042 = vmatmul.mubr.msk.bf16.gmra.mrb[236].mxu1 %vm881_vm2, %v4063_v40  ;;  %v15183_v40 = vld [vmem:[#allocation49_spill] sm:$0xff] }
 0x68d   : > { %v7916_v30 = vpop.eup %7915 }
 0x68e   : > { %v1640_v16 = vmul.f32 %v7916_v30, %v11276_v44  ;;  %v1639_v23 = vmul.f32 %v7916_v30, %v11272_v19 }
 0x68f   : > { %2759 = vrot.lane.b32.xlu0 %v15182_v55, %s8865_s13 }
 0x690   : > { %v1545_v59 = vpop.xlane.xlu0 %1544 }
 0x691   : > { %v7918_v26 = vpop.eup %7917  ;;  %7921 = vrcp.f32 %v1545_v59 }
 0x692   : > { %v1642_v51 = vmul.f32 %v7918_v26, %v11287_v42  ;;  %v1641_v6 = vmul.f32 %v7918_v26, %v11283_v39  ;;  %7923 = vpow2.f32 %v2411_v58  ;;  %v11508_v19 = vpop.eup %7919 }
 0x693   : > { %4068 = vrot.lane.b32.xlu0 %v15183_v40, %s8864_s10 }
 0x694   : > { %v1548_v14 = vpop.xlane.xlu0 %1547  ;;  %v1678_v3 = vpack.c.bf16 %v1642_v51, %v1640_v16  ;;  %v1677_v55 = vpack.c.bf16 %v1641_v6, %v1639_v23 }
 0x695   : > { %7925 = vrcp.f32 %v1548_v14  ;;  %v15188_v14 = vld [vmem:[#allocation89_spill] sm:$0xff] }
 0x696   : > { %1867 = vmatprep.mubr.bf16.mxu0 %v1678_v3  ;;  %v2347_v3 = vsub.f32 %v15188_v14, %v11203_v8 }
 0x697   : > { %2777 = vrot.lane.b32.xlu0 %v15102_v11, %s8865_s13  ;;  %1868 = vmatmul.mubr.bf16.gmra.mrb[84].mxu0 %v1677_v55 }
 0x698   : > { %v4065_v44 = vpop.permute.xlu0 %4064  ;;  %v2417_v10 = vmul.f32 1.442695, %v2347_v3 }
 0x699   : > { %7043 = vmatprep.mubr.msk.bf16.mxu1 %vm881_vm2, %v4065_v44 }
 0x69a   : > { %7044 = vmatmul.mubr.msk.bf16.gmra.mrb[240].mxu1 %vm881_vm2, %v4065_v44  ;;  %7927 = vpow2.f32 %v2417_v10 }
 0x69b   : > { %v7922_v42 = vpop.eup %7921 }
 0x69c   : > { %v11510_v39 = vpop.f32.mrb[212].mxu1  ;;  %v11514_v51 = vpop.eup %7923  ;;  %v1644_v22 = vmul.f32 %v7922_v42, %v11300_v18  ;;  %v1643_v59 = vmul.f32 %v7922_v42, %v11298_v62  ;;  %v15190_v62 = vld [vmem:[#allocation132_spill] sm:$0xff]  ;;  %v15191_v42 = vld [vmem:[#allocation133_spill] sm:$0xff] }
 0x69d   : > { %15184 = vst [vmem:[#allocation128_spill] sm:$0xff] %v11510_v39  ;;  %v11512_v26 = vpop.f32.mrb[213].mxu1  ;;  %v2536_v44 = vadd.f32 %v11514_v51, %v11508_v19  ;;  %v15189_v39 = vld [vmem:[#allocation90_spill] sm:$0xff] }
 0x69e   : > { %15185 = vst [vmem:[#allocation129_spill] sm:$0xff] %v11512_v26  ;;  %v11518_v16 = vpop.f32.mrb[214].mxu1  ;;  %v2348_v18 = vsub.f32 %v15189_v39, %v11203_v8 }
 0x69f   : > { %15186 = vst [vmem:[#allocation86_spill] sm:$0xff] %v11518_v16  ;;  %v7926_v55 = vpop.eup %7925  ;;  %v11520_v58 = vpop.f32.mrb[215].mxu1 }
 0x6a0   : > { %15187 = vst [vmem:[#allocation87_spill] sm:$0xff] %v11520_v58  ;;  %v1646_v30 = vmul.f32 %v7926_v55, %v11309_v35  ;;  %v1645_v6 = vmul.f32 %v7926_v55, %v11305_v48  ;;  %v2419_v35 = vmul.f32 1.442695, %v2348_v18  ;;  %v15192_v48 = vmax.f32 %v15190_v62, %v15191_v42 }
 0x6a2   : > { %v1680_v23 = vpack.c.bf16 %v1646_v30, %v1644_v22  ;;  %v1679_v26 = vpack.c.bf16 %v1645_v6, %v1643_v59  ;;  %7929 = vpow2.f32 %v2419_v35 }
 0x6a4   : > { %2537 = vadd.xlane.f32.xlu1 %v2536_v44  ;;  %1875 = vmatprep.mubr.bf16.mxu0 %v1680_v23  ;;  %v11553_v6 = vpop.eup %7927  ;;  %v15200_v44 = vld [vmem:[#allocation130_spill] sm:$0xff] }
 0x6a5   : > { %1876 = vmatmul.mubr.bf16.gmra.mrb[88].mxu0 %v1679_v26  ;;  %15199 = vst [vmem:[#allocation202_spill] sm:$0xff] %v11553_v6 }
 0x6a7   : > { %v6629_v58 = vpop.f32.mrb[60].mxu0 }
 0x6a8   : > { %2321 = vmax.xlane.f32.xlu1 %v15192_v48  ;;  %v6630_v55 = vpop.f32.mrb[61].mxu0 }
 0x6a9   : > { %v11537_v14 = vadd.f32 %v6630_v55, %v6629_v58  ;;  %v6632_v16 = vpop.f32.mrb[62].mxu0  ;;  %v15205_v58 = vld [vmem:[#allocation37_spill] sm:$0xff] }
 0x6aa   : > { %v6633_v22 = vpop.f32.mrb[63].mxu0  ;;  %v11539_v30 = vpop.f32.mrb[216].mxu1 }
 0x6ab   : > { %15193 = vst [vmem:[#allocation89_spill] sm:$0xff] %v11537_v14  ;;  %15194 = vst [vmem:[#allocation90_spill] sm:$0xff] %v11539_v30  ;;  %v11541_v8 = vadd.f32 %v6633_v22, %v6632_v16  ;;  %v11543_v39 = vpop.f32.mrb[217].mxu1  ;;  %v15201_v16 = vld [vmem:[#allocation131_spill] sm:$0xff] }
 0x6ac   : > { %15196 = vst [vmem:[#allocation133_spill] sm:$0xff] %v11543_v39  ;;  %v11547_v23 = vpop.f32.mrb[218].mxu1  ;;  %v11555_v10 = vpop.eup %7929  ;;  %v15202_v18 = vmax.f32 %v15200_v44, %v15201_v16 }
 0x6ad   : > { %15195 = vst [vmem:[#allocation132_spill] sm:$0xff] %v11541_v8  ;;  %15197 = vst [vmem:[#allocation200_spill] sm:$0xff] %v11547_v23  ;;  %v11549_v59 = vpop.f32.mrb[219].mxu1  ;;  %v2542_v26 = vadd.f32 %v11555_v10, %v11553_v6 }
 0x6ae   : > { %15198 = vst [vmem:[#allocation201_spill] sm:$0xff] %v11549_v59 }
 0x6b5   : > { %v6635_v3 = vpop.f32.mrb[64].mxu0 }
 0x6b6   : > { %2318 = vmax.xlane.f32.xlu0 %v15202_v18  ;;  %v6636_v35 = vpop.f32.mrb[65].mxu0  ;;  %v15206_v18 = vld [vmem:[#allocation78_spill] sm:$0xff] }
 0x6b7   : > { %v11560_v48 = vadd.f32 %v6636_v35, %v6635_v3  ;;  %v6638_v55 = vpop.f32.mrb[66].mxu0  ;;  %v2345_v3 = vsub.f32 %v15206_v18, %v11148_v38  ;;  %v15207_v35 = vld [vmem:[#allocation88_spill] sm:$0xff] }
 0x6b8   : > { %v6639_v22 = vpop.f32.mrb[67].mxu0 }
 0x6b9   : > { %15203 = vst [vmem:[#allocation130_spill] sm:$0xff] %v11560_v48  ;;  %v11564_v14 = vadd.f32 %v6639_v22, %v6638_v55  ;;  %2761 = vrot.lane.b32.xlu1 %v15205_v58, %s8865_s13  ;;  %v2346_v48 = vsub.f32 %v15207_v35, %v11148_v38  ;;  %v2413_v55 = vmul.f32 1.442695, %v2345_v3  ;;  %v15208_v35 = vld [vmem:[#allocation36_spill] sm:$0xff] }
 0x6ba   : > { %2543 = vadd.xlane.f32.xlu0 %v2542_v26 }
 0x6bb   : > { %15204 = vst [vmem:[#allocation131_spill] sm:$0xff] %v11564_v14  ;;  %v11568_v8 = vpop.xlane.xlu1 %2303  ;;  %v2415_v14 = vmul.f32 1.442695, %v2346_v48 }
 0x6bf   : > { %v11570_v59 = vpop.xlane.xlu1 %2309 }
 0x6c3   : > { %v1551_v23 = vpop.xlane.xlu1 %1550 }
 0x6c4   : > { %7931 = vrcp.f32 %v1551_v23 }
 0x6c7   : > { %v1554_v39 = vpop.xlane.xlu1 %1553 }
 0x6c8   : > { %7933 = vrcp.f32 %v1554_v39 }
 0x6c9   : > { %v11576_v22 = vpop.xlane.xlu0 %2306  ;;  %7935 = vpow2.f32 %v2413_v55 }
 0x6ca   : > { %7937 = vpow2.f32 %v2415_v14 }
 0x6cb   : > { %v4067_v30 = vpop.permute.xlu1 %4066 }
 0x6cc   : > { %7045 = vmatprep.mubr.msk.bf16.mxu1 %vm881_vm2, %v4067_v30 }
 0x6cd   : > { %v2774_v26 = vpop.permute.xlu0 %2773  ;;  %7046 = vmatmul.mubr.msk.bf16.gmra.mrb[244].mxu1 %vm881_vm2, %v4067_v30 }
 0x6ce   : > { %6731 = vmatprep.subr.bf16.mxu0 %v2774_v26  ;;  %v7932_v18 = vpop.eup %7931 }
 0x6cf   : > { %v1648_v39 = vmul.f32 %v7932_v18, %v11358_v0  ;;  %v1647_v48 = vmul.f32 %v7932_v18, %v11356_v47 }
 0x6d0   : > { %2779 = vrot.lane.b32.xlu0 %v15124_v24, %s8865_s13 }
 0x6d2   : > { %v7934_v38 = vpop.eup %7933 }
 0x6d3   : > { %v1650_v23 = vmul.f32 %v7934_v38, %v11367_v54  ;;  %v1649_v3 = vmul.f32 %v7934_v38, %v11363_v25  ;;  %v11588_v14 = vpop.eup %7935 }
 0x6d4   : > { %2763 = vrot.lane.b32.xlu0 %v15208_v35, %s8865_s13  ;;  %15209 = vst [vmem:[#allocation78_spill] sm:$0xff] %v11588_v14  ;;  %v11590_v26 = vpop.eup %7937  ;;  %v15226_v35 = vld [vmem:[#allocation79_spill] sm:$0xff] }
 0x6d5   : > { %v1682_v55 = vpack.c.bf16 %v1650_v23, %v1648_v39  ;;  %v1681_v30 = vpack.c.bf16 %v1649_v3, %v1647_v48  ;;  %v2539_v0 = vadd.f32 %v11590_v26, %v11588_v14  ;;  %v2349_v58 = vsub.f32 %v15226_v35, %v11225_v20  ;;  %v15256_v14 = vld [vmem:[#allocation96_spill] sm:$0xff] }
 0x6d7   : > { %1883 = vmatprep.mubr.bf16.mxu0 %v1682_v55 }
 0x6d8   : > { %2781 = vrot.lane.b32.xlu0 %v15131_v15, %s8865_s13  ;;  %1884 = vmatmul.mubr.bf16.gmra.mrb[92].mxu0 %v1681_v30 }
 0x6dd   : > { %2540 = vadd.xlane.f32.xlu1 %v2539_v0  ;;  %v11596_v47 = vpop.f32.mrb[220].mxu1 }
 0x6de   : > { %15210 = vst [vmem:[#allocation88_spill] sm:$0xff] %v11596_v47  ;;  %v11598_v25 = vpop.f32.mrb[221].mxu1  ;;  %v15219_v47 = vld [vmem:[#allocation48_spill] sm:$0xff] }
 0x6df   : > { %15211 = vst [vmem:[#allocation203_spill] sm:$0xff] %v11598_v25  ;;  %v11602_v18 = vpop.f32.mrb[222].mxu1 }
 0x6e0   : > { %15212 = vst [vmem:[#allocation204_spill] sm:$0xff] %v11602_v18  ;;  %v11604_v38 = vpop.f32.mrb[223].mxu1 }
 0x6e1   : > { %15213 = vst [vmem:[#allocation205_spill] sm:$0xff] %v11604_v38  ;;  %v15222_v38 = vld [vmem:[#allocation135_spill] sm:$0xff] }
 0x6e8   : > { %v6641_v23 = vpop.f32.mrb[68].mxu0 }
 0x6e9   : > { %v6642_v48 = vpop.f32.mrb[69].mxu0 }
 0x6ea   : > { %v11608_v3 = vadd.f32 %v6642_v48, %v6641_v23  ;;  %v6644_v55 = vpop.f32.mrb[70].mxu0  ;;  %v15227_v23 = vld [vmem:[#allocation91_spill] sm:$0xff] }
 0x6eb   : > { %v6645_v30 = vpop.f32.mrb[71].mxu0  ;;  %v11610_v0 = vpop.f32.mrb[224].mxu1 }
 0x6ec   : > { %15214 = vst [vmem:[#allocation206_spill] sm:$0xff] %v11608_v3  ;;  %15215 = vst [vmem:[#allocation207_spill] sm:$0xff] %v11610_v0  ;;  %v11612_v24 = vadd.f32 %v6645_v30, %v6644_v55  ;;  %v11614_v15 = vpop.f32.mrb[225].mxu1  ;;  %v15221_v3 = vld [vmem:[#allocation134_spill] sm:$0xff] }
 0x6ed   : > { %15217 = vst [vmem:[#allocation209_spill] sm:$0xff] %v11614_v15  ;;  %v11618_v25 = vpop.f32.mrb[226].mxu1  ;;  %v15223_v55 = vmax.f32 %v15221_v3, %v15222_v38 }
 0x6ee   : > { %15216 = vst [vmem:[#allocation208_spill] sm:$0xff] %v11612_v24  ;;  %15218 = vst [vmem:[#allocation210_spill] sm:$0xff] %v11618_v25  ;;  %4070 = vrot.lane.b32.xlu1 %v15219_v47, %s8864_s10  ;;  %v11622_v39 = vpop.f32.mrb[227].mxu1 }
 0x6ef   : > { %15220 = vst [vmem:[#allocation211_spill] sm:$0xff] %v11622_v39  ;;  %v2350_v39 = vsub.f32 %v15227_v23, %v11225_v20  ;;  %v15230_v20 = vld [vmem:[#allocation39_spill] sm:$0xff] }
 0x6f6   : > { %v6647_v48 = vpop.f32.mrb[72].mxu0 }
 0x6f7   : > { %2324 = vmax.xlane.f32.xlu0 %v15223_v55  ;;  %v6648_v30 = vpop.f32.mrb[73].mxu0  ;;  %v15228_v55 = vld [vmem:[#allocation92_spill] sm:$0xff] }
 0x6f8   : > { %v11629_v24 = vadd.f32 %v6648_v30, %v6647_v48  ;;  %v6650_v18 = vpop.f32.mrb[74].mxu0  ;;  %v2351_v48 = vsub.f32 %v15228_v55, %v11208_v63  ;;  %v2421_v30 = vmul.f32 1.442695, %v2349_v58 }
 0x6f9   : > { %v6651_v54 = vpop.f32.mrb[75].mxu0 }
 0x6fa   : > { %15224 = vst [vmem:[#allocation134_spill] sm:$0xff] %v11629_v24  ;;  %v11631_v15 = vadd.f32 %v6651_v54, %v6650_v18  ;;  %v15229_v54 = vld [vmem:[#allocation93_spill] sm:$0xff]  ;;  %v2425_v9 = vmul.f32 1.442695, %v2351_v48  ;;  %7939 = vpow2.f32 %v2421_v30 }
 0x6fb   : > { %v2352_v18 = vsub.f32 %v15229_v54, %v11208_v63 }
 0x6fc   : > { %15225 = vst [vmem:[#allocation135_spill] sm:$0xff] %v11631_v15  ;;  %v11633_v0 = vpop.xlane.xlu1 %2312  ;;  %v2423_v15 = vmul.f32 1.442695, %v2350_v39 }
 0x6fd   : > { %v2427_v35 = vmul.f32 1.442695, %v2352_v18 }
 0x6fe   : > { %v11637_v11 = vpop.xlane.xlu0 %2315  ;;  %7941 = vpow2.f32 %v2423_v15  ;;  %v15233_v15 = vld [vmem:[#allocation136_spill] sm:$0xff] }
 0x6ff   : > { %7943 = vpow2.f32 %v2425_v9  ;;  %v15234_v9 = vld [vmem:[#allocation137_spill] sm:$0xff] }
 0x700   : > { %v2758_v25 = vpop.permute.xlu1 %2757  ;;  %7945 = vpow2.f32 %v2427_v35  ;;  %v15235_v39 = vmax.f32 %v15233_v15, %v15234_v9 }
 0x701   : > { %6732 = vmatpush3.bf16.msra.mxu0 %v2758_v25 }
 0x702   : > { %v2535_v24 = vpop.xlane.xlu0 %2534 }
 0x703   : > { %7947 = vrcp.f32 %v2535_v24  ;;  %v15253_v24 = vld [vmem:[#allocation94_spill] sm:$0xff] }
 0x704   : > { %v11648_v58 = vpop.eup %7939 }
 0x705   : > { %15231 = vst [vmem:[#allocation79_spill] sm:$0xff] %v11648_v58 }
 0x706   : > { %v2776_v61 = vpop.permute.xlu0 %2775 }
 0x707   : > { %6733 = vmatprep.subr.bf16.mxu0 %v2776_v61 }
 0x708   : > { %v11651_v63 = vpop.eup %7941 }
 0x709   : > { %15232 = vst [vmem:[#allocation91_spill] sm:$0xff] %v11651_v63  ;;  %v2545_v23 = vadd.f32 %v11651_v63, %v11648_v58 }
 0x70a   : > { %v2760_v6 = vpop.permute.xlu0 %2759 }
 0x70b   : > { %6734 = vmatpush3.bf16.msra.mxu0 %v2760_v6  ;;  %v11658_v6 = vpop.eup %7943 }
 0x70c   : > { %15236 = vst [vmem:[#allocation92_spill] sm:$0xff] %v11658_v6  ;;  %v11662_v55 = vpop.eup %7945 }
 0x70d   : > { %2765 = vrot.lane.b32.xlu0 %v15230_v20, %s8865_s13  ;;  %15237 = vst [vmem:[#allocation93_spill] sm:$0xff] %v11662_v55  ;;  %v2548_v48 = vadd.f32 %v11662_v55, %v11658_v6 }
 0x70e   : > { %v4069_v25 = vpop.permute.xlu0 %4068 }
 0x70f   : > { %7047 = vmatprep.mubr.msk.bf16.mxu1 %vm881_vm2, %v4069_v25 }
 0x710   : > { %7048 = vmatmul.mubr.msk.bf16.gmra.mrb[248].mxu1 %vm881_vm2, %v4069_v25 }
 0x711   : > { %2783 = vrot.lane.b32.xlu0 %v15146_v32, %s8865_s13 }
 0x712   : > { %v2778_v61 = vpop.permute.xlu0 %2777  ;;  %2327 = vmax.xlane.f32.xlu1 %v15235_v39 }
 0x713   : > { %6735 = vmatprep.subr.bf16.mxu0 %v2778_v61 }
 0x715   : > { %2785 = vrot.lane.b32.xlu0 %v15183_v40, %s8865_s13 }
 0x716   : > { %2546 = vadd.xlane.f32.xlu1 %v2545_v23 }
 0x71a   : > { %2549 = vadd.xlane.f32.xlu1 %v2548_v48  ;;  %v15243_v48 = vld [vmem:[#allocation38_spill] sm:$0xff] }
 0x71e   : > { %v11668_v30 = vpop.f32.mrb[228].mxu1 }
 0x71f   : > { %15238 = vst [vmem:[#allocation136_spill] sm:$0xff] %v11668_v30  ;;  %v11670_v54 = vpop.f32.mrb[229].mxu1 }
 0x720   : > { %15239 = vst [vmem:[#allocation137_spill] sm:$0xff] %v11670_v54  ;;  %v11674_v35 = vpop.f32.mrb[230].mxu1 }
 0x721   : > { %15240 = vst [vmem:[#allocation212_spill] sm:$0xff] %v11674_v35  ;;  %v11676_v25 = vpop.f32.mrb[231].mxu1 }
 0x722   : > { %15241 = vst [vmem:[#allocation213_spill] sm:$0xff] %v11676_v25  ;;  %v15250_v25 = vld [vmem:[#allocation139_spill] sm:$0xff] }
 0x729   : > { %v6653_v39 = vpop.f32.mrb[76].mxu0 }
 0x72a   : > { %v6654_v23 = vpop.f32.mrb[77].mxu0 }
 0x72b   : > { %v11680_v32 = vadd.f32 %v6654_v23, %v6653_v39  ;;  %2767 = vrot.lane.b32.xlu1 %v15243_v48, %s8865_s13  ;;  %v6656_v40 = vpop.f32.mrb[78].mxu0  ;;  %v2353_v39 = vsub.f32 %v15253_v24, %v11228_v7  ;;  %v2355_v24 = vsub.f32 %v15256_v14, %v11291_v53  ;;  %v15258_v14 = vld [vmem:[#allocation41_spill] sm:$0xff] }
 0x72c   : > { %v6657_v20 = vpop.f32.mrb[79].mxu0  ;;  %v11684_v58 = vpop.f32.mrb[232].mxu1 }
 0x72d   : > { %15242 = vst [vmem:[#allocation214_spill] sm:$0xff] %v11680_v32  ;;  %15244 = vst [vmem:[#allocation215_spill] sm:$0xff] %v11684_v58  ;;  %v11686_v6 = vadd.f32 %v6657_v20, %v6656_v40  ;;  %v11688_v18 = vpop.f32.mrb[233].mxu1  ;;  %v15249_v32 = vld [vmem:[#allocation138_spill] sm:$0xff]  ;;  %v7948_v58 = vpop.eup %7947 }
 0x72e   : > { %15246 = vst [vmem:[#allocation217_spill] sm:$0xff] %v11688_v18  ;;  %v11692_v30 = vpop.f32.mrb[234].mxu1  ;;  %v15251_v35 = vmax.f32 %v15249_v32, %v15250_v25  ;;  %v11712_v55 = vmul.f32 %v7948_v58, %v11458_v52 }
 0x72f   : > { %15245 = vst [vmem:[#allocation216_spill] sm:$0xff] %v11686_v6  ;;  %15247 = vst [vmem:[#allocation218_spill] sm:$0xff] %v11692_v30  ;;  %v11694_v61 = vpop.f32.mrb[235].mxu1  ;;  %v15255_v30 = vld [vmem:[#allocation95_spill] sm:$0xff] }
 0x730   : > { %15248 = vst [vmem:[#allocation219_spill] sm:$0xff] %v11694_v61 }
 0x731   : > { %v2538_v23 = vpop.xlane.xlu1 %2537 }
 0x732   : > { %7949 = vrcp.f32 %v2538_v23 }
 0x734   : > { %2330 = vmax.xlane.f32.xlu0 %v15251_v35  ;;  %v2354_v35 = vsub.f32 %v15255_v30, %v11228_v7  ;;  %v15257_v7 = vld [vmem:[#allocation97_spill] sm:$0xff] }
 0x735   : > { %v11701_v40 = vpop.xlane.xlu1 %2321  ;;  %v2356_v52 = vsub.f32 %v15257_v7, %v11291_v53 }
 0x737   : > { %v6659_v20 = vpop.f32.mrb[80].mxu0 }
 0x738   : > { %v6660_v6 = vpop.f32.mrb[81].mxu0 }
 0x739   : > { %v11703_v48 = vadd.f32 %v6660_v6, %v6659_v20  ;;  %v6662_v54 = vpop.f32.mrb[82].mxu0  ;;  %v2762_v18 = vpop.permute.xlu1 %2761  ;;  %v2662_v20 = vmul.f32 %v7948_v58, %v11463_v2  ;;  %v2435_v2 = vmul.f32 1.442695, %v2356_v52  ;;  %v2357_v52 = vsub.f32 %v15069_v28, %v11313_v4 }
 0x73a   : > { %v6663_v63 = vpop.f32.mrb[83].mxu0  ;;  %6736 = vmatpush3.bf16.msra.mxu0 %v2762_v18  ;;  %v2429_v18 = vmul.f32 1.442695, %v2353_v39 }
 0x73b   : > { %15252 = vst [vmem:[#allocation138_spill] sm:$0xff] %v11703_v48  ;;  %v11707_v61 = vadd.f32 %v6663_v63, %v6662_v54 }
 0x73c   : > { %v7950_v23 = vpop.eup %7949  ;;  %7951 = vpow2.f32 %v2429_v18 }
 0x73d   : > { %15254 = vst [vmem:[#allocation139_spill] sm:$0xff] %v11707_v61  ;;  %v11715_v6 = vmul.f32 %v7950_v23, %v11508_v19  ;;  %v2664_v48 = vmul.f32 %v7950_v23, %v11514_v51  ;;  %v2431_v61 = vmul.f32 1.442695, %v2354_v35  ;;  %v2433_v19 = vmul.f32 1.442695, %v2355_v24  ;;  %v15260_v23 = vld [vmem:[#allocation140_spill] sm:$0xff] }
 0x73f   : > { %v2726_v63 = vpack.c.bf16 %v2664_v48, %v2662_v20  ;;  %7953 = vpow2.f32 %v2431_v61  ;;  %v15261_v61 = vld [vmem:[#allocation141_spill] sm:$0xff] }
 0x740   : > { %7955 = vpow2.f32 %v2433_v19  ;;  %v15262_v35 = vmax.f32 %v15260_v23, %v15261_v61  ;;  %v2358_v19 = vsub.f32 %v15070_v27, %v11313_v4 }
 0x741   : > { %2837 = vmatprep.mubr.bf16.mxu0 %v2726_v63  ;;  %7957 = vpow2.f32 %v2435_v2  ;;  %v2359_v2 = vsub.f32 %v15063_v41, %v11296_v12 }
 0x742   : > { %v2439_v54 = vmul.f32 1.442695, %v2358_v19  ;;  %v15269_v19 = vld [vmem:[#allocation103_spill] sm:$0xff] }
 0x743   : > { %v11725_v30 = vpop.xlane.xlu0 %2318 }
 0x746   : > { %v11731_v48 = vpop.eup %7951 }
 0x747   : > { %v11727_v51 = vpop.xlane.xlu0 %2543  ;;  %15259 = vst [vmem:[#allocation94_spill] sm:$0xff] %v11731_v48 }
 0x749   : > { %v11733_v39 = vpop.eup %7953 }
 0x74a   : > { %2769 = vrot.lane.b32.xlu0 %v15258_v14, %s8865_s13  ;;  %v11740_v20 = vpop.eup %7955  ;;  %v2551_v18 = vadd.f32 %v11733_v39, %v11731_v48 }
 0x74b   : > { %v2780_v58 = vpop.permute.xlu0 %2779  ;;  %v11744_v24 = vpop.eup %7957 }
 0x74c   : > { %6737 = vmatprep.subr.bf16.mxu0 %v2780_v58  ;;  %v2554_v7 = vadd.f32 %v11744_v24, %v11740_v20  ;;  %v2437_v58 = vmul.f32 1.442695, %v2357_v52 }
 0x74e   : > { %2787 = vrot.lane.b32.xlu0 %v15219_v47, %s8865_s13  ;;  %v2441_v47 = vmul.f32 1.442695, %v2359_v2  ;;  %7959 = vpow2.f32 %v2437_v58  ;;  %v2362_v2 = vsub.f32 %v15269_v19, %v11316_v37 }
 0x74f   : > { %v2764_v53 = vpop.permute.xlu0 %2763  ;;  %2333 = vmax.xlane.f32.xlu1 %v15262_v35  ;;  %7961 = vpow2.f32 %v2439_v54 }
 0x750   : > { %6738 = vmatpush3.bf16.msra.mxu0 %v2764_v53  ;;  %v15263_v53 = vld [vmem:[#allocation101_spill] sm:$0xff]  ;;  %7963 = vpow2.f32 %v2441_v47 }
 0x751   : > { %v2360_v35 = vsub.f32 %v15263_v53, %v11296_v12  ;;  %v15268_v12 = vld [vmem:[#allocation102_spill] sm:$0xff] }
 0x752   : > { %v2361_v52 = vsub.f32 %v15268_v12, %v11316_v37  ;;  %v2447_v37 = vmul.f32 1.442695, %v2362_v2 }
 0x753   : > { %v2782_v63 = vpop.permute.xlu0 %2781  ;;  %2552 = vadd.xlane.f32.xlu1 %v2551_v18  ;;  %v2443_v27 = vmul.f32 1.442695, %v2360_v35 }
 0x754   : > { %6739 = vmatprep.subr.bf16.mxu0 %v2782_v63 }
 0x755   : > { %7965 = vpow2.f32 %v2443_v27  ;;  %v2445_v27 = vmul.f32 1.442695, %v2361_v52 }
 0x757   : > { %2555 = vadd.xlane.f32.xlu1 %v2554_v7  ;;  %7967 = vpow2.f32 %v2445_v27 }
 0x758   : > { %v11776_v54 = vpop.eup %7959  ;;  %7969 = vpow2.f32 %v2447_v37  ;;  %v2369_v37 = vsub.f32 %v15093_v1, %v11385_v50 }
 0x759   : > { %v11778_v28 = vpop.eup %7961 }
 0x75a   : > { %v11791_v48 = vpop.eup %7963 }
 0x75f   : > { %v11756_v18 = vpop.f32.mrb[236].mxu1  ;;  %v11800_v52 = vpop.eup %7965 }
 0x760   : > { %15264 = vst [vmem:[#allocation95_spill] sm:$0xff] %v11756_v18  ;;  %v11758_v63 = vpop.f32.mrb[237].mxu1 }
 0x761   : > { %15265 = vst [vmem:[#allocation96_spill] sm:$0xff] %v11758_v63  ;;  %v11762_v7 = vpop.f32.mrb[238].mxu1 }
 0x762   : > { %15266 = vst [vmem:[#allocation97_spill] sm:$0xff] %v11762_v7  ;;  %v11764_v4 = vpop.f32.mrb[239].mxu1  ;;  %v15272_v7 = vld [vmem:[#allocation143_spill] sm:$0xff] }
 0x763   : > { %15267 = vst [vmem:[#allocation140_spill] sm:$0xff] %v11764_v4  ;;  %v15271_v4 = vld [vmem:[#allocation142_spill] sm:$0xff] }
 0x764   : > { %v15273_v63 = vmax.f32 %v15271_v4, %v15272_v7 }
 0x768   : > { %2771 = vrot.lane.b32.xlu1 %v9517_v57, %s8865_s13 }
 0x76a   : > { %v6665_v58 = vpop.f32.mrb[84].mxu0  ;;  %v11774_v53 = vpop.xlane.xlu1 %2540 }
 0x76b   : > { %v6666_v35 = vpop.f32.mrb[85].mxu0 }
 0x76c   : > { %v11780_v41 = vadd.f32 %v6666_v35, %v6665_v58  ;;  %v6668_v47 = vpop.f32.mrb[86].mxu0  ;;  %v2366_v58 = vsub.f32 %v15091_v29, %v11378_v36 }
 0x76d   : > { %2336 = vmax.xlane.f32.xlu0 %v15273_v63  ;;  %v6669_v12 = vpop.f32.mrb[87].mxu0  ;;  %v11785_v18 = vpop.f32.mrb[240].mxu1  ;;  %v2557_v63 = vadd.f32 %v11778_v28, %v11776_v54 }
 0x76e   : > { %15270 = vst [vmem:[#allocation141_spill] sm:$0xff] %v11780_v41  ;;  %15274 = vst [vmem:[#allocation101_spill] sm:$0xff] %v11785_v18  ;;  %v11787_v19 = vadd.f32 %v6669_v12, %v6668_v47  ;;  %v11789_v57 = vpop.f32.mrb[241].mxu1  ;;  %v4071_v14 = vpop.permute.xlu1 %4070  ;;  %v2365_v47 = vsub.f32 %v15090_v17, %v11378_v36  ;;  %v2560_v41 = vadd.f32 %v11800_v52, %v11791_v48  ;;  %v15280_v12 = vld [vmem:[#allocation147_spill] sm:$0xff]  ;;  %v2461_v18 = vmul.f32 1.442695, %v2369_v37 }
 0x76f   : > { %15276 = vst [vmem:[#allocation103_spill] sm:$0xff] %v11789_v57  ;;  %v11795_v35 = vpop.f32.mrb[242].mxu1  ;;  %7049 = vmatprep.mubr.msk.bf16.mxu1 %vm881_vm2, %v4071_v14  ;;  %v2455_v57 = vmul.f32 1.442695, %v2366_v58  ;;  %v2364_v17 = vsub.f32 %v15083_v31, %v11371_v60 }
 0x770   : > { %15275 = vst [vmem:[#allocation102_spill] sm:$0xff] %v11787_v19  ;;  %15277 = vst [vmem:[#allocation142_spill] sm:$0xff] %v11795_v35  ;;  %v11802_v2 = vpop.f32.mrb[243].mxu1  ;;  %7050 = vmatmul.mubr.msk.bf16.gmra.mrb[252].mxu1 %vm881_vm2, %v4071_v14  ;;  %v2453_v19 = vmul.f32 1.442695, %v2365_v47  ;;  %v2363_v14 = vsub.f32 %v15082_v46, %v11371_v60 }
 0x771   : > { %15278 = vst [vmem:[#allocation143_spill] sm:$0xff] %v11802_v2  ;;  %2558 = vadd.xlane.f32.xlu0 %v2557_v63  ;;  %v15279_v63 = vld [vmem:[#allocation146_spill] sm:$0xff]  ;;  %v11826_v2 = vpop.eup %7967  ;;  %v2451_v35 = vmul.f32 1.442695, %v2364_v17 }
 0x772   : > { %7971 = vpow2.f32 %v2453_v19  ;;  %v15281_v29 = vmax.f32 %v15279_v63, %v15280_v12  ;;  %v2449_v31 = vmul.f32 1.442695, %v2363_v14  ;;  %v11828_v19 = vpop.eup %7969  ;;  %v15285_v12 = vld [vmem:[#allocation148_spill] sm:$0xff]  ;;  %v15289_v14 = vld [vmem:[#allocation109_spill] sm:$0xff]  ;;  %v15290_v17 = vld [vmem:[#allocation114_spill] sm:$0xff] }
 0x773   : > { %7973 = vpow2.f32 %v2455_v57  ;;  %v2373_v37 = vsub.f32 %v15290_v17, %v11484_v45 }
 0x774   : > { %7975 = vpow2.f32 %v2449_v31 }
 0x775   : > { %2561 = vadd.xlane.f32.xlu0 %v2560_v41  ;;  %v15282_v41 = vld [vmem:[#allocation111_spill] sm:$0xff]  ;;  %7977 = vpow2.f32 %v2451_v35  ;;  %v2469_v35 = vmul.f32 1.442695, %v2373_v37  ;;  %v15300_v37 = vld [vmem:[#allocation118_spill] sm:$0xff] }
 0x776   : > { %v2370_v58 = vsub.f32 %v15282_v41, %v11385_v50  ;;  %v15288_v50 = vld [vmem:[#allocation108_spill] sm:$0xff]  ;;  %v2368_v41 = vsub.f32 %v15289_v14, %v11376_v33  ;;  %7979 = vpow2.f32 %v2461_v18 }
 0x778   : > { %v6671_v27 = vpop.f32.mrb[88].mxu0  ;;  %v2463_v57 = vmul.f32 1.442695, %v2370_v58 }
 0x779   : > { %3320 = vmax.xlane.f32.xlu0 %v15281_v29  ;;  %v6672_v36 = vpop.f32.mrb[89].mxu0  ;;  %v15286_v29 = vld [vmem:[#allocation149_spill] sm:$0xff] }
 0x77a   : > { %v11824_v47 = vadd.f32 %v6672_v36, %v6671_v27  ;;  %v6674_v46 = vpop.f32.mrb[90].mxu0  ;;  %v15287_v63 = vmax.f32 %v15285_v12, %v15286_v29  ;;  %v2367_v27 = vsub.f32 %v15288_v50, %v11376_v33  ;;  %v2563_v36 = vadd.f32 %v11828_v19, %v11826_v2  ;;  %v15295_v33 = vld [vmem:[#allocation151_spill] sm:$0xff]  ;;  %v15304_v29 = vld [vmem:[#allocation144_spill] sm:$0xff] }
 0x77b   : > { %v6675_v60 = vpop.f32.mrb[91].mxu0  ;;  %7981 = vpow2.f32 %v2463_v57  ;;  %v2459_v50 = vmul.f32 1.442695, %v2368_v41  ;;  %v15297_v57 = vld [vmem:[#allocation112_spill] sm:$0xff] }
 0x77c   : > { %15283 = vst [vmem:[#allocation111_spill] sm:$0xff] %v11824_v47  ;;  %v11830_v1 = vadd.f32 %v6675_v60, %v6674_v46  ;;  %v11845_v46 = vpop.eup %7971  ;;  %v2457_v31 = vmul.f32 1.442695, %v2367_v27  ;;  %v15298_v27 = vld [vmem:[#allocation113_spill] sm:$0xff] }
 0x77d   : > { %3323 = vmax.xlane.f32.xlu0 %v15287_v63  ;;  %v15291_v63 = vld [vmem:[#allocation115_spill] sm:$0xff]  ;;  %15292 = vst [vmem:[#allocation108_spill] sm:$0xff] %v11845_v46  ;;  %v11847_v60 = vpop.eup %7973  ;;  %v2372_v17 = vsub.f32 %v15298_v27, %v11476_v34 }
 0x77e   : > { %15284 = vst [vmem:[#allocation220_spill] sm:$0xff] %v11830_v1  ;;  %v2374_v58 = vsub.f32 %v15291_v63, %v11484_v45  ;;  %15293 = vst [vmem:[#allocation109_spill] sm:$0xff] %v11847_v60  ;;  %v15294_v1 = vld [vmem:[#allocation150_spill] sm:$0xff]  ;;  %7983 = vpow2.f32 %v2457_v31  ;;  %v2569_v45 = vadd.f32 %v11847_v60, %v11845_v46  ;;  %v11860_v63 = vpop.eup %7975  ;;  %v15301_v31 = vld [vmem:[#allocation119_spill] sm:$0xff] }
 0x77f   : > { %v15296_v18 = vmax.f32 %v15294_v1, %v15295_v33  ;;  %7985 = vpow2.f32 %v2459_v50  ;;  %15299 = vst [vmem:[#allocation114_spill] sm:$0xff] %v11860_v63  ;;  %v2377_v33 = vsub.f32 %v15300_v37, %v11493_v56 }
 0x780   : > { %v2471_v14 = vmul.f32 1.442695, %v2374_v58  ;;  %7987 = vpow2.f32 %v2469_v35  ;;  %v11864_v58 = vpop.eup %7977  ;;  %v15305_v35 = vld [vmem:[#allocation145_spill] sm:$0xff] }
 0x781   : > { %2564 = vadd.xlane.f32.xlu0 %v2563_v36  ;;  %v2371_v36 = vsub.f32 %v15297_v57, %v11476_v34  ;;  %v11868_v57 = vpop.eup %7979  ;;  %v2467_v34 = vmul.f32 1.442695, %v2372_v17  ;;  %v15306_v12 = vmax.f32 %v15304_v29, %v15305_v35  ;;  %v2477_v37 = vmul.f32 1.442695, %v2377_v33 }
 0x782   : > { %7989 = vpow2.f32 %v2471_v14  ;;  %15302 = vst [vmem:[#allocation115_spill] sm:$0xff] %v11868_v57 }
 0x783   : > { %v2465_v50 = vmul.f32 1.442695, %v2371_v36  ;;  %v15310_v36 = vld [vmem:[#allocation116_spill] sm:$0xff] }
 0x784   : > { %v11849_v47 = vpop.xlane.xlu0 %2324 }
 0x785   : > { %3326 = vmax.xlane.f32.xlu0 %v15296_v18  ;;  %v2378_v18 = vsub.f32 %v15301_v31, %v11493_v56  ;;  %v11870_v1 = vpop.eup %7981  ;;  %v2566_v56 = vadd.f32 %v11864_v58, %v11860_v63  ;;  %7991 = vpow2.f32 %v2465_v50  ;;  %v2375_v31 = vsub.f32 %v15310_v36, %v11480_v43  ;;  %v15313_v50 = vld [vmem:[#allocation123_spill] sm:$0xff] }
 0x786   : > { %15303 = vst [vmem:[#allocation112_spill] sm:$0xff] %v11870_v1  ;;  %v2575_v17 = vadd.f32 %v11870_v1, %v11868_v57  ;;  %7993 = vpow2.f32 %v2467_v34  ;;  %v2382_v36 = vsub.f32 %v15313_v50, %v11576_v22  ;;  %v15318_v1 = vld [vmem:[#allocation158_spill] sm:$0xff]  ;;  %v15322_v50 = vld [vmem:[#allocation121_spill] sm:$0xff] }
 0x787   : > { %v2479_v14 = vmul.f32 1.442695, %v2378_v18  ;;  %7995 = vpow2.f32 %v2477_v37  ;;  %v2473_v34 = vmul.f32 1.442695, %v2375_v31 }
 0x788   : > { %v2766_v41 = vpop.permute.xlu0 %2765  ;;  %v11886_v60 = vpop.eup %7983  ;;  %v2487_v63 = vmul.f32 1.442695, %v2382_v36  ;;  %v2385_v36 = vsub.f32 %v15169_v13, %v11633_v0  ;;  %v15329_v13 = vld [vmem:[#allocation163_spill] sm:$0xff] }
 0x789   : > { %2570 = vadd.xlane.f32.xlu0 %v2569_v45  ;;  %6740 = vmatpush3.bf16.msra.mxu0 %v2766_v41  ;;  %v15307_v45 = vld [vmem:[#allocation154_spill] sm:$0xff]  ;;  %v15308_v41 = vld [vmem:[#allocation155_spill] sm:$0xff]  ;;  %7997 = vpow2.f32 %v2479_v14 }
 0x78a   : > { %v15309_v46 = vmax.f32 %v15307_v45, %v15308_v41  ;;  %7999 = vpow2.f32 %v2473_v34  ;;  %v2386_v34 = vsub.f32 %v15170_v21, %v11633_v0  ;;  %v15331_v21 = vld [vmem:[#allocation124_spill] sm:$0xff] }
 0x78b   : > { %v2383_v0 = vsub.f32 %v15331_v21, %v11570_v59 }
 0x78c   : > { %v2784_v27 = vpop.permute.xlu0 %2783  ;;  %2339 = vmax.xlane.f32.xlu1 %v15306_v12  ;;  %v15311_v12 = vld [vmem:[#allocation117_spill] sm:$0xff] }
 0x78d   : > { %3332 = vmax.xlane.f32.xlu0 %v15309_v46  ;;  %6741 = vmatprep.subr.bf16.mxu0 %v2784_v27  ;;  %v2376_v33 = vsub.f32 %v15311_v12, %v11480_v43  ;;  %v15312_v46 = vld [vmem:[#allocation122_spill] sm:$0xff]  ;;  %v11890_v27 = vpop.eup %7985  ;;  %v15316_v12 = vld [vmem:[#allocation153_spill] sm:$0xff] }
 0x78e   : > { %v2381_v18 = vsub.f32 %v15312_v46, %v11576_v22  ;;  %v11894_v41 = vpop.eup %7987  ;;  %v15319_v46 = vld [vmem:[#allocation159_spill] sm:$0xff]  ;;  %v2572_v14 = vadd.f32 %v11890_v27, %v11886_v60  ;;  %v15321_v22 = vld [vmem:[#allocation120_spill] sm:$0xff] }
 0x78f   : > { %15314 = vst [vmem:[#allocation113_spill] sm:$0xff] %v11894_v41  ;;  %v11896_v45 = vpop.eup %7989  ;;  %v2475_v43 = vmul.f32 1.442695, %v2376_v33  ;;  %v2379_v31 = vsub.f32 %v15321_v22, %v11568_v8 }
 0x790   : > { %2567 = vadd.xlane.f32.xlu1 %v2566_v56  ;;  %v15315_v56 = vld [vmem:[#allocation152_spill] sm:$0xff]  ;;  %v2485_v37 = vmul.f32 1.442695, %v2381_v18  ;;  %v2581_v33 = vadd.f32 %v11896_v45, %v11894_v41  ;;  %v11912_v18 = vpop.eup %7991 }
 0x791   : > { %2576 = vadd.xlane.f32.xlu0 %v2575_v17  ;;  %v15317_v57 = vmax.f32 %v15315_v56, %v15316_v12  ;;  %v15320_v17 = vmax.f32 %v15318_v1, %v15319_v46  ;;  %8001 = vpow2.f32 %v2475_v43  ;;  %v2481_v43 = vmul.f32 1.442695, %v2379_v31  ;;  %v15328_v12 = vld [vmem:[#allocation162_spill] sm:$0xff] }
 0x792   : > { %8003 = vpow2.f32 %v2485_v37  ;;  %v2493_v37 = vmul.f32 1.442695, %v2385_v36  ;;  %v2495_v56 = vmul.f32 1.442695, %v2386_v34 }
 0x793   : > { %8005 = vpow2.f32 %v2487_v63 }
 0x794   : > { %3329 = vmax.xlane.f32.xlu1 %v15317_v57  ;;  %v2380_v57 = vsub.f32 %v15322_v50, %v11568_v8  ;;  %v15326_v50 = vld [vmem:[#allocation157_spill] sm:$0xff]  ;;  %8007 = vpow2.f32 %v2481_v43  ;;  %v2389_v43 = vsub.f32 %v15200_v44, %v11725_v30 }
 0x795   : > { %3338 = vmax.xlane.f32.xlu0 %v15320_v17  ;;  %v11916_v17 = vpop.eup %7993 }
 0x796   : > { %v11920_v22 = vpop.eup %7995  ;;  %v2483_v8 = vmul.f32 1.442695, %v2380_v57  ;;  %v2578_v63 = vadd.f32 %v11916_v17, %v11912_v18 }
 0x797   : > { %15323 = vst [vmem:[#allocation118_spill] sm:$0xff] %v11920_v22  ;;  %v11922_v46 = vpop.eup %7997 }
 0x798   : > { %2573 = vadd.xlane.f32.xlu1 %v2572_v14  ;;  %15324 = vst [vmem:[#allocation119_spill] sm:$0xff] %v11922_v46  ;;  %v15325_v14 = vld [vmem:[#allocation156_spill] sm:$0xff]  ;;  %v2587_v57 = vadd.f32 %v11922_v46, %v11920_v22  ;;  %8009 = vpow2.f32 %v2483_v8  ;;  %v11942_v34 = vpop.eup %7999  ;;  %v2390_v8 = vsub.f32 %v15201_v16, %v11725_v30  ;;  %v15340_v16 = vld [vmem:[#allocation161_spill] sm:$0xff] }
 0x799   : > { %2582 = vadd.xlane.f32.xlu0 %v2581_v33  ;;  %v15327_v1 = vmax.f32 %v15325_v14, %v15326_v50  ;;  %v15330_v33 = vmax.f32 %v15328_v12, %v15329_v13  ;;  %8011 = vpow2.f32 %v2493_v37  ;;  %v2489_v37 = vmul.f32 1.442695, %v2383_v0  ;;  %v15339_v14 = vld [vmem:[#allocation160_spill] sm:$0xff] }
 0x79a   : > { %8013 = vpow2.f32 %v2495_v56  ;;  %v15341_v30 = vmax.f32 %v15339_v14, %v15340_v16  ;;  %v2503_v0 = vmul.f32 1.442695, %v2390_v8  ;;  %v15349_v16 = vld [vmem:[#allocation170_spill] sm:$0xff] }
 0x79b   : > { %v11948_v21 = vpop.eup %8001  ;;  %8015 = vpow2.f32 %v2489_v37 }
 0x79c   : > { %3335 = vmax.xlane.f32.xlu1 %v15327_v1  ;;  %v15332_v1 = vld [vmem:[#allocation125_spill] sm:$0xff]  ;;  %v2584_v46 = vadd.f32 %v11948_v21, %v11942_v34 }
 0x79d   : > { %3344 = vmax.xlane.f32.xlu0 %v15330_v33  ;;  %v2384_v36 = vsub.f32 %v15332_v1, %v11570_v59  ;;  %v11956_v1 = vpop.eup %8003  ;;  %v2501_v59 = vmul.f32 1.442695, %v2389_v43  ;;  %v2388_v43 = vsub.f32 %v15173_v49, %v11637_v11 }
 0x79e   : > { %15336 = vst [vmem:[#allocation117_spill] sm:$0xff] %v11956_v1 }
 0x79f   : > { %v11934_v31 = vpop.xlane.xlu1 %2327  ;;  %v2491_v50 = vmul.f32 1.442695, %v2384_v36  ;;  %v2387_v36 = vsub.f32 %v15172_v5, %v11637_v11  ;;  %v2394_v5 = vsub.f32 %v15222_v38, %v11849_v47  ;;  %v2499_v49 = vmul.f32 1.442695, %v2388_v43  ;;  %v15350_v38 = vld [vmem:[#allocation62_spill] sm:$0xff] }
 0x7a0   : > { %2579 = vadd.xlane.f32.xlu1 %v2578_v63  ;;  %v11940_v13 = vpop.f32.mrb[244].mxu1 }
 0x7a1   : > { %15333 = vst [vmem:[#allocation144_spill] sm:$0xff] %v11940_v13  ;;  %2588 = vadd.xlane.f32.xlu0 %v2587_v57  ;;  %v11946_v33 = vpop.f32.mrb[245].mxu1  ;;  %v11962_v57 = vpop.eup %8005  ;;  %v15343_v13 = vld [vmem:[#allocation167_spill] sm:$0xff]  ;;  %8017 = vpow2.f32 %v2491_v50  ;;  %v2497_v50 = vmul.f32 1.442695, %v2387_v36 }
 0x7a2   : > { %15334 = vst [vmem:[#allocation145_spill] sm:$0xff] %v11946_v33  ;;  %v11954_v63 = vpop.f32.mrb[246].mxu1  ;;  %15338 = vst [vmem:[#allocation123_spill] sm:$0xff] %v11962_v57  ;;  %v15342_v33 = vld [vmem:[#allocation166_spill] sm:$0xff]  ;;  %v2593_v56 = vadd.f32 %v11962_v57, %v11956_v1  ;;  %8019 = vpow2.f32 %v2501_v59  ;;  %v15345_v59 = vld [vmem:[#allocation164_spill] sm:$0xff] }
 0x7a3   : > { %15335 = vst [vmem:[#allocation116_spill] sm:$0xff] %v11954_v63  ;;  %v11958_v12 = vpop.f32.mrb[247].mxu1  ;;  %v11960_v44 = vpop.xlane.xlu1 %2546  ;;  %v15344_v22 = vmax.f32 %v15342_v33, %v15343_v13  ;;  %8021 = vpow2.f32 %v2503_v0  ;;  %v15346_v13 = vld [vmem:[#allocation165_spill] sm:$0xff]  ;;  %v2511_v14 = vmul.f32 1.442695, %v2394_v5 }
 0x7a4   : > { %15337 = vst [vmem:[#allocation122_spill] sm:$0xff] %v11958_v12  ;;  %3341 = vmax.xlane.f32.xlu1 %v15341_v30  ;;  %v11982_v30 = vpop.eup %8007  ;;  %v15347_v33 = vmax.f32 %v15345_v59, %v15346_v13  ;;  %8023 = vpow2.f32 %v2497_v50 }
 0x7a5   : > { %3350 = vmax.xlane.f32.xlu0 %v15344_v22  ;;  %v2393_v22 = vsub.f32 %v15221_v3, %v11849_v47  ;;  %v11986_v8 = vpop.eup %8009  ;;  %v15351_v47 = vmax.f32 %v15349_v16, %v15350_v38  ;;  %8025 = vpow2.f32 %v2499_v49  ;;  %v15353_v49 = vld [vmem:[#allocation168_spill] sm:$0xff] }
 0x7a6   : > { %v11990_v37 = vpop.eup %8011  ;;  %v2590_v43 = vadd.f32 %v11986_v8, %v11982_v30 }
 0x7a7   : > { %v11976_v41 = vpop.xlane.xlu1 %2549  ;;  %v11992_v11 = vpop.eup %8013 }
 0x7a8   : > { %2585 = vadd.xlane.f32.xlu1 %v2584_v46  ;;  %v2786_v46 = vpop.permute.xlu0 %2785 }
 0x7a9   : > { %2594 = vadd.xlane.f32.xlu0 %v2593_v56  ;;  %v2509_v56 = vmul.f32 1.442695, %v2393_v22  ;;  %v2392_v22 = vsub.f32 %v15191_v42, %v11701_v40 }
 0x7ab   : > { %v6677_v12 = vpop.f32.mrb[92].mxu0  ;;  %v2768_v63 = vpop.permute.xlu1 %2767  ;;  %8027 = vpow2.f32 %v2509_v56 }
 0x7ac   : > { %3347 = vmax.xlane.f32.xlu1 %v15347_v33  ;;  %v6678_v3 = vpop.f32.mrb[93].mxu0  ;;  %6742 = vmatpush3.bf16.msra.mxu0 %v2768_v63  ;;  %v2599_v33 = vadd.f32 %v11992_v11, %v11990_v37  ;;  %v12010_v63 = vpop.eup %8015  ;;  %8029 = vpow2.f32 %v2511_v14  ;;  %v2395_v14 = vsub.f32 %v15233_v15, %v11934_v31 }
 0x7ad   : > { %v11997_v0 = vadd.f32 %v6678_v3, %v6677_v12  ;;  %3356 = vmax.xlane.f32.xlu0 %v15351_v47  ;;  %v6680_v36 = vpop.f32.mrb[94].mxu0  ;;  %6743 = vmatprep.subr.bf16.mxu0 %v2786_v46  ;;  %v2391_v12 = vsub.f32 %v15190_v62, %v11701_v40  ;;  %v12014_v5 = vpop.eup %8017  ;;  %v15354_v3 = vld [vmem:[#allocation169_spill] sm:$0xff]  ;;  %v2507_v62 = vmul.f32 1.442695, %v2392_v22 }
 0x7ae   : > { %v6681_v1 = vpop.f32.mrb[95].mxu0  ;;  %v15355_v47 = vmax.f32 %v15353_v49, %v15354_v3  ;;  %v2596_v42 = vadd.f32 %v12014_v5, %v12010_v63  ;;  %v15363_v49 = vld [vmem:[#allocation177_spill] sm:$0xff] }
 0x7af   : > { %15348 = vst [vmem:[#allocation120_spill] sm:$0xff] %v11997_v0  ;;  %v12004_v57 = vadd.f32 %v6681_v1, %v6680_v36  ;;  %v12016_v1 = vpop.eup %8019  ;;  %v2505_v46 = vmul.f32 1.442695, %v2391_v12  ;;  %v15356_v36 = vld [vmem:[#allocation172_spill] sm:$0xff] }
 0x7b0   : > { %2591 = vadd.xlane.f32.xlu1 %v2590_v43  ;;  %v12018_v50 = vpop.eup %8021  ;;  %v15357_v43 = vld [vmem:[#allocation173_spill] sm:$0xff] }
 0x7b1   : > { %15352 = vst [vmem:[#allocation121_spill] sm:$0xff] %v12004_v57  ;;  %2600 = vadd.xlane.f32.xlu0 %v2599_v33  ;;  %v15358_v0 = vmax.f32 %v15356_v36, %v15357_v43  ;;  %v2605_v40 = vadd.f32 %v12018_v50, %v12016_v1  ;;  %8031 = vpow2.f32 %v2505_v46  ;;  %v12032_v56 = vpop.eup %8023  ;;  %v2396_v33 = vsub.f32 %v15234_v9, %v11934_v31  ;;  %v15359_v57 = vld [vmem:[#allocation68_spill] sm:$0xff]  ;;  %v15360_v46 = vld [vmem:[#allocation171_spill] sm:$0xff] }
 0x7b2   : > { %8033 = vpow2.f32 %v2507_v62  ;;  %v12036_v12 = vpop.eup %8025  ;;  %v15361_v3 = vmax.f32 %v15359_v57, %v15360_v46  ;;  %v15365_v57 = vld [vmem:[#allocation174_spill] sm:$0xff] }
 0x7b3   : > { %v2515_v15 = vmul.f32 1.442695, %v2396_v33  ;;  %v2602_v9 = vadd.f32 %v12036_v12, %v12032_v56 }
 0x7b4   : > { %3353 = vmax.xlane.f32.xlu1 %v15355_v47  ;;  %v2513_v47 = vmul.f32 1.442695, %v2395_v14 }
 0x7b5   : > { %3362 = vmax.xlane.f32.xlu0 %v15358_v0  ;;  %v12038_v0 = vpop.eup %8027 }
 0x7b6   : > { %v12040_v22 = vpop.eup %8029  ;;  %8035 = vpow2.f32 %v2513_v47  ;;  %v15368_v47 = vld [vmem:[#allocation180_spill] sm:$0xff] }
 0x7b7   : > { %v2611_v31 = vadd.f32 %v12040_v22, %v12038_v0  ;;  %8037 = vpow2.f32 %v2515_v15 }
 0x7b8   : > { %2597 = vadd.xlane.f32.xlu1 %v2596_v42  ;;  %v15362_v42 = vld [vmem:[#allocation176_spill] sm:$0xff] }
 0x7b9   : > { %2606 = vadd.xlane.f32.xlu0 %v2605_v40  ;;  %v15364_v43 = vmax.f32 %v15362_v42, %v15363_v49  ;;  %v15366_v49 = vld [vmem:[#allocation175_spill] sm:$0xff] }
 0x7ba   : > { %v15367_v42 = vmax.f32 %v15365_v57, %v15366_v49  ;;  %v15377_v57 = vld [vmem:[#allocation184_spill] sm:$0xff] }
 0x7bb   : > { %v12052_v40 = vpop.eup %8031 }
 0x7bc   : > { %3359 = vmax.xlane.f32.xlu1 %v15361_v3  ;;  %v12056_v33 = vpop.eup %8033 }
 0x7bd   : > { %3368 = vmax.xlane.f32.xlu0 %v15364_v43 }
 0x7c0   : > { %2603 = vadd.xlane.f32.xlu1 %v2602_v9  ;;  %v15369_v9 = vld [vmem:[#allocation181_spill] sm:$0xff] }
 0x7c1   : > { %v2331_v62 = vpop.xlane.xlu0 %2330  ;;  %2612 = vadd.xlane.f32.xlu0 %v2611_v31  ;;  %v15370_v15 = vmax.f32 %v15368_v47, %v15369_v9  ;;  %v12066_v31 = vpop.eup %8035  ;;  %v15378_v9 = vld [vmem:[#allocation185_spill] sm:$0xff] }
 0x7c2   : > { %v2397_v3 = vsub.f32 %v15249_v32, %v2331_v62  ;;  %v2398_v14 = vsub.f32 %v15250_v25, %v2331_v62  ;;  %v2608_v32 = vadd.f32 %v12056_v33, %v12052_v40  ;;  %v12068_v62 = vpop.eup %8037 }
 0x7c4   : > { %v2517_v43 = vmul.f32 1.442695, %v2397_v3  ;;  %v2519_v46 = vmul.f32 1.442695, %v2398_v14  ;;  %3365 = vmax.xlane.f32.xlu1 %v15367_v42  ;;  %v15371_v3 = vld [vmem:[#allocation178_spill] sm:$0xff]  ;;  %v15372_v42 = vld [vmem:[#allocation179_spill] sm:$0xff] }
 0x7c5   : > { %v2770_v36 = vpop.permute.xlu0 %2769  ;;  %3374 = vmax.xlane.f32.xlu0 %v15370_v15  ;;  %v15373_v14 = vmax.f32 %v15371_v3, %v15372_v42  ;;  %v2614_v15 = vadd.f32 %v12068_v62, %v12066_v31  ;;  %v15379_v42 = vmax.f32 %v15377_v57, %v15378_v9  ;;  %v15390_v57 = vld [vmem:[#allocation187_spill] sm:$0xff] }
 0x7c6   : > { %8039 = vpow2.f32 %v2517_v43  ;;  %6744 = vmatpush3.bf16.msra.mxu0 %v2770_v36 }
 0x7c7   : > { %8041 = vpow2.f32 %v2519_v46 }
 0x7c8   : > { %2609 = vadd.xlane.f32.xlu1 %v2608_v32  ;;  %v15374_v32 = vld [vmem:[#allocation182_spill] sm:$0xff]  ;;  %8043 = vrcp.f32 %v11774_v53 }
 0x7c9   : > { %v2788_v25 = vpop.permute.xlu0 %2787  ;;  %8045 = vrcp.f32 %v11727_v51 }
 0x7ca   : > { %6745 = vmatprep.subr.bf16.mxu0 %v2788_v25  ;;  %v15375_v25 = vld [vmem:[#allocation183_spill] sm:$0xff]  ;;  %8047 = vrcp.f32 %v11976_v41 }
 0x7cb   : > { %v15376_v49 = vmax.f32 %v15374_v32, %v15375_v25 }
 0x7cc   : > { %3371 = vmax.xlane.f32.xlu1 %v15373_v14 }
 0x7d0   : > { %v12075_v43 = vpop.eup %8039  ;;  %2615 = vadd.xlane.f32.xlu1 %v2614_v15 }
 0x7d1   : > { %v12077_v36 = vpop.eup %8041 }
 0x7d2   : > { %v2617_v46 = vadd.f32 %v12077_v36, %v12075_v43  ;;  %v8044_v25 = vpop.eup %8043 }
 0x7d4   : > { %2618 = vadd.xlane.f32.xlu0 %v2617_v46  ;;  %3377 = vmax.xlane.f32.xlu1 %v15376_v49 }
 0x7d8   : > { %3380 = vmax.xlane.f32.xlu0 %v15379_v42 }
 0x7dc   : > { %v2334_v14 = vpop.xlane.xlu1 %2333 }
 0x7dd   : > { %v2399_v15 = vsub.f32 %v15260_v23, %v2334_v14  ;;  %v2400_v3 = vsub.f32 %v15261_v61, %v2334_v14  ;;  %v8046_v61 = vpop.eup %8045 }
 0x7de   : > { %v8048_v14 = vpop.eup %8047 }
 0x7df   : > { %v2521_v47 = vmul.f32 1.442695, %v2399_v15  ;;  %v2523_v38 = vmul.f32 1.442695, %v2400_v3 }
 0x7e0   : > { %v2553_v46 = vpop.xlane.xlu1 %2552 }
 0x7e1   : > { %8049 = vpow2.f32 %v2521_v47 }
 0x7e2   : > { %8051 = vpow2.f32 %v2523_v38  ;;  %v2666_v38 = vmul.f32 %v8044_v25, %v11590_v26 }
 0x7e3   : > { %v12092_v49 = vpop.f32.mrb[248].mxu1  ;;  %8053 = vrcp.f32 %v11960_v44  ;;  %v2668_v44 = vmul.f32 %v8046_v61, %v11555_v10  ;;  %v15386_v10 = vld [vmem:[#allocation93_spill] sm:$0xff] }
 0x7e4   : > { %15380 = vst [vmem:[#allocation124_spill] sm:$0xff] %v12092_v49  ;;  %v12095_v53 = vpop.f32.mrb[249].mxu1  ;;  %v2556_v51 = vpop.xlane.xlu1 %2555 }
 0x7e5   : > { %15381 = vst [vmem:[#allocation125_spill] sm:$0xff] %v12095_v53  ;;  %v12099_v42 = vpop.f32.mrb[250].mxu1  ;;  %8055 = vrcp.f32 %v2556_v51  ;;  %v2728_v32 = vpack.c.bf16 %v2668_v44, %v2666_v38  ;;  %v15384_v53 = vpack.c.bf16 %v11715_v6, %v11712_v55  ;;  %v2672_v51 = vmul.f32 %v8048_v14, %v15386_v10  ;;  %v15388_v38 = vld [vmem:[#allocation91_spill] sm:$0xff] }
 0x7e6   : > { %15382 = vst [vmem:[#allocation164_spill] sm:$0xff] %v12099_v42  ;;  %v12101_v3 = vpop.f32.mrb[251].mxu1  ;;  %8057 = vrcp.f32 %v2553_v46  ;;  %v15387_v42 = vld [vmem:[#allocation202_spill] sm:$0xff] }
 0x7e7   : > { %15383 = vst [vmem:[#allocation221_spill] sm:$0xff] %v12101_v3  ;;  %v2667_v49 = vmul.f32 %v8046_v61, %v15387_v42  ;;  %v15389_v46 = vld [vmem:[#allocation186_spill] sm:$0xff] }
 0x7e8   : > { %v2772_v47 = vpop.permute.xlu1 %2771  ;;  %v15391_v16 = vmax.f32 %v15389_v46, %v15390_v57  ;;  %v15399_v57 = vld [vmem:[#allocation188_spill] sm:$0xff]  ;;  %v15400_v46 = vld [vmem:[#allocation189_spill] sm:$0xff] }
 0x7e9   : > { %6746 = vmatpush3.bf16.msra.mxu0 %v2772_v47  ;;  %v15385_v47 = vld [vmem:[#allocation78_spill] sm:$0xff] }
 0x7ea   : > { %v2665_v3 = vmul.f32 %v8044_v25, %v15385_v47 }
 0x7eb   : > { %v12107_v15 = vpop.eup %8049 }
 0x7ec   : > { %v12109_v23 = vpop.eup %8051  ;;  %2838 = vmatmul.mubr.bf16.vlgmr.msra.gmra.mrb[96].mxu0 %v15384_v53  ;;  %v2727_v9 = vpack.c.bf16 %v2667_v49, %v2665_v3  ;;  %v15392_v53 = vld [vmem:[#allocation92_spill] sm:$0xff] }
 0x7ed   : > { %2845 = vmatprep.mubr.bf16.mxu0 %v2728_v32  ;;  %v2620_v26 = vadd.f32 %v12109_v23, %v12107_v15  ;;  %v8054_v41 = vpop.eup %8053  ;;  %v2671_v13 = vmul.f32 %v8048_v14, %v15392_v53 }
 0x7ee   : > { %v2670_v44 = vmul.f32 %v8054_v41, %v15388_v38 }
 0x7ef   : > { %2621 = vadd.xlane.f32.xlu1 %v2620_v26  ;;  %v8056_v6 = vpop.eup %8055  ;;  %v15393_v26 = vld [vmem:[#allocation79_spill] sm:$0xff] }
 0x7f0   : > { %v2730_v55 = vpack.c.bf16 %v2672_v51, %v2670_v44  ;;  %v8058_v32 = vpop.eup %8057  ;;  %v2676_v25 = vmul.f32 %v8056_v6, %v11744_v24  ;;  %v2669_v47 = vmul.f32 %v8054_v41, %v15393_v26  ;;  %v2675_v14 = vmul.f32 %v8056_v6, %v11740_v20  ;;  %v15394_v24 = vld [vmem:[#allocation94_spill] sm:$0xff] }
 0x7f1   : > { %v2674_v42 = vmul.f32 %v8058_v32, %v11733_v39  ;;  %v2673_v41 = vmul.f32 %v8058_v32, %v15394_v24 }
 0x7f2   : > { %v2729_v10 = vpack.c.bf16 %v2671_v13, %v2669_v47 }
 0x7f3   : > { %3383 = vmax.xlane.f32.xlu1 %v15391_v16  ;;  %v2732_v16 = vpack.c.bf16 %v2676_v25, %v2674_v42  ;;  %v2731_v44 = vpack.c.bf16 %v2675_v14, %v2673_v41  ;;  %v15395_v41 = vld [vmem:[#allocation43_spill] sm:$0xff] }
 0x7f4   : > { %2846 = vmatmul.mubr.bf16.gmra.mrb[100].mxu0 %v2727_v9 }
 0x7f5   : > { %2853 = vmatprep.mubr.bf16.mxu0 %v2730_v55 }
 0x7fa   : > { %v2337_v61 = vpop.xlane.xlu0 %2336 }
 0x7fb   : > { %v2401_v49 = vsub.f32 %v15271_v4, %v2337_v61  ;;  %v2402_v3 = vsub.f32 %v15272_v7, %v2337_v61 }
 0x7fc   : > { %2854 = vmatmul.mubr.bf16.gmra.mrb[104].mxu0 %v2729_v10 }
 0x7fd   : > { %v2525_v51 = vmul.f32 1.442695, %v2401_v49  ;;  %v2527_v9 = vmul.f32 1.442695, %v2402_v3  ;;  %2861 = vmatprep.mubr.bf16.mxu0 %v2732_v16 }
 0x7fe   : > { %v2559_v38 = vpop.xlane.xlu0 %2558 }
 0x7ff   : > { %8059 = vpow2.f32 %v2525_v51 }
 0x800   : > { %8061 = vpow2.f32 %v2527_v9 }
 0x801   : > { %8063 = vrcp.f32 %v2559_v38 }
 0x802   : > { %v2562_v39 = vpop.xlane.xlu0 %2561 }
 0x803   : > { %8065 = vrcp.f32 %v2562_v39 }
 0x804   : > { %2862 = vmatmul.mubr.bf16.gmra.mrb[108].mxu0 %v2731_v44  ;;  %v15396_v44 = vld [vmem:[#allocation146_spill] sm:$0xff] }
 0x806   : > { %v3321_v4 = vpop.xlane.xlu0 %3320 }
 0x809   : > { %v12131_v13 = vpop.eup %8059 }
 0x80a   : > { %v12133_v7 = vpop.eup %8061  ;;  %v12135_v55 = vpop.xlane.xlu0 %3323 }
 0x80b   : > { %v8064_v53 = vpop.eup %8063  ;;  %v2623_v20 = vadd.f32 %v12133_v7, %v12131_v13 }
 0x80c   : > { %v2678_v32 = vmul.f32 %v8064_v53, %v11778_v28  ;;  %v2677_v47 = vmul.f32 %v8064_v53, %v11776_v54  ;;  %v3415_v53 = vsub.f32 %v15396_v44, %v3321_v4 }
 0x80d   : > { %v8066_v6 = vpop.eup %8065  ;;  %2624 = vadd.xlane.f32.xlu0 %v2623_v20 }
 0x80e   : > { %v2565_v25 = vpop.xlane.xlu0 %2564  ;;  %v2680_v26 = vmul.f32 %v8066_v6, %v11800_v52  ;;  %v2679_v42 = vmul.f32 %v8066_v6, %v11791_v48 }
 0x810   : > { %v2734_v61 = vpack.c.bf16 %v2680_v26, %v2678_v32  ;;  %v2733_v10 = vpack.c.bf16 %v2679_v42, %v2677_v47  ;;  %v15397_v47 = vld [vmem:[#allocation147_spill] sm:$0xff] }
 0x811   : > { %v3416_v42 = vsub.f32 %v15397_v47, %v3321_v4  ;;  %v15401_v4 = vmax.f32 %v15399_v57, %v15400_v46 }
 0x812   : > { %v12143_v49 = vpop.xlane.xlu0 %3326  ;;  %2869 = vmatprep.mubr.bf16.mxu0 %v2734_v61 }
 0x813   : > { %2870 = vmatmul.mubr.bf16.gmra.mrb[112].mxu0 %v2733_v10  ;;  %v3479_v10 = vmul.f32 1.442695, %v3415_v53 }
 0x816   : > { %v2571_v3 = vpop.xlane.xlu0 %2570 }
 0x819   : > { %v2340_v16 = vpop.xlane.xlu1 %2339 }
 0x81a   : > { %v2403_v51 = vsub.f32 %v15304_v29, %v2340_v16  ;;  %v2404_v9 = vsub.f32 %v15305_v35, %v2340_v16  ;;  %v12147_v38 = vpop.xlane.xlu0 %3332 }
 0x81c   : > { %v2529_v28 = vmul.f32 1.442695, %v2403_v51  ;;  %v2531_v52 = vmul.f32 1.442695, %v2404_v9 }
 0x81d   : > { %v2568_v14 = vpop.xlane.xlu1 %2567 }
 0x81e   : > { %8067 = vpow2.f32 %v2529_v28  ;;  %v2577_v54 = vpop.xlane.xlu0 %2576  ;;  %v15398_v28 = vld [vmem:[#allocation114_spill] sm:$0xff] }
 0x81f   : > { %8069 = vpow2.f32 %v2531_v52 }
 0x820   : > { %8071 = vrcp.f32 %v2565_v25 }
 0x821   : > { %v12149_v48 = vpop.xlane.xlu1 %3329  ;;  %8073 = vrcp.f32 %v2568_v14 }
 0x822   : > { %v12151_v24 = vpop.xlane.xlu0 %3338  ;;  %8075 = vrcp.f32 %v2571_v3 }
 0x823   : > { %3847 = vrot.lane.b32.xlu0 %v15395_v41, %s8866_s24 }
 0x825   : > { %v2574_v29 = vpop.xlane.xlu1 %2573 }
 0x826   : > { %v2583_v35 = vpop.xlane.xlu0 %2582  ;;  %8077 = vrcp.f32 %v2574_v29  ;;  %v3481_v29 = vmul.f32 1.442695, %v3416_v42 }
 0x827   : > { %8079 = vrcp.f32 %v2577_v54  ;;  %v15405_v54 = vld [vmem:[#allocation109_spill] sm:$0xff] }
 0x828   : > { %v12155_v39 = vpop.eup %8067  ;;  %8081 = vpow2.f32 %v3479_v10  ;;  %v15406_v10 = vld [vmem:[#allocation108_spill] sm:$0xff] }
 0x829   : > { %v12158_v20 = vpop.eup %8069  ;;  %v12160_v6 = vpop.xlane.xlu1 %3335 }
 0x82a   : > { %v8072_v25 = vpop.eup %8071  ;;  %v12162_v32 = vpop.xlane.xlu0 %3344  ;;  %v2626_v26 = vadd.f32 %v12158_v20, %v12155_v39 }
 0x82b   : > { %v8074_v61 = vpop.eup %8073  ;;  %v2682_v16 = vmul.f32 %v8072_v25, %v11828_v19  ;;  %v2681_v9 = vmul.f32 %v8072_v25, %v11826_v2  ;;  %v15402_v25 = vld [vmem:[#allocation190_spill] sm:$0xff] }
 0x82c   : > { %2627 = vadd.xlane.f32.xlu1 %v2626_v26  ;;  %v2684_v3 = vmul.f32 %v8074_v61, %v11864_v58  ;;  %v2683_v52 = vmul.f32 %v8074_v61, %v15398_v28  ;;  %v8076_v19 = vpop.eup %8075  ;;  %v15403_v26 = vld [vmem:[#allocation191_spill] sm:$0xff] }
 0x82d   : > { %v2580_v51 = vpop.xlane.xlu1 %2579  ;;  %v15404_v47 = vmax.f32 %v15402_v25, %v15403_v26  ;;  %v2686_v42 = vmul.f32 %v8076_v19, %v15405_v54 }
 0x82e   : > { %v2589_v14 = vpop.xlane.xlu0 %2588  ;;  %v2736_v44 = vpack.c.bf16 %v2684_v3, %v2682_v16  ;;  %v2735_v41 = vpack.c.bf16 %v2683_v52, %v2681_v9  ;;  %8083 = vrcp.f32 %v2580_v51  ;;  %v2685_v3 = vmul.f32 %v8076_v19, %v15406_v10  ;;  %v15407_v19 = vld [vmem:[#allocation112_spill] sm:$0xff] }
 0x82f   : > { %8085 = vpow2.f32 %v3481_v29 }
 0x830   : > { %3386 = vmax.xlane.f32.xlu1 %v15401_v4  ;;  %2877 = vmatprep.mubr.bf16.mxu0 %v2736_v44  ;;  %v8078_v2 = vpop.eup %8077  ;;  %8087 = vrcp.f32 %v2583_v35 }
 0x831   : > { %v12174_v53 = vpop.xlane.xlu1 %3341  ;;  %2878 = vmatmul.mubr.bf16.gmra.mrb[116].mxu0 %v2735_v41  ;;  %v2688_v61 = vmul.f32 %v8078_v2, %v11890_v27  ;;  %v2687_v9 = vmul.f32 %v8078_v2, %v11886_v60  ;;  %v8080_v29 = vpop.eup %8079 }
 0x832   : > { %v12176_v58 = vpop.xlane.xlu0 %3350  ;;  %v12187_v44 = vpop.eup %8081  ;;  %v2690_v54 = vmul.f32 %v8080_v29, %v15407_v19 }
 0x833   : > { %v2738_v28 = vpack.c.bf16 %v2688_v61, %v2686_v42  ;;  %v2737_v41 = vpack.c.bf16 %v2687_v9, %v2685_v3  ;;  %v15408_v42 = vld [vmem:[#allocation115_spill] sm:$0xff] }
 0x834   : > { %3389 = vmax.xlane.f32.xlu1 %v15404_v47  ;;  %v2689_v35 = vmul.f32 %v8080_v29, %v15408_v42  ;;  %v15413_v42 = vld [vmem:[#allocation113_spill] sm:$0xff] }
 0x835   : > { %v2586_v16 = vpop.xlane.xlu1 %2585  ;;  %2885 = vmatprep.mubr.bf16.mxu0 %v2738_v28 }
 0x836   : > { %v2595_v51 = vpop.xlane.xlu0 %2594  ;;  %8089 = vrcp.f32 %v2586_v16 }
 0x837   : > { %8091 = vrcp.f32 %v2589_v14  ;;  %v15411_v14 = vld [vmem:[#allocation35_spill] sm:$0xff] }
 0x838   : > { %v8084_v4 = vpop.eup %8083 }
 0x839   : > { %v12185_v52 = vpop.xlane.xlu1 %3347  ;;  %2886 = vmatmul.mubr.bf16.gmra.mrb[120].mxu0 %v2737_v41  ;;  %v12189_v47 = vpop.eup %8085  ;;  %v2692_v60 = vmul.f32 %v8084_v4, %v11916_v17  ;;  %v2691_v61 = vmul.f32 %v8084_v4, %v11912_v18 }
 0x83a   : > { %v12191_v27 = vpop.xlane.xlu0 %3356  ;;  %v3607_v16 = vadd.f32 %v12189_v47, %v12187_v44  ;;  %v8088_v28 = vpop.eup %8087 }
 0x83b   : > { %v2740_v10 = vpack.c.bf16 %v2692_v60, %v2690_v54  ;;  %v2739_v3 = vpack.c.bf16 %v2691_v61, %v2689_v35  ;;  %v2694_v4 = vmul.f32 %v8088_v28, %v11896_v45  ;;  %v2693_v35 = vmul.f32 %v8088_v28, %v15413_v42  ;;  %v15415_v28 = vld [vmem:[#allocation119_spill] sm:$0xff] }
 0x83d   : > { %v2592_v2 = vpop.xlane.xlu1 %2591  ;;  %2893 = vmatprep.mubr.bf16.mxu0 %v2740_v10 }
 0x83e   : > { %8093 = vrcp.f32 %v2592_v2  ;;  %v2601_v41 = vpop.xlane.xlu0 %2600 }
 0x83f   : > { %8095 = vrcp.f32 %v2595_v51  ;;  %v15417_v51 = vld [vmem:[#allocation148_spill] sm:$0xff] }
 0x840   : > { %v8090_v19 = vpop.eup %8089 }
 0x841   : > { %v12199_v9 = vpop.xlane.xlu1 %3353  ;;  %2894 = vmatmul.mubr.bf16.gmra.mrb[124].mxu0 %v2739_v3  ;;  %v2696_v54 = vmul.f32 %v8090_v19, %v11948_v21  ;;  %v2695_v61 = vmul.f32 %v8090_v19, %v11942_v34  ;;  %v8092_v21 = vpop.eup %8091 }
 0x842   : > { %3608 = vadd.xlane.f32.xlu0 %v3607_v16  ;;  %v2698_v42 = vmul.f32 %v8092_v21, %v15415_v28 }
 0x843   : > { %v12201_v17 = vpop.f32.mrb[252].mxu1  ;;  %v2742_v3 = vpack.c.bf16 %v2696_v54, %v2694_v4  ;;  %v2741_v18 = vpack.c.bf16 %v2695_v61, %v2693_v35  ;;  %v15416_v4 = vld [vmem:[#allocation118_spill] sm:$0xff]  ;;  %v3417_v35 = vsub.f32 %v15417_v51, %v12135_v55 }
 0x844   : > { %15409 = vst [vmem:[#allocation78_spill] sm:$0xff] %v12201_v17  ;;  %v12203_v29 = vpop.f32.mrb[253].mxu1  ;;  %v2697_v54 = vmul.f32 %v8092_v21, %v15416_v4 }
 0x845   : > { %15410 = vst [vmem:[#allocation93_spill] sm:$0xff] %v12203_v29  ;;  %3831 = vrot.lane.b32.xlu1 %v15411_v14, %s8866_s24  ;;  %v12211_v60 = vpop.f32.mrb[254].mxu1  ;;  %v2598_v2 = vpop.xlane.xlu1 %2597  ;;  %2901 = vmatprep.mubr.bf16.mxu0 %v2742_v3 }
 0x846   : > { %15412 = vst [vmem:[#allocation202_spill] sm:$0xff] %v12211_v60  ;;  %v12215_v10 = vpop.f32.mrb[255].mxu1  ;;  %v12219_v29 = vpop.xlane.xlu0 %3362  ;;  %8097 = vrcp.f32 %v2598_v2  ;;  %v15418_v60 = vld [vmem:[#allocation149_spill] sm:$0xff] }
 0x847   : > { %15414 = vst [vmem:[#allocation91_spill] sm:$0xff] %v12215_v10  ;;  %v3418_v2 = vsub.f32 %v15418_v60, %v12135_v55  ;;  %8099 = vrcp.f32 %v2601_v41 }
 0x848   : > { %v8094_v17 = vpop.eup %8093 }
 0x849   : > { %v12221_v45 = vpop.xlane.xlu1 %3359  ;;  %2902 = vmatmul.mubr.bf16.gmra.mrb[128].mxu0 %v2741_v18  ;;  %v2700_v34 = vmul.f32 %v8094_v17, %v11986_v8  ;;  %v2699_v16 = vmul.f32 %v8094_v17, %v11982_v30  ;;  %v8096_v28 = vpop.eup %8095  ;;  %v3483_v8 = vmul.f32 1.442695, %v3417_v35  ;;  %v3485_v4 = vmul.f32 1.442695, %v3418_v2  ;;  %v15419_v17 = vld [vmem:[#allocation123_spill] sm:$0xff]  ;;  %v15422_v2 = vld [vmem:[#allocation45_spill] sm:$0xff] }
 0x84a   : > { %v2607_v61 = vpop.xlane.xlu0 %2606  ;;  %v2702_v51 = vmul.f32 %v8096_v28, %v15419_v17 }
 0x84b   : > { %v2744_v3 = vpack.c.bf16 %v2700_v34, %v2698_v42  ;;  %v2743_v10 = vpack.c.bf16 %v2699_v16, %v2697_v54  ;;  %v15420_v34 = vld [vmem:[#allocation117_spill] sm:$0xff] }
 0x84c   : > { %v2701_v54 = vmul.f32 %v8096_v28, %v15420_v34 }
 0x84d   : > { %v2604_v19 = vpop.xlane.xlu1 %2603  ;;  %2909 = vmatprep.mubr.bf16.mxu0 %v2744_v3 }
 0x84e   : > { %8101 = vrcp.f32 %v2604_v19  ;;  %v12233_v30 = vpop.xlane.xlu0 %3368 }
 0x84f   : > { %8103 = vpow2.f32 %v3483_v8 }
 0x850   : > { %v8098_v21 = vpop.eup %8097  ;;  %8105 = vrcp.f32 %v2607_v61 }
 0x851   : > { %v12231_v18 = vpop.xlane.xlu1 %3365  ;;  %2910 = vmatmul.mubr.bf16.gmra.mrb[132].mxu0 %v2743_v10  ;;  %v2704_v42 = vmul.f32 %v8098_v21, %v12014_v5  ;;  %v2703_v55 = vmul.f32 %v8098_v21, %v12010_v63  ;;  %v15421_v10 = vld [vmem:[#allocation42_spill] sm:$0xff]  ;;  %8107 = vpow2.f32 %v3485_v4  ;;  %v8100_v35 = vpop.eup %8099 }
 0x852   : > { %v2613_v5 = vpop.xlane.xlu0 %2612  ;;  %v2706_v63 = vmul.f32 %v8100_v35, %v11992_v11  ;;  %v2705_v8 = vmul.f32 %v8100_v35, %v11990_v37 }
 0x853   : > { %v2746_v41 = vpack.c.bf16 %v2704_v42, %v2702_v51  ;;  %v2745_v60 = vpack.c.bf16 %v2703_v55, %v2701_v54 }
 0x855   : > { %v2610_v16 = vpop.xlane.xlu1 %2609  ;;  %2917 = vmatprep.mubr.bf16.mxu0 %v2746_v41 }
 0x856   : > { %8109 = vrcp.f32 %v2610_v16 }
 0x857   : > { %8111 = vrcp.f32 %v2613_v5 }
 0x858   : > { %3849 = vrot.lane.b32.xlu0 %v15421_v10, %s8866_s24  ;;  %v8102_v3 = vpop.eup %8101 }
 0x859   : > { %v12241_v19 = vpop.xlane.xlu1 %3371  ;;  %2918 = vmatmul.mubr.bf16.gmra.mrb[136].mxu0 %v2745_v60  ;;  %v2708_v28 = vmul.f32 %v8102_v3, %v12036_v12  ;;  %v2707_v21 = vmul.f32 %v8102_v3, %v12032_v56  ;;  %v12249_v51 = vpop.eup %8103 }
 0x85a   : > { %v8106_v42 = vpop.eup %8105 }
 0x85b   : > { %v2748_v4 = vpack.c.bf16 %v2708_v28, %v2706_v63  ;;  %v2747_v17 = vpack.c.bf16 %v2707_v21, %v2705_v8  ;;  %v12251_v16 = vpop.eup %8107  ;;  %v2710_v11 = vmul.f32 %v8106_v42, %v12018_v50  ;;  %v2709_v37 = vmul.f32 %v8106_v42, %v12016_v1  ;;  %v12263_v63 = vpop.xlane.xlu0 %3374  ;;  %v15423_v8 = vld [vmem:[#allocation34_spill] sm:$0xff]  ;;  %v15425_v21 = vld [vmem:[#allocation193_spill] sm:$0xff] }
 0x85c   : > { %3851 = vrot.lane.b32.xlu0 %v15422_v2, %s8866_s24  ;;  %v3610_v41 = vadd.f32 %v12251_v16, %v12249_v51  ;;  %v15484_v2 = vld [vmem:[#allocation165_spill] sm:$0xff] }
 0x85d   : > { %v2616_v61 = vpop.xlane.xlu1 %2615  ;;  %2925 = vmatprep.mubr.bf16.mxu0 %v2748_v4  ;;  %v3434_v10 = vsub.f32 %v15484_v2, %v12185_v52  ;;  %v15488_v2 = vld [vmem:[#allocation167_spill] sm:$0xff] }
 0x85e   : > { %8113 = vrcp.f32 %v2616_v61 }
 0x860   : > { %v8110_v34 = vpop.eup %8109 }
 0x861   : > { %2926 = vmatmul.mubr.bf16.gmra.mrb[140].mxu0 %v2747_v17  ;;  %v2712_v12 = vmul.f32 %v8110_v34, %v12056_v33  ;;  %v2711_v56 = vmul.f32 %v8110_v34, %v12052_v40  ;;  %v8112_v60 = vpop.eup %8111  ;;  %v2619_v28 = vpop.xlane.xlu0 %2618 }
 0x862   : > { %v2714_v5 = vmul.f32 %v8112_v60, %v12040_v22  ;;  %v2713_v1 = vmul.f32 %v8112_v60, %v12038_v0  ;;  %v12265_v61 = vpop.xlane.xlu1 %3377  ;;  %8115 = vrcp.f32 %v2619_v28  ;;  %v15424_v22 = vld [vmem:[#allocation192_spill] sm:$0xff] }
 0x863   : > { %v2750_v54 = vpack.c.bf16 %v2712_v12, %v2710_v11  ;;  %v2749_v55 = vpack.c.bf16 %v2711_v56, %v2709_v37  ;;  %v15427_v12 = vld [vmem:[#allocation150_spill] sm:$0xff] }
 0x864   : > { %v3419_v37 = vsub.f32 %v15427_v12, %v12143_v49 }
 0x865   : > { %2933 = vmatprep.mubr.bf16.mxu0 %v2750_v54 }
 0x866   : > { %v3487_v60 = vmul.f32 1.442695, %v3419_v37  ;;  %v15437_v37 = vld [vmem:[#allocation44_spill] sm:$0xff] }
 0x868   : > { %v8114_v35 = vpop.eup %8113 }
 0x869   : > { %3611 = vadd.xlane.f32.xlu1 %v3610_v41  ;;  %2934 = vmatmul.mubr.bf16.gmra.mrb[144].mxu0 %v2749_v55  ;;  %v2716_v50 = vmul.f32 %v8114_v35, %v12068_v62  ;;  %v2715_v33 = vmul.f32 %v8114_v35, %v12066_v31  ;;  %v15426_v62 = vmax.f32 %v15424_v22, %v15425_v21  ;;  %v15428_v55 = vld [vmem:[#allocation151_spill] sm:$0xff]  ;;  %v15429_v35 = vld [vmem:[#allocation152_spill] sm:$0xff] }
 0x86a   : > { %v3420_v41 = vsub.f32 %v15428_v55, %v12143_v49  ;;  %v12288_v49 = vpop.xlane.xlu0 %3380 }
 0x86b   : > { %v2752_v3 = vpack.c.bf16 %v2716_v50, %v2714_v5  ;;  %v2751_v40 = vpack.c.bf16 %v2715_v33, %v2713_v1  ;;  %v15432_v1 = vld [vmem:[#allocation36_spill] sm:$0xff] }
 0x86c   : > { %v8116_v0 = vpop.eup %8115  ;;  %v3489_v5 = vmul.f32 1.442695, %v3420_v41 }
 0x86d   : > { %2941 = vmatprep.mubr.bf16.mxu0 %v2752_v3  ;;  %v2718_v17 = vmul.f32 %v8116_v0, %v12077_v36  ;;  %v2717_v34 = vmul.f32 %v8116_v0, %v12075_v43  ;;  %v3421_v36 = vsub.f32 %v15429_v35, %v12149_v48  ;;  %v15433_v3 = vld [vmem:[#allocation47_spill] sm:$0xff]  ;;  %v15435_v0 = vld [vmem:[#allocation66_spill] sm:$0xff] }
 0x86f   : > { %v3491_v50 = vmul.f32 1.442695, %v3421_v36 }
 0x871   : > { %2942 = vmatmul.mubr.bf16.gmra.mrb[148].mxu0 %v2751_v40 }
 0x87a   : > { %3833 = vrot.lane.b32.xlu1 %v15423_v8, %s8866_s24 }
 0x87b   : > { %3392 = vmax.xlane.f32.xlu0 %v15426_v62 }
 0x87c   : > { %v2622_v31 = vpop.xlane.xlu1 %2621 }
 0x87d   : > { %8117 = vrcp.f32 %v2622_v31  ;;  %v15434_v31 = vld [vmem:[#allocation194_spill] sm:$0xff] }
 0x87e   : > { %8119 = vpow2.f32 %v3487_v60 }
 0x87f   : > { %8121 = vpow2.f32 %v3489_v5 }
 0x880   : > { %8123 = vpow2.f32 %v3491_v50  ;;  %v12307_v12 = vpop.xlane.xlu1 %3383 }
 0x887   : > { %v8118_v4 = vpop.eup %8117 }
 0x888   : > { %v2720_v42 = vmul.f32 %v8118_v4, %v12109_v23  ;;  %v2719_v11 = vmul.f32 %v8118_v4, %v12107_v15  ;;  %v15430_v23 = vld [vmem:[#allocation153_spill] sm:$0xff]  ;;  %v12292_v28 = vpop.eup %8119  ;;  %v15436_v4 = vmax.f32 %v15434_v31, %v15435_v0 }
 0x889   : > { %v3422_v43 = vsub.f32 %v15430_v23, %v12149_v48  ;;  %v15431_v15 = vld [vmem:[#allocation37_spill] sm:$0xff]  ;;  %v12294_v48 = vpop.eup %8121 }
 0x88a   : > { %v2754_v56 = vpack.c.bf16 %v2720_v42, %v2718_v17  ;;  %v2753_v54 = vpack.c.bf16 %v2719_v11, %v2717_v34  ;;  %v12299_v17 = vpop.eup %8123  ;;  %v3613_v42 = vadd.f32 %v12294_v48, %v12292_v28 }
 0x88b   : > { %v3493_v33 = vmul.f32 1.442695, %v3422_v43 }
 0x88c   : > { %2949 = vmatprep.mubr.bf16.mxu0 %v2754_v56  ;;  %v15438_v56 = vld [vmem:[#allocation72_spill] sm:$0xff] }
 0x88d   : > { %2950 = vmatmul.mubr.bf16.gmra.mrb[152].mxu0 %v2753_v54  ;;  %8125 = vpow2.f32 %v3493_v33  ;;  %v15439_v54 = vld [vmem:[#allocation64_spill] sm:$0xff] }
 0x88e   : > { %v15440_v55 = vmax.f32 %v15438_v56, %v15439_v54 }
 0x891   : > { %3835 = vrot.lane.b32.xlu0 %v15431_v15, %s8866_s24 }
 0x895   : > { %3837 = vrot.lane.b32.xlu0 %v15432_v1, %s8866_s24  ;;  %v15444_v1 = vld [vmem:[#allocation155_spill] sm:$0xff] }
 0x897   : > { %v12303_v34 = vpop.eup %8125 }
 0x898   : > { %v3616_v11 = vadd.f32 %v12303_v34, %v12299_v17 }
 0x899   : > { %3855 = vrot.lane.b32.xlu0 %v15433_v3, %s8866_s24 }
 0x89a   : > { %v2625_v40 = vpop.xlane.xlu0 %2624 }
 0x89b   : > { %8127 = vrcp.f32 %v2625_v40 }
 0x89e   : > { %v3848_v62 = vpop.permute.xlu0 %3847  ;;  %3395 = vmax.xlane.f32.xlu1 %v15436_v4 }
 0x89f   : > { %6891 = vmatprep.subr.bf16.mxu0 %v3848_v62 }
 0x8a2   : > { %3614 = vadd.xlane.f32.xlu1 %v3613_v42 }
 0x8a5   : > { %v8128_v5 = vpop.eup %8127 }
 0x8a6   : > { %3617 = vadd.xlane.f32.xlu1 %v3616_v11  ;;  %v2722_v4 = vmul.f32 %v8128_v5, %v12133_v7  ;;  %v3424_v7 = vsub.f32 %v15444_v1, %v12147_v38 }
 0x8b7   : > { %3853 = vrot.lane.b32.xlu1 %v15437_v37, %s8866_s24 }
 0x8b8   : > { %3398 = vmax.xlane.f32.xlu0 %v15440_v55 }
 0x8b9   : > { %v2628_v41 = vpop.xlane.xlu1 %2627 }
 0x8ba   : > { %8129 = vrcp.f32 %v2628_v41  ;;  %v2721_v41 = vmul.f32 %v8128_v5, %v12131_v13 }
 0x8bd   : > { %v12314_v60 = vpop.xlane.xlu1 %3386 }
 0x8bf   : > { %v6747_v35 = vpop.f32.mrb[96].mxu0 }
 0x8c0   : > { %v6748_v36 = vpop.f32.mrb[97].mxu0 }
 0x8c1   : > { %v12316_v23 = vadd.f32 %v6748_v36, %v6747_v35  ;;  %v12318_v43 = vpop.xlane.xlu1 %3389  ;;  %v6750_v50 = vpop.f32.mrb[98].mxu0  ;;  %v15443_v36 = vld [vmem:[#allocation154_spill] sm:$0xff] }
 0x8c2   : > { %v6751_v33 = vpop.f32.mrb[99].mxu0  ;;  %v3423_v37 = vsub.f32 %v15443_v36, %v12147_v38 }
 0x8c3   : > { %15441 = vst [vmem:[#allocation92_spill] sm:$0xff] %v12316_v23  ;;  %v12320_v40 = vadd.f32 %v6751_v33, %v6750_v50 }
 0x8c4   : > { %v8130_v62 = vpop.eup %8129  ;;  %v3495_v13 = vmul.f32 1.442695, %v3423_v37 }
 0x8c5   : > { %15442 = vst [vmem:[#allocation79_spill] sm:$0xff] %v12320_v40  ;;  %v3832_v11 = vpop.permute.xlu1 %3831  ;;  %v2724_v55 = vmul.f32 %v8130_v62, %v12158_v20  ;;  %v2723_v35 = vmul.f32 %v8130_v62, %v12155_v39  ;;  %v15446_v39 = vld [vmem:[#allocation156_spill] sm:$0xff] }
 0x8c6   : > { %6892 = vmatpush3.bf16.msra.mxu0 %v3832_v11  ;;  %v3425_v5 = vsub.f32 %v15446_v39, %v12160_v6  ;;  %v3497_v11 = vmul.f32 1.442695, %v3424_v7  ;;  %8131 = vpow2.f32 %v3495_v13  ;;  %v15453_v13 = vld [vmem:[#allocation49_spill] sm:$0xff] }
 0x8c7   : > { %v6753_v3 = vpop.f32.mrb[100].mxu0  ;;  %v2756_v50 = vpack.c.bf16 %v2724_v55, %v2722_v4  ;;  %v2755_v33 = vpack.c.bf16 %v2723_v35, %v2721_v41  ;;  %v15448_v4 = vld [vmem:[#allocation157_spill] sm:$0xff] }
 0x8c8   : > { %v6754_v15 = vpop.f32.mrb[101].mxu0  ;;  %v3426_v55 = vsub.f32 %v15448_v4, %v12160_v6  ;;  %v3499_v1 = vmul.f32 1.442695, %v3425_v5  ;;  %8133 = vpow2.f32 %v3497_v11 }
 0x8c9   : > { %v12332_v8 = vadd.f32 %v6754_v15, %v6753_v3  ;;  %2957 = vmatprep.mubr.bf16.mxu0 %v2756_v50  ;;  %v6756_v42 = vpop.f32.mrb[102].mxu0  ;;  %v15449_v15 = vld [vmem:[#allocation39_spill] sm:$0xff]  ;;  %v15451_v50 = vld [vmem:[#allocation38_spill] sm:$0xff] }
 0x8ca   : > { %2958 = vmatmul.mubr.bf16.gmra.mrb[156].mxu0 %v2755_v33  ;;  %v6757_v20 = vpop.f32.mrb[103].mxu0  ;;  %v3501_v37 = vmul.f32 1.442695, %v3426_v55  ;;  %8135 = vpow2.f32 %v3499_v1 }
 0x8cb   : > { %15445 = vst [vmem:[#allocation94_spill] sm:$0xff] %v12332_v8  ;;  %v12336_v62 = vadd.f32 %v6757_v20, %v6756_v42 }
 0x8cc   : > { %8137 = vpow2.f32 %v3501_v37  ;;  %v15456_v37 = vld [vmem:[#allocation65_spill] sm:$0xff] }
 0x8cd   : > { %15447 = vst [vmem:[#allocation146_spill] sm:$0xff] %v12336_v62 }
 0x8ce   : > { %3839 = vrot.lane.b32.xlu0 %v15449_v15, %s8866_s24 }
 0x8cf   : > { %v3609_v3 = vpop.xlane.xlu0 %3608  ;;  %v6759_v41 = vpop.f32.mrb[104].mxu0 }
 0x8d0   : > { %v6760_v35 = vpop.f32.mrb[105].mxu0  ;;  %v12354_v11 = vpop.eup %8131  ;;  %8139 = vrcp.f32 %v3609_v3 }
 0x8d1   : > { %v12344_v36 = vadd.f32 %v6760_v35, %v6759_v41  ;;  %v6762_v42 = vpop.f32.mrb[106].mxu0 }
 0x8d2   : > { %3841 = vrot.lane.b32.xlu0 %v15451_v50, %s8866_s24  ;;  %v6763_v6 = vpop.f32.mrb[107].mxu0  ;;  %v12358_v41 = vpop.eup %8133 }
 0x8d3   : > { %15450 = vst [vmem:[#allocation147_spill] sm:$0xff] %v12344_v36  ;;  %v3850_v33 = vpop.permute.xlu0 %3849  ;;  %v12348_v7 = vadd.f32 %v6763_v6, %v6762_v42  ;;  %v15457_v42 = vld [vmem:[#allocation195_spill] sm:$0xff]  ;;  %v3619_v38 = vadd.f32 %v12358_v41, %v12354_v11 }
 0x8d4   : > { %6893 = vmatprep.subr.bf16.mxu0 %v3850_v33  ;;  %v15458_v6 = vmax.f32 %v15456_v37, %v15457_v42  ;;  %v12365_v33 = vpop.eup %8135 }
 0x8d5   : > { %15452 = vst [vmem:[#allocation114_spill] sm:$0xff] %v12348_v7 }
 0x8d6   : > { %3859 = vrot.lane.b32.xlu0 %v15453_v13, %s8866_s24 }
 0x8d7   : > { %v6765_v39 = vpop.f32.mrb[108].mxu0 }
 0x8d8   : > { %v6766_v5 = vpop.f32.mrb[109].mxu0 }
 0x8d9   : > { %v12356_v4 = vadd.f32 %v6766_v5, %v6765_v39  ;;  %v6768_v55 = vpop.f32.mrb[110].mxu0  ;;  %v12371_v39 = vpop.eup %8137 }
 0x8da   : > { %v6769_v1 = vpop.f32.mrb[111].mxu0  ;;  %v3622_v5 = vadd.f32 %v12371_v39, %v12365_v33 }
 0x8db   : > { %15454 = vst [vmem:[#allocation188_spill] sm:$0xff] %v12356_v4  ;;  %v12360_v35 = vadd.f32 %v6769_v1, %v6768_v55  ;;  %3401 = vmax.xlane.f32.xlu1 %v15458_v6  ;;  %v15461_v4 = vld [vmem:[#allocation46_spill] sm:$0xff] }
 0x8dd   : > { %15455 = vst [vmem:[#allocation189_spill] sm:$0xff] %v12360_v35  ;;  %v15463_v35 = vld [vmem:[#allocation70_spill] sm:$0xff] }
 0x8df   : > { %3620 = vadd.xlane.f32.xlu1 %v3619_v38  ;;  %v15462_v38 = vld [vmem:[#allocation196_spill] sm:$0xff] }
 0x8e0   : > { %v15464_v62 = vmax.f32 %v15462_v38, %v15463_v35 }
 0x8e3   : > { %3623 = vadd.xlane.f32.xlu1 %v3622_v5 }
 0x8e6   : > { %v6771_v55 = vpop.f32.mrb[112].mxu0 }
 0x8e7   : > { %v6772_v1 = vpop.f32.mrb[113].mxu0 }
 0x8e8   : > { %v12375_v36 = vadd.f32 %v6772_v1, %v6771_v55  ;;  %v6774_v6 = vpop.f32.mrb[114].mxu0  ;;  %v3852_v55 = vpop.permute.xlu0 %3851 }
 0x8e9   : > { %v6775_v7 = vpop.f32.mrb[115].mxu0  ;;  %v8140_v1 = vpop.eup %8139 }
 0x8ea   : > { %15459 = vst [vmem:[#allocation190_spill] sm:$0xff] %v12375_v36  ;;  %v12377_v8 = vadd.f32 %v6775_v7, %v6774_v6  ;;  %v12387_v6 = vmul.f32 %v8140_v1, %v12187_v44  ;;  %v3736_v3 = vmul.f32 %v8140_v1, %v12189_v47  ;;  %v15468_v47 = vld [vmem:[#allocation160_spill] sm:$0xff] }
 0x8ec   : > { %15460 = vst [vmem:[#allocation191_spill] sm:$0xff] %v12377_v8 }
 0x8f4   : > { %3857 = vrot.lane.b32.xlu1 %v15461_v4, %s8866_s24 }
 0x8f5   : > { %3404 = vmax.xlane.f32.xlu0 %v15464_v62  ;;  %v15465_v62 = vld [vmem:[#allocation158_spill] sm:$0xff] }
 0x8f6   : > { %v3612_v5 = vpop.xlane.xlu1 %3611  ;;  %v3427_v8 = vsub.f32 %v15465_v62, %v12151_v24 }
 0x8f7   : > { %8141 = vrcp.f32 %v3612_v5 }
 0x8f8   : > { %v3503_v50 = vmul.f32 1.442695, %v3427_v8 }
 0x8fa   : > { %v3834_v23 = vpop.permute.xlu1 %3833  ;;  %8143 = vpow2.f32 %v3503_v50 }
 0x8fb   : > { %6894 = vmatpush3.bf16.msra.mxu0 %v3834_v23 }
 0x8fc   : > { %6895 = vmatprep.subr.bf16.mxu0 %v3852_v55  ;;  %v15466_v55 = vld [vmem:[#allocation159_spill] sm:$0xff] }
 0x8fd   : > { %v3428_v40 = vsub.f32 %v15466_v55, %v12151_v24  ;;  %v15477_v24 = vld [vmem:[#allocation76_spill] sm:$0xff] }
 0x901   : > { %v8142_v7 = vpop.eup %8141 }
 0x902   : > { %v12390_v20 = vmul.f32 %v8142_v7, %v12249_v51  ;;  %v3738_v36 = vmul.f32 %v8142_v7, %v12251_v16  ;;  %v3429_v16 = vsub.f32 %v15468_v47, %v12174_v53 }
 0x904   : > { %v3800_v5 = vpack.c.bf16 %v3738_v36, %v3736_v3  ;;  %v6777_v4 = vpop.f32.mrb[116].mxu0  ;;  %v3505_v36 = vmul.f32 1.442695, %v3428_v40  ;;  %v15469_v3 = vld [vmem:[#allocation161_spill] sm:$0xff]  ;;  %v3507_v8 = vmul.f32 1.442695, %v3429_v16 }
 0x905   : > { %v6778_v44 = vpop.f32.mrb[117].mxu0  ;;  %v3430_v62 = vsub.f32 %v15469_v3, %v12174_v53  ;;  %v15473_v53 = vld [vmem:[#allocation40_spill] sm:$0xff] }
 0x906   : > { %3911 = vmatprep.mubr.bf16.mxu0 %v3800_v5  ;;  %v12400_v13 = vadd.f32 %v6778_v44, %v6777_v4  ;;  %v6780_v51 = vpop.f32.mrb[118].mxu0  ;;  %v15471_v4 = vld [vmem:[#allocation41_spill] sm:$0xff]  ;;  %8145 = vpow2.f32 %v3505_v36  ;;  %v12422_v36 = vpop.eup %8143 }
 0x907   : > { %v6781_v1 = vpop.f32.mrb[119].mxu0  ;;  %v3509_v55 = vmul.f32 1.442695, %v3430_v62  ;;  %8147 = vpow2.f32 %v3507_v8  ;;  %15475 = vst [vmem:[#allocation113_spill] sm:$0xff] %v12422_v36 }
 0x908   : > { %15467 = vst [vmem:[#allocation109_spill] sm:$0xff] %v12400_v13  ;;  %v12404_v7 = vpop.xlane.xlu0 %3392  ;;  %v12408_v23 = vadd.f32 %v6781_v1, %v6780_v51  ;;  %v15478_v13 = vld [vmem:[#allocation53_spill] sm:$0xff] }
 0x909   : > { %8149 = vpow2.f32 %v3509_v55  ;;  %v15479_v8 = vmax.f32 %v15477_v24, %v15478_v13 }
 0x90a   : > { %15470 = vst [vmem:[#allocation108_spill] sm:$0xff] %v12408_v23 }
 0x90b   : > { %3843 = vrot.lane.b32.xlu0 %v15471_v4, %s8866_s24 }
 0x90c   : > { %v3836_v5 = vpop.permute.xlu0 %3835  ;;  %v6783_v44 = vpop.f32.mrb[120].mxu0 }
 0x90d   : > { %6896 = vmatpush3.bf16.msra.mxu0 %v3836_v5  ;;  %v6784_v47 = vpop.f32.mrb[121].mxu0 }
 0x90e   : > { %v12414_v40 = vadd.f32 %v6784_v47, %v6783_v44  ;;  %v6786_v15 = vpop.f32.mrb[122].mxu0 }
 0x90f   : > { %3845 = vrot.lane.b32.xlu0 %v15473_v53, %s8866_s24  ;;  %v6787_v51 = vpop.f32.mrb[123].mxu0 }
 0x910   : > { %15472 = vst [vmem:[#allocation112_spill] sm:$0xff] %v12414_v40  ;;  %v12418_v1 = vadd.f32 %v6787_v51, %v6786_v15  ;;  %v12424_v62 = vpop.eup %8145  ;;  %v15482_v51 = vld [vmem:[#allocation162_spill] sm:$0xff] }
 0x911   : > { %v12433_v15 = vpop.eup %8147  ;;  %v3431_v50 = vsub.f32 %v15482_v51, %v12162_v32  ;;  %v3625_v40 = vadd.f32 %v12424_v62, %v12422_v36 }
 0x912   : > { %15474 = vst [vmem:[#allocation115_spill] sm:$0xff] %v12418_v1  ;;  %15481 = vst [vmem:[#allocation148_spill] sm:$0xff] %v12433_v15 }
 0x913   : > { %v12439_v1 = vpop.eup %8149 }
 0x914   : > { %v6789_v16 = vpop.f32.mrb[124].mxu0  ;;  %v3628_v51 = vadd.f32 %v12439_v1, %v12433_v15 }
 0x915   : > { %v6790_v3 = vpop.f32.mrb[125].mxu0 }
 0x916   : > { %v12426_v5 = vadd.f32 %v6790_v3, %v6789_v16  ;;  %v6792_v44 = vpop.f32.mrb[126].mxu0  ;;  %v15483_v16 = vld [vmem:[#allocation163_spill] sm:$0xff] }
 0x917   : > { %v6793_v47 = vpop.f32.mrb[127].mxu0  ;;  %v3432_v3 = vsub.f32 %v15483_v16, %v12162_v32 }
 0x918   : > { %15476 = vst [vmem:[#allocation119_spill] sm:$0xff] %v12426_v5  ;;  %3407 = vmax.xlane.f32.xlu1 %v15479_v8  ;;  %v12431_v55 = vadd.f32 %v6793_v47, %v6792_v44  ;;  %v3511_v44 = vmul.f32 1.442695, %v3431_v50  ;;  %v3433_v47 = vsub.f32 %v15345_v59, %v12185_v52  ;;  %v3517_v50 = vmul.f32 1.442695, %v3434_v10 }
 0x919   : > { %v3513_v4 = vmul.f32 1.442695, %v3432_v3  ;;  %v15487_v3 = vld [vmem:[#allocation166_spill] sm:$0xff] }
 0x91a   : > { %15480 = vst [vmem:[#allocation118_spill] sm:$0xff] %v12431_v55  ;;  %8151 = vpow2.f32 %v3511_v44  ;;  %v3435_v55 = vsub.f32 %v15487_v3, %v12176_v58 }
 0x91b   : > { %8153 = vpow2.f32 %v3513_v4 }
 0x91c   : > { %3626 = vadd.xlane.f32.xlu1 %v3625_v40  ;;  %v6795_v8 = vpop.f32.mrb[128].mxu0  ;;  %v3515_v40 = vmul.f32 1.442695, %v3433_v47  ;;  %v3519_v10 = vmul.f32 1.442695, %v3435_v55  ;;  %v15497_v55 = vld [vmem:[#allocation62_spill] sm:$0xff] }
 0x91d   : > { %v6796_v53 = vpop.f32.mrb[129].mxu0 }
 0x91e   : > { %v12451_v14 = vadd.f32 %v6796_v53, %v6795_v8  ;;  %v6798_v32 = vpop.f32.mrb[130].mxu0  ;;  %8155 = vpow2.f32 %v3515_v40  ;;  %v3436_v53 = vsub.f32 %v15488_v2, %v12176_v58  ;;  %v15493_v58 = vld [vmem:[#allocation170_spill] sm:$0xff]  ;;  %v15495_v2 = vld [vmem:[#allocation100_spill] sm:$0xff] }
 0x91f   : > { %v6799_v16 = vpop.f32.mrb[131].mxu0  ;;  %8157 = vpow2.f32 %v3517_v50 }
 0x920   : > { %15485 = vst [vmem:[#allocation149_spill] sm:$0xff] %v12451_v14  ;;  %3629 = vadd.xlane.f32.xlu1 %v3628_v51  ;;  %v12453_v23 = vadd.f32 %v6799_v16, %v6798_v32  ;;  %v3521_v4 = vmul.f32 1.442695, %v3436_v53  ;;  %8159 = vpow2.f32 %v3519_v10  ;;  %v3440_v53 = vsub.f32 %v15497_v55, %v12191_v27 }
 0x922   : > { %15486 = vst [vmem:[#allocation123_spill] sm:$0xff] %v12453_v23  ;;  %8161 = vpow2.f32 %v3521_v4  ;;  %v15502_v4 = vld [vmem:[#allocation48_spill] sm:$0xff] }
 0x924   : > { %v6801_v5 = vpop.f32.mrb[132].mxu0  ;;  %v12469_v3 = vpop.eup %8151 }
 0x925   : > { %v6802_v52 = vpop.f32.mrb[133].mxu0  ;;  %15491 = vst [vmem:[#allocation193_spill] sm:$0xff] %v12469_v3  ;;  %v12471_v40 = vpop.eup %8153 }
 0x926   : > { %v12461_v8 = vadd.f32 %v6802_v52, %v6801_v5  ;;  %v6804_v51 = vpop.f32.mrb[134].mxu0  ;;  %15492 = vst [vmem:[#allocation150_spill] sm:$0xff] %v12471_v40  ;;  %v3439_v5 = vsub.f32 %v15493_v58, %v12191_v27  ;;  %v15494_v52 = vld [vmem:[#allocation52_spill] sm:$0xff]  ;;  %v3631_v58 = vadd.f32 %v12471_v40, %v12469_v3  ;;  %v3529_v27 = vmul.f32 1.442695, %v3440_v53 }
 0x927   : > { %v6805_v44 = vpop.f32.mrb[135].mxu0 }
 0x928   : > { %15489 = vst [vmem:[#allocation117_spill] sm:$0xff] %v12461_v8  ;;  %v12463_v47 = vadd.f32 %v6805_v44, %v6804_v51  ;;  %v15496_v51 = vmax.f32 %v15494_v52, %v15495_v2 }
 0x92a   : > { %15490 = vst [vmem:[#allocation192_spill] sm:$0xff] %v12463_v47  ;;  %v12484_v47 = vpop.eup %8155 }
 0x92b   : > { %v12467_v16 = vpop.xlane.xlu1 %3395  ;;  %15499 = vst [vmem:[#allocation152_spill] sm:$0xff] %v12484_v47  ;;  %v12488_v14 = vpop.eup %8157 }
 0x92c   : > { %v6807_v59 = vpop.f32.mrb[136].mxu0  ;;  %15500 = vst [vmem:[#allocation153_spill] sm:$0xff] %v12488_v14  ;;  %v3634_v36 = vadd.f32 %v12488_v14, %v12484_v47 }
 0x92d   : > { %v6808_v50 = vpop.f32.mrb[137].mxu0 }
 0x92e   : > { %3410 = vmax.xlane.f32.xlu0 %v15496_v51  ;;  %v12480_v44 = vadd.f32 %v6808_v50, %v6807_v59  ;;  %v6810_v32 = vpop.f32.mrb[138].mxu0  ;;  %v3527_v51 = vmul.f32 1.442695, %v3439_v5  ;;  %v3838_v59 = vpop.permute.xlu0 %3837  ;;  %v15504_v5 = vld [vmem:[#allocation173_spill] sm:$0xff] }
 0x92f   : > { %v12482_v8 = vpop.xlane.xlu1 %3614  ;;  %v6811_v10 = vpop.f32.mrb[139].mxu0  ;;  %v3444_v53 = vsub.f32 %v15504_v5, %v12219_v29  ;;  %v15512_v5 = vld [vmem:[#allocation176_spill] sm:$0xff] }
 0x930   : > { %15498 = vst [vmem:[#allocation151_spill] sm:$0xff] %v12480_v44  ;;  %v12490_v23 = vadd.f32 %v6811_v10, %v6810_v32  ;;  %8163 = vpow2.f32 %v3527_v51  ;;  %v15503_v32 = vld [vmem:[#allocation172_spill] sm:$0xff]  ;;  %v12506_v44 = vpop.eup %8159 }
 0x931   : > { %3861 = vrot.lane.b32.xlu1 %v15502_v4, %s8866_s24  ;;  %v3443_v10 = vsub.f32 %v15503_v32, %v12219_v29  ;;  %8165 = vpow2.f32 %v3529_v27  ;;  %15506 = vst [vmem:[#allocation72_spill] sm:$0xff] %v12506_v44  ;;  %v12508_v47 = vpop.eup %8161  ;;  %v15510_v27 = vld [vmem:[#allocation99_spill] sm:$0xff]  ;;  %v3537_v29 = vmul.f32 1.442695, %v3444_v53 }
 0x932   : > { %15501 = vst [vmem:[#allocation194_spill] sm:$0xff] %v12490_v23  ;;  %3632 = vadd.xlane.f32.xlu0 %v3631_v58  ;;  %15507 = vst [vmem:[#allocation64_spill] sm:$0xff] %v12508_v47  ;;  %v3856_v51 = vpop.permute.xlu0 %3855 }
 0x933   : > { %v12496_v55 = vpop.xlane.xlu1 %3617  ;;  %v3535_v32 = vmul.f32 1.442695, %v3443_v10 }
 0x934   : > { %v6813_v3 = vpop.f32.mrb[140].mxu0 }
 0x935   : > { %v6814_v40 = vpop.f32.mrb[141].mxu0  ;;  %8167 = vpow2.f32 %v3535_v32 }
 0x936   : > { %3635 = vadd.xlane.f32.xlu0 %v3634_v36  ;;  %v12504_v58 = vadd.f32 %v6814_v40, %v6813_v3  ;;  %v6816_v4 = vpop.f32.mrb[142].mxu0  ;;  %v15509_v36 = vld [vmem:[#allocation98_spill] sm:$0xff]  ;;  %v3637_v40 = vadd.f32 %v12508_v47, %v12506_v44  ;;  %8169 = vpow2.f32 %v3537_v29  ;;  %v15518_v44 = vld [vmem:[#allocation51_spill] sm:$0xff]  ;;  %v15524_v29 = vld [vmem:[#allocation181_spill] sm:$0xff] }
 0x937   : > { %v3854_v50 = vpop.permute.xlu1 %3853  ;;  %v6817_v23 = vpop.f32.mrb[143].mxu0  ;;  %v15511_v15 = vmax.f32 %v15509_v36, %v15510_v27  ;;  %v15519_v47 = vld [vmem:[#allocation59_spill] sm:$0xff]  ;;  %v15527_v36 = vld [vmem:[#allocation106_spill] sm:$0xff] }
 0x938   : > { %15505 = vst [vmem:[#allocation66_spill] sm:$0xff] %v12504_v58  ;;  %6897 = vmatprep.subr.bf16.mxu0 %v3854_v50  ;;  %v12510_v14 = vadd.f32 %v6817_v23, %v6816_v4  ;;  %v3447_v23 = vsub.f32 %v15512_v5, %v12233_v30  ;;  %v15520_v5 = vmax.f32 %v15518_v44, %v15519_v47 }
 0x939   : > { %6898 = vmatpush3.bf16.msra.mxu0 %v3838_v59  ;;  %v15513_v59 = vld [vmem:[#allocation177_spill] sm:$0xff] }
 0x93a   : > { %15508 = vst [vmem:[#allocation154_spill] sm:$0xff] %v12510_v14  ;;  %4394 = vmax.xlane.f32.xlu0 %v15511_v15  ;;  %6899 = vmatprep.subr.bf16.mxu0 %v3856_v51  ;;  %v3448_v10 = vsub.f32 %v15513_v59, %v12233_v30  ;;  %v12525_v51 = vpop.eup %8163  ;;  %v3543_v32 = vmul.f32 1.442695, %v3447_v23  ;;  %v15521_v30 = vld [vmem:[#allocation168_spill] sm:$0xff]  ;;  %v15522_v59 = vld [vmem:[#allocation169_spill] sm:$0xff] }
 0x93b   : > { %15515 = vst [vmem:[#allocation156_spill] sm:$0xff] %v12525_v51  ;;  %v12527_v58 = vpop.eup %8165  ;;  %v3438_v27 = vsub.f32 %v15522_v59, %v12199_v9  ;;  %v15523_v23 = vld [vmem:[#allocation180_spill] sm:$0xff] }
 0x93c   : > { %v6819_v50 = vpop.f32.mrb[144].mxu0  ;;  %15516 = vst [vmem:[#allocation157_spill] sm:$0xff] %v12527_v58  ;;  %8171 = vpow2.f32 %v3543_v32 }
 0x93d   : > { %v6820_v4 = vpop.f32.mrb[145].mxu0 }
 0x93e   : > { %3638 = vadd.xlane.f32.xlu0 %v3637_v40  ;;  %v12523_v15 = vadd.f32 %v6820_v4, %v6819_v50  ;;  %v6822_v53 = vpop.f32.mrb[146].mxu0  ;;  %v3545_v40 = vmul.f32 1.442695, %v3448_v10  ;;  %v3437_v50 = vsub.f32 %v15521_v30, %v12199_v9  ;;  %v3643_v4 = vadd.f32 %v12527_v58, %v12525_v51 }
 0x93f   : > { %v6823_v3 = vpop.f32.mrb[147].mxu0  ;;  %v12550_v47 = vpop.eup %8167  ;;  %v3525_v51 = vmul.f32 1.442695, %v3438_v27 }
 0x940   : > { %15514 = vst [vmem:[#allocation155_spill] sm:$0xff] %v12523_v15  ;;  %v12529_v14 = vadd.f32 %v6823_v3, %v6822_v53  ;;  %8173 = vpow2.f32 %v3545_v40  ;;  %v3452_v15 = vsub.f32 %v15524_v29, %v12263_v63  ;;  %v3523_v44 = vmul.f32 1.442695, %v3437_v50  ;;  %v12552_v59 = vpop.eup %8169  ;;  %v15530_v50 = vld [vmem:[#allocation68_spill] sm:$0xff] }
 0x941   : > { %v3649_v27 = vadd.f32 %v12552_v59, %v12550_v47 }
 0x942   : > { %15517 = vst [vmem:[#allocation65_spill] sm:$0xff] %v12529_v14  ;;  %4400 = vmax.xlane.f32.xlu0 %v15520_v5  ;;  %v3451_v5 = vsub.f32 %v15523_v23, %v12263_v63  ;;  %v3553_v63 = vmul.f32 1.442695, %v3452_v15  ;;  %8175 = vpow2.f32 %v3523_v44 }
 0x943   : > { %8177 = vpow2.f32 %v3525_v51  ;;  %v15535_v51 = vld [vmem:[#allocation67_spill] sm:$0xff] }
 0x944   : > { %v6825_v3 = vpop.f32.mrb[148].mxu0  ;;  %v3551_v23 = vmul.f32 1.442695, %v3451_v5 }
 0x945   : > { %v12542_v53 = vpop.xlane.xlu0 %3398  ;;  %v6826_v10 = vpop.f32.mrb[149].mxu0 }
 0x946   : > { %3644 = vadd.xlane.f32.xlu0 %v3643_v4  ;;  %v12548_v30 = vadd.f32 %v6826_v10, %v6825_v3  ;;  %v6828_v14 = vpop.f32.mrb[150].mxu0  ;;  %v15528_v4 = vld [vmem:[#allocation107_spill] sm:$0xff]  ;;  %v3441_v3 = vsub.f32 %v15530_v50, %v12221_v45  ;;  %8179 = vpow2.f32 %v3551_v23  ;;  %v15532_v10 = vld [vmem:[#allocation184_spill] sm:$0xff]  ;;  %v12571_v44 = vpop.eup %8171  ;;  %v15538_v23 = vld [vmem:[#allocation174_spill] sm:$0xff] }
 0x947   : > { %v6829_v9 = vpop.f32.mrb[151].mxu0  ;;  %v15529_v40 = vmax.f32 %v15527_v36, %v15528_v4  ;;  %8181 = vpow2.f32 %v3553_v63  ;;  %15534 = vst [vmem:[#allocation70_spill] sm:$0xff] %v12571_v44 }
 0x948   : > { %15525 = vst [vmem:[#allocation195_spill] sm:$0xff] %v12548_v30  ;;  %v12554_v32 = vadd.f32 %v6829_v9, %v6828_v14  ;;  %v15531_v14 = vld [vmem:[#allocation171_spill] sm:$0xff]  ;;  %v3455_v9 = vsub.f32 %v15532_v10, %v12288_v49 }
 0x949   : > { %v3840_v58 = vpop.permute.xlu0 %3839  ;;  %v3442_v5 = vsub.f32 %v15531_v14, %v12221_v45  ;;  %v15540_v14 = vld [vmem:[#allocation198_spill] sm:$0xff]  ;;  %v15541_v10 = vld [vmem:[#allocation199_spill] sm:$0xff] }
 0x94a   : > { %15526 = vst [vmem:[#allocation196_spill] sm:$0xff] %v12554_v32  ;;  %4406 = vmax.xlane.f32.xlu0 %v15529_v40  ;;  %6900 = vmatpush3.bf16.msra.mxu0 %v3840_v58  ;;  %v15533_v58 = vld [vmem:[#allocation185_spill] sm:$0xff]  ;;  %v3531_v40 = vmul.f32 1.442695, %v3441_v3  ;;  %v12573_v50 = vpop.eup %8173  ;;  %v3559_v30 = vmul.f32 1.442695, %v3455_v9 }
 0x94b   : > { %v3456_v15 = vsub.f32 %v15533_v58, %v12288_v49  ;;  %v3533_v29 = vmul.f32 1.442695, %v3442_v5  ;;  %v15536_v32 = vld [vmem:[#allocation58_spill] sm:$0xff]  ;;  %v3655_v63 = vadd.f32 %v12573_v50, %v12571_v44  ;;  %v15539_v49 = vld [vmem:[#allocation175_spill] sm:$0xff]  ;;  %v15542_v5 = vmax.f32 %v15540_v14, %v15541_v10 }
 0x94c   : > { %v15537_v4 = vmax.f32 %v15535_v51, %v15536_v32  ;;  %8183 = vpow2.f32 %v3531_v40  ;;  %v3446_v3 = vsub.f32 %v15539_v49, %v12231_v18  ;;  %v12587_v9 = vpop.eup %8175  ;;  %v15545_v49 = vld [vmem:[#allocation50_spill] sm:$0xff]  ;;  %v15548_v51 = vld [vmem:[#allocation81_spill] sm:$0xff] }
 0x94d   : > { %v3561_v45 = vmul.f32 1.442695, %v3456_v15  ;;  %8185 = vpow2.f32 %v3533_v29  ;;  %v12591_v58 = vpop.eup %8177  ;;  %v3460_v29 = vsub.f32 %v15400_v46, %v12314_v60  ;;  %v15551_v46 = vld [vmem:[#allocation178_spill] sm:$0xff] }
 0x94e   : > { %3650 = vadd.xlane.f32.xlu0 %v3649_v27  ;;  %v3445_v27 = vsub.f32 %v15538_v23, %v12231_v18  ;;  %8187 = vpow2.f32 %v3559_v30  ;;  %v3541_v23 = vmul.f32 1.442695, %v3446_v3  ;;  %v15552_v3 = vld [vmem:[#allocation179_spill] sm:$0xff] }
 0x94f   : > { %8189 = vpow2.f32 %v3561_v45  ;;  %v3569_v36 = vmul.f32 1.442695, %v3460_v29  ;;  %v3640_v45 = vadd.f32 %v12591_v58, %v12587_v9  ;;  %v3463_v29 = vsub.f32 %v15424_v22, %v12404_v7 }
 0x950   : > { %v12595_v15 = vpop.eup %8179  ;;  %v3539_v18 = vmul.f32 1.442695, %v3445_v27 }
 0x951   : > { %15543 = vst [vmem:[#allocation158_spill] sm:$0xff] %v12595_v15  ;;  %v12597_v40 = vpop.eup %8181  ;;  %v3575_v22 = vmul.f32 1.442695, %v3463_v29 }
 0x952   : > { %4412 = vmax.xlane.f32.xlu0 %v15537_v4  ;;  %v3459_v4 = vsub.f32 %v15399_v57, %v12314_v60  ;;  %15544 = vst [vmem:[#allocation159_spill] sm:$0xff] %v12597_v40  ;;  %v15549_v57 = vld [vmem:[#allocation77_spill] sm:$0xff]  ;;  %8191 = vpow2.f32 %v3539_v18  ;;  %v3449_v60 = vsub.f32 %v15551_v46, %v12241_v19  ;;  %v3661_v27 = vadd.f32 %v12597_v40, %v12595_v15  ;;  %v15557_v15 = vld [vmem:[#allocation128_spill] sm:$0xff] }
 0x953   : > { %8193 = vpow2.f32 %v3541_v23  ;;  %v3464_v18 = vsub.f32 %v15425_v21, %v12404_v7 }
 0x954   : > { %v3567_v30 = vmul.f32 1.442695, %v3459_v4  ;;  %v3547_v23 = vmul.f32 1.442695, %v3449_v60 }
 0x955   : > { %3413 = vmax.xlane.f32.xlu1 %v15542_v5  ;;  %v15546_v5 = vld [vmem:[#allocation71_spill] sm:$0xff]  ;;  %v3577_v7 = vmul.f32 1.442695, %v3464_v18  ;;  %v3467_v18 = vsub.f32 %v15438_v56, %v12542_v53 }
 0x956   : > { %3656 = vadd.xlane.f32.xlu0 %v3655_v63  ;;  %v15547_v32 = vmax.f32 %v15545_v49, %v15546_v5  ;;  %v15550_v63 = vmax.f32 %v15548_v51, %v15549_v57  ;;  %v12613_v4 = vpop.eup %8183  ;;  %8195 = vpow2.f32 %v3567_v30  ;;  %v15564_v56 = vld [vmem:[#allocation63_spill] sm:$0xff] }
 0x957   : > { %8197 = vpow2.f32 %v3569_v36  ;;  %v15558_v36 = vld [vmem:[#allocation129_spill] sm:$0xff] }
 0x958   : > { %v15559_v40 = vmax.f32 %v15557_v15, %v15558_v36  ;;  %8199 = vpow2.f32 %v3547_v23  ;;  %v3583_v23 = vmul.f32 1.442695, %v3467_v18 }
 0x959   : > { %4397 = vmax.xlane.f32.xlu1 %v15547_v32  ;;  %v3450_v32 = vsub.f32 %v15552_v3, %v12241_v19  ;;  %v15554_v3 = vld [vmem:[#allocation56_spill] sm:$0xff] }
 0x95a   : > { %4418 = vmax.xlane.f32.xlu0 %v15550_v63  ;;  %v12617_v63 = vpop.eup %8185 }
 0x95b   : > { %v12621_v46 = vpop.eup %8187  ;;  %v3549_v19 = vmul.f32 1.442695, %v3450_v32  ;;  %v3646_v60 = vadd.f32 %v12617_v63, %v12613_v4  ;;  %v15560_v32 = vld [vmem:[#allocation182_spill] sm:$0xff] }
 0x95c   : > { %v12623_v51 = vpop.eup %8189  ;;  %v3453_v44 = vsub.f32 %v15560_v32, %v12265_v61  ;;  %v15563_v32 = vld [vmem:[#allocation110_spill] sm:$0xff] }
 0x95d   : > { %3641 = vadd.xlane.f32.xlu1 %v3640_v45  ;;  %v15553_v45 = vld [vmem:[#allocation55_spill] sm:$0xff]  ;;  %8201 = vpow2.f32 %v3549_v19  ;;  %v3468_v19 = vsub.f32 %v15439_v54, %v12542_v53 }
 0x95e   : > { %3662 = vadd.xlane.f32.xlu0 %v3661_v27  ;;  %v15555_v30 = vmax.f32 %v15553_v45, %v15554_v3  ;;  %8203 = vpow2.f32 %v3575_v22  ;;  %v15576_v45 = vld [vmem:[#allocation88_spill] sm:$0xff] }
 0x95f   : > { %8205 = vpow2.f32 %v3577_v7  ;;  %v3585_v7 = vmul.f32 1.442695, %v3468_v19 }
 0x960   : > { %v6831_v57 = vpop.f32.mrb[152].mxu0 }
 0x961   : > { %4403 = vmax.xlane.f32.xlu1 %v15555_v30  ;;  %v6832_v5 = vpop.f32.mrb[153].mxu0 }
 0x962   : > { %v12628_v27 = vadd.f32 %v6832_v5, %v6831_v57  ;;  %4424 = vmax.xlane.f32.xlu0 %v15559_v40  ;;  %v6834_v21 = vpop.f32.mrb[154].mxu0  ;;  %v3667_v5 = vadd.f32 %v12623_v51, %v12621_v46  ;;  %v15562_v57 = vld [vmem:[#allocation183_spill] sm:$0xff]  ;;  %v12643_v40 = vpop.eup %8191 }
 0x963   : > { %v6835_v49 = vpop.f32.mrb[155].mxu0  ;;  %v3454_v29 = vsub.f32 %v15562_v57, %v12265_v61  ;;  %v3555_v61 = vmul.f32 1.442695, %v3453_v44  ;;  %v15565_v57 = vmax.f32 %v15563_v32, %v15564_v56 }
 0x964   : > { %15556 = vst [vmem:[#allocation160_spill] sm:$0xff] %v12628_v27  ;;  %v12637_v3 = vadd.f32 %v6835_v49, %v6834_v21  ;;  %v12649_v49 = vpop.eup %8193  ;;  %v15567_v27 = vld [vmem:[#allocation133_spill] sm:$0xff] }
 0x965   : > { %3647 = vadd.xlane.f32.xlu1 %v3646_v60  ;;  %v12653_v30 = vpop.eup %8195  ;;  %v3557_v22 = vmul.f32 1.442695, %v3454_v29  ;;  %v3652_v54 = vadd.f32 %v12649_v49, %v12643_v40  ;;  %8207 = vpow2.f32 %v3555_v61  ;;  %v15569_v29 = vld [vmem:[#allocation186_spill] sm:$0xff] }
 0x966   : > { %15561 = vst [vmem:[#allocation161_spill] sm:$0xff] %v12637_v3  ;;  %3668 = vadd.xlane.f32.xlu0 %v3667_v5  ;;  %v12657_v60 = vpop.eup %8197  ;;  %v15566_v5 = vld [vmem:[#allocation90_spill] sm:$0xff]  ;;  %v3457_v36 = vsub.f32 %v15569_v29, %v12307_v12  ;;  %v15573_v29 = vld [vmem:[#allocation73_spill] sm:$0xff] }
 0x967   : > { %v15568_v3 = vmax.f32 %v15566_v5, %v15567_v27  ;;  %v3673_v44 = vadd.f32 %v12657_v60, %v12653_v30  ;;  %8209 = vpow2.f32 %v3557_v22  ;;  %v12673_v18 = vpop.eup %8199  ;;  %v3842_v27 = vpop.permute.xlu0 %3841 }
 0x968   : > { %v12655_v21 = vpop.xlane.xlu1 %3401  ;;  %8211 = vpow2.f32 %v3583_v23  ;;  %v12677_v19 = vpop.eup %8201  ;;  %v3563_v15 = vmul.f32 1.442695, %v3457_v36  ;;  %v3461_v36 = vsub.f32 %v15402_v25, %v12318_v43  ;;  %v15579_v25 = vld [vmem:[#allocation82_spill] sm:$0xff] }
 0x969   : > { %4409 = vmax.xlane.f32.xlu1 %v15565_v57  ;;  %v15570_v57 = vld [vmem:[#allocation187_spill] sm:$0xff]  ;;  %8213 = vpow2.f32 %v3585_v7  ;;  %v12679_v61 = vpop.eup %8203  ;;  %v3658_v7 = vadd.f32 %v12677_v19, %v12673_v18 }
 0x96a   : > { %4430 = vmax.xlane.f32.xlu0 %v15568_v3  ;;  %v3458_v3 = vsub.f32 %v15570_v57, %v12307_v12  ;;  %15571 = vst [vmem:[#allocation76_spill] sm:$0xff] %v12679_v61  ;;  %v12683_v22 = vpop.eup %8205  ;;  %v15577_v12 = vld [vmem:[#allocation203_spill] sm:$0xff]  ;;  %8215 = vpow2.f32 %v3563_v15 }
 0x96b   : > { %15572 = vst [vmem:[#allocation53_spill] sm:$0xff] %v12683_v22  ;;  %v15578_v23 = vmax.f32 %v15576_v45, %v15577_v12  ;;  %v3679_v57 = vadd.f32 %v12683_v22, %v12679_v61  ;;  %v3571_v45 = vmul.f32 1.442695, %v3461_v36  ;;  %v15583_v61 = vld [vmem:[#allocation209_spill] sm:$0xff] }
 0x96c   : > { %v12667_v53 = vpop.xlane.xlu1 %3620  ;;  %v3565_v32 = vmul.f32 1.442695, %v3458_v3  ;;  %v3860_v3 = vpop.permute.xlu0 %3859 }
 0x96d   : > { %3653 = vadd.xlane.f32.xlu1 %v3652_v54  ;;  %v15574_v54 = vld [vmem:[#allocation60_spill] sm:$0xff] }
 0x96e   : > { %3674 = vadd.xlane.f32.xlu0 %v3673_v44  ;;  %v15575_v56 = vmax.f32 %v15573_v29, %v15574_v54  ;;  %8217 = vpow2.f32 %v3565_v32  ;;  %v15582_v32 = vld [vmem:[#allocation207_spill] sm:$0xff] }
 0x96f   : > { %v12697_v54 = vpop.eup %8207  ;;  %v15584_v22 = vmax.f32 %v15582_v32, %v15583_v61  ;;  %8219 = vpow2.f32 %v3571_v45 }
 0x970   : > { %v12681_v5 = vpop.xlane.xlu1 %3623 }
 0x971   : > { %4415 = vmax.xlane.f32.xlu1 %v15575_v56  ;;  %v3462_v56 = vsub.f32 %v15403_v26, %v12318_v43 }
 0x972   : > { %4436 = vmax.xlane.f32.xlu0 %v15578_v23  ;;  %v12701_v23 = vpop.eup %8209 }
 0x973   : > { %v12703_v12 = vpop.eup %8211  ;;  %v3573_v29 = vmul.f32 1.442695, %v3462_v56  ;;  %v3664_v26 = vadd.f32 %v12701_v23, %v12697_v54 }
 0x974   : > { %v3858_v44 = vpop.permute.xlu1 %3857  ;;  %v12705_v15 = vpop.eup %8213 }
 0x975   : > { %3659 = vadd.xlane.f32.xlu1 %v3658_v7  ;;  %6901 = vmatprep.subr.bf16.mxu0 %v3858_v44  ;;  %v15580_v7 = vld [vmem:[#allocation84_spill] sm:$0xff]  ;;  %v3685_v43 = vadd.f32 %v12705_v15, %v12703_v12  ;;  %8221 = vpow2.f32 %v3573_v29  ;;  %v12721_v36 = vpop.eup %8215 }
 0x976   : > { %3680 = vadd.xlane.f32.xlu0 %v3679_v57  ;;  %6902 = vmatpush3.bf16.msra.mxu0 %v3842_v27  ;;  %v15581_v44 = vmax.f32 %v15579_v25, %v15580_v7  ;;  %v3465_v27 = vsub.f32 %v15434_v31, %v12467_v16  ;;  %v3466_v57 = vsub.f32 %v15435_v0, %v12467_v16  ;;  %v15588_v7 = vld [vmem:[#allocation136_spill] sm:$0xff]  ;;  %v15589_v25 = vld [vmem:[#allocation137_spill] sm:$0xff] }
 0x977   : > { %6903 = vmatprep.subr.bf16.mxu0 %v3860_v3  ;;  %v15585_v3 = vld [vmem:[#allocation86_spill] sm:$0xff]  ;;  %v15590_v31 = vmax.f32 %v15588_v7, %v15589_v25 }
 0x978   : > { %v12723_v56 = vpop.eup %8217  ;;  %v3581_v32 = vmul.f32 1.442695, %v3466_v57 }
 0x979   : > { %4421 = vmax.xlane.f32.xlu1 %v15581_v44  ;;  %v15586_v44 = vld [vmem:[#allocation87_spill] sm:$0xff]  ;;  %v3670_v16 = vadd.f32 %v12723_v56, %v12721_v36 }
 0x97a   : > { %4442 = vmax.xlane.f32.xlu0 %v15584_v22  ;;  %v3579_v22 = vmul.f32 1.442695, %v3465_v27  ;;  %v15587_v61 = vmax.f32 %v15585_v3, %v15586_v44 }
 0x97c   : > { %8223 = vpow2.f32 %v3579_v22  ;;  %v15591_v22 = vld [vmem:[#allocation200_spill] sm:$0xff] }
 0x97d   : > { %3665 = vadd.xlane.f32.xlu1 %v3664_v26  ;;  %v3469_v26 = vsub.f32 %v15456_v37, %v12655_v21  ;;  %8225 = vpow2.f32 %v3581_v32 }
 0x97e   : > { %3686 = vadd.xlane.f32.xlu0 %v3685_v43 }
 0x981   : > { %4427 = vmax.xlane.f32.xlu1 %v15587_v61  ;;  %v3470_v61 = vsub.f32 %v15457_v42, %v12655_v21 }
 0x982   : > { %v3405_v45 = vpop.xlane.xlu0 %3404  ;;  %4448 = vmax.xlane.f32.xlu0 %v15590_v31  ;;  %v12739_v31 = vpop.eup %8219 }
 0x983   : > { %v3471_v29 = vsub.f32 %v15462_v38, %v3405_v45  ;;  %v3472_v0 = vsub.f32 %v15463_v35, %v3405_v45  ;;  %v12741_v35 = vpop.eup %8221  ;;  %v3587_v38 = vmul.f32 1.442695, %v3469_v26  ;;  %v15592_v45 = vld [vmem:[#allocation201_spill] sm:$0xff]  ;;  %v3589_v37 = vmul.f32 1.442695, %v3470_v61 }
 0x984   : > { %v15593_v44 = vmax.f32 %v15591_v22, %v15592_v45  ;;  %v3676_v32 = vadd.f32 %v12741_v35, %v12739_v31 }
 0x985   : > { %v3591_v43 = vmul.f32 1.442695, %v3471_v29  ;;  %v3593_v27 = vmul.f32 1.442695, %v3472_v0  ;;  %3671 = vadd.xlane.f32.xlu1 %v3670_v16  ;;  %v15595_v0 = vld [vmem:[#allocation204_spill] sm:$0xff]  ;;  %v15596_v16 = vld [vmem:[#allocation205_spill] sm:$0xff] }
 0x986   : > { %v3844_v57 = vpop.permute.xlu0 %3843  ;;  %v12748_v42 = vpop.eup %8223  ;;  %v15597_v26 = vmax.f32 %v15595_v0, %v15596_v16  ;;  %v15602_v16 = vld [vmem:[#allocation210_spill] sm:$0xff] }
 0x987   : > { %8227 = vpow2.f32 %v3591_v43  ;;  %6904 = vmatpush3.bf16.msra.mxu0 %v3844_v57  ;;  %v12750_v21 = vpop.eup %8225 }
 0x988   : > { %8229 = vpow2.f32 %v3593_v27  ;;  %v3682_v27 = vadd.f32 %v12750_v21, %v12748_v42 }
 0x989   : > { %4433 = vmax.xlane.f32.xlu1 %v15593_v44  ;;  %8231 = vpow2.f32 %v3587_v38  ;;  %v15599_v38 = vld [vmem:[#allocation215_spill] sm:$0xff] }
 0x98a   : > { %8233 = vpow2.f32 %v3589_v37  ;;  %v15600_v37 = vld [vmem:[#allocation217_spill] sm:$0xff] }
 0x98b   : > { %8235 = vrcp.f32 %v12496_v55 }
 0x98c   : > { %8237 = vrcp.f32 %v12482_v8  ;;  %v3846_v8 = vpop.permute.xlu0 %3845 }
 0x98d   : > { %3677 = vadd.xlane.f32.xlu1 %v3676_v32  ;;  %v15601_v32 = vmax.f32 %v15599_v38, %v15600_v37 }
 0x991   : > { %v12752_v29 = vpop.eup %8227  ;;  %4439 = vmax.xlane.f32.xlu1 %v15597_v26  ;;  %v15603_v26 = vld [vmem:[#allocation211_spill] sm:$0xff] }
 0x992   : > { %15594 = vst [vmem:[#allocation162_spill] sm:$0xff] %v12752_v29  ;;  %v12757_v43 = vpop.eup %8229  ;;  %v15604_v0 = vmax.f32 %v15602_v16, %v15603_v26 }
 0x993   : > { %15598 = vst [vmem:[#allocation163_spill] sm:$0xff] %v12757_v43  ;;  %v3691_v44 = vadd.f32 %v12757_v43, %v12752_v29  ;;  %v12763_v61 = vpop.eup %8231  ;;  %v15607_v29 = vld [vmem:[#allocation212_spill] sm:$0xff]  ;;  %v15608_v43 = vld [vmem:[#allocation213_spill] sm:$0xff] }
 0x994   : > { %v12765_v57 = vpop.eup %8233  ;;  %v15609_v37 = vmax.f32 %v15607_v29, %v15608_v43 }
 0x995   : > { %3692 = vadd.xlane.f32.xlu0 %v3691_v44  ;;  %3683 = vadd.xlane.f32.xlu1 %v3682_v27  ;;  %v3688_v45 = vadd.f32 %v12765_v57, %v12763_v61 }
 0x999   : > { %4454 = vmax.xlane.f32.xlu0 %v15601_v32  ;;  %4445 = vmax.xlane.f32.xlu1 %v15604_v0 }
 0x99d   : > { %v6837_v22 = vpop.f32.mrb[156].mxu0  ;;  %3689 = vadd.xlane.f32.xlu1 %v3688_v45 }
 0x99e   : > { %v6838_v3 = vpop.f32.mrb[157].mxu0 }
 0x99f   : > { %v12775_v44 = vadd.f32 %v6838_v3, %v6837_v22  ;;  %v6840_v27 = vpop.f32.mrb[158].mxu0 }
 0x9a0   : > { %v6841_v25 = vpop.f32.mrb[159].mxu0 }
 0x9a1   : > { %15605 = vst [vmem:[#allocation165_spill] sm:$0xff] %v12775_v44  ;;  %v12777_v7 = vadd.f32 %v6841_v25, %v6840_v27  ;;  %4451 = vmax.xlane.f32.xlu1 %v15609_v37  ;;  %v8236_v27 = vpop.eup %8235 }
 0x9a2   : > { %v8238_v32 = vpop.eup %8237  ;;  %v3742_v44 = vmul.f32 %v8236_v27, %v12303_v34 }
 0x9a3   : > { %15606 = vst [vmem:[#allocation166_spill] sm:$0xff] %v12777_v7 }
 0x9a5   : > { %v3408_v0 = vpop.xlane.xlu1 %3407 }
 0x9a6   : > { %v3473_v45 = vsub.f32 %v15477_v24, %v3408_v0  ;;  %v3474_v3 = vsub.f32 %v15478_v13, %v3408_v0  ;;  %v3740_v13 = vmul.f32 %v8238_v32, %v12294_v48  ;;  %v3741_v48 = vmul.f32 %v8236_v27, %v12299_v17 }
 0x9a8   : > { %v3595_v22 = vmul.f32 1.442695, %v3473_v45  ;;  %v3597_v26 = vmul.f32 1.442695, %v3474_v3 }
 0x9a9   : > { %v3627_v25 = vpop.xlane.xlu1 %3626 }
 0x9aa   : > { %8239 = vpow2.f32 %v3595_v22  ;;  %v3739_v22 = vmul.f32 %v8238_v32, %v12292_v28 }
 0x9ab   : > { %8241 = vpow2.f32 %v3597_v26  ;;  %v3802_v26 = vpack.c.bf16 %v3742_v44, %v3740_v13 }
 0x9ac   : > { %8243 = vrcp.f32 %v12681_v5  ;;  %v3801_v13 = vpack.c.bf16 %v3741_v48, %v3739_v22 }
 0x9ad   : > { %v3630_v37 = vpop.xlane.xlu1 %3629  ;;  %8245 = vrcp.f32 %v12667_v53  ;;  %v15610_v53 = vpack.c.bf16 %v12390_v20, %v12387_v6  ;;  %v15611_v6 = vld [vmem:[#allocation218_spill] sm:$0xff] }
 0x9ae   : > { %8247 = vrcp.f32 %v3630_v37 }
 0x9af   : > { %8249 = vrcp.f32 %v3627_v25 }
 0x9b1   : > { %v3862_v55 = vpop.permute.xlu1 %3861 }
 0x9b2   : > { %6905 = vmatprep.subr.bf16.mxu0 %v3862_v55  ;;  %v15612_v55 = vld [vmem:[#allocation219_spill] sm:$0xff] }
 0x9b3   : > { %6906 = vmatpush3.bf16.msra.mxu0 %v3846_v8  ;;  %v15613_v8 = vmax.f32 %v15611_v6, %v15612_v55  ;;  %v15629_v6 = vld [vmem:[#allocation140_spill] sm:$0xff] }
 0x9b4   : > { %v12792_v24 = vpop.eup %8239 }
 0x9b5   : > { %v12794_v0 = vpop.eup %8241 }
 0x9b6   : > { %v8244_v5 = vpop.eup %8243  ;;  %3912 = vmatmul.mubr.bf16.vlgmr.msra.gmra.mrb[160].mxu0 %v15610_v53  ;;  %v3694_v34 = vadd.f32 %v12794_v0, %v12792_v24 }
 0x9b7   : > { %3919 = vmatprep.mubr.bf16.mxu0 %v3802_v26  ;;  %v8246_v45 = vpop.eup %8245  ;;  %v3746_v3 = vmul.f32 %v8244_v5, %v12371_v39 }
 0x9b8   : > { %3695 = vadd.xlane.f32.xlu1 %v3694_v34  ;;  %v3744_v44 = vmul.f32 %v8246_v45, %v12358_v41  ;;  %v8248_v53 = vpop.eup %8247  ;;  %v3745_v41 = vmul.f32 %v8244_v5, %v12365_v33  ;;  %v15615_v33 = vld [vmem:[#allocation113_spill] sm:$0xff] }
 0x9b9   : > { %v8250_v28 = vpop.eup %8249 }
 0x9ba   : > { %v3804_v26 = vpack.c.bf16 %v3746_v3, %v3744_v44  ;;  %v3748_v27 = vmul.f32 %v8250_v28, %v12424_v62  ;;  %v3747_v5 = vmul.f32 %v8250_v28, %v15615_v33 }
 0x9bb   : > { %v3411_v37 = vpop.xlane.xlu0 %3410 }
 0x9bc   : > { %v3475_v25 = vsub.f32 %v15494_v52, %v3411_v37  ;;  %v3476_v20 = vsub.f32 %v15495_v2, %v3411_v37  ;;  %4457 = vmax.xlane.f32.xlu1 %v15613_v8  ;;  %v3750_v52 = vmul.f32 %v8248_v53, %v12439_v1  ;;  %v3743_v2 = vmul.f32 %v8246_v45, %v12354_v11  ;;  %v15614_v37 = vld [vmem:[#allocation148_spill] sm:$0xff] }
 0x9bd   : > { %v3749_v44 = vmul.f32 %v8248_v53, %v15614_v37 }
 0x9be   : > { %v3599_v34 = vmul.f32 1.442695, %v3475_v25  ;;  %v3601_v17 = vmul.f32 1.442695, %v3476_v20  ;;  %3920 = vmatmul.mubr.bf16.gmra.mrb[164].mxu0 %v3801_v13  ;;  %v3803_v48 = vpack.c.bf16 %v3745_v41, %v3743_v2  ;;  %v3806_v3 = vpack.c.bf16 %v3750_v52, %v3748_v27  ;;  %v15616_v13 = vld [vmem:[#allocation150_spill] sm:$0xff]  ;;  %v15619_v52 = vld [vmem:[#allocation193_spill] sm:$0xff] }
 0x9bf   : > { %v3633_v39 = vpop.xlane.xlu0 %3632  ;;  %3927 = vmatprep.mubr.bf16.mxu0 %v3804_v26  ;;  %v3805_v62 = vpack.c.bf16 %v3749_v44, %v3747_v5  ;;  %v15620_v5 = vld [vmem:[#allocation43_spill] sm:$0xff] }
 0x9c0   : > { %8251 = vpow2.f32 %v3599_v34  ;;  %v15617_v34 = vld [vmem:[#allocation153_spill] sm:$0xff] }
 0x9c1   : > { %8253 = vpow2.f32 %v3601_v17 }
 0x9c2   : > { %8255 = vrcp.f32 %v3633_v39  ;;  %v15618_v39 = vld [vmem:[#allocation152_spill] sm:$0xff] }
 0x9c3   : > { %v3636_v32 = vpop.xlane.xlu0 %3635 }
 0x9c4   : > { %8257 = vrcp.f32 %v3636_v32 }
 0x9c6   : > { %3928 = vmatmul.mubr.bf16.gmra.mrb[168].mxu0 %v3803_v48 }
 0x9c7   : > { %v4395_v22 = vpop.xlane.xlu0 %4394  ;;  %3935 = vmatprep.mubr.bf16.mxu0 %v3806_v3 }
 0x9ca   : > { %v12815_v25 = vpop.eup %8251 }
 0x9cb   : > { %v12818_v20 = vpop.eup %8253  ;;  %v3639_v1 = vpop.xlane.xlu0 %3638 }
 0x9cc   : > { %v8256_v8 = vpop.eup %8255  ;;  %v3697_v11 = vadd.f32 %v12818_v20, %v12815_v25 }
 0x9cd   : > { %v3752_v26 = vmul.f32 %v8256_v8, %v15616_v13  ;;  %v3751_v2 = vmul.f32 %v8256_v8, %v15619_v52 }
 0x9ce   : > { %v8258_v45 = vpop.eup %8257  ;;  %3698 = vadd.xlane.f32.xlu0 %v3697_v11  ;;  %3936 = vmatmul.mubr.bf16.gmra.mrb[172].mxu0 %v3805_v62 }
 0x9cf   : > { %v3754_v17 = vmul.f32 %v8258_v45, %v15617_v34  ;;  %v12824_v53 = vpop.xlane.xlu0 %4400  ;;  %v3753_v41 = vmul.f32 %v8258_v45, %v15618_v39 }
 0x9d1   : > { %v3808_v28 = vpack.c.bf16 %v3754_v17, %v3752_v26  ;;  %v3807_v32 = vpack.c.bf16 %v3753_v41, %v3751_v2  ;;  %v15621_v26 = vld [vmem:[#allocation98_spill] sm:$0xff]  ;;  %v15622_v17 = vld [vmem:[#allocation99_spill] sm:$0xff] }
 0x9d2   : > { %v4489_v34 = vsub.f32 %v15621_v26, %v4395_v22  ;;  %v4490_v39 = vsub.f32 %v15622_v17, %v4395_v22  ;;  %v15626_v26 = vld [vmem:[#allocation64_spill] sm:$0xff] }
 0x9d3   : > { %3943 = vmatprep.mubr.bf16.mxu0 %v3808_v28  ;;  %v3645_v27 = vpop.xlane.xlu0 %3644 }
 0x9d4   : > { %v4553_v41 = vmul.f32 1.442695, %v4489_v34  ;;  %v4555_v28 = vmul.f32 1.442695, %v4490_v39 }
 0x9d6   : > { %3944 = vmatmul.mubr.bf16.gmra.mrb[176].mxu0 %v3807_v32 }
 0x9d7   : > { %v12828_v48 = vpop.xlane.xlu0 %4406 }
 0x9db   : > { %v3651_v3 = vpop.xlane.xlu0 %3650 }
 0x9df   : > { %v12836_v8 = vpop.xlane.xlu0 %4412 }
 0x9e2   : > { %v3414_v37 = vpop.xlane.xlu1 %3413 }
 0x9e3   : > { %v3477_v44 = vsub.f32 %v15540_v14, %v3414_v37  ;;  %v3478_v33 = vsub.f32 %v15541_v10, %v3414_v37  ;;  %v3657_v14 = vpop.xlane.xlu0 %3656 }
 0x9e4   : > { %4921 = vrot.lane.b32.xlu0 %v15620_v5, %s8867_s23  ;;  %v15623_v5 = vld [vmem:[#allocation95_spill] sm:$0xff] }
 0x9e5   : > { %v3603_v11 = vmul.f32 1.442695, %v3477_v44  ;;  %v3605_v62 = vmul.f32 1.442695, %v3478_v33 }
 0x9e6   : > { %v12834_v45 = vpop.xlane.xlu1 %4397 }
 0x9e7   : > { %8259 = vpow2.f32 %v3603_v11  ;;  %v12848_v44 = vpop.xlane.xlu0 %4418  ;;  %v15624_v11 = vld [vmem:[#allocation96_spill] sm:$0xff] }
 0x9e8   : > { %8261 = vpow2.f32 %v3605_v62  ;;  %v15625_v62 = vmax.f32 %v15623_v5, %v15624_v11 }
 0x9e9   : > { %8263 = vrcp.f32 %v3639_v1 }
 0x9ea   : > { %v3642_v13 = vpop.xlane.xlu1 %3641 }
 0x9eb   : > { %8265 = vrcp.f32 %v3642_v13  ;;  %v3663_v13 = vpop.xlane.xlu0 %3662 }
 0x9ec   : > { %8267 = vpow2.f32 %v4553_v41  ;;  %v15627_v41 = vld [vmem:[#allocation72_spill] sm:$0xff] }
 0x9ed   : > { %8269 = vpow2.f32 %v4555_v28 }
 0x9ee   : > { %v12840_v10 = vpop.xlane.xlu1 %4403  ;;  %8271 = vrcp.f32 %v3645_v27 }
 0x9f1   : > { %v12842_v52 = vpop.eup %8259 }
 0x9f2   : > { %v12844_v2 = vpop.eup %8261  ;;  %v3648_v32 = vpop.xlane.xlu1 %3647 }
 0x9f3   : > { %v3700_v37 = vadd.f32 %v12844_v2, %v12842_v52  ;;  %v8264_v1 = vpop.eup %8263  ;;  %8273 = vrcp.f32 %v3648_v32  ;;  %v15628_v32 = vld [vmem:[#allocation97_spill] sm:$0xff] }
 0x9f4   : > { %v3756_v34 = vmul.f32 %v8264_v1, %v15626_v26  ;;  %v3755_v28 = vmul.f32 %v8264_v1, %v15627_v41  ;;  %8275 = vrcp.f32 %v3651_v3  ;;  %v15630_v43 = vmax.f32 %v15628_v32, %v15629_v6  ;;  %v12868_v1 = vpop.xlane.xlu0 %4424 }
 0x9f5   : > { %3701 = vadd.xlane.f32.xlu1 %v3700_v37  ;;  %v8266_v33 = vpop.eup %8265 }
 0x9f6   : > { %v12850_v22 = vpop.xlane.xlu1 %4409  ;;  %v3758_v17 = vmul.f32 %v8266_v33, %v12591_v58  ;;  %v3757_v27 = vmul.f32 %v8266_v33, %v12587_v9  ;;  %v12859_v55 = vpop.eup %8267 }
 0x9f8   : > { %v3810_v37 = vpack.c.bf16 %v3758_v17, %v3756_v34  ;;  %v3809_v7 = vpack.c.bf16 %v3757_v27, %v3755_v28  ;;  %v15631_v34 = vld [vmem:[#allocation157_spill] sm:$0xff] }
 0x9f9   : > { %4460 = vmax.xlane.f32.xlu1 %v15625_v62  ;;  %v12864_v62 = vpop.eup %8269 }
 0x9fa   : > { %v3654_v39 = vpop.xlane.xlu1 %3653  ;;  %3951 = vmatprep.mubr.bf16.mxu0 %v3810_v37  ;;  %v8272_v58 = vpop.eup %8271  ;;  %v4681_v33 = vadd.f32 %v12864_v62, %v12859_v55 }
 0x9fb   : > { %8277 = vrcp.f32 %v3654_v39  ;;  %3952 = vmatmul.mubr.bf16.gmra.mrb[180].mxu0 %v3809_v7  ;;  %v3760_v3 = vmul.f32 %v8272_v58, %v15631_v34  ;;  %v3669_v7 = vpop.xlane.xlu0 %3668 }
 0x9fc   : > { %8279 = vrcp.f32 %v3657_v14 }
 0x9fd   : > { %4463 = vmax.xlane.f32.xlu1 %v15630_v43  ;;  %v8274_v9 = vpop.eup %8273  ;;  %v15632_v43 = vld [vmem:[#allocation156_spill] sm:$0xff] }
 0x9fe   : > { %v12866_v26 = vpop.xlane.xlu1 %4415  ;;  %v3762_v17 = vmul.f32 %v8274_v9, %v12617_v63  ;;  %v3759_v28 = vmul.f32 %v8272_v58, %v15632_v43  ;;  %v3761_v27 = vmul.f32 %v8274_v9, %v12613_v4  ;;  %v8276_v32 = vpop.eup %8275 }
 0x9ff   : > { %v3764_v34 = vmul.f32 %v8276_v32, %v12552_v59  ;;  %v3763_v58 = vmul.f32 %v8276_v32, %v12550_v47  ;;  %v12882_v9 = vpop.xlane.xlu0 %4430  ;;  %v15634_v32 = vld [vmem:[#allocation70_spill] sm:$0xff] }
 0xa00   : > { %v3812_v37 = vpack.c.bf16 %v3762_v17, %v3760_v3  ;;  %v3811_v6 = vpack.c.bf16 %v3761_v27, %v3759_v28  ;;  %v15633_v3 = vld [vmem:[#allocation35_spill] sm:$0xff] }
 0xa02   : > { %v3660_v41 = vpop.xlane.xlu1 %3659  ;;  %3959 = vmatprep.mubr.bf16.mxu0 %v3812_v37 }
 0xa03   : > { %4682 = vadd.xlane.f32.xlu0 %v4681_v33  ;;  %8281 = vrcp.f32 %v3660_v41  ;;  %3960 = vmatmul.mubr.bf16.gmra.mrb[184].mxu0 %v3811_v6 }
 0xa04   : > { %8283 = vrcp.f32 %v3663_v13 }
 0xa05   : > { %v8278_v29 = vpop.eup %8277 }
 0xa06   : > { %v12876_v39 = vpop.xlane.xlu1 %4421  ;;  %v3766_v63 = vmul.f32 %v8278_v29, %v12649_v49  ;;  %v3765_v4 = vmul.f32 %v8278_v29, %v12643_v40  ;;  %v8280_v17 = vpop.eup %8279 }
 0xa07   : > { %v3675_v49 = vpop.xlane.xlu0 %3674  ;;  %v3768_v47 = vmul.f32 %v8280_v17, %v12573_v50  ;;  %v3767_v41 = vmul.f32 %v8280_v17, %v15634_v32  ;;  %v15635_v50 = vld [vmem:[#allocation50_spill] sm:$0xff]  ;;  %v15639_v17 = vld [vmem:[#allocation71_spill] sm:$0xff]  ;;  %v15640_v32 = vld [vmem:[#allocation45_spill] sm:$0xff] }
 0xa08   : > { %v3814_v14 = vpack.c.bf16 %v3766_v63, %v3764_v34  ;;  %v3813_v33 = vpack.c.bf16 %v3765_v4, %v3763_v58  ;;  %v15636_v63 = vld [vmem:[#allocation42_spill] sm:$0xff]  ;;  %v15637_v58 = vld [vmem:[#allocation159_spill] sm:$0xff] }
 0xa0a   : > { %v3666_v16 = vpop.xlane.xlu1 %3665  ;;  %3967 = vmatprep.mubr.bf16.mxu0 %v3814_v14  ;;  %v15638_v14 = vld [vmem:[#allocation158_spill] sm:$0xff] }
 0xa0b   : > { %8285 = vrcp.f32 %v3666_v16  ;;  %3968 = vmatmul.mubr.bf16.gmra.mrb[188].mxu0 %v3813_v33  ;;  %v12894_v16 = vpop.xlane.xlu0 %4436 }
 0xa0c   : > { %8287 = vrcp.f32 %v3669_v7 }
 0xa0d   : > { %v8282_v59 = vpop.eup %8281 }
 0xa0e   : > { %4905 = vrot.lane.b32.xlu1 %v15633_v3, %s8867_s23  ;;  %v12886_v6 = vpop.xlane.xlu1 %4427  ;;  %v3770_v40 = vmul.f32 %v8282_v59, %v12677_v19  ;;  %v3769_v13 = vmul.f32 %v8282_v59, %v12673_v18  ;;  %v8284_v37 = vpop.eup %8283  ;;  %v4491_v19 = vsub.f32 %v15635_v50, %v12834_v45  ;;  %v4492_v59 = vsub.f32 %v15639_v17, %v12834_v45 }
 0xa0f   : > { %v3772_v18 = vmul.f32 %v8284_v37, %v15637_v58  ;;  %v3771_v33 = vmul.f32 %v8284_v37, %v15638_v14 }
 0xa10   : > { %v3816_v43 = vpack.c.bf16 %v3770_v40, %v3768_v47  ;;  %v3815_v28 = vpack.c.bf16 %v3769_v13, %v3767_v41  ;;  %v3681_v41 = vpop.xlane.xlu0 %3680 }
 0xa12   : > { %v3672_v29 = vpop.xlane.xlu1 %3671  ;;  %3975 = vmatprep.mubr.bf16.mxu0 %v3816_v43  ;;  %v4559_v43 = vmul.f32 1.442695, %v4492_v59 }
 0xa13   : > { %8289 = vrcp.f32 %v3672_v29  ;;  %3976 = vmatmul.mubr.bf16.gmra.mrb[192].mxu0 %v3815_v28  ;;  %v4557_v29 = vmul.f32 1.442695, %v4491_v19 }
 0xa14   : > { %8291 = vrcp.f32 %v3675_v49  ;;  %v12914_v50 = vpop.xlane.xlu0 %4442 }
 0xa15   : > { %v8286_v34 = vpop.eup %8285 }
 0xa16   : > { %v12892_v27 = vpop.xlane.xlu1 %4433  ;;  %v3774_v4 = vmul.f32 %v8286_v34, %v12701_v23  ;;  %v3773_v3 = vmul.f32 %v8286_v34, %v12697_v54  ;;  %v8288_v23 = vpop.eup %8287 }
 0xa17   : > { %v3776_v54 = vmul.f32 %v8288_v23, %v12623_v51  ;;  %v3775_v37 = vmul.f32 %v8288_v23, %v12621_v46 }
 0xa18   : > { %v3818_v47 = vpack.c.bf16 %v3774_v4, %v3772_v18  ;;  %v3817_v40 = vpack.c.bf16 %v3773_v3, %v3771_v33 }
 0xa19   : > { %4923 = vrot.lane.b32.xlu0 %v15636_v63, %s8867_s23 }
 0xa1a   : > { %v3678_v7 = vpop.xlane.xlu1 %3677  ;;  %3983 = vmatprep.mubr.bf16.mxu0 %v3818_v47 }
 0xa1b   : > { %8293 = vrcp.f32 %v3678_v7  ;;  %3984 = vmatmul.mubr.bf16.gmra.mrb[196].mxu0 %v3817_v40  ;;  %v3687_v7 = vpop.xlane.xlu0 %3686 }
 0xa1c   : > { %8295 = vpow2.f32 %v4557_v29  ;;  %v15642_v29 = vld [vmem:[#allocation76_spill] sm:$0xff] }
 0xa1d   : > { %4925 = vrot.lane.b32.xlu0 %v15640_v32, %s8867_s23  ;;  %v8290_v28 = vpop.eup %8289  ;;  %8297 = vpow2.f32 %v4559_v43 }
 0xa1e   : > { %v12908_v13 = vpop.xlane.xlu1 %4439  ;;  %v3778_v45 = vmul.f32 %v8290_v28, %v12723_v56  ;;  %v3777_v34 = vmul.f32 %v8290_v28, %v12721_v36  ;;  %8299 = vrcp.f32 %v3681_v41  ;;  %v8292_v58 = vpop.eup %8291 }
 0xa1f   : > { %v3780_v51 = vmul.f32 %v8292_v58, %v12657_v60  ;;  %v3779_v36 = vmul.f32 %v8292_v58, %v12653_v30 }
 0xa20   : > { %v3820_v19 = vpack.c.bf16 %v3778_v45, %v3776_v54  ;;  %v3819_v63 = vpack.c.bf16 %v3777_v34, %v3775_v37 }
 0xa22   : > { %v3684_v49 = vpop.xlane.xlu1 %3683  ;;  %3991 = vmatprep.mubr.bf16.mxu0 %v3820_v19  ;;  %v15643_v19 = vld [vmem:[#allocation101_spill] sm:$0xff] }
 0xa23   : > { %8301 = vrcp.f32 %v3684_v49  ;;  %3992 = vmatmul.mubr.bf16.gmra.mrb[200].mxu0 %v3819_v63  ;;  %v15644_v63 = vld [vmem:[#allocation103_spill] sm:$0xff] }
 0xa24   : > { %8303 = vrcp.f32 %v3687_v7  ;;  %v15645_v58 = vmax.f32 %v15643_v19, %v15644_v63 }
 0xa25   : > { %v8294_v4 = vpop.eup %8293 }
 0xa26   : > { %v12916_v18 = vpop.xlane.xlu1 %4445  ;;  %v3782_v56 = vmul.f32 %v8294_v4, %v12741_v35  ;;  %v3781_v46 = vmul.f32 %v8294_v4, %v12739_v31  ;;  %v12922_v33 = vpop.eup %8295  ;;  %v15641_v31 = vld [vmem:[#allocation53_spill] sm:$0xff] }
 0xa27   : > { %v12924_v59 = vpop.eup %8297  ;;  %v12939_v4 = vpop.xlane.xlu0 %4448 }
 0xa28   : > { %v3822_v14 = vpack.c.bf16 %v3782_v56, %v3780_v51  ;;  %v3821_v3 = vpack.c.bf16 %v3781_v46, %v3779_v36  ;;  %v8300_v47 = vpop.eup %8299  ;;  %v4684_v35 = vadd.f32 %v12924_v59, %v12922_v33  ;;  %v15647_v46 = vld [vmem:[#allocation163_spill] sm:$0xff] }
 0xa29   : > { %v3784_v40 = vmul.f32 %v8300_v47, %v15641_v31  ;;  %v3783_v32 = vmul.f32 %v8300_v47, %v15642_v29  ;;  %v15649_v47 = vld [vmem:[#allocation37_spill] sm:$0xff] }
 0xa2a   : > { %3999 = vmatprep.mubr.bf16.mxu0 %v3822_v14  ;;  %v3690_v17 = vpop.xlane.xlu1 %3689  ;;  %v15648_v14 = vld [vmem:[#allocation162_spill] sm:$0xff] }
 0xa2b   : > { %8305 = vrcp.f32 %v3690_v17  ;;  %4000 = vmatmul.mubr.bf16.gmra.mrb[204].mxu0 %v3821_v3  ;;  %v3693_v51 = vpop.xlane.xlu0 %3692 }
 0xa2c   : > { %8307 = vrcp.f32 %v3693_v51  ;;  %v15657_v51 = vld [vmem:[#allocation143_spill] sm:$0xff] }
 0xa2d   : > { %v8302_v60 = vpop.eup %8301 }
 0xa2e   : > { %v3786_v30 = vmul.f32 %v8302_v60, %v12750_v21  ;;  %v3785_v41 = vmul.f32 %v8302_v60, %v12748_v42  ;;  %v8304_v28 = vpop.eup %8303  ;;  %v12941_v56 = vpop.xlane.xlu1 %4451  ;;  %v15650_v60 = vld [vmem:[#allocation51_spill] sm:$0xff] }
 0xa2f   : > { %v3788_v45 = vmul.f32 %v8304_v28, %v12705_v15  ;;  %v3787_v37 = vmul.f32 %v8304_v28, %v12703_v12  ;;  %v15646_v15 = vld [vmem:[#allocation34_spill] sm:$0xff]  ;;  %v15654_v28 = vld [vmem:[#allocation56_spill] sm:$0xff] }
 0xa30   : > { %v3824_v23 = vpack.c.bf16 %v3786_v30, %v3784_v40  ;;  %v3823_v43 = vpack.c.bf16 %v3785_v41, %v3783_v32  ;;  %v15651_v30 = vld [vmem:[#allocation59_spill] sm:$0xff]  ;;  %v15652_v32 = vld [vmem:[#allocation36_spill] sm:$0xff] }
 0xa31   : > { %v4494_v29 = vsub.f32 %v15651_v30, %v12824_v53  ;;  %v15653_v41 = vld [vmem:[#allocation55_spill] sm:$0xff] }
 0xa32   : > { %4685 = vadd.xlane.f32.xlu1 %v4684_v35  ;;  %4007 = vmatprep.mubr.bf16.mxu0 %v3824_v23  ;;  %v4493_v35 = vsub.f32 %v15650_v60, %v12824_v53  ;;  %v12959_v23 = vpop.xlane.xlu0 %4454 }
 0xa33   : > { %4008 = vmatmul.mubr.bf16.gmra.mrb[208].mxu0 %v3823_v43  ;;  %v4563_v43 = vmul.f32 1.442695, %v4494_v29 }
 0xa35   : > { %v8306_v54 = vpop.eup %8305 }
 0xa36   : > { %v3790_v49 = vmul.f32 %v8306_v54, %v12765_v57  ;;  %v3789_v34 = vmul.f32 %v8306_v54, %v12763_v61  ;;  %v8308_v61 = vpop.eup %8307  ;;  %v4496_v54 = vsub.f32 %v15654_v28, %v12840_v10 }
 0xa37   : > { %v3792_v36 = vmul.f32 %v8308_v61, %v15647_v46  ;;  %v3791_v3 = vmul.f32 %v8308_v61, %v15648_v14  ;;  %v15659_v46 = vld [vmem:[#allocation144_spill] sm:$0xff] }
 0xa38   : > { %v3826_v21 = vpack.c.bf16 %v3790_v49, %v3788_v45  ;;  %v3825_v42 = vpack.c.bf16 %v3789_v34, %v3787_v37  ;;  %v15655_v45 = vld [vmem:[#allocation47_spill] sm:$0xff]  ;;  %v4567_v37 = vmul.f32 1.442695, %v4496_v54 }
 0xa3a   : > { %4015 = vmatprep.mubr.bf16.mxu0 %v3826_v21 }
 0xa3b   : > { %4016 = vmatmul.mubr.bf16.gmra.mrb[212].mxu0 %v3825_v42  ;;  %v15656_v42 = vld [vmem:[#allocation142_spill] sm:$0xff] }
 0xa3c   : > { %4466 = vmax.xlane.f32.xlu0 %v15645_v58 }
 0xa43   : > { %4907 = vrot.lane.b32.xlu1 %v15646_v15, %s8867_s23  ;;  %v15658_v15 = vmax.f32 %v15656_v42, %v15657_v51 }
 0xa45   : > { %v3696_v12 = vpop.xlane.xlu1 %3695 }
 0xa46   : > { %8309 = vrcp.f32 %v3696_v12 }
 0xa49   : > { %v12983_v14 = vpop.xlane.xlu1 %4457 }
 0xa50   : > { %v8310_v57 = vpop.eup %8309 }
 0xa51   : > { %v3794_v7 = vmul.f32 %v8310_v57, %v12794_v0  ;;  %v3793_v17 = vmul.f32 %v8310_v57, %v12792_v24  ;;  %v4561_v0 = vmul.f32 1.442695, %v4493_v35  ;;  %v4495_v24 = vsub.f32 %v15653_v41, %v12840_v10 }
 0xa52   : > { %4909 = vrot.lane.b32.xlu0 %v15649_v47, %s8867_s23 }
 0xa53   : > { %v3828_v31 = vpack.c.bf16 %v3794_v7, %v3792_v36  ;;  %v3827_v40 = vpack.c.bf16 %v3793_v17, %v3791_v3  ;;  %8311 = vpow2.f32 %v4561_v0  ;;  %v4565_v53 = vmul.f32 1.442695, %v4495_v24  ;;  %v15660_v36 = vld [vmem:[#allocation145_spill] sm:$0xff]  ;;  %v15662_v3 = vld [vmem:[#allocation44_spill] sm:$0xff] }
 0xa54   : > { %8313 = vpow2.f32 %v4563_v43  ;;  %v15661_v7 = vmax.f32 %v15659_v46, %v15660_v36 }
 0xa55   : > { %4023 = vmatprep.mubr.bf16.mxu0 %v3828_v31  ;;  %8315 = vpow2.f32 %v4565_v53 }
 0xa56   : > { %4911 = vrot.lane.b32.xlu0 %v15652_v32, %s8867_s23  ;;  %4024 = vmatmul.mubr.bf16.gmra.mrb[216].mxu0 %v3827_v40  ;;  %8317 = vpow2.f32 %v4567_v37  ;;  %v15666_v37 = vld [vmem:[#allocation106_spill] sm:$0xff] }
 0xa5a   : > { %4929 = vrot.lane.b32.xlu0 %v15655_v45, %s8867_s23 }
 0xa5b   : > { %v3699_v49 = vpop.xlane.xlu0 %3698 }
 0xa5c   : > { %8319 = vrcp.f32 %v3699_v49  ;;  %v15665_v49 = vld [vmem:[#allocation39_spill] sm:$0xff] }
 0xa5d   : > { %v12965_v21 = vpop.eup %8311 }
 0xa5e   : > { %v12967_v58 = vpop.eup %8313 }
 0xa5f   : > { %v4922_v34 = vpop.permute.xlu0 %4921  ;;  %v12972_v10 = vpop.eup %8315  ;;  %v4687_v12 = vadd.f32 %v12967_v58, %v12965_v21 }
 0xa60   : > { %7051 = vmatprep.subr.bf16.mxu0 %v4922_v34  ;;  %v12976_v61 = vpop.eup %8317  ;;  %v4497_v34 = vsub.f32 %v15666_v37, %v12828_v48 }
 0xa61   : > { %v4690_v57 = vadd.f32 %v12976_v61, %v12972_v10 }
 0xa66   : > { %v8320_v40 = vpop.eup %8319 }
 0xa67   : > { %4469 = vmax.xlane.f32.xlu1 %v15658_v15  ;;  %v3796_v43 = vmul.f32 %v8320_v40, %v12818_v20  ;;  %v3795_v54 = vmul.f32 %v8320_v40, %v12815_v25  ;;  %v15667_v20 = vld [vmem:[#allocation107_spill] sm:$0xff] }
 0xa6b   : > { %4688 = vadd.xlane.f32.xlu1 %v4687_v12 }
 0xa6f   : > { %4691 = vadd.xlane.f32.xlu1 %v4690_v57 }
 0xa79   : > { %4472 = vmax.xlane.f32.xlu0 %v15661_v7 }
 0xa80   : > { %4927 = vrot.lane.b32.xlu1 %v15662_v3, %s8867_s23 }
 0xa82   : > { %v3702_v17 = vpop.xlane.xlu1 %3701 }
 0xa83   : > { %8321 = vrcp.f32 %v3702_v17 }
 0xa86   : > { %v12987_v47 = vpop.xlane.xlu1 %4460 }
 0xa89   : > { %v6907_v60 = vpop.f32.mrb[160].mxu0 }
 0xa8a   : > { %v12989_v35 = vpop.xlane.xlu1 %4463  ;;  %v6908_v31 = vpop.f32.mrb[161].mxu0 }
 0xa8b   : > { %v12991_v30 = vadd.f32 %v6908_v31, %v6907_v60  ;;  %v6910_v29 = vpop.f32.mrb[162].mxu0  ;;  %v4569_v60 = vmul.f32 1.442695, %v4497_v34  ;;  %v15670_v31 = vld [vmem:[#allocation110_spill] sm:$0xff] }
 0xa8c   : > { %v6911_v32 = vpop.f32.mrb[163].mxu0  ;;  %v4499_v40 = vsub.f32 %v15670_v31, %v12850_v22 }
 0xa8d   : > { %15663 = vst [vmem:[#allocation167_spill] sm:$0xff] %v12991_v30  ;;  %v8322_v0 = vpop.eup %8321  ;;  %v12993_v41 = vadd.f32 %v6911_v32, %v6910_v29  ;;  %8323 = vpow2.f32 %v4569_v60 }
 0xa8e   : > { %v4906_v24 = vpop.permute.xlu1 %4905  ;;  %v3798_v28 = vmul.f32 %v8322_v0, %v12844_v2  ;;  %v3797_v45 = vmul.f32 %v8322_v0, %v12842_v52  ;;  %v4498_v2 = vsub.f32 %v15667_v20, %v12828_v48  ;;  %v15668_v52 = vld [vmem:[#allocation38_spill] sm:$0xff] }
 0xa8f   : > { %15664 = vst [vmem:[#allocation170_spill] sm:$0xff] %v12993_v41  ;;  %4913 = vrot.lane.b32.xlu0 %v15665_v49, %s8867_s23  ;;  %7052 = vmatpush3.bf16.msra.mxu0 %v4906_v24  ;;  %v15671_v24 = vld [vmem:[#allocation63_spill] sm:$0xff] }
 0xa90   : > { %v4683_v15 = vpop.xlane.xlu0 %4682  ;;  %v3830_v12 = vpack.c.bf16 %v3798_v28, %v3796_v43  ;;  %v3829_v57 = vpack.c.bf16 %v3797_v45, %v3795_v54  ;;  %v4571_v0 = vmul.f32 1.442695, %v4498_v2  ;;  %v4500_v48 = vsub.f32 %v15671_v24, %v12850_v22  ;;  %v15673_v54 = vld [vmem:[#allocation49_spill] sm:$0xff] }
 0xa91   : > { %v6913_v7 = vpop.f32.mrb[164].mxu0  ;;  %v4573_v45 = vmul.f32 1.442695, %v4499_v40  ;;  %v15677_v40 = vld [vmem:[#allocation116_spill] sm:$0xff]  ;;  %v15684_v2 = vld [vmem:[#allocation125_spill] sm:$0xff] }
 0xa92   : > { %4031 = vmatprep.mubr.bf16.mxu0 %v3830_v12  ;;  %v6914_v25 = vpop.f32.mrb[165].mxu0  ;;  %8325 = vpow2.f32 %v4571_v0  ;;  %v4575_v49 = vmul.f32 1.442695, %v4500_v48 }
 0xa93   : > { %4915 = vrot.lane.b32.xlu0 %v15668_v52, %s8867_s23  ;;  %v13009_v3 = vadd.f32 %v6914_v25, %v6913_v7  ;;  %4032 = vmatmul.mubr.bf16.gmra.mrb[220].mxu0 %v3829_v57  ;;  %v6916_v17 = vpop.f32.mrb[166].mxu0  ;;  %8327 = vpow2.f32 %v4573_v45 }
 0xa94   : > { %v4924_v29 = vpop.permute.xlu0 %4923  ;;  %v6917_v32 = vpop.f32.mrb[167].mxu0  ;;  %8329 = vpow2.f32 %v4575_v49 }
 0xa95   : > { %15669 = vst [vmem:[#allocation52_spill] sm:$0xff] %v13009_v3  ;;  %v13015_v43 = vadd.f32 %v6917_v32, %v6916_v17  ;;  %7053 = vmatprep.subr.bf16.mxu0 %v4924_v29  ;;  %v15678_v29 = vld [vmem:[#allocation122_spill] sm:$0xff]  ;;  %8331 = vrcp.f32 %v4683_v15  ;;  %v15709_v3 = vld [vmem:[#allocation133_spill] sm:$0xff] }
 0xa96   : > { %v15679_v32 = vmax.f32 %v15677_v40, %v15678_v29 }
 0xa97   : > { %15672 = vst [vmem:[#allocation100_spill] sm:$0xff] %v13015_v43  ;;  %4933 = vrot.lane.b32.xlu0 %v15673_v54, %s8867_s23  ;;  %v13027_v25 = vpop.eup %8323 }
 0xa99   : > { %v6919_v37 = vpop.f32.mrb[168].mxu0 }
 0xa9a   : > { %v6920_v34 = vpop.f32.mrb[169].mxu0 }
 0xa9b   : > { %v13021_v12 = vadd.f32 %v6920_v34, %v6919_v37  ;;  %v6922_v57 = vpop.f32.mrb[170].mxu0 }
 0xa9c   : > { %v6923_v22 = vpop.f32.mrb[171].mxu0  ;;  %v13029_v17 = vpop.eup %8325 }
 0xa9d   : > { %15674 = vst [vmem:[#allocation62_spill] sm:$0xff] %v13021_v12  ;;  %v13023_v20 = vadd.f32 %v6923_v22, %v6922_v57  ;;  %v13038_v48 = vpop.eup %8327  ;;  %v4693_v54 = vadd.f32 %v13029_v17, %v13027_v25 }
 0xa9e   : > { %v13042_v45 = vpop.eup %8329 }
 0xa9f   : > { %15675 = vst [vmem:[#allocation172_spill] sm:$0xff] %v13023_v20  ;;  %v4696_v57 = vadd.f32 %v13042_v45, %v13038_v48 }
 0xaa1   : > { %v6925_v7 = vpop.f32.mrb[172].mxu0 }
 0xaa2   : > { %v6926_v52 = vpop.f32.mrb[173].mxu0 }
 0xaa3   : > { %v13031_v60 = vadd.f32 %v6926_v52, %v6925_v7  ;;  %v6928_v31 = vpop.f32.mrb[174].mxu0 }
 0xaa4   : > { %4475 = vmax.xlane.f32.xlu1 %v15679_v32  ;;  %v6929_v0 = vpop.f32.mrb[175].mxu0 }
 0xaa5   : > { %15676 = vst [vmem:[#allocation173_spill] sm:$0xff] %v13031_v60  ;;  %v13036_v24 = vadd.f32 %v6929_v0, %v6928_v31  ;;  %v15683_v0 = vld [vmem:[#allocation124_spill] sm:$0xff] }
 0xaa6   : > { %v15685_v53 = vmax.f32 %v15683_v0, %v15684_v2 }
 0xaa7   : > { %15680 = vst [vmem:[#allocation176_spill] sm:$0xff] %v13036_v24 }
 0xaa8   : > { %4694 = vadd.xlane.f32.xlu1 %v4693_v54  ;;  %v15686_v54 = vld [vmem:[#allocation46_spill] sm:$0xff] }
 0xaa9   : > { %v6931_v37 = vpop.f32.mrb[176].mxu0 }
 0xaaa   : > { %v6932_v34 = vpop.f32.mrb[177].mxu0 }
 0xaab   : > { %v13048_v22 = vadd.f32 %v6932_v34, %v6931_v37  ;;  %v6934_v7 = vpop.f32.mrb[178].mxu0  ;;  %v4926_v34 = vpop.permute.xlu0 %4925 }
 0xaac   : > { %4697 = vadd.xlane.f32.xlu1 %v4696_v57  ;;  %v6935_v52 = vpop.f32.mrb[179].mxu0  ;;  %v8332_v57 = vpop.eup %8331 }
 0xaad   : > { %15681 = vst [vmem:[#allocation177_spill] sm:$0xff] %v13048_v22  ;;  %v13050_v31 = vadd.f32 %v6935_v52, %v6934_v7  ;;  %v13062_v32 = vmul.f32 %v8332_v57, %v12859_v55  ;;  %v15689_v55 = vld [vmem:[#allocation58_spill] sm:$0xff] }
 0xaae   : > { %v4502_v60 = vsub.f32 %v15689_v55, %v12836_v8 }
 0xaaf   : > { %15682 = vst [vmem:[#allocation168_spill] sm:$0xff] %v13050_v31 }
 0xab6   : > { %4478 = vmax.xlane.f32.xlu0 %v15685_v53  ;;  %v4810_v53 = vmul.f32 %v8332_v57, %v12864_v62  ;;  %v15690_v62 = vld [vmem:[#allocation40_spill] sm:$0xff] }
 0xabd   : > { %4931 = vrot.lane.b32.xlu1 %v15686_v54, %s8867_s23  ;;  %v15688_v54 = vld [vmem:[#allocation67_spill] sm:$0xff] }
 0xabf   : > { %v4686_v49 = vpop.xlane.xlu1 %4685 }
 0xac0   : > { %8333 = vrcp.f32 %v4686_v49  ;;  %v15687_v49 = vld [vmem:[#allocation41_spill] sm:$0xff] }
 0xac3   : > { %v4908_v37 = vpop.permute.xlu1 %4907 }
 0xac4   : > { %7054 = vmatpush3.bf16.msra.mxu0 %v4908_v37  ;;  %v4501_v37 = vsub.f32 %v15688_v54, %v12836_v8 }
 0xac5   : > { %7055 = vmatprep.subr.bf16.mxu0 %v4926_v34 }
 0xac9   : > { %v13059_v7 = vpop.xlane.xlu0 %4466 }
 0xaca   : > { %v8334_v52 = vpop.eup %8333 }
 0xacb   : > { %v13065_v28 = vmul.f32 %v8334_v52, %v12922_v33  ;;  %v4812_v15 = vmul.f32 %v8334_v52, %v12924_v59  ;;  %v4577_v33 = vmul.f32 1.442695, %v4501_v37  ;;  %v15691_v59 = vld [vmem:[#allocation73_spill] sm:$0xff]  ;;  %v4579_v52 = vmul.f32 1.442695, %v4502_v60 }
 0xacc   : > { %4917 = vrot.lane.b32.xlu0 %v15687_v49, %s8867_s23  ;;  %v4503_v57 = vsub.f32 %v15691_v59, %v12866_v26  ;;  %v15692_v49 = vld [vmem:[#allocation60_spill] sm:$0xff] }
 0xacd   : > { %v4910_v34 = vpop.permute.xlu0 %4909  ;;  %v4874_v22 = vpack.c.bf16 %v4812_v15, %v4810_v53  ;;  %v4504_v54 = vsub.f32 %v15692_v49, %v12866_v26  ;;  %8335 = vpow2.f32 %v4577_v33  ;;  %v15695_v26 = vld [vmem:[#allocation81_spill] sm:$0xff] }
 0xace   : > { %7056 = vmatpush3.bf16.msra.mxu0 %v4910_v34  ;;  %v6937_v53 = vpop.f32.mrb[180].mxu0  ;;  %v4581_v8 = vmul.f32 1.442695, %v4503_v57  ;;  %8337 = vpow2.f32 %v4579_v52  ;;  %v15696_v49 = vld [vmem:[#allocation77_spill] sm:$0xff] }
 0xacf   : > { %4985 = vmatprep.mubr.bf16.mxu0 %v4874_v22  ;;  %v6938_v15 = vpop.f32.mrb[181].mxu0  ;;  %v4583_v22 = vmul.f32 1.442695, %v4504_v54 }
 0xad0   : > { %4919 = vrot.lane.b32.xlu0 %v15690_v62, %s8867_s23  ;;  %v13083_v24 = vadd.f32 %v6938_v15, %v6937_v53  ;;  %v6940_v31 = vpop.f32.mrb[182].mxu0  ;;  %8339 = vpow2.f32 %v4581_v8  ;;  %v4505_v62 = vsub.f32 %v15695_v26, %v12848_v44  ;;  %v4506_v53 = vsub.f32 %v15696_v49, %v12848_v44  ;;  %v15699_v8 = vld [vmem:[#allocation82_spill] sm:$0xff]  ;;  %v15700_v26 = vld [vmem:[#allocation84_spill] sm:$0xff] }
 0xad1   : > { %v6941_v34 = vpop.f32.mrb[183].mxu0  ;;  %8341 = vpow2.f32 %v4583_v22 }
 0xad2   : > { %15693 = vst [vmem:[#allocation169_spill] sm:$0xff] %v13083_v24  ;;  %v13085_v55 = vadd.f32 %v6941_v34, %v6940_v31  ;;  %v4585_v15 = vmul.f32 1.442695, %v4505_v62  ;;  %v4507_v34 = vsub.f32 %v15699_v8, %v12876_v39  ;;  %v4587_v37 = vmul.f32 1.442695, %v4506_v53  ;;  %v15704_v62 = vld [vmem:[#allocation128_spill] sm:$0xff] }
 0xad3   : > { %v4508_v24 = vsub.f32 %v15700_v26, %v12876_v39  ;;  %v4509_v8 = vsub.f32 %v15704_v62, %v12868_v1  ;;  %v15705_v26 = vld [vmem:[#allocation129_spill] sm:$0xff] }
 0xad4   : > { %15694 = vst [vmem:[#allocation180_spill] sm:$0xff] %v13085_v55  ;;  %8343 = vpow2.f32 %v4585_v15  ;;  %v4589_v55 = vmul.f32 1.442695, %v4507_v34  ;;  %v4510_v44 = vsub.f32 %v15705_v26, %v12868_v1  ;;  %v15708_v34 = vld [vmem:[#allocation90_spill] sm:$0xff]  ;;  %v4514_v1 = vsub.f32 %v15709_v3, %v12882_v9 }
 0xad5   : > { %8345 = vpow2.f32 %v4587_v37  ;;  %v4593_v62 = vmul.f32 1.442695, %v4509_v8  ;;  %v4513_v30 = vsub.f32 %v15708_v34, %v12882_v9 }
 0xad6   : > { %v6943_v60 = vpop.f32.mrb[184].mxu0  ;;  %8347 = vpow2.f32 %v4589_v55  ;;  %v4595_v37 = vmul.f32 1.442695, %v4510_v44  ;;  %v4603_v55 = vmul.f32 1.442695, %v4514_v1  ;;  %v15717_v1 = vld [vmem:[#allocation93_spill] sm:$0xff] }
 0xad7   : > { %v6944_v59 = vpop.f32.mrb[185].mxu0  ;;  %v13097_v31 = vpop.eup %8335 }
 0xad8   : > { %v13093_v33 = vadd.f32 %v6944_v59, %v6943_v60  ;;  %v6946_v57 = vpop.f32.mrb[186].mxu0  ;;  %v13101_v22 = vpop.eup %8337  ;;  %v15701_v60 = vld [vmem:[#allocation164_spill] sm:$0xff]  ;;  %v15702_v59 = vld [vmem:[#allocation221_spill] sm:$0xff] }
 0xad9   : > { %v6947_v52 = vpop.f32.mrb[187].mxu0  ;;  %v15703_v49 = vmax.f32 %v15701_v60, %v15702_v59  ;;  %v4699_v53 = vadd.f32 %v13101_v22, %v13097_v31 }
 0xada   : > { %15697 = vst [vmem:[#allocation181_spill] sm:$0xff] %v13093_v33  ;;  %v13095_v54 = vadd.f32 %v6947_v52, %v6946_v57  ;;  %v13110_v52 = vpop.eup %8339  ;;  %v4591_v33 = vmul.f32 1.442695, %v4508_v24 }
 0xadb   : > { %v13116_v39 = vpop.eup %8341 }
 0xadc   : > { %15698 = vst [vmem:[#allocation68_spill] sm:$0xff] %v13095_v54  ;;  %v4702_v41 = vadd.f32 %v13116_v39, %v13110_v52  ;;  %8349 = vpow2.f32 %v4591_v33 }
 0xadd   : > { %8351 = vpow2.f32 %v4593_v62  ;;  %v15715_v62 = vld [vmem:[#allocation207_spill] sm:$0xff] }
 0xade   : > { %v6949_v57 = vpop.f32.mrb[188].mxu0  ;;  %8353 = vpow2.f32 %v4595_v37  ;;  %v13138_v3 = vpop.eup %8343  ;;  %v15716_v37 = vld [vmem:[#allocation78_spill] sm:$0xff] }
 0xadf   : > { %v6950_v12 = vpop.f32.mrb[189].mxu0  ;;  %15713 = vst [vmem:[#allocation174_spill] sm:$0xff] %v13138_v3  ;;  %v13140_v34 = vpop.eup %8345 }
 0xae0   : > { %v6952_v54 = vpop.f32.mrb[190].mxu0 }
 0xae1   : > { %4481 = vmax.xlane.f32.xlu1 %v15703_v49  ;;  %v13120_v49 = vadd.f32 %v6950_v12, %v6949_v57  ;;  %v6953_v20 = vpop.f32.mrb[191].mxu0  ;;  %v15718_v12 = vmax.f32 %v15716_v37, %v15717_v1 }
 0xae2   : > { %v13122_v15 = vadd.f32 %v6953_v20, %v6952_v54  ;;  %v4601_v20 = vmul.f32 1.442695, %v4513_v30  ;;  %v15710_v54 = vld [vmem:[#allocation88_spill] sm:$0xff] }
 0xae3   : > { %15706 = vst [vmem:[#allocation171_spill] sm:$0xff] %v13120_v49  ;;  %v4517_v57 = vsub.f32 %v15710_v54, %v12894_v16  ;;  %v4521_v54 = vsub.f32 %v15715_v62, %v12914_v50  ;;  %v13153_v49 = vpop.eup %8347 }
 0xae4   : > { %15707 = vst [vmem:[#allocation184_spill] sm:$0xff] %v13122_v15  ;;  %8355 = vpow2.f32 %v4601_v20  ;;  %v4705_v20 = vadd.f32 %v13140_v34, %v13138_v3 }
 0xae5   : > { %4700 = vadd.xlane.f32.xlu1 %v4699_v53  ;;  %v15711_v53 = vld [vmem:[#allocation203_spill] sm:$0xff]  ;;  %v4609_v30 = vmul.f32 1.442695, %v4517_v57  ;;  %8357 = vpow2.f32 %v4603_v55 }
 0xae6   : > { %v6955_v24 = vpop.f32.mrb[192].mxu0  ;;  %v4518_v44 = vsub.f32 %v15711_v53, %v12894_v16  ;;  %v13157_v57 = vpop.eup %8349 }
 0xae7   : > { %v6956_v8 = vpop.f32.mrb[193].mxu0  ;;  %8359 = vpow2.f32 %v4609_v30  ;;  %v13167_v15 = vpop.eup %8351 }
 0xae8   : > { %v13136_v26 = vadd.f32 %v6956_v8, %v6955_v24  ;;  %v6958_v9 = vpop.f32.mrb[194].mxu0  ;;  %v4611_v16 = vmul.f32 1.442695, %v4518_v44  ;;  %v15719_v24 = vld [vmem:[#allocation209_spill] sm:$0xff]  ;;  %v13171_v30 = vpop.eup %8353 }
 0xae9   : > { %4703 = vadd.xlane.f32.xlu1 %v4702_v41  ;;  %v6959_v33 = vpop.f32.mrb[195].mxu0  ;;  %v4522_v8 = vsub.f32 %v15719_v24, %v12914_v50  ;;  %v15721_v44 = vld [vmem:[#allocation137_spill] sm:$0xff] }
 0xaea   : > { %15712 = vst [vmem:[#allocation185_spill] sm:$0xff] %v13136_v26  ;;  %v13142_v41 = vadd.f32 %v6959_v33, %v6958_v9  ;;  %v15720_v9 = vld [vmem:[#allocation136_spill] sm:$0xff]  ;;  %8361 = vpow2.f32 %v4611_v16  ;;  %v4526_v24 = vsub.f32 %v15721_v44, %v12939_v4 }
 0xaeb   : > { %v4525_v33 = vsub.f32 %v15720_v9, %v12939_v4  ;;  %v4619_v50 = vmul.f32 1.442695, %v4522_v8  ;;  %v4708_v9 = vadd.f32 %v13157_v57, %v13153_v49  ;;  %v4529_v4 = vsub.f32 %v15599_v38, %v12959_v23  ;;  %v15724_v8 = vld [vmem:[#allocation217_spill] sm:$0xff]  ;;  %v15725_v38 = vld [vmem:[#allocation48_spill] sm:$0xff] }
 0xaec   : > { %15714 = vst [vmem:[#allocation175_spill] sm:$0xff] %v13142_v41  ;;  %v4627_v16 = vmul.f32 1.442695, %v4526_v24 }
 0xaee   : > { %v6961_v62 = vpop.f32.mrb[196].mxu0  ;;  %v13181_v3 = vpop.eup %8355 }
 0xaef   : > { %4484 = vmax.xlane.f32.xlu0 %v15718_v12  ;;  %v4617_v12 = vmul.f32 1.442695, %v4521_v54  ;;  %v6962_v55 = vpop.f32.mrb[197].mxu0  ;;  %v4625_v54 = vmul.f32 1.442695, %v4525_v33 }
 0xaf0   : > { %v13163_v53 = vadd.f32 %v6962_v55, %v6961_v62  ;;  %v6964_v26 = vpop.f32.mrb[198].mxu0  ;;  %v4530_v62 = vsub.f32 %v15724_v8, %v12959_v23  ;;  %v4533_v23 = vsub.f32 %v15623_v5, %v12987_v47  ;;  %v4534_v8 = vsub.f32 %v15624_v11, %v12987_v47 }
 0xaf1   : > { %v6965_v43 = vpop.f32.mrb[199].mxu0  ;;  %8363 = vpow2.f32 %v4617_v12  ;;  %v4633_v12 = vmul.f32 1.442695, %v4529_v4  ;;  %v4538_v47 = vsub.f32 %v15644_v63, %v13059_v7 }
 0xaf2   : > { %15722 = vst [vmem:[#allocation198_spill] sm:$0xff] %v13163_v53  ;;  %8365 = vpow2.f32 %v4619_v50  ;;  %v4912_v50 = vpop.permute.xlu0 %4911  ;;  %v4641_v11 = vmul.f32 1.442695, %v4533_v23 }
 0xaf3   : > { %4706 = vadd.xlane.f32.xlu0 %v4705_v20  ;;  %v13173_v20 = vadd.f32 %v6965_v43, %v6964_v26  ;;  %v4711_v43 = vadd.f32 %v13171_v30, %v13167_v15  ;;  %v13185_v26 = vpop.eup %8357  ;;  %8367 = vpow2.f32 %v4625_v54  ;;  %v4651_v63 = vmul.f32 1.442695, %v4538_v47 }
 0xaf4   : > { %v13165_v41 = vpop.xlane.xlu1 %4469  ;;  %v4717_v5 = vadd.f32 %v13185_v26, %v13181_v3 }
 0xaf5   : > { %15723 = vst [vmem:[#allocation199_spill] sm:$0xff] %v13173_v20  ;;  %v13195_v20 = vpop.eup %8359 }
 0xaf6   : > { %v6967_v33 = vpop.f32.mrb[200].mxu0  ;;  %v13199_v4 = vpop.eup %8361 }
 0xaf7   : > { %4709 = vadd.xlane.f32.xlu0 %v4708_v9  ;;  %v6968_v24 = vpop.f32.mrb[201].mxu0  ;;  %v4635_v9 = vmul.f32 1.442695, %v4530_v62  ;;  %v4930_v23 = vpop.permute.xlu0 %4929 }
 0xaf8   : > { %v4689_v44 = vpop.xlane.xlu1 %4688  ;;  %v13193_v55 = vadd.f32 %v6968_v24, %v6967_v33  ;;  %v6970_v54 = vpop.f32.mrb[202].mxu0 }
 0xaf9   : > { %8369 = vrcp.f32 %v4689_v44  ;;  %v4643_v44 = vmul.f32 1.442695, %v4534_v8 }
 0xafa   : > { %4935 = vrot.lane.b32.xlu1 %v15725_v38, %s8867_s23  ;;  %8371 = vpow2.f32 %v4627_v16  ;;  %15726 = vst [vmem:[#allocation178_spill] sm:$0xff] %v13193_v55  ;;  %v6971_v38 = vpop.f32.mrb[203].mxu0  ;;  %v4537_v16 = vsub.f32 %v15643_v19, %v13059_v7  ;;  %v4723_v19 = vadd.f32 %v13199_v4, %v13195_v20 }
 0xafb   : > { %4712 = vadd.xlane.f32.xlu0 %v4711_v43  ;;  %v13203_v62 = vadd.f32 %v6971_v38, %v6970_v54  ;;  %v13209_v33 = vpop.eup %8363 }
 0xafc   : > { %v4692_v53 = vpop.xlane.xlu1 %4691  ;;  %v13213_v24 = vpop.eup %8365 }
 0xafd   : > { %8373 = vrcp.f32 %v4692_v53  ;;  %15727 = vst [vmem:[#allocation179_spill] sm:$0xff] %v13203_v62  ;;  %v4729_v53 = vadd.f32 %v13213_v24, %v13209_v33  ;;  %v15736_v62 = vld [vmem:[#allocation200_spill] sm:$0xff] }
 0xafe   : > { %8375 = vpow2.f32 %v4633_v12  ;;  %v4649_v12 = vmul.f32 1.442695, %v4537_v16  ;;  %v6973_v54 = vpop.f32.mrb[204].mxu0 }
 0xaff   : > { %4718 = vadd.xlane.f32.xlu0 %v4717_v5  ;;  %8377 = vpow2.f32 %v4635_v9  ;;  %v6974_v7 = vpop.f32.mrb[205].mxu0  ;;  %v13215_v9 = vpop.eup %8367 }
 0xb00   : > { %v4928_v43 = vpop.permute.xlu1 %4927  ;;  %8379 = vpow2.f32 %v4641_v11  ;;  %v13217_v8 = vadd.f32 %v6974_v7, %v6973_v54  ;;  %v6976_v38 = vpop.f32.mrb[206].mxu0 }
 0xb01   : > { %7057 = vmatprep.subr.bf16.mxu0 %v4928_v43  ;;  %8381 = vpow2.f32 %v4643_v44  ;;  %v6977_v43 = vpop.f32.mrb[207].mxu0 }
 0xb02   : > { %7058 = vmatpush3.bf16.msra.mxu0 %v4912_v50  ;;  %15728 = vst [vmem:[#allocation182_spill] sm:$0xff] %v13217_v8  ;;  %8383 = vpow2.f32 %v4649_v12  ;;  %v13223_v50 = vadd.f32 %v6977_v43, %v6976_v38  ;;  %v15732_v43 = vld [vmem:[#allocation86_spill] sm:$0xff] }
 0xb03   : > { %4724 = vadd.xlane.f32.xlu0 %v4723_v19  ;;  %7059 = vmatprep.subr.bf16.mxu0 %v4930_v23  ;;  %v8370_v5 = vpop.eup %8369  ;;  %8385 = vpow2.f32 %v4651_v63 }
 0xb04   : > { %v13221_v16 = vpop.eup %8371  ;;  %15729 = vst [vmem:[#allocation183_spill] sm:$0xff] %v13223_v50  ;;  %v13228_v23 = vmul.f32 %v8370_v5, %v12967_v58  ;;  %v13236_v12 = vmul.f32 %v8370_v5, %v12965_v21  ;;  %v15733_v5 = vld [vmem:[#allocation87_spill] sm:$0xff] }
 0xb05   : > { %v4735_v58 = vadd.f32 %v13221_v16, %v13215_v9 }
 0xb06   : > { %v4473_v11 = vpop.xlane.xlu0 %4472 }
 0xb07   : > { %v8374_v47 = vpop.eup %8373  ;;  %v4541_v19 = vsub.f32 %v15659_v46, %v4473_v11  ;;  %v4542_v44 = vsub.f32 %v15660_v36, %v4473_v11  ;;  %4730 = vadd.xlane.f32.xlu0 %v4729_v53  ;;  %v4511_v11 = vsub.f32 %v15732_v43, %v12886_v6 }
 0xb08   : > { %v13233_v7 = vmul.f32 %v8374_v47, %v12976_v61  ;;  %v13239_v38 = vmul.f32 %v8374_v47, %v12972_v10  ;;  %v13241_v63 = vpop.eup %8375  ;;  %v6979_v61 = vpop.f32.mrb[208].mxu0  ;;  %v4512_v47 = vsub.f32 %v15733_v5, %v12886_v6  ;;  %v4515_v6 = vsub.f32 %v15736_v62, %v12892_v27  ;;  %v15741_v62 = vld [vmem:[#allocation204_spill] sm:$0xff] }
 0xb09   : > { %15730 = vst [vmem:[#allocation186_spill] sm:$0xff] %v13241_v63  ;;  %v4657_v46 = vmul.f32 1.442695, %v4541_v19  ;;  %v4659_v36 = vmul.f32 1.442695, %v4542_v44  ;;  %v13245_v53 = vpop.eup %8377  ;;  %v6980_v19 = vpop.f32.mrb[209].mxu0 }
 0xb0a   : > { %15731 = vst [vmem:[#allocation187_spill] sm:$0xff] %v13245_v53  ;;  %v4914_v54 = vpop.permute.xlu0 %4913  ;;  %v13255_v44 = vadd.f32 %v6980_v19, %v6979_v61  ;;  %v6982_v8 = vpop.f32.mrb[210].mxu0  ;;  %v4741_v21 = vadd.f32 %v13245_v53, %v13241_v63  ;;  %v4597_v10 = vmul.f32 1.442695, %v4511_v11  ;;  %v4605_v63 = vmul.f32 1.442695, %v4515_v6 }
 0xb0b   : > { %8387 = vpow2.f32 %v4657_v46  ;;  %4736 = vadd.xlane.f32.xlu0 %v4735_v58  ;;  %7060 = vmatpush3.bf16.msra.mxu0 %v4914_v54  ;;  %v13257_v43 = vpop.eup %8379  ;;  %v6983_v50 = vpop.f32.mrb[211].mxu0  ;;  %v4599_v58 = vmul.f32 1.442695, %v4512_v47  ;;  %v15738_v54 = vld [vmem:[#allocation201_spill] sm:$0xff] }
 0xb0c   : > { %8389 = vpow2.f32 %v4659_v36  ;;  %15734 = vst [vmem:[#allocation215_spill] sm:$0xff] %v13255_v44  ;;  %15735 = vst [vmem:[#allocation148_spill] sm:$0xff] %v13257_v43  ;;  %v13261_v55 = vpop.eup %8381  ;;  %v13265_v46 = vadd.f32 %v6983_v50, %v6982_v8  ;;  %v4516_v36 = vsub.f32 %v15738_v54, %v12892_v27  ;;  %v4519_v8 = vsub.f32 %v15741_v62, %v12908_v13  ;;  %v15742_v27 = vld [vmem:[#allocation205_spill] sm:$0xff] }
 0xb0d   : > { %v13269_v61 = vpop.eup %8383  ;;  %v4747_v11 = vadd.f32 %v13261_v55, %v13257_v43  ;;  %8391 = vpow2.f32 %v4597_v10 }
 0xb0e   : > { %15737 = vst [vmem:[#allocation113_spill] sm:$0xff] %v13265_v46  ;;  %15739 = vst [vmem:[#allocation150_spill] sm:$0xff] %v13269_v61  ;;  %v13273_v19 = vpop.eup %8385  ;;  %v6985_v50 = vpop.f32.mrb[212].mxu0  ;;  %8393 = vpow2.f32 %v4599_v58  ;;  %v4607_v47 = vmul.f32 1.442695, %v4516_v36  ;;  %v15746_v58 = vld [vmem:[#allocation210_spill] sm:$0xff] }
 0xb0f   : > { %4742 = vadd.xlane.f32.xlu0 %v4741_v21  ;;  %15740 = vst [vmem:[#allocation153_spill] sm:$0xff] %v13273_v19  ;;  %v4520_v21 = vsub.f32 %v15742_v27, %v12908_v13  ;;  %v6986_v54 = vpop.f32.mrb[213].mxu0  ;;  %v4753_v10 = vadd.f32 %v13273_v19, %v13269_v61  ;;  %8395 = vpow2.f32 %v4605_v63  ;;  %v4613_v62 = vmul.f32 1.442695, %v4519_v8  ;;  %v15749_v8 = vld [vmem:[#allocation212_spill] sm:$0xff] }
 0xb10   : > { %v13281_v53 = vadd.f32 %v6986_v54, %v6985_v50  ;;  %v6988_v5 = vpop.f32.mrb[214].mxu0  ;;  %v4523_v36 = vsub.f32 %v15746_v58, %v12916_v18  ;;  %8397 = vpow2.f32 %v4607_v47  ;;  %v4527_v61 = vsub.f32 %v15749_v8, %v12941_v56  ;;  %v15751_v58 = vld [vmem:[#allocation218_spill] sm:$0xff] }
 0xb11   : > { %v6989_v46 = vpop.f32.mrb[215].mxu0  ;;  %v4615_v13 = vmul.f32 1.442695, %v4520_v21  ;;  %8399 = vpow2.f32 %v4613_v62  ;;  %v15752_v62 = vld [vmem:[#allocation202_spill] sm:$0xff] }
 0xb12   : > { %15743 = vst [vmem:[#allocation152_spill] sm:$0xff] %v13281_v53  ;;  %v13291_v43 = vadd.f32 %v6989_v46, %v6988_v5  ;;  %v4621_v63 = vmul.f32 1.442695, %v4523_v36  ;;  %v15750_v5 = vld [vmem:[#allocation213_spill] sm:$0xff]  ;;  %v15753_v36 = vld [vmem:[#allocation91_spill] sm:$0xff] }
 0xb13   : > { %4748 = vadd.xlane.f32.xlu0 %v4747_v11  ;;  %v15748_v11 = vld [vmem:[#allocation211_spill] sm:$0xff]  ;;  %8401 = vpow2.f32 %v4615_v13  ;;  %v4528_v47 = vsub.f32 %v15750_v5, %v12941_v56  ;;  %v15754_v27 = vmax.f32 %v15752_v62, %v15753_v36 }
 0xb14   : > { %15747 = vst [vmem:[#allocation98_spill] sm:$0xff] %v13291_v43  ;;  %v4524_v50 = vsub.f32 %v15748_v11, %v12916_v18  ;;  %8403 = vpow2.f32 %v4621_v63  ;;  %v4531_v11 = vsub.f32 %v15751_v58, %v12983_v14  ;;  %v15756_v63 = vld [vmem:[#allocation97_spill] sm:$0xff] }
 0xb15   : > { %v13283_v44 = vpop.eup %8387  ;;  %v4631_v13 = vmul.f32 1.442695, %v4528_v47  ;;  %v4535_v58 = vsub.f32 %v15756_v63, %v12989_v35 }
 0xb16   : > { %15744 = vst [vmem:[#allocation193_spill] sm:$0xff] %v13283_v44  ;;  %v13287_v6 = vpop.eup %8389  ;;  %v4623_v46 = vmul.f32 1.442695, %v4524_v50  ;;  %v15755_v50 = vld [vmem:[#allocation219_spill] sm:$0xff] }
 0xb17   : > { %15745 = vst [vmem:[#allocation43_spill] sm:$0xff] %v13287_v6  ;;  %4754 = vadd.xlane.f32.xlu0 %v4753_v10  ;;  %v4759_v54 = vadd.f32 %v13287_v6, %v13283_v44  ;;  %v13303_v21 = vpop.eup %8391  ;;  %v4629_v10 = vmul.f32 1.442695, %v4527_v61  ;;  %v4532_v8 = vsub.f32 %v15755_v50, %v12983_v14  ;;  %v4637_v61 = vmul.f32 1.442695, %v4531_v11 }
 0xb18   : > { %v13305_v18 = vpop.eup %8393  ;;  %8405 = vpow2.f32 %v4623_v46  ;;  %v15757_v46 = vld [vmem:[#allocation140_spill] sm:$0xff]  ;;  %v4645_v43 = vmul.f32 1.442695, %v4535_v58 }
 0xb19   : > { %v13314_v56 = vpop.eup %8395  ;;  %8407 = vpow2.f32 %v4629_v10  ;;  %v4536_v47 = vsub.f32 %v15757_v46, %v12989_v35  ;;  %v4539_v10 = vsub.f32 %v15656_v42, %v13165_v41 }
 0xb1a   : > { %v13318_v5 = vpop.eup %8397  ;;  %8409 = vpow2.f32 %v4631_v13  ;;  %v4540_v13 = vsub.f32 %v15657_v51, %v13165_v41 }
 0xb1b   : > { %4760 = vadd.xlane.f32.xlu0 %v4759_v54  ;;  %v4714_v54 = vadd.f32 %v13305_v18, %v13303_v21  ;;  %v13324_v53 = vpop.eup %8399  ;;  %v4720_v14 = vadd.f32 %v13318_v5, %v13314_v56  ;;  %8411 = vpow2.f32 %v4637_v61  ;;  %v4647_v11 = vmul.f32 1.442695, %v4536_v47 }
 0xb1c   : > { %v4653_v61 = vmul.f32 1.442695, %v4539_v10  ;;  %v4655_v42 = vmul.f32 1.442695, %v4540_v13 }
 0xb1d   : > { %v13328_v50 = vpop.eup %8401 }
 0xb1e   : > { %4487 = vmax.xlane.f32.xlu1 %v15754_v27  ;;  %v4639_v27 = vmul.f32 1.442695, %v4532_v8  ;;  %v13334_v8 = vpop.eup %8403  ;;  %v4726_v35 = vadd.f32 %v13328_v50, %v13324_v53 }
 0xb20   : > { %8413 = vpow2.f32 %v4639_v27 }
 0xb21   : > { %8415 = vpow2.f32 %v4645_v43 }
 0xb22   : > { %4715 = vadd.xlane.f32.xlu1 %v4714_v54  ;;  %v13338_v54 = vpop.eup %8405  ;;  %8417 = vpow2.f32 %v4647_v11 }
 0xb23   : > { %v13342_v47 = vpop.eup %8407  ;;  %v4732_v41 = vadd.f32 %v13338_v54, %v13334_v8  ;;  %8419 = vpow2.f32 %v4653_v61 }
 0xb24   : > { %8421 = vpow2.f32 %v4655_v42 }
 0xb26   : > { %4721 = vadd.xlane.f32.xlu1 %v4720_v14  ;;  %v13346_v14 = vpop.eup %8409 }
 0xb27   : > { %v13352_v10 = vpop.eup %8411  ;;  %v4738_v11 = vadd.f32 %v13346_v14, %v13342_v47 }
 0xb29   : > { %v6991_v63 = vpop.f32.mrb[216].mxu0 }
 0xb2a   : > { %4727 = vadd.xlane.f32.xlu1 %v4726_v35  ;;  %v6992_v58 = vpop.f32.mrb[217].mxu0  ;;  %v13356_v13 = vpop.eup %8413 }
 0xb2b   : > { %v13340_v46 = vadd.f32 %v6992_v58, %v6991_v63  ;;  %v6994_v27 = vpop.f32.mrb[218].mxu0 }
 0xb2c   : > { %v6995_v51 = vpop.f32.mrb[219].mxu0 }
 0xb2d   : > { %15758 = vst [vmem:[#allocation99_spill] sm:$0xff] %v13340_v46  ;;  %v13348_v44 = vadd.f32 %v6995_v51, %v6994_v27  ;;  %v13360_v27 = vpop.eup %8415  ;;  %v4744_v51 = vadd.f32 %v13356_v13, %v13352_v10 }
 0xb2e   : > { %4733 = vadd.xlane.f32.xlu1 %v4732_v41  ;;  %15760 = vst [vmem:[#allocation96_spill] sm:$0xff] %v13360_v27  ;;  %v13364_v41 = vpop.eup %8417 }
 0xb2f   : > { %15759 = vst [vmem:[#allocation95_spill] sm:$0xff] %v13348_v44  ;;  %v13366_v46 = vpop.eup %8419 }
 0xb30   : > { %15761 = vst [vmem:[#allocation64_spill] sm:$0xff] %v13366_v46 }
 0xb31   : > { %v4476_v35 = vpop.xlane.xlu1 %4475 }
 0xb32   : > { %v4543_v63 = vsub.f32 %v15677_v40, %v4476_v35  ;;  %v4544_v58 = vsub.f32 %v15678_v29, %v4476_v35  ;;  %4739 = vadd.xlane.f32.xlu1 %v4738_v11  ;;  %v4750_v40 = vadd.f32 %v13364_v41, %v13360_v27  ;;  %v13370_v29 = vpop.eup %8421  ;;  %v4916_v11 = vpop.permute.xlu0 %4915 }
 0xb33   : > { %15762 = vst [vmem:[#allocation72_spill] sm:$0xff] %v13370_v29 }
 0xb34   : > { %v4661_v61 = vmul.f32 1.442695, %v4543_v63  ;;  %v4663_v42 = vmul.f32 1.442695, %v4544_v58  ;;  %v4756_v63 = vadd.f32 %v13370_v29, %v13366_v46 }
 0xb35   : > { %v4695_v43 = vpop.xlane.xlu1 %4694 }
 0xb36   : > { %8423 = vpow2.f32 %v4661_v61  ;;  %4745 = vadd.xlane.f32.xlu1 %v4744_v51  ;;  %v4934_v44 = vpop.permute.xlu0 %4933 }
 0xb37   : > { %8425 = vpow2.f32 %v4663_v42 }
 0xb39   : > { %v4698_v35 = vpop.xlane.xlu1 %4697 }
 0xb3a   : > { %4751 = vadd.xlane.f32.xlu1 %v4750_v40 }
 0xb3d   : > { %v4932_v58 = vpop.permute.xlu1 %4931 }
 0xb3e   : > { %4757 = vadd.xlane.f32.xlu1 %v4756_v63  ;;  %7061 = vmatprep.subr.bf16.mxu0 %v4932_v58 }
 0xb3f   : > { %7062 = vmatpush3.bf16.msra.mxu0 %v4916_v11 }
 0xb40   : > { %v13374_v61 = vpop.eup %8423  ;;  %7063 = vmatprep.subr.bf16.mxu0 %v4934_v44 }
 0xb41   : > { %15763 = vst [vmem:[#allocation157_spill] sm:$0xff] %v13374_v61  ;;  %v13376_v42 = vpop.eup %8425 }
 0xb42   : > { %15764 = vst [vmem:[#allocation156_spill] sm:$0xff] %v13376_v42  ;;  %v4762_v51 = vadd.f32 %v13376_v42, %v13374_v61 }
 0xb43   : > { %v4479_v6 = vpop.xlane.xlu0 %4478 }
 0xb44   : > { %v4545_v19 = vsub.f32 %v15683_v0, %v4479_v6  ;;  %v4546_v40 = vsub.f32 %v15684_v2, %v4479_v6  ;;  %4763 = vadd.xlane.f32.xlu1 %v4762_v51 }
 0xb46   : > { %v4665_v46 = vmul.f32 1.442695, %v4545_v19  ;;  %v4667_v29 = vmul.f32 1.442695, %v4546_v40 }
 0xb47   : > { %v4918_v63 = vpop.permute.xlu0 %4917 }
 0xb48   : > { %8427 = vpow2.f32 %v4665_v46  ;;  %7064 = vmatpush3.bf16.msra.mxu0 %v4918_v63 }
 0xb49   : > { %8429 = vpow2.f32 %v4667_v29 }
 0xb52   : > { %v13382_v11 = vpop.eup %8427 }
 0xb53   : > { %v13384_v44 = vpop.eup %8429 }
 0xb54   : > { %15765 = vst [vmem:[#allocation35_spill] sm:$0xff] %v13384_v44  ;;  %v4765_v58 = vadd.f32 %v13384_v44, %v13382_v11 }
 0xb56   : > { %4766 = vadd.xlane.f32.xlu0 %v4765_v58 }
 0xb66   : > { %v6997_v61 = vpop.f32.mrb[220].mxu0 }
 0xb67   : > { %v6998_v42 = vpop.f32.mrb[221].mxu0 }
 0xb68   : > { %v13388_v0 = vadd.f32 %v6998_v42, %v6997_v61  ;;  %v7000_v2 = vpop.f32.mrb[222].mxu0  ;;  %v4920_v42 = vpop.permute.xlu0 %4919 }
 0xb69   : > { %v7001_v6 = vpop.f32.mrb[223].mxu0 }
 0xb6a   : > { %v13390_v19 = vadd.f32 %v7001_v6, %v7000_v2 }
 0xb6c   : > { %v7710_v46 = vpack.i.bf16 %v13390_v19, %v13388_v0  ;;  %v15884_v19 = vld [vmem:[#allocation83_spill] sm:$0xff] }
 0xb6e   : > { %v4482_v29 = vpop.xlane.xlu1 %4481 }
 0xb6f   : > { %v4547_v51 = vsub.f32 %v15701_v60, %v4482_v29  ;;  %v4548_v40 = vsub.f32 %v15702_v59, %v4482_v29 }
 0xb71   : > { %v4669_v63 = vmul.f32 1.442695, %v4547_v51  ;;  %v4671_v27 = vmul.f32 1.442695, %v4548_v40 }
 0xb72   : > { %v4701_v44 = vpop.xlane.xlu1 %4700 }
 0xb73   : > { %8431 = vpow2.f32 %v4669_v63 }
 0xb74   : > { %8433 = vpow2.f32 %v4671_v27 }
 0xb75   : > { %8435 = vrcp.f32 %v4698_v35 }
 0xb76   : > { %v4704_v61 = vpop.xlane.xlu1 %4703  ;;  %8437 = vrcp.f32 %v4695_v43  ;;  %v15766_v43 = vpack.c.bf16 %v13065_v28, %v13062_v32 }
 0xb77   : > { %8439 = vrcp.f32 %v4704_v61  ;;  %v15767_v61 = vpack.c.bf16 %v13233_v7, %v13228_v23 }
 0xb78   : > { %8441 = vrcp.f32 %v4701_v44 }
 0xb7a   : > { %v4936_v58 = vpop.permute.xlu1 %4935 }
 0xb7b   : > { %7065 = vmatprep.subr.bf16.mxu0 %v4936_v58  ;;  %v15768_v58 = vpack.c.bf16 %v13239_v38, %v13236_v12 }
 0xb7c   : > { %v4485_v2 = vpop.xlane.xlu0 %4484  ;;  %7066 = vmatpush3.bf16.msra.mxu0 %v4920_v42 }
 0xb7d   : > { %v13396_v6 = vpop.eup %8431  ;;  %v4549_v60 = vsub.f32 %v15716_v37, %v4485_v2  ;;  %v4550_v59 = vsub.f32 %v15717_v1, %v4485_v2 }
 0xb7e   : > { %v13400_v29 = vpop.eup %8433 }
 0xb7f   : > { %v8436_v51 = vpop.eup %8435  ;;  %v4673_v27 = vmul.f32 1.442695, %v4549_v60  ;;  %v4675_v35 = vmul.f32 1.442695, %v4550_v59  ;;  %4986 = vmatmul.mubr.bf16.vlgmr.msra.gmra.mrb[224].mxu0 %v15766_v43  ;;  %v4768_v40 = vadd.f32 %v13400_v29, %v13396_v6 }
 0xb80   : > { %v4707_v63 = vpop.xlane.xlu0 %4706  ;;  %4993 = vmatprep.mubr.bf16.mxu0 %v15767_v61  ;;  %v8438_v37 = vpop.eup %8437  ;;  %v4820_v1 = vmul.f32 %v8436_v51, %v13042_v45  ;;  %v4819_v7 = vmul.f32 %v8436_v51, %v13038_v48  ;;  %v15769_v61 = vld [vmem:[#allocation174_spill] sm:$0xff] }
 0xb81   : > { %8443 = vpow2.f32 %v4673_v27  ;;  %4769 = vadd.xlane.f32.xlu1 %v4768_v40  ;;  %v4818_v42 = vmul.f32 %v8438_v37, %v13029_v17  ;;  %v8440_v32 = vpop.eup %8439  ;;  %v4817_v45 = vmul.f32 %v8438_v37, %v13027_v25 }
 0xb82   : > { %8445 = vpow2.f32 %v4675_v35  ;;  %v8442_v23 = vpop.eup %8441  ;;  %v4824_v2 = vmul.f32 %v8440_v32, %v13116_v39  ;;  %v4823_v39 = vmul.f32 %v8440_v32, %v13110_v52  ;;  %v15771_v52 = vld [vmem:[#allocation92_spill] sm:$0xff] }
 0xb83   : > { %v4878_v28 = vpack.c.bf16 %v4820_v1, %v4818_v42  ;;  %v4822_v17 = vmul.f32 %v8442_v23, %v13101_v22  ;;  %v4877_v35 = vpack.c.bf16 %v4819_v7, %v4817_v45  ;;  %v4821_v25 = vmul.f32 %v8442_v23, %v13097_v31  ;;  %v15773_v31 = vld [vmem:[#allocation100_spill] sm:$0xff] }
 0xb84   : > { %v4710_v44 = vpop.xlane.xlu0 %4709 }
 0xb85   : > { %8447 = vrcp.f32 %v4710_v44  ;;  %v4880_v12 = vpack.c.bf16 %v4824_v2, %v4822_v17  ;;  %v4879_v40 = vpack.c.bf16 %v4823_v39, %v4821_v25  ;;  %v15770_v44 = vld [vmem:[#allocation79_spill] sm:$0xff] }
 0xb86   : > { %8449 = vrcp.f32 %v4707_v63  ;;  %v15772_v42 = vpack.i.bf16 %v15770_v44, %v15771_v52 }
 0xb87   : > { %4994 = vmatmul.mubr.bf16.gmra.mrb[228].mxu0 %v15768_v58 }
 0xb88   : > { %5001 = vmatprep.mubr.bf16.mxu0 %v4878_v28 }
 0xb8b   : > { %v13417_v60 = vpop.eup %8443 }
 0xb8c   : > { %v13420_v59 = vpop.eup %8445 }
 0xb8d   : > { %v4771_v27 = vadd.f32 %v13420_v59, %v13417_v60 }
 0xb8f   : > { %v8448_v38 = vpop.eup %8447  ;;  %4772 = vadd.xlane.f32.xlu0 %v4771_v27  ;;  %5002 = vmatmul.mubr.bf16.gmra.mrb[232].mxu0 %v4877_v35 }
 0xb90   : > { %5009 = vmatprep.mubr.bf16.mxu0 %v4880_v12  ;;  %v8450_v48 = vpop.eup %8449  ;;  %v4828_v51 = vmul.f32 %v8448_v38, %v13157_v57  ;;  %v4827_v63 = vmul.f32 %v8448_v38, %v13153_v49  ;;  %v4713_v57 = vpop.xlane.xlu0 %4712 }
 0xb91   : > { %v4826_v43 = vmul.f32 %v8450_v48, %v13140_v34  ;;  %v4825_v37 = vmul.f32 %v8450_v48, %v15769_v61  ;;  %v15774_v34 = vld [vmem:[#allocation52_spill] sm:$0xff]  ;;  %8451 = vrcp.f32 %v4713_v57 }
 0xb92   : > { %v15775_v28 = vpack.i.bf16 %v15773_v31, %v15774_v34 }
 0xb93   : > { %v4882_v22 = vpack.c.bf16 %v4828_v51, %v4826_v43  ;;  %v4881_v1 = vpack.c.bf16 %v4827_v63, %v4825_v37 }
 0xb94   : > { %v4719_v58 = vpop.xlane.xlu0 %4718 }
 0xb95   : > { %8453 = vrcp.f32 %v4719_v58 }
 0xb97   : > { %5010 = vmatmul.mubr.bf16.gmra.mrb[236].mxu0 %v4879_v40 }
 0xb98   : > { %5017 = vmatprep.mubr.bf16.mxu0 %v4882_v22  ;;  %v4725_v27 = vpop.xlane.xlu0 %4724 }
 0xb9b   : > { %v8452_v12 = vpop.eup %8451 }
 0xb9c   : > { %v4830_v25 = vmul.f32 %v8452_v12, %v13171_v30  ;;  %v4829_v40 = vmul.f32 %v8452_v12, %v13167_v15  ;;  %v4731_v61 = vpop.xlane.xlu0 %4730 }
 0xb9f   : > { %5018 = vmatmul.mubr.bf16.gmra.mrb[240].mxu0 %v4881_v1  ;;  %v8454_v38 = vpop.eup %8453 }
 0xba0   : > { %v4834_v44 = vmul.f32 %v8454_v38, %v13185_v26  ;;  %v4833_v31 = vmul.f32 %v8454_v38, %v13181_v3  ;;  %v4737_v34 = vpop.xlane.xlu0 %4736  ;;  %v15776_v3 = vld [vmem:[#allocation146_spill] sm:$0xff] }
 0xba5   : > { %7486 = vrot.lane.b32.xlu0 %v15772_v42, %s8868_s26 }
 0xba9   : > { %7501 = vrot.lane.b32.xlu0 %v15775_v28, %s8869_s11 }
 0xbab   : > { %v4488_v32 = vpop.xlane.xlu1 %4487 }
 0xbac   : > { %v4551_v49 = vsub.f32 %v15752_v62, %v4488_v32  ;;  %v4552_v23 = vsub.f32 %v15753_v36, %v4488_v32 }
 0xbae   : > { %v4677_v7 = vmul.f32 1.442695, %v4551_v49  ;;  %v4679_v2 = vmul.f32 1.442695, %v4552_v23 }
 0xbaf   : > { %v4716_v45 = vpop.xlane.xlu1 %4715 }
 0xbb0   : > { %8455 = vpow2.f32 %v4677_v7  ;;  %v4743_v7 = vpop.xlane.xlu0 %4742 }
 0xbb1   : > { %8457 = vpow2.f32 %v4679_v2  ;;  %v15777_v2 = vld [vmem:[#allocation94_spill] sm:$0xff] }
 0xbb2   : > { %8459 = vrcp.f32 %v4716_v45 }
 0xbb3   : > { %v4722_v17 = vpop.xlane.xlu1 %4721 }
 0xbb4   : > { %8461 = vrcp.f32 %v4722_v17 }
 0xbb7   : > { %v4728_v35 = vpop.xlane.xlu1 %4727 }
 0xbb8   : > { %8463 = vrcp.f32 %v4728_v35 }
 0xbb9   : > { %8465 = vrcp.f32 %v4725_v27 }
 0xbba   : > { %v13441_v48 = vpop.eup %8455 }
 0xbbb   : > { %v13443_v62 = vpop.eup %8457  ;;  %v4734_v51 = vpop.xlane.xlu1 %4733 }
 0xbbc   : > { %v8460_v36 = vpop.eup %8459  ;;  %v4774_v39 = vadd.f32 %v13443_v62, %v13441_v48  ;;  %8467 = vrcp.f32 %v4734_v51  ;;  %v4749_v51 = vpop.xlane.xlu0 %4748 }
 0xbbd   : > { %v4832_v43 = vmul.f32 %v8460_v36, %v13305_v18  ;;  %v4831_v22 = vmul.f32 %v8460_v36, %v13303_v21  ;;  %8469 = vrcp.f32 %v4731_v61 }
 0xbbe   : > { %v8462_v63 = vpop.eup %8461  ;;  %4775 = vadd.xlane.f32.xlu1 %v4774_v39 }
 0xbbf   : > { %v4884_v37 = vpack.c.bf16 %v4832_v43, %v4830_v25  ;;  %v4883_v1 = vpack.c.bf16 %v4831_v22, %v4829_v40  ;;  %v4836_v52 = vmul.f32 %v8462_v63, %v13318_v5  ;;  %v4835_v15 = vmul.f32 %v8462_v63, %v13314_v56  ;;  %v4740_v21 = vpop.xlane.xlu1 %4739 }
 0xbc0   : > { %8471 = vrcp.f32 %v4740_v21  ;;  %v15783_v21 = vld [vmem:[#allocation186_spill] sm:$0xff] }
 0xbc1   : > { %5025 = vmatprep.mubr.bf16.mxu0 %v4884_v37  ;;  %v4886_v42 = vpack.c.bf16 %v4836_v52, %v4834_v44  ;;  %v4885_v5 = vpack.c.bf16 %v4835_v15, %v4833_v31  ;;  %8473 = vrcp.f32 %v4737_v34 }
 0xbc2   : > { %v8464_v57 = vpop.eup %8463  ;;  %5026 = vmatmul.mubr.bf16.gmra.mrb[244].mxu0 %v4883_v1  ;;  %v4755_v1 = vpop.xlane.xlu0 %4754 }
 0xbc3   : > { %5033 = vmatprep.mubr.bf16.mxu0 %v4886_v42  ;;  %v8466_v30 = vpop.eup %8465  ;;  %v4840_v18 = vmul.f32 %v8464_v57, %v13328_v50  ;;  %v4839_v49 = vmul.f32 %v8464_v57, %v13324_v53  ;;  %v4746_v23 = vpop.xlane.xlu1 %4745  ;;  %v15779_v53 = vld [vmem:[#allocation170_spill] sm:$0xff] }
 0xbc4   : > { %v4838_v26 = vmul.f32 %v8466_v30, %v13199_v4  ;;  %v4837_v50 = vmul.f32 %v8466_v30, %v13195_v20  ;;  %v15778_v4 = vpack.i.bf16 %v15776_v3, %v15777_v2  ;;  %8475 = vrcp.f32 %v4746_v23  ;;  %v15788_v2 = vld [vmem:[#allocation64_spill] sm:$0xff] }
 0xbc5   : > { %8477 = vrcp.f32 %v4743_v7 }
 0xbc6   : > { %v4888_v28 = vpack.c.bf16 %v4840_v18, %v4838_v26  ;;  %v8468_v32 = vpop.eup %8467  ;;  %v4887_v17 = vpack.c.bf16 %v4839_v49, %v4837_v50  ;;  %v4761_v18 = vpop.xlane.xlu0 %4760  ;;  %v15786_v49 = vld [vmem:[#allocation148_spill] sm:$0xff] }
 0xbc7   : > { %v8470_v58 = vpop.eup %8469  ;;  %v4844_v56 = vmul.f32 %v8468_v32, %v13338_v54  ;;  %v15780_v54 = vld [vmem:[#allocation167_spill] sm:$0xff]  ;;  %v4843_v38 = vmul.f32 %v8468_v32, %v13334_v8  ;;  %v4752_v36 = vpop.xlane.xlu1 %4751 }
 0xbc8   : > { %v4842_v45 = vmul.f32 %v8470_v58, %v13213_v24  ;;  %v15781_v12 = vpack.i.bf16 %v15779_v53, %v15780_v54  ;;  %v4841_v24 = vmul.f32 %v8470_v58, %v13209_v33  ;;  %8479 = vrcp.f32 %v4752_v36  ;;  %v15782_v33 = vld [vmem:[#allocation187_spill] sm:$0xff]  ;;  %v15785_v58 = vld [vmem:[#allocation72_spill] sm:$0xff] }
 0xbc9   : > { %8481 = vrcp.f32 %v4749_v51  ;;  %v15791_v53 = vld [vmem:[#allocation43_spill] sm:$0xff] }
 0xbca   : > { %5034 = vmatmul.mubr.bf16.gmra.mrb[248].mxu0 %v4885_v5  ;;  %v4890_v27 = vpack.c.bf16 %v4844_v56, %v4842_v45  ;;  %v8472_v35 = vpop.eup %8471  ;;  %v4889_v43 = vpack.c.bf16 %v4843_v38, %v4841_v24  ;;  %v15789_v45 = vld [vmem:[#allocation156_spill] sm:$0xff]  ;;  %v15792_v38 = vld [vmem:[#allocation157_spill] sm:$0xff] }
 0xbcb   : > { %5041 = vmatprep.mubr.bf16.mxu0 %v4888_v28  ;;  %v8474_v20 = vpop.eup %8473  ;;  %v4848_v39 = vmul.f32 %v8472_v35, %v13346_v14  ;;  %v4847_v61 = vmul.f32 %v8472_v35, %v13342_v47  ;;  %v4758_v37 = vpop.xlane.xlu1 %4757  ;;  %v15784_v28 = vld [vmem:[#allocation96_spill] sm:$0xff] }
 0xbcc   : > { %v4846_v25 = vmul.f32 %v8474_v20, %v13221_v16  ;;  %v4845_v14 = vmul.f32 %v8474_v20, %v13215_v9  ;;  %8483 = vrcp.f32 %v4758_v37  ;;  %v15794_v37 = vld [vmem:[#allocation35_spill] sm:$0xff] }
 0xbcd   : > { %8485 = vrcp.f32 %v4755_v1 }
 0xbce   : > { %v4892_v40 = vpack.c.bf16 %v4848_v39, %v4846_v25  ;;  %v8476_v22 = vpop.eup %8475  ;;  %v4891_v52 = vpack.c.bf16 %v4847_v61, %v4845_v14  ;;  %v15793_v39 = vld [vmem:[#allocation193_spill] sm:$0xff] }
 0xbcf   : > { %7491 = vrot.lane.b32.xlu1 %v15778_v4, %s8868_s26  ;;  %v8478_v63 = vpop.eup %8477  ;;  %v4852_v8 = vmul.f32 %v8476_v22, %v13356_v13  ;;  %v4851_v30 = vmul.f32 %v8476_v22, %v13352_v10 }
 0xbd0   : > { %v4850_v44 = vmul.f32 %v8478_v63, %v15782_v33  ;;  %v4849_v13 = vmul.f32 %v8478_v63, %v15783_v21 }
 0xbd1   : > { %v4764_v15 = vpop.xlane.xlu1 %4763 }
 0xbd2   : > { %5042 = vmatmul.mubr.bf16.gmra.mrb[252].mxu0 %v4887_v17  ;;  %v4894_v16 = vpack.c.bf16 %v4852_v8, %v4850_v44  ;;  %v8480_v42 = vpop.eup %8479  ;;  %v4893_v31 = vpack.c.bf16 %v4851_v30, %v4849_v13  ;;  %8487 = vrcp.f32 %v4764_v15 }
 0xbd3   : > { %5049 = vmatprep.mubr.bf16.mxu0 %v4890_v27  ;;  %7496 = vrot.lane.b32.xlu1 %v15781_v12, %s8869_s11  ;;  %v8482_v57 = vpop.eup %8481  ;;  %v4856_v47 = vmul.f32 %v8480_v42, %v13364_v41  ;;  %8489 = vrcp.f32 %v4761_v18  ;;  %v4855_v32 = vmul.f32 %v8480_v42, %v15784_v28  ;;  %v15787_v41 = vld [vmem:[#allocation153_spill] sm:$0xff]  ;;  %v15790_v27 = vld [vmem:[#allocation150_spill] sm:$0xff] }
 0xbd4   : > { %v4854_v9 = vmul.f32 %v8482_v57, %v13261_v55  ;;  %v4853_v23 = vmul.f32 %v8482_v57, %v15786_v49  ;;  %v7727_v57 = vld [vmem:[%s395_s16] sm:$0xff]  }
 0xbd5   : > { %7235 = vmatprep.subr.bf16.mxu1 %v7727_v57 }
 0xbd6   : > { %v4896_v34 = vpack.c.bf16 %v4856_v47, %v4854_v9  ;;  %v8484_v26 = vpop.eup %8483  ;;  %v4895_v50 = vpack.c.bf16 %v4855_v32, %v4853_v23  ;;  %7236 = vmatpush3.bf16.msra.mxu1 %v7727_v57  ;;  %v15814_v57 = vld [vmem:[#allocation109_spill] sm:$0xff] }
 0xbd7   : > { %v8486_v5 = vpop.eup %8485  ;;  %v4860_v10 = vmul.f32 %v8484_v26, %v15785_v58  ;;  %v4859_v4 = vmul.f32 %v8484_v26, %v15788_v2 }
 0xbd8   : > { %v4858_v56 = vmul.f32 %v8486_v5, %v15787_v41  ;;  %v4857_v35 = vmul.f32 %v8486_v5, %v15790_v27  ;;  %v15802_v27 = vld [vmem:[#allocation188_spill] sm:$0xff] }
 0xbda   : > { %5050 = vmatmul.mubr.bf16.gmra.mrb[0].mxu0 %v4889_v43  ;;  %v4898_v7 = vpack.c.bf16 %v4860_v10, %v4858_v56  ;;  %v4897_v12 = vpack.c.bf16 %v4859_v4, %v4857_v35  ;;  %v15796_v10 = vld [vmem:[#allocation147_spill] sm:$0xff]  ;;  %v15798_v56 = vld [vmem:[#allocation172_spill] sm:$0xff] }
 0xbdb   : > { %5057 = vmatprep.mubr.bf16.mxu0 %v4892_v40 }
 0xbdc   : > { %v8488_v3 = vpop.eup %8487 }
 0xbdd   : > { %v8490_v55 = vpop.eup %8489  ;;  %v4864_v17 = vmul.f32 %v8488_v3, %v15789_v45  ;;  %v4863_v36 = vmul.f32 %v8488_v3, %v15792_v38 }
 0xbde   : > { %v4862_v54 = vmul.f32 %v8490_v55, %v15791_v53  ;;  %v4861_v24 = vmul.f32 %v8490_v55, %v15793_v39 }
 0xbe0   : > { %v4900_v20 = vpack.c.bf16 %v4864_v17, %v4862_v54  ;;  %v4899_v51 = vpack.c.bf16 %v4863_v36, %v4861_v24  ;;  %v15801_v17 = vld [vmem:[#allocation189_spill] sm:$0xff] }
 0xbe1   : > { %v15803_v35 = vpack.i.bf16 %v15801_v17, %v15802_v27 }
 0xbe2   : > { %5058 = vmatmul.mubr.bf16.gmra.mrb[4].mxu0 %v4891_v52 }
 0xbe3   : > { %5065 = vmatprep.mubr.bf16.mxu0 %v4894_v16  ;;  %v4767_v25 = vpop.xlane.xlu0 %4766 }
 0xbe4   : > { %8491 = vrcp.f32 %v4767_v25 }
 0xbea   : > { %5066 = vmatmul.mubr.bf16.gmra.mrb[8].mxu0 %v4893_v31  ;;  %v7728_v31 = vld [vmem:[%s395_s16 + $0x8] sm:$0xff]  }
 0xbeb   : > { %5073 = vmatprep.mubr.bf16.mxu0 %v4896_v34  ;;  %7237 = vmatprep.subr.bf16.mxu1 %v7728_v31 }
 0xbec   : > { %7238 = vmatpush3.bf16.msra.mxu1 %v7728_v31 }
 0xbee   : > { %v8492_v40 = vpop.eup %8491 }
 0xbef   : > { %v4865_v63 = vmul.f32 %v8492_v40, %v13382_v11  ;;  %v4866_v8 = vmul.f32 %v8492_v40, %v15794_v37  ;;  %v15808_v40 = vld [vmem:[#allocation190_spill] sm:$0xff]  ;;  %v15810_v37 = vld [vmem:[#allocation168_spill] sm:$0xff] }
 0xbf2   : > { %5074 = vmatmul.mubr.bf16.gmra.mrb[12].mxu0 %v4895_v50  ;;  %v15799_v50 = vld [vmem:[#allocation62_spill] sm:$0xff] }
 0xbf3   : > { %5081 = vmatprep.mubr.bf16.mxu0 %v4898_v7  ;;  %v15800_v7 = vpack.i.bf16 %v15798_v56, %v15799_v50  ;;  %v15826_v56 = vld [vmem:[#allocation119_spill] sm:$0xff] }
 0xbfa   : > { %5082 = vmatmul.mubr.bf16.gmra.mrb[16].mxu0 %v4897_v12  ;;  %v15804_v12 = vld [vmem:[#allocation176_spill] sm:$0xff] }
 0xbfb   : > { %5089 = vmatprep.mubr.bf16.mxu0 %v4900_v20  ;;  %v15805_v20 = vld [vmem:[#allocation173_spill] sm:$0xff] }
 0xbfc   : > { %v15806_v38 = vpack.i.bf16 %v15804_v12, %v15805_v20  ;;  %v15832_v12 = vld [vmem:[#allocation149_spill] sm:$0xff] }
 0xc02   : > { %5090 = vmatmul.mubr.bf16.gmra.mrb[20].mxu0 %v4899_v51 }
 0xc0e   : > { %v4770_v43 = vpop.xlane.xlu1 %4769 }
 0xc0f   : > { %8493 = vrcp.f32 %v4770_v43  ;;  %v15807_v43 = vld [vmem:[#allocation191_spill] sm:$0xff] }
 0xc19   : > { %v8494_v22 = vpop.eup %8493 }
 0xc1a   : > { %v4867_v61 = vmul.f32 %v8494_v22, %v13396_v6  ;;  %v4868_v14 = vmul.f32 %v8494_v22, %v13400_v29  ;;  %v15809_v22 = vpack.i.bf16 %v15807_v43, %v15808_v40 }
 0xc1c   : > { %v4901_v1 = vpack.c.bf16 %v4867_v61, %v4865_v63  ;;  %v4902_v33 = vpack.c.bf16 %v4868_v14, %v4866_v8  ;;  %v4773_v44 = vpop.xlane.xlu0 %4772  ;;  %v15811_v8 = vld [vmem:[#allocation177_spill] sm:$0xff] }
 0xc1d   : > { %8495 = vrcp.f32 %v4773_v44  ;;  %v15812_v14 = vpack.i.bf16 %v15810_v37, %v15811_v8  ;;  %v15838_v37 = vld [vmem:[#allocation117_spill] sm:$0xff] }
 0xc1e   : > { %5097 = vmatprep.mubr.bf16.mxu0 %v4902_v33 }
 0xc1f   : > { %5098 = vmatmul.mubr.bf16.gmra.mrb[24].mxu0 %v4901_v1 }
 0xc27   : > { %v8496_v11 = vpop.eup %8495 }
 0xc28   : > { %v4869_v21 = vmul.f32 %v8496_v11, %v13417_v60  ;;  %v4870_v18 = vmul.f32 %v8496_v11, %v13420_v59 }
 0xc4b   : > { %v4776_v52 = vpop.xlane.xlu1 %4775 }
 0xc4c   : > { %8497 = vrcp.f32 %v4776_v52 }
 0xc52   : > { %v7067_v16 = vpop.f32.mrb[224].mxu0 }
 0xc53   : > { %v7068_v42 = vpop.f32.mrb[225].mxu0 }
 0xc54   : > { %v7069_v30 = vadd.f32 %v7068_v42, %v7067_v16  ;;  %v7070_v6 = vpop.f32.mrb[226].mxu0  ;;  %v15813_v42 = vld [vmem:[#allocation108_spill] sm:$0xff] }
 0xc55   : > { %v7071_v15 = vpop.f32.mrb[227].mxu0  ;;  %v15815_v11 = vpack.i.bf16 %v15813_v42, %v15814_v57 }
 0xc56   : > { %v8498_v47 = vpop.eup %8497  ;;  %v7072_v29 = vadd.f32 %v7071_v15, %v7070_v6  ;;  %v15816_v6 = vld [vmem:[#allocation180_spill] sm:$0xff]  ;;  %v15817_v15 = vld [vmem:[#allocation169_spill] sm:$0xff] }
 0xc57   : > { %v4871_v13 = vmul.f32 %v8498_v47, %v13441_v48  ;;  %v4872_v9 = vmul.f32 %v8498_v47, %v13443_v62  ;;  %v15795_v62 = vld [vmem:[#allocation114_spill] sm:$0xff]  ;;  %v15818_v47 = vpack.i.bf16 %v15816_v6, %v15817_v15  ;;  %v15844_v15 = vld [vmem:[#allocation151_spill] sm:$0xff] }
 0xc58   : > { %v7505_v34 = vpack.i.bf16 %v7072_v29, %v7069_v30  ;;  %v15797_v49 = vpack.i.bf16 %v15795_v62, %v15796_v10  ;;  %v15819_v29 = vld [vmem:[#allocation115_spill] sm:$0xff]  ;;  %v15843_v6 = vld [vmem:[#allocation194_spill] sm:$0xff] }
 0xc59   : > { %v4903_v26 = vpack.c.bf16 %v4871_v13, %v4869_v21  ;;  %v4904_v5 = vpack.c.bf16 %v4872_v9, %v4870_v18  ;;  %v15820_v21 = vld [vmem:[#allocation112_spill] sm:$0xff]  ;;  %v15823_v9 = vld [vmem:[#allocation181_spill] sm:$0xff] }
 0xc5a   : > { %v7073_v28 = vpop.f32.mrb[228].mxu0  ;;  %7506 = vrot.lane.b32.xlu1 %v7505_v34, %s8870_s22  ;;  %v15821_v13 = vpack.i.bf16 %v15819_v29, %v15820_v21  ;;  %v15822_v18 = vld [vmem:[#allocation68_spill] sm:$0xff]  ;;  %v15846_v21 = vld [vmem:[#allocation179_spill] sm:$0xff] }
 0xc5b   : > { %5105 = vmatprep.mubr.bf16.mxu0 %v4904_v5  ;;  %v7074_v32 = vpop.f32.mrb[229].mxu0  ;;  %v15824_v31 = vpack.i.bf16 %v15822_v18, %v15823_v9 }
 0xc5c   : > { %v7075_v60 = vadd.f32 %v7074_v32, %v7073_v28  ;;  %5106 = vmatmul.mubr.bf16.gmra.mrb[28].mxu0 %v4903_v26  ;;  %v7076_v48 = vpop.f32.mrb[230].mxu0 }
 0xc5d   : > { %v7077_v58 = vpop.f32.mrb[231].mxu0 }
 0xc5e   : > { %v7078_v59 = vadd.f32 %v7077_v58, %v7076_v48  ;;  %7516 = vrot.lane.b32.xlu1 %v15797_v49, %s8868_s26 }
 0xc60   : > { %v7510_v23 = vpack.i.bf16 %v7078_v59, %v7075_v60 }
 0xc62   : > { %v7079_v41 = vpop.f32.mrb[232].mxu0  ;;  %7511 = vrot.lane.b32.xlu0 %v7510_v23, %s8870_s22  ;;  %7526 = vrot.lane.b32.xlu1 %v15800_v7, %s8869_s11 }
 0xc63   : > { %v7080_v3 = vpop.f32.mrb[233].mxu0 }
 0xc64   : > { %v7081_v55 = vadd.f32 %v7080_v3, %v7079_v41  ;;  %v7082_v2 = vpop.f32.mrb[234].mxu0  ;;  %v15825_v41 = vld [vmem:[#allocation118_spill] sm:$0xff]  ;;  %v15828_v3 = vld [vmem:[#allocation184_spill] sm:$0xff] }
 0xc65   : > { %v7083_v4 = vpop.f32.mrb[235].mxu0  ;;  %v15827_v50 = vpack.i.bf16 %v15825_v41, %v15826_v56  ;;  %v7487_v41 = vpop.permute.xlu0 %7486 }
 0xc66   : > { %v7084_v45 = vadd.f32 %v7083_v4, %v7082_v2  ;;  %7521 = vrot.lane.b32.xlu0 %v15803_v35, %s8868_s26 }
 0xc68   : > { %v7535_v53 = vpack.i.bf16 %v7084_v45, %v7081_v55  ;;  %v15829_v55 = vld [vmem:[#allocation171_spill] sm:$0xff] }
 0xc69   : > { %v15830_v2 = vpack.i.bf16 %v15828_v3, %v15829_v55 }
 0xc6a   : > { %v7085_v54 = vpop.f32.mrb[236].mxu0  ;;  %7531 = vrot.lane.b32.xlu0 %v15806_v38, %s8869_s11  ;;  %7536 = vrot.lane.b32.xlu1 %v7535_v53, %s8870_s22 }
 0xc6b   : > { %v7086_v36 = vpop.f32.mrb[237].mxu0 }
 0xc6c   : > { %v7087_v39 = vadd.f32 %v7086_v36, %v7085_v54  ;;  %v7088_v24 = vpop.f32.mrb[238].mxu0  ;;  %v15831_v54 = vld [vmem:[#allocation123_spill] sm:$0xff] }
 0xc6d   : > { %v7089_v51 = vpop.f32.mrb[239].mxu0  ;;  %v15833_v20 = vpack.i.bf16 %v15831_v54, %v15832_v12  ;;  %v15834_v36 = vld [vmem:[#allocation175_spill] sm:$0xff] }
 0xc6e   : > { %v7090_v25 = vadd.f32 %v7089_v51, %v7088_v24  ;;  %7546 = vrot.lane.b32.xlu1 %v15809_v22, %s8868_s26 }
 0xc70   : > { %v7540_v63 = vpack.i.bf16 %v7090_v25, %v7087_v39  ;;  %v15835_v39 = vld [vmem:[#allocation185_spill] sm:$0xff] }
 0xc71   : > { %v15836_v24 = vpack.i.bf16 %v15834_v36, %v15835_v39  ;;  %v15859_v39 = vld [vmem:[#allocation104_spill] sm:$0xff] }
 0xc72   : > { %v7091_v61 = vpop.f32.mrb[240].mxu0  ;;  %7541 = vrot.lane.b32.xlu0 %v7540_v63, %s8870_s22  ;;  %7556 = vrot.lane.b32.xlu1 %v15812_v14, %s8869_s11 }
 0xc73   : > { %v7092_v1 = vpop.f32.mrb[241].mxu0 }
 0xc74   : > { %v7093_v33 = vadd.f32 %v7092_v1, %v7091_v61  ;;  %v7094_v44 = vpop.f32.mrb[242].mxu0  ;;  %v15837_v61 = vld [vmem:[#allocation192_spill] sm:$0xff]  ;;  %v15840_v1 = vld [vmem:[#allocation199_spill] sm:$0xff] }
 0xc75   : > { %v7095_v52 = vpop.f32.mrb[243].mxu0  ;;  %v15839_v8 = vpack.i.bf16 %v15837_v61, %v15838_v37 }
 0xc76   : > { %v7096_v16 = vadd.f32 %v7095_v52, %v7094_v44  ;;  %7551 = vrot.lane.b32.xlu0 %v15815_v11, %s8868_s26 }
 0xc78   : > { %v7565_v30 = vpack.i.bf16 %v7096_v16, %v7093_v33  ;;  %v15841_v33 = vld [vmem:[#allocation198_spill] sm:$0xff] }
 0xc79   : > { %v15842_v44 = vpack.i.bf16 %v15840_v1, %v15841_v33 }
 0xc7a   : > { %7561 = vrot.lane.b32.xlu0 %v15818_v47, %s8869_s11  ;;  %7566 = vrot.lane.b32.xlu1 %v7565_v30, %s8870_s22  ;;  %v15845_v47 = vpack.i.bf16 %v15843_v6, %v15844_v15  ;;  %v15863_v6 = vld [vmem:[#allocation196_spill] sm:$0xff]  ;;  %v15864_v15 = vld [vmem:[#allocation195_spill] sm:$0xff] }
 0xc7e   : > { %7576 = vrot.lane.b32.xlu1 %v15821_v13, %s8868_s26  ;;  %v15847_v13 = vld [vmem:[#allocation178_spill] sm:$0xff] }
 0xc7f   : > { %v15848_v18 = vpack.i.bf16 %v15846_v21, %v15847_v13  ;;  %v15866_v21 = vld [vmem:[#allocation54_spill] sm:$0xff] }
 0xc82   : > { %7586 = vrot.lane.b32.xlu1 %v15824_v31, %s8869_s11 }
 0xc95   : > { %v7097_v34 = vpop.f32.mrb[244].mxu0 }
 0xc96   : > { %v7098_v26 = vpop.f32.mrb[245].mxu0 }
 0xc97   : > { %v7099_v5 = vadd.f32 %v7098_v26, %v7097_v34  ;;  %v7100_v28 = vpop.f32.mrb[246].mxu0 }
 0xc98   : > { %v7101_v32 = vpop.f32.mrb[247].mxu0 }
 0xc99   : > { %v7102_v60 = vadd.f32 %v7101_v32, %v7100_v28  ;;  %v7492_v28 = vpop.permute.xlu1 %7491 }
 0xc9a   : > { %v7494_v61 = vunpack.i.h.bf16 %v7492_v28  ;;  %v7493_v1 = vunpack.i.l.bf16 %v7492_v28  ;;  %v15868_v28 = vld [vmem:[#allocation98_spill] sm:$0xff] }
 0xc9b   : > { %v7570_v48 = vpack.i.bf16 %v7102_v60, %v7099_v5  ;;  %v15849_v60 = vld [vmem:[#allocation154_spill] sm:$0xff] }
 0xc9c   : > { %v5501_v13 = vsel %vm881_vm2, %v15866_v21, %v7494_v61  ;;  %v15883_v21 = vld [vmem:[#allocation69_spill] sm:$0xff] }
 0xc9d   : > { %7571 = vrot.lane.b32.xlu0 %v7570_v48, %s8870_s22  ;;  %v7103_v58 = vpop.f32.mrb[248].mxu0  ;;  %v15850_v48 = vld [vmem:[#allocation66_spill] sm:$0xff] }
 0xc9e   : > { %v7104_v59 = vpop.f32.mrb[249].mxu0 }
 0xc9f   : > { %v7105_v62 = vadd.f32 %v7104_v59, %v7103_v58  ;;  %v7106_v10 = vpop.f32.mrb[250].mxu0  ;;  %v15851_v58 = vpack.i.bf16 %v15849_v60, %v15850_v48 }
 0xca0   : > { %v7107_v49 = vpop.f32.mrb[251].mxu0 }
 0xca1   : > { %v7108_v23 = vadd.f32 %v7107_v49, %v7106_v10  ;;  %7581 = vrot.lane.b32.xlu0 %v15827_v50, %s8868_s26  ;;  %v15853_v10 = vld [vmem:[#allocation182_spill] sm:$0xff]  ;;  %v7497_v50 = vpop.permute.xlu1 %7496 }
 0xca2   : > { %v7498_v54 = vunpack.i.l.bf16 %v7497_v50 }
 0xca3   : > { %v7595_v7 = vpack.i.bf16 %v7108_v23, %v7105_v62  ;;  %v15852_v62 = vld [vmem:[#allocation183_spill] sm:$0xff] }
 0xca4   : > { %v15854_v49 = vpack.i.bf16 %v15852_v62, %v15853_v10 }
 0xca5   : > { %7591 = vrot.lane.b32.xlu0 %v15830_v2, %s8869_s11  ;;  %7596 = vrot.lane.b32.xlu1 %v7595_v7, %s8870_s22  ;;  %v7109_v4 = vpop.f32.mrb[252].mxu0  ;;  %v7489_v2 = vunpack.i.h.bf16 %v7487_v41 }
 0xca6   : > { %v7110_v45 = vpop.f32.mrb[253].mxu0 }
 0xca7   : > { %v7111_v17 = vadd.f32 %v7110_v45, %v7109_v4  ;;  %v7112_v27 = vpop.f32.mrb[254].mxu0  ;;  %v7488_v4 = vunpack.i.l.bf16 %v7487_v41 }
 0xca8   : > { %v7113_v35 = vpop.f32.mrb[255].mxu0 }
 0xca9   : > { %v7114_v53 = vadd.f32 %v7113_v35, %v7112_v27  ;;  %7606 = vrot.lane.b32.xlu1 %v15833_v20, %s8868_s26  ;;  %v15856_v27 = vld [vmem:[#allocation155_spill] sm:$0xff] }
 0xcab   : > { %v7600_v38 = vpack.i.bf16 %v7114_v53, %v7111_v17  ;;  %v15855_v17 = vld [vmem:[#allocation65_spill] sm:$0xff]  ;;  %v7499_v53 = vunpack.i.h.bf16 %v7497_v50 }
 0xcac   : > { %v15857_v35 = vpack.i.bf16 %v15855_v17, %v15856_v27  ;;  %v15871_v17 = vld [vmem:[#allocation161_spill] sm:$0xff]  ;;  %v15872_v27 = vld [vmem:[#allocation160_spill] sm:$0xff] }
 0xcad   : > { %7616 = vrot.lane.b32.xlu1 %v15836_v24, %s8869_s11  ;;  %7601 = vrot.lane.b32.xlu0 %v7600_v38, %s8870_s22  ;;  %v7115_v51 = vpop.f32.mrb[0].mxu0  ;;  %v15858_v38 = vld [vmem:[#allocation105_spill] sm:$0xff]  ;;  %v5498_v24 = vsel %vm881_vm2, %v15859_v39, %v7488_v4 }
 0xcae   : > { %v7116_v25 = vpop.f32.mrb[1].mxu0  ;;  %v5499_v36 = vsel %vm881_vm2, %v15858_v38, %v7489_v2 }
 0xcaf   : > { %v7117_v43 = vadd.f32 %v7116_v25, %v7115_v51  ;;  %v7118_v40 = vpop.f32.mrb[2].mxu0  ;;  %v15860_v51 = vld [vmem:[#allocation113_spill] sm:$0xff]  ;;  %v15861_v25 = vld [vmem:[#allocation215_spill] sm:$0xff]  ;;  %v5532_v37 = vsel %vm5530_vm3, %v5499_v36, %v7499_v53 }
 0xcb0   : > { %v7119_v22 = vpop.f32.mrb[3].mxu0  ;;  %v15874_v36 = vld [vmem:[#allocation61_spill] sm:$0xff] }
 0xcb1   : > { %v7120_v63 = vadd.f32 %v7119_v22, %v7118_v40  ;;  %7611 = vrot.lane.b32.xlu0 %v15839_v8, %s8868_s26  ;;  %v5531_v8 = vsel %vm5530_vm3, %v5498_v24, %v7498_v54  ;;  %v15875_v24 = vld [vmem:[#allocation57_spill] sm:$0xff] }
 0xcb3   : > { %v7625_v14 = vpack.i.bf16 %v7120_v63, %v7117_v43  ;;  %v15862_v43 = vpack.i.bf16 %v15860_v51, %v15861_v25  ;;  %v15876_v25 = vld [vmem:[#allocation95_spill] sm:$0xff] }
 0xcb5   : > { %7621 = vrot.lane.b32.xlu0 %v15842_v44, %s8869_s11  ;;  %7626 = vrot.lane.b32.xlu1 %v7625_v14, %s8870_s22  ;;  %v7121_v52 = vpop.f32.mrb[4].mxu0 }
 0xcb6   : > { %v7122_v16 = vpop.f32.mrb[5].mxu0 }
 0xcb7   : > { %v7123_v42 = vadd.f32 %v7122_v16, %v7121_v52  ;;  %v7124_v57 = vpop.f32.mrb[6].mxu0 }
 0xcb8   : > { %v7125_v11 = vpop.f32.mrb[7].mxu0 }
 0xcb9   : > { %v7126_v30 = vadd.f32 %v7125_v11, %v7124_v57  ;;  %7636 = vrot.lane.b32.xlu1 %v15845_v47, %s8868_s26  ;;  %v15865_v47 = vpack.i.bf16 %v15863_v6, %v15864_v15 }
 0xcbb   : > { %v7630_v29 = vpack.i.bf16 %v7126_v30, %v7123_v42  ;;  %v7502_v42 = vpop.permute.xlu0 %7501 }
 0xcbd   : > { %7646 = vrot.lane.b32.xlu1 %v15848_v18, %s8869_s11  ;;  %7631 = vrot.lane.b32.xlu0 %v7630_v29, %s8870_s22  ;;  %v7127_v9 = vpop.f32.mrb[8].mxu0  ;;  %v15867_v18 = vld [vmem:[#allocation75_spill] sm:$0xff] }
 0xcbe   : > { %v7128_v31 = vpop.f32.mrb[9].mxu0 }
 0xcbf   : > { %v7129_v34 = vadd.f32 %v7128_v31, %v7127_v9  ;;  %v7130_v26 = vpop.f32.mrb[10].mxu0  ;;  %v5500_v9 = vsel %vm881_vm2, %v15867_v18, %v7493_v1 }
 0xcc0   : > { %v7131_v5 = vpop.f32.mrb[11].mxu0 }
 0xcc1   : > { %v7132_v32 = vadd.f32 %v7131_v5, %v7130_v26  ;;  %7641 = vrot.lane.b32.xlu0 %v15851_v58, %s8868_s26  ;;  %v7503_v26 = vunpack.i.l.bf16 %v7502_v42 }
 0xcc3   : > { %v7655_v59 = vpack.i.bf16 %v7132_v32, %v7129_v34  ;;  %v7504_v34 = vunpack.i.h.bf16 %v7502_v42  ;;  %v15869_v32 = vld [vmem:[#allocation152_spill] sm:$0xff]  ;;  %v5533_v62 = vsel %vm5530_vm3, %v5500_v9, %v7503_v26  ;;  %v15880_v42 = vld [vmem:[#allocation165_spill] sm:$0xff] }
 0xcc4   : > { %v15870_v60 = vpack.i.bf16 %v15868_v28, %v15869_v32 }
 0xcc5   : > { %7651 = vrot.lane.b32.xlu0 %v15854_v49, %s8869_s11  ;;  %7656 = vrot.lane.b32.xlu1 %v7655_v59, %s8870_s22  ;;  %v7133_v23 = vpop.f32.mrb[12].mxu0  ;;  %v5534_v10 = vsel %vm5530_vm3, %v5501_v13, %v7504_v34 }
 0xcc6   : > { %v7134_v56 = vpop.f32.mrb[13].mxu0 }
 0xcc7   : > { %v7135_v7 = vadd.f32 %v7134_v56, %v7133_v23  ;;  %v7136_v3 = vpop.f32.mrb[14].mxu0 }
 0xcc8   : > { %v7137_v55 = vpop.f32.mrb[15].mxu0 }
 0xcc9   : > { %v7138_v45 = vadd.f32 %v7137_v55, %v7136_v3  ;;  %7666 = vrot.lane.b32.xlu1 %v15857_v35, %s8868_s26  ;;  %v15873_v35 = vpack.i.bf16 %v15871_v17, %v15872_v27 }
 0xccb   : > { %v7660_v12 = vpack.i.bf16 %v7138_v45, %v7135_v7 }
 0xccc   : > { %v7507_v20 = vpop.permute.xlu1 %7506 }
 0xccd   : > { %7676 = vrot.lane.b32.xlu1 %v15862_v43, %s8869_s11  ;;  %7661 = vrot.lane.b32.xlu0 %v7660_v12, %s8870_s22  ;;  %v7139_v40 = vpop.f32.mrb[16].mxu0  ;;  %v7509_v22 = vunpack.i.h.bf16 %v7507_v20  ;;  %v7508_v63 = vunpack.i.l.bf16 %v7507_v20  ;;  %v15877_v43 = vld [vmem:[#allocation99_spill] sm:$0xff] }
 0xcce   : > { %v7140_v14 = vpop.f32.mrb[17].mxu0 }
 0xccf   : > { %v7141_v33 = vadd.f32 %v7140_v14, %v7139_v40  ;;  %v5564_v44 = vsel %vm5563_vm4, %v5531_v8, %v7508_v63  ;;  %v5565_v52 = vsel %vm5563_vm4, %v5532_v37, %v7509_v22  ;;  %v7142_v16 = vpop.f32.mrb[18].mxu0  ;;  %v15878_v40 = vpack.i.bf16 %v15876_v25, %v15877_v43  ;;  %v15887_v43 = vld [vmem:[#allocation74_spill] sm:$0xff] }
 0xcd0   : > { %v5596_v57 = vpack.c.bf16 %v5565_v52, %v5564_v44  ;;  %v7143_v11 = vpop.f32.mrb[19].mxu0  ;;  %v7517_v29 = vpop.permute.xlu1 %7516 }
 0xcd1   : > { %v7144_v30 = vadd.f32 %v7143_v11, %v7142_v16  ;;  %7671 = vrot.lane.b32.xlu0 %v15865_v47, %s8868_s26  ;;  %v7519_v2 = vunpack.i.h.bf16 %v7517_v29  ;;  %v7518_v4 = vunpack.i.l.bf16 %v7517_v29  ;;  %v15879_v16 = vld [vmem:[#allocation166_spill] sm:$0xff]  ;;  %v15882_v47 = vld [vmem:[#allocation80_spill] sm:$0xff] }
 0xcd2   : > { %7239 = vmatprep.mubr.msk.bf16.mxu1 %vm607_vm1, %v5596_v57  ;;  %v15881_v57 = vpack.i.bf16 %v15879_v16, %v15880_v42 }
 0xcd3   : > { %v7685_v31 = vpack.i.bf16 %v7144_v30, %v7141_v33  ;;  %v5503_v39 = vsel %vm881_vm2, %v15874_v36, %v7519_v2  ;;  %v5502_v51 = vsel %vm881_vm2, %v15875_v24, %v7518_v4 }
 0xcd4   : > { %v7512_v5 = vpop.permute.xlu0 %7511  ;;  %v7527_v50 = vpop.permute.xlu1 %7526 }
 0xcd5   : > { %7681 = vrot.lane.b32.xlu0 %v15870_v60, %s8869_s11  ;;  %7686 = vrot.lane.b32.xlu1 %v7685_v31, %s8870_s22  ;;  %v7145_v48 = vpop.f32.mrb[20].mxu0  ;;  %v7514_v58 = vunpack.i.h.bf16 %v7512_v5  ;;  %v7513_v59 = vunpack.i.l.bf16 %v7512_v5  ;;  %v7529_v54 = vunpack.i.h.bf16 %v7527_v50  ;;  %v7528_v12 = vunpack.i.l.bf16 %v7527_v50 }
 0xcd6   : > { %v7146_v49 = vpop.f32.mrb[21].mxu0 }
 0xcd7   : > { %v5566_v23 = vsel %vm5563_vm4, %v5533_v62, %v7513_v59  ;;  %v5567_v41 = vsel %vm5563_vm4, %v5534_v10, %v7514_v58  ;;  %v7147_v56 = vadd.f32 %v7146_v49, %v7145_v48  ;;  %v7148_v7 = vpop.f32.mrb[22].mxu0  ;;  %v5535_v61 = vsel %vm5530_vm3, %v5502_v51, %v7528_v12  ;;  %v15885_v62 = vld [vmem:[#allocation197_spill] sm:$0xff] }
 0xcd8   : > { %v5597_v3 = vpack.c.bf16 %v5567_v41, %v5566_v23  ;;  %v7149_v55 = vpop.f32.mrb[23].mxu0  ;;  %v7522_v53 = vpop.permute.xlu0 %7521  ;;  %v5536_v37 = vsel %vm5530_vm3, %v5503_v39, %v7529_v54  ;;  %v15886_v51 = vld [vmem:[#allocation85_spill] sm:$0xff] }
 0xcd9   : > { %v7150_v45 = vadd.f32 %v7149_v55, %v7148_v7  ;;  %7696 = vrot.lane.b32.xlu1 %v15873_v35, %s8868_s26  ;;  %v7524_v44 = vunpack.i.h.bf16 %v7522_v53  ;;  %v7523_v52 = vunpack.i.l.bf16 %v7522_v53 }
 0xcda   : > { %7240 = vmatmul.mubr.msk.bf16.vlgmr.msra.gmra.mrb[0].mxu1 %vm607_vm1, %v5597_v3 }
 0xcdb   : > { %v7690_v20 = vpack.i.bf16 %v7150_v45, %v7147_v56  ;;  %v5505_v29 = vsel %vm881_vm2, %v15882_v47, %v7524_v44  ;;  %v5504_v13 = vsel %vm881_vm2, %v15883_v21, %v7523_v52 }
 0xcdc   : > { %v7537_v38 = vpop.permute.xlu1 %7536  ;;  %v7532_v8 = vpop.permute.xlu0 %7531 }
 0xcdd   : > { %7706 = vrot.lane.b32.xlu1 %v15878_v40, %s8869_s11  ;;  %7691 = vrot.lane.b32.xlu0 %v7690_v20, %s8870_s22  ;;  %v7539_v22 = vunpack.i.h.bf16 %v7537_v38  ;;  %v7538_v63 = vunpack.i.l.bf16 %v7537_v38  ;;  %v7534_v30 = vunpack.i.h.bf16 %v7532_v8  ;;  %v7533_v6 = vunpack.i.l.bf16 %v7532_v8 }
 0xcdf   : > { %v5568_v14 = vsel %vm5563_vm4, %v5535_v61, %v7538_v63  ;;  %v5569_v1 = vsel %vm5563_vm4, %v5536_v37, %v7539_v22  ;;  %v5537_v31 = vsel %vm5530_vm3, %v5504_v13, %v7533_v6  ;;  %v5538_v34 = vsel %vm5530_vm3, %v5505_v29, %v7534_v30  ;;  %v15888_v30 = vld [vmem:[#allocation127_spill] sm:$0xff] }
 0xce0   : > { %v5598_v33 = vpack.c.bf16 %v5569_v1, %v5568_v14  ;;  %v7547_v11 = vpop.permute.xlu1 %7546 }
 0xce1   : > { %7701 = vrot.lane.b32.xlu0 %v15881_v57, %s8868_s26  ;;  %v7549_v60 = vunpack.i.h.bf16 %v7547_v11  ;;  %v7548_v48 = vunpack.i.l.bf16 %v7547_v11 }
 0xce2   : > { %7243 = vmatprep.mubr.msk.bf16.mxu1 %vm607_vm1, %v5598_v33 }
 0xce3   : > { %v5506_v10 = vsel %vm881_vm2, %v15885_v62, %v7548_v48 }
 0xce4   : > { %v7542_v15 = vpop.permute.xlu0 %7541  ;;  %v7557_v28 = vpop.permute.xlu1 %7556 }
 0xce5   : > { %7711 = vrot.lane.b32.xlu0 %v7710_v46, %s8869_s11  ;;  %v7544_v18 = vunpack.i.h.bf16 %v7542_v15  ;;  %v7543_v9 = vunpack.i.l.bf16 %v7542_v15  ;;  %v7559_v58 = vunpack.i.h.bf16 %v7557_v28  ;;  %v7558_v59 = vunpack.i.l.bf16 %v7557_v28  ;;  %v15889_v15 = vld [vmem:[#allocation126_spill] sm:$0xff] }
 0xce6   : > { %v5507_v46 = vsel %vm881_vm2, %v15884_v19, %v7549_v60  ;;  %v15891_v19 = vld [vmem:[#allocation89_spill] sm:$0xff] }
 0xce7   : > { %v5570_v26 = vsel %vm5563_vm4, %v5537_v31, %v7543_v9  ;;  %v5571_v5 = vsel %vm5563_vm4, %v5538_v34, %v7544_v18  ;;  %v5539_v41 = vsel %vm5530_vm3, %v5506_v10, %v7558_v59  ;;  %v5540_v56 = vsel %vm5530_vm3, %v5507_v46, %v7559_v58  ;;  %v15890_v59 = vld [vmem:[#allocation132_spill] sm:$0xff] }
 0xce8   : > { %v5599_v32 = vpack.c.bf16 %v5571_v5, %v5570_v26  ;;  %v7552_v53 = vpop.permute.xlu0 %7551 }
 0xce9   : > { %v7554_v12 = vunpack.i.h.bf16 %v7552_v53  ;;  %v7553_v20 = vunpack.i.l.bf16 %v7552_v53  ;;  %v15893_v53 = vld [vmem:[#allocation130_spill] sm:$0xff] }
 0xcea   : > { %7244 = vmatmul.mubr.msk.bf16.gmra.mrb[4].mxu1 %vm607_vm1, %v5599_v32 }
 0xceb   : > { %v5509_v25 = vsel %vm881_vm2, %v15886_v51, %v7554_v12  ;;  %v5508_v40 = vsel %vm881_vm2, %v15887_v43, %v7553_v20 }
 0xcec   : > { %v7567_v0 = vpop.permute.xlu1 %7566  ;;  %v7562_v54 = vpop.permute.xlu0 %7561 }
 0xced   : > { %v7569_v49 = vunpack.i.h.bf16 %v7567_v0  ;;  %v7568_v23 = vunpack.i.l.bf16 %v7567_v0  ;;  %v7564_v36 = vunpack.i.h.bf16 %v7562_v54  ;;  %v7563_v39 = vunpack.i.l.bf16 %v7562_v54 }
 0xcef   : > { %v5572_v50 = vsel %vm5563_vm4, %v5539_v41, %v7568_v23  ;;  %v5573_v7 = vsel %vm5563_vm4, %v5540_v56, %v7569_v49  ;;  %v5541_v61 = vsel %vm5530_vm3, %v5508_v40, %v7563_v39  ;;  %v5542_v37 = vsel %vm5530_vm3, %v5509_v25, %v7564_v36 }
 0xcf0   : > { %v5600_v3 = vpack.c.bf16 %v5573_v7, %v5572_v50  ;;  %v7577_v38 = vpop.permute.xlu1 %7576 }
 0xcf1   : > { %v7579_v44 = vunpack.i.h.bf16 %v7577_v38  ;;  %v7578_v52 = vunpack.i.l.bf16 %v7577_v38 }
 0xcf2   : > { %v7151_v55 = vpop.f32.mrb[24].mxu0  ;;  %7247 = vmatprep.mubr.msk.bf16.mxu1 %vm607_vm1, %v5600_v3 }
 0xcf3   : > { %v7152_v2 = vpop.f32.mrb[25].mxu0  ;;  %v5511_v6 = vsel %vm881_vm2, %v15888_v30, %v7579_v44  ;;  %v5510_v47 = vsel %vm881_vm2, %v15889_v15, %v7578_v52  ;;  %v7729_v30 = vld [vmem:[%s412_s9] sm:$0xff]  }
 0xcf4   : > { %v7153_v4 = vadd.f32 %v7152_v2, %v7151_v55  ;;  %v7154_v45 = vpop.f32.mrb[26].mxu0  ;;  %v7587_v8 = vpop.permute.xlu1 %7586  ;;  %7271 = vmatprep.subr.bf16.mxu0 %v7729_v30 }
 0xcf5   : > { %v7155_v17 = vpop.f32.mrb[27].mxu0  ;;  %v7589_v42 = vunpack.i.h.bf16 %v7587_v8  ;;  %v7588_v57 = vunpack.i.l.bf16 %v7587_v8  ;;  %v15894_v8 = vld [vmem:[#allocation208_spill] sm:$0xff]  ;;  %7272 = vmatpush3.bf16.msra.mxu0 %v7729_v30 }
 0xcf6   : > { %v7156_v27 = vadd.f32 %v7155_v17, %v7154_v45 }
 0xcf7   : > { %v5543_v13 = vsel %vm5530_vm3, %v5510_v47, %v7588_v57  ;;  %v5544_v18 = vsel %vm5530_vm3, %v5511_v6, %v7589_v42 }
 0xcf8   : > { %v7715_v35 = vpack.i.bf16 %v7156_v27, %v7153_v4  ;;  %v15892_v27 = vld [vmem:[#allocation131_spill] sm:$0xff] }
 0xcfa   : > { %7716 = vrot.lane.b32.xlu1 %v7715_v35, %s8870_s22 }
 0xd0f   : > { %v7572_v24 = vpop.permute.xlu0 %7571 }
 0xd10   : > { %v7574_v22 = vunpack.i.h.bf16 %v7572_v24  ;;  %v7573_v63 = vunpack.i.l.bf16 %v7572_v24 }
 0xd12   : > { %v5575_v14 = vsel %vm5563_vm4, %v5542_v37, %v7574_v22  ;;  %v5574_v1 = vsel %vm5563_vm4, %v5541_v61, %v7573_v63 }
 0xd13   : > { %v5601_v33 = vpack.c.bf16 %v5575_v14, %v5574_v1  ;;  %v7582_v16 = vpop.permute.xlu0 %7581  ;;  %v15895_v1 = vld [vmem:[#allocation206_spill] sm:$0xff] }
 0xd14   : > { %v7584_v5 = vunpack.i.h.bf16 %v7582_v16  ;;  %v7583_v28 = vunpack.i.l.bf16 %v7582_v16 }
 0xd15   : > { %7248 = vmatmul.mubr.msk.bf16.gmra.mrb[8].mxu1 %vm607_vm1, %v5601_v33 }
 0xd16   : > { %v5513_v0 = vsel %vm881_vm2, %v15890_v59, %v7584_v5  ;;  %v5512_v46 = vsel %vm881_vm2, %v15891_v19, %v7583_v28 }
 0xd17   : > { %v7597_v11 = vpop.permute.xlu1 %7596  ;;  %v7592_v9 = vpop.permute.xlu0 %7591 }
 0xd18   : > { %v7599_v29 = vunpack.i.h.bf16 %v7597_v11  ;;  %v7598_v21 = vunpack.i.l.bf16 %v7597_v11  ;;  %v7594_v60 = vunpack.i.h.bf16 %v7592_v9  ;;  %v7593_v48 = vunpack.i.l.bf16 %v7592_v9 }
 0xd1a   : > { %v5576_v31 = vsel %vm5563_vm4, %v5543_v13, %v7598_v21  ;;  %v5577_v34 = vsel %vm5563_vm4, %v5544_v18, %v7599_v29  ;;  %v5545_v49 = vsel %vm5530_vm3, %v5512_v46, %v7593_v48  ;;  %v5546_v23 = vsel %vm5530_vm3, %v5513_v0, %v7594_v60  ;;  %v15897_v0 = vld [vmem:[#allocation134_spill] sm:$0xff] }
 0xd1b   : > { %v5602_v26 = vpack.c.bf16 %v5577_v34, %v5576_v31  ;;  %v7607_v32 = vpop.permute.xlu1 %7606 }
 0xd1c   : > { %v7609_v3 = vunpack.i.h.bf16 %v7607_v32  ;;  %v7608_v55 = vunpack.i.l.bf16 %v7607_v32  ;;  %v7730_v32 = vld [vmem:[%s412_s9 + $0x8] sm:$0xff]   ;;  %s14053_s9 = scalar_lea.hbm %s15909_s15, %s6504_s21 }
 0xd1d   : > { %7251 = vmatprep.mubr.msk.bf16.mxu1 %vm607_vm1, %v5602_v26  ;;  %7273 = vmatprep.subr.bf16.mxu0 %v7730_v32 }
 0xd1e   : > { %v5515_v35 = vsel %vm881_vm2, %v15892_v27, %v7609_v3  ;;  %v5514_v54 = vsel %vm881_vm2, %v15893_v53, %v7608_v55  ;;  %7274 = vmatpush3.bf16.msra.mxu0 %v7730_v32 }
 0xd1f   : > { %v7602_v58 = vpop.permute.xlu0 %7601  ;;  %v7617_v50 = vpop.permute.xlu1 %7616 }
 0xd20   : > { %v7604_v62 = vunpack.i.h.bf16 %v7602_v58  ;;  %v7603_v10 = vunpack.i.l.bf16 %v7602_v58  ;;  %v7619_v4 = vunpack.i.h.bf16 %v7617_v50  ;;  %v7618_v45 = vunpack.i.l.bf16 %v7617_v50  ;;  %v15896_v58 = vld [vmem:[#allocation135_spill] sm:$0xff] }
 0xd22   : > { %v5579_v41 = vsel %vm5563_vm4, %v5546_v23, %v7604_v62  ;;  %v5578_v56 = vsel %vm5563_vm4, %v5545_v49, %v7603_v10  ;;  %v5547_v38 = vsel %vm5530_vm3, %v5514_v54, %v7618_v45  ;;  %v5548_v36 = vsel %vm5530_vm3, %v5515_v35, %v7619_v4  ;;  %v15899_v35 = vld [vmem:[#allocation214_spill] sm:$0xff] }
 0xd23   : > { %v5603_v7 = vpack.c.bf16 %v5579_v41, %v5578_v56  ;;  %v7612_v2 = vpop.permute.xlu0 %7611 }
 0xd24   : > { %v7614_v43 = vunpack.i.h.bf16 %v7612_v2  ;;  %v7613_v40 = vunpack.i.l.bf16 %v7612_v2 }
 0xd25   : > { %7252 = vmatmul.mubr.msk.bf16.gmra.mrb[12].mxu1 %vm607_vm1, %v5603_v7 }
 0xd26   : > { %v5517_v14 = vsel %vm881_vm2, %v15894_v8, %v7614_v43  ;;  %v5516_v33 = vsel %vm881_vm2, %v15895_v1, %v7613_v40 }
 0xd27   : > { %v7627_v17 = vpop.permute.xlu1 %7626  ;;  %v7622_v39 = vpop.permute.xlu0 %7621 }
 0xd28   : > { %v7629_v12 = vunpack.i.h.bf16 %v7627_v17  ;;  %v7628_v20 = vunpack.i.l.bf16 %v7627_v17  ;;  %v7624_v63 = vunpack.i.h.bf16 %v7622_v39  ;;  %v7623_v61 = vunpack.i.l.bf16 %v7622_v39  ;;  %v15898_v17 = vld [vmem:[#allocation216_spill] sm:$0xff] }
 0xd2a   : > { %v5580_v24 = vsel %vm5563_vm4, %v5547_v38, %v7628_v20  ;;  %v5581_v51 = vsel %vm5563_vm4, %v5548_v36, %v7629_v12  ;;  %v5549_v42 = vsel %vm5530_vm3, %v5516_v33, %v7623_v61  ;;  %v5550_v57 = vsel %vm5530_vm3, %v5517_v14, %v7624_v63  ;;  %v15901_v14 = vld [vmem:[#allocation138_spill] sm:$0xff] }
 0xd2b   : > { %v5604_v25 = vpack.c.bf16 %v5581_v51, %v5580_v24  ;;  %v7637_v22 = vpop.permute.xlu1 %7636 }
 0xd2c   : > { %v7639_v9 = vunpack.i.h.bf16 %v7637_v22  ;;  %v7638_v31 = vunpack.i.l.bf16 %v7637_v22 }
 0xd2d   : > { %7255 = vmatprep.mubr.msk.bf16.mxu1 %vm607_vm1, %v5604_v25 }
 0xd2e   : > { %v5519_v59 = vsel %vm881_vm2, %v15896_v58, %v7639_v9  ;;  %v5518_v19 = vsel %vm881_vm2, %v15897_v0, %v7638_v31  ;;  %v15903_v9 = vld [vmem:[#allocation141_spill] sm:$0xff] }
 0xd2f   : > { %v7632_v37 = vpop.permute.xlu0 %7631  ;;  %v7157_v16 = vpop.f32.mrb[28].mxu0 }
 0xd30   : > { %v7634_v44 = vunpack.i.h.bf16 %v7632_v37  ;;  %v7633_v52 = vunpack.i.l.bf16 %v7632_v37  ;;  %v7158_v11 = vpop.f32.mrb[29].mxu0  ;;  %v7647_v47 = vpop.permute.xlu1 %7646  ;;  %v15900_v37 = vld [vmem:[#allocation139_spill] sm:$0xff] }
 0xd31   : > { %v7160_v29 = vpop.f32.mrb[30].mxu0  ;;  %v7159_v13 = vadd.f32 %v7158_v11, %v7157_v16  ;;  %v7649_v5 = vunpack.i.h.bf16 %v7647_v47  ;;  %v7648_v28 = vunpack.i.l.bf16 %v7647_v47 }
 0xd32   : > { %v5583_v6 = vsel %vm5563_vm4, %v5550_v57, %v7634_v44  ;;  %v5582_v15 = vsel %vm5563_vm4, %v5549_v42, %v7633_v52  ;;  %v7161_v18 = vpop.f32.mrb[31].mxu0 }
 0xd33   : > { %v5605_v21 = vpack.c.bf16 %v5583_v6, %v5582_v15  ;;  %v7642_v34 = vpop.permute.xlu0 %7641  ;;  %v7162_v26 = vadd.f32 %v7161_v18, %v7160_v29  ;;  %v5551_v10 = vsel %vm5530_vm3, %v5518_v19, %v7648_v28  ;;  %v5552_v49 = vsel %vm5530_vm3, %v5519_v59, %v7649_v5 }
 0xd34   : > { %v7644_v7 = vunpack.i.h.bf16 %v7642_v34  ;;  %v7643_v3 = vunpack.i.l.bf16 %v7642_v34 }
 0xd35   : > { %7256 = vmatmul.mubr.msk.bf16.gmra.mrb[16].mxu1 %vm607_vm1, %v5605_v21  ;;  %v7720_v60 = vpack.i.bf16 %v7162_v26, %v7159_v13  ;;  %v15902_v13 = vld [vmem:[#allocation102_spill] sm:$0xff] }
 0xd36   : > { %v5521_v27 = vsel %vm881_vm2, %v15898_v17, %v7644_v7  ;;  %v5520_v53 = vsel %vm881_vm2, %v15899_v35, %v7643_v3 }
 0xd37   : > { %v7657_v48 = vpop.permute.xlu1 %7656  ;;  %7721 = vrot.lane.b32.xlu0 %v7720_v60, %s8870_s22  ;;  %v7652_v23 = vpop.permute.xlu0 %7651 }
 0xd38   : > { %v7659_v46 = vunpack.i.h.bf16 %v7657_v48  ;;  %v7658_v62 = vunpack.i.l.bf16 %v7657_v48  ;;  %v7654_v2 = vunpack.i.h.bf16 %v7652_v23  ;;  %v7653_v4 = vunpack.i.l.bf16 %v7652_v23 }
 0xd3a   : > { %v5584_v41 = vsel %vm5563_vm4, %v5551_v10, %v7658_v62  ;;  %v5585_v56 = vsel %vm5563_vm4, %v5552_v49, %v7659_v46  ;;  %v5553_v20 = vsel %vm5530_vm3, %v5520_v53, %v7653_v4  ;;  %v5554_v38 = vsel %vm5530_vm3, %v5521_v27, %v7654_v2  ;;  %v15904_v49 = vld [vmem:[#allocation220_spill] sm:$0xff] }
 0xd3b   : > { %v5606_v50 = vpack.c.bf16 %v5585_v56, %v5584_v41  ;;  %v7667_v55 = vpop.permute.xlu1 %7666  ;;  %v15905_v41 = vld [vmem:[#allocation111_spill] sm:$0xff] }
 0xd3c   : > { %v7669_v25 = vunpack.i.h.bf16 %v7667_v55  ;;  %v7668_v43 = vunpack.i.l.bf16 %v7667_v55 }
 0xd3d   : > { %7259 = vmatprep.mubr.msk.bf16.mxu1 %vm607_vm1, %v5606_v50 }
 0xd3e   : > { %v5523_v8 = vsel %vm881_vm2, %v15900_v37, %v7669_v25  ;;  %v5522_v1 = vsel %vm881_vm2, %v15901_v14, %v7668_v43 }
 0xd3f   : > { %v7662_v45 = vpop.permute.xlu0 %7661  ;;  %v7677_v24 = vpop.permute.xlu1 %7676 }
 0xd40   : > { %v7664_v54 = vunpack.i.h.bf16 %v7662_v45  ;;  %v7663_v12 = vunpack.i.l.bf16 %v7662_v45  ;;  %v7679_v22 = vunpack.i.h.bf16 %v7677_v24  ;;  %v7678_v63 = vunpack.i.l.bf16 %v7677_v24 }
 0xd42   : > { %v5587_v36 = vsel %vm5563_vm4, %v5554_v38, %v7664_v54  ;;  %v5586_v39 = vsel %vm5563_vm4, %v5553_v20, %v7663_v12  ;;  %v5555_v52 = vsel %vm5530_vm3, %v5522_v1, %v7678_v63  ;;  %v5556_v16 = vsel %vm5530_vm3, %v5523_v8, %v7679_v22  ;;  %v15906_v38 = vld [vmem:[#allocation121_spill] sm:$0xff] }
 0xd43   : > { %v5607_v51 = vpack.c.bf16 %v5587_v36, %v5586_v39  ;;  %v7672_v40 = vpop.permute.xlu0 %7671  ;;  %v15907_v39 = vld [vmem:[#allocation120_spill] sm:$0xff]  ;;  %v13778_v22 = vld [vmem:[%s403_s8] ss:$0 sm:$0xff] }
 0xd44   : > { %v7674_v6 = vunpack.i.h.bf16 %v7672_v40  ;;  %v7673_v15 = vunpack.i.l.bf16 %v7672_v40 }
 0xd45   : > { %7260 = vmatmul.mubr.msk.bf16.gmra.mrb[20].mxu1 %vm607_vm1, %v5607_v51 }
 0xd46   : > { %v5525_v18 = vsel %vm881_vm2, %v15902_v13, %v7674_v6  ;;  %v5524_v31 = vsel %vm881_vm2, %v15903_v9, %v7673_v15  ;;  %v8501_v15 = vld [vmem:[%s9308_s28 + $0x8] sm:$0xff] }
 0xd47   : > { %v7687_v61 = vpop.permute.xlu1 %7686  ;;  %v7682_v42 = vpop.permute.xlu0 %7681 }
 0xd48   : > { %v7689_v33 = vunpack.i.h.bf16 %v7687_v61  ;;  %v7688_v44 = vunpack.i.l.bf16 %v7687_v61  ;;  %v7684_v47 = vunpack.i.h.bf16 %v7682_v42  ;;  %v7683_v29 = vunpack.i.l.bf16 %v7682_v42 }
 0xd4a   : > { %v5588_v57 = vsel %vm5563_vm4, %v5555_v52, %v7688_v44  ;;  %v5589_v11 = vsel %vm5563_vm4, %v5556_v16, %v7689_v33  ;;  %v5557_v5 = vsel %vm5530_vm3, %v5524_v31, %v7683_v29  ;;  %v5558_v28 = vsel %vm5530_vm3, %v5525_v18, %v7684_v47  ;;  %v8502_v29 = vld [vmem:[%s9308_s28 + $0x10] sm:$0xff] }
 0xd4b   : > { %v5608_v30 = vpack.c.bf16 %v5589_v11, %v5588_v57  ;;  %v7697_v58 = vpop.permute.xlu1 %7696  ;;  %v8499_v57 = vld [vmem:[%s9308_s28 + $0x18] sm:$0xff] }
 0xd4c   : > { %v7699_v0 = vunpack.i.h.bf16 %v7697_v58  ;;  %v7698_v19 = vunpack.i.l.bf16 %v7697_v58 }
 0xd4d   : > { %7263 = vmatprep.mubr.msk.bf16.mxu1 %vm607_vm1, %v5608_v30  ;;  %v8500_v30 = vld [vmem:[%s9308_s28] sm:$0xff] }
 0xd4e   : > { %v5527_v23 = vsel %vm881_vm2, %v15904_v49, %v7699_v0  ;;  %v5526_v56 = vsel %vm881_vm2, %v15905_v41, %v7698_v19  ;;  %v8505_v19 = vld [vmem:[%s9308_s28 + $0x28] sm:$0xff] }
 0xd4f   : > { %v7692_v21 = vpop.permute.xlu0 %7691  ;;  %v7707_v59 = vpop.permute.xlu1 %7706 }
 0xd50   : > { %v7694_v34 = vunpack.i.h.bf16 %v7692_v21  ;;  %v7693_v26 = vunpack.i.l.bf16 %v7692_v21  ;;  %v7709_v46 = vunpack.i.h.bf16 %v7707_v59  ;;  %v7708_v62 = vunpack.i.l.bf16 %v7707_v59  ;;  %v8504_v59 = vld [vmem:[%s9308_s28 + $0x20] sm:$0xff] }
 0xd52   : > { %v5591_v32 = vsel %vm5563_vm4, %v5558_v28, %v7694_v34  ;;  %v5590_v60 = vsel %vm5563_vm4, %v5557_v5, %v7693_v26  ;;  %v5559_v3 = vsel %vm5530_vm3, %v5526_v56, %v7708_v62  ;;  %v5560_v55 = vsel %vm5530_vm3, %v5527_v23, %v7709_v46  ;;  %v8506_v62 = vld [vmem:[%s9308_s28 + $0x30] sm:$0xff] }
 0xd53   : > { %v5609_v48 = vpack.c.bf16 %v5591_v32, %v5590_v60  ;;  %v7702_v17 = vpop.permute.xlu0 %7701 }
 0xd54   : > { %v7704_v35 = vunpack.i.h.bf16 %v7702_v17  ;;  %v7703_v53 = vunpack.i.l.bf16 %v7702_v17 }
 0xd55   : > { %7264 = vmatmul.mubr.msk.bf16.gmra.mrb[24].mxu1 %vm607_vm1, %v5609_v48  ;;  %v8503_v48 = vld [vmem:[%s9308_s28 + $0x38] sm:$0xff] }
 0xd56   : > { %v5529_v36 = vsel %vm881_vm2, %v15906_v38, %v7704_v35  ;;  %v5528_v24 = vsel %vm881_vm2, %v15907_v39, %v7703_v53  ;;  %v8509_v53 = vld [vmem:[%s9308_s28 + $0x48] sm:$0xff] }
 0xd57   : > { %v7712_v27 = vpop.permute.xlu0 %7711 }
 0xd58   : > { %v7714_v54 = vunpack.i.h.bf16 %v7712_v27  ;;  %v7713_v12 = vunpack.i.l.bf16 %v7712_v27  ;;  %v8508_v27 = vld [vmem:[%s9308_s28 + $0x40] sm:$0xff] }
 0xd5a   : > { %v5561_v43 = vsel %vm5530_vm3, %v5528_v24, %v7713_v12  ;;  %v5562_v40 = vsel %vm5530_vm3, %v5529_v36, %v7714_v54  ;;  %v8510_v12 = vld [vmem:[%s9308_s28 + $0x50] sm:$0xff] }
 0xd6c   : > { %v7717_v10 = vpop.permute.xlu1 %7716 }
 0xd6d   : > { %v7719_v50 = vunpack.i.h.bf16 %v7717_v10  ;;  %v7718_v7 = vunpack.i.l.bf16 %v7717_v10 }
 0xd6f   : > { %v5592_v2 = vsel %vm5563_vm4, %v5559_v3, %v7718_v7  ;;  %v5593_v4 = vsel %vm5563_vm4, %v5560_v55, %v7719_v50 }
 0xd70   : > { %v5610_v45 = vpack.c.bf16 %v5593_v4, %v5592_v2 }
 0xd72   : > { %7267 = vmatprep.mubr.msk.bf16.mxu1 %vm607_vm1, %v5610_v45  ;;  %v8507_v45 = vld [vmem:[%s9308_s28 + $0x58] sm:$0xff] }
 0xda9   : > { %v7722_v20 = vpop.permute.xlu0 %7721 }
 0xdaa   : > { %v7724_v51 = vunpack.i.h.bf16 %v7722_v20  ;;  %v7723_v25 = vunpack.i.l.bf16 %v7722_v20 }
 0xdac   : > { %v5595_v63 = vsel %vm5563_vm4, %v5562_v40, %v7724_v51  ;;  %v5594_v61 = vsel %vm5563_vm4, %v5561_v43, %v7723_v25 }
 0xdad   : > { %v7241_v37 = vpop.f32.mrb[0].mxu1  ;;  %v5611_v8 = vpack.c.bf16 %v5595_v63, %v5594_v61 }
 0xdae   : > { %v5717_v14 = vpop.f32.mrb[1].mxu1  ;;  %v5726_v44 = vadd.f32 %v7241_v37, %v13778_v22  ;;  %v8511_v37 = vld [vmem:[%s9308_s28 + $0x78] sm:$0xff] }
 0xdaf   : > { %v5718_v1 = vadd.f32 %v13778_v22, %v5717_v14  ;;  %v7242_v33 = vpop.f32.mrb[2].mxu1  ;;  %7268 = vmatmul.mubr.msk.bf16.gmra.mrb[28].mxu1 %vm607_vm1, %v5611_v8  ;;  %v8512_v14 = vld [vmem:[%s9308_s28 + $0x60] sm:$0xff] }
 0xdb0   : > { %v5729_v52 = vadd.f32 %v7242_v33, %v13778_v22  ;;  %v5720_v16 = vpop.f32.mrb[3].mxu1  ;;  %v13797_v21 = vadd.f32 %v8502_v29, %v5726_v44  ;;  %v8513_v33 = vld [vmem:[%s9308_s28 + $0x68] sm:$0xff] }
 0xdb1   : > { %v5721_v42 = vadd.f32 %v13778_v22, %v5720_v16  ;;  %v13791_v6 = vadd.f32 %v8500_v30, %v5718_v1 }
 0xdb2   : > { %v13788_v11 = vadd.f32 %v8499_v57, %v5729_v52  ;;  %v8514_v52 = vld [vmem:[%s9308_s28 + $0x70] sm:$0xff] }
 0xdb3   : > { %v13794_v47 = vadd.f32 %v8501_v15, %v5721_v42 }
 0xdb4   : > { %v5877_v18 = vpack.c.bf16 %v13788_v11, %v13797_v21 }
 0xdb5   : > { %v5876_v13 = vpack.c.bf16 %v13794_v47, %v13791_v6 }
 0xdb7   : > { %7275 = vmatprep.mubr.msk.bf16.mxu0 %vm607_vm1, %v5876_v13 }
 0xdb8   : > { %7276 = vmatmul.mubr.msk.bf16.vlgmr.msra.gmra.mrb[32].mxu0 %vm607_vm1, %v5877_v18 }
 0xdbd   : > { %v7245_v9 = vpop.f32.mrb[4].mxu1 }
 0xdbe   : > { %v5733_v31 = vpop.f32.mrb[5].mxu1  ;;  %v5742_v5 = vadd.f32 %v7245_v9, %v13778_v22 }
 0xdbf   : > { %v5734_v34 = vadd.f32 %v13778_v22, %v5733_v31  ;;  %v7246_v26 = vpop.f32.mrb[6].mxu1 }
 0xdc0   : > { %v5745_v28 = vadd.f32 %v7246_v26, %v13778_v22  ;;  %v5736_v32 = vpop.f32.mrb[7].mxu1  ;;  %v13819_v10 = vadd.f32 %v8506_v62, %v5742_v5  ;;  %v8515_v26 = vld [vmem:[%s9308_s28 + $0x98] sm:$0xff] }
 0xdc1   : > { %v5737_v60 = vadd.f32 %v13778_v22, %v5736_v32  ;;  %v13813_v0 = vadd.f32 %v8504_v59, %v5734_v34  ;;  %v8518_v59 = vld [vmem:[%s9308_s28 + $0x90] sm:$0xff] }
 0xdc2   : > { %v13810_v58 = vadd.f32 %v8503_v48, %v5745_v28  ;;  %v8516_v28 = vld [vmem:[%s9308_s28 + $0x80] sm:$0xff] }
 0xdc3   : > { %v13816_v46 = vadd.f32 %v8505_v19, %v5737_v60  ;;  %v8517_v60 = vld [vmem:[%s9308_s28 + $0x88] sm:$0xff] }
 0xdc4   : > { %v5879_v23 = vpack.c.bf16 %v13810_v58, %v13819_v10 }
 0xdc5   : > { %v5878_v49 = vpack.c.bf16 %v13816_v46, %v13813_v0 }
 0xdc7   : > { %7279 = vmatprep.mubr.msk.bf16.mxu0 %vm607_vm1, %v5878_v49 }
 0xdc8   : > { %7280 = vmatmul.mubr.msk.bf16.gmra.mrb[36].mxu0 %vm607_vm1, %v5879_v23 }
 0xde8   : > { %v7249_v41 = vpop.f32.mrb[8].mxu1 }
 0xde9   : > { %v5749_v56 = vpop.f32.mrb[9].mxu1  ;;  %v5758_v3 = vadd.f32 %v7249_v41, %v13778_v22 }
 0xdea   : > { %v5750_v50 = vadd.f32 %v13778_v22, %v5749_v56  ;;  %v7250_v7 = vpop.f32.mrb[10].mxu1 }
 0xdeb   : > { %v5761_v55 = vadd.f32 %v7250_v7, %v13778_v22  ;;  %v5752_v2 = vpop.f32.mrb[11].mxu1  ;;  %v13841_v20 = vadd.f32 %v8510_v12, %v5758_v3  ;;  %v8521_v12 = vld [vmem:[%s9308_s28 + $0xa8] sm:$0xff] }
 0xdec   : > { %v5753_v4 = vadd.f32 %v13778_v22, %v5752_v2  ;;  %v13835_v35 = vadd.f32 %v8508_v27, %v5750_v50  ;;  %v8520_v27 = vld [vmem:[%s9308_s28 + $0xa0] sm:$0xff] }
 0xded   : > { %v13832_v17 = vadd.f32 %v8507_v45, %v5761_v55 }
 0xdee   : > { %v13838_v54 = vadd.f32 %v8509_v53, %v5753_v4  ;;  %v8519_v4 = vld [vmem:[%s9308_s28 + $0xb8] sm:$0xff] }
 0xdef   : > { %v5881_v36 = vpack.c.bf16 %v13832_v17, %v13841_v20 }
 0xdf0   : > { %v5880_v38 = vpack.c.bf16 %v13838_v54, %v13835_v35 }
 0xdf2   : > { %7283 = vmatprep.mubr.msk.bf16.mxu0 %vm607_vm1, %v5880_v38 }
 0xdf3   : > { %7284 = vmatmul.mubr.msk.bf16.gmra.mrb[40].mxu0 %vm607_vm1, %v5881_v36  ;;  %v8522_v36 = vld [vmem:[%s9308_s28 + $0xb0] sm:$0xff] }
 0xdf8   : > { %v7253_v39 = vpop.f32.mrb[12].mxu1 }
 0xdf9   : > { %v5765_v24 = vpop.f32.mrb[13].mxu1  ;;  %v5774_v43 = vadd.f32 %v7253_v39, %v13778_v22 }
 0xdfa   : > { %v5766_v51 = vadd.f32 %v13778_v22, %v5765_v24  ;;  %v7254_v25 = vpop.f32.mrb[14].mxu1 }
 0xdfb   : > { %v5777_v40 = vadd.f32 %v7254_v25, %v13778_v22  ;;  %v5768_v63 = vpop.f32.mrb[15].mxu1  ;;  %v13863_v16 = vadd.f32 %v8514_v52, %v5774_v43  ;;  %v8523_v52 = vld [vmem:[%s9308_s28 + $0xd8] sm:$0xff] }
 0xdfc   : > { %v5769_v61 = vadd.f32 %v13778_v22, %v5768_v63  ;;  %v13857_v1 = vadd.f32 %v8512_v14, %v5766_v51 }
 0xdfd   : > { %v13854_v8 = vadd.f32 %v8511_v37, %v5777_v40 }
 0xdfe   : > { %v13860_v44 = vadd.f32 %v8513_v33, %v5769_v61 }
 0xdff   : > { %v5883_v57 = vpack.c.bf16 %v13854_v8, %v13863_v16 }
 0xe00   : > { %v5882_v42 = vpack.c.bf16 %v13860_v44, %v13857_v1 }
 0xe02   : > { %7287 = vmatprep.mubr.msk.bf16.mxu0 %vm607_vm1, %v5882_v42 }
 0xe03   : > { %7288 = vmatmul.mubr.msk.bf16.gmra.mrb[44].mxu0 %vm607_vm1, %v5883_v57  ;;  %v8524_v57 = vld [vmem:[%s9308_s28 + $0xc0] sm:$0xff] }
 0xe08   : > { %v7257_v30 = vpop.f32.mrb[16].mxu1 }
 0xe09   : > { %v5781_v15 = vpop.f32.mrb[17].mxu1  ;;  %v5790_v18 = vadd.f32 %v7257_v30, %v13778_v22 }
 0xe0a   : > { %v5782_v29 = vadd.f32 %v13778_v22, %v5781_v15  ;;  %v7258_v13 = vpop.f32.mrb[18].mxu1  ;;  %v8525_v15 = vld [vmem:[%s9308_s28 + $0xc8] sm:$0xff] }
 0xe0b   : > { %v5793_v9 = vadd.f32 %v7258_v13, %v13778_v22  ;;  %v5784_v31 = vpop.f32.mrb[19].mxu1  ;;  %v13885_v19 = vadd.f32 %v8518_v59, %v5790_v18  ;;  %v8526_v13 = vld [vmem:[%s9308_s28 + $0xd0] sm:$0xff] }
 0xe0c   : > { %v5785_v34 = vadd.f32 %v13778_v22, %v5784_v31  ;;  %v13879_v32 = vadd.f32 %v8516_v28, %v5782_v29 }
 0xe0d   : > { %v13876_v5 = vadd.f32 %v8515_v26, %v5793_v9 }
 0xe0e   : > { %v13882_v48 = vadd.f32 %v8517_v60, %v5785_v34 }
 0xe0f   : > { %v5885_v49 = vpack.c.bf16 %v13876_v5, %v13885_v19 }
 0xe10   : > { %v5884_v62 = vpack.c.bf16 %v13882_v48, %v13879_v32 }
 0xe12   : > { %7291 = vmatprep.mubr.msk.bf16.mxu0 %vm607_vm1, %v5884_v62 }
 0xe13   : > { %7292 = vmatmul.mubr.msk.bf16.gmra.mrb[48].mxu0 %vm607_vm1, %v5885_v49 }
 0xe18   : > { %v7261_v23 = vpop.f32.mrb[20].mxu1 }
 0xe19   : > { %v5797_v41 = vpop.f32.mrb[21].mxu1  ;;  %v5806_v7 = vadd.f32 %v7261_v23, %v13778_v22 }
 0xe1a   : > { %v5798_v56 = vadd.f32 %v13778_v22, %v5797_v41  ;;  %v7262_v50 = vpop.f32.mrb[22].mxu1  ;;  %v8527_v41 = vld [vmem:[%s9308_s28 + $0xf8] sm:$0xff] }
 0xe1b   : > { %v5809_v3 = vadd.f32 %v7262_v50, %v13778_v22  ;;  %v5800_v55 = vpop.f32.mrb[23].mxu1  ;;  %v13907_v39 = vadd.f32 %v8522_v36, %v5806_v7  ;;  %v8528_v50 = vld [vmem:[%s9308_s28 + $0xe0] sm:$0xff] }
 0xe1c   : > { %v5801_v2 = vadd.f32 %v13778_v22, %v5800_v55  ;;  %v13901_v53 = vadd.f32 %v8520_v27, %v5798_v56 }
 0xe1d   : > { %v13898_v45 = vadd.f32 %v8519_v4, %v5809_v3  ;;  %v8529_v3 = vld [vmem:[%s9308_s28 + $0xe8] sm:$0xff] }
 0xe1e   : > { %v13904_v38 = vadd.f32 %v8521_v12, %v5801_v2  ;;  %v8530_v2 = vld [vmem:[%s9308_s28 + $0xf0] sm:$0xff] }
 0xe1f   : > { %v5887_v51 = vpack.c.bf16 %v13898_v45, %v13907_v39 }
 0xe20   : > { %v5886_v24 = vpack.c.bf16 %v13904_v38, %v13901_v53 }
 0xe22   : > { %7295 = vmatprep.mubr.msk.bf16.mxu0 %vm607_vm1, %v5886_v24 }
 0xe23   : > { %7296 = vmatmul.mubr.msk.bf16.gmra.mrb[52].mxu0 %vm607_vm1, %v5887_v51 }
 0xe28   : > { %v7265_v25 = vpop.f32.mrb[24].mxu1 }
 0xe29   : > { %v5813_v43 = vpop.f32.mrb[25].mxu1  ;;  %v5822_v61 = vadd.f32 %v7265_v25, %v13778_v22 }
 0xe2a   : > { %v5814_v40 = vadd.f32 %v13778_v22, %v5813_v43  ;;  %v7266_v63 = vpop.f32.mrb[26].mxu1 }
 0xe2b   : > { %v5825_v37 = vadd.f32 %v7266_v63, %v13778_v22  ;;  %v5816_v14 = vpop.f32.mrb[27].mxu1  ;;  %v13929_v18 = vadd.f32 %v8526_v13, %v5822_v61 }
 0xe2c   : > { %v5817_v33 = vadd.f32 %v13778_v22, %v5816_v14  ;;  %v13923_v30 = vadd.f32 %v8524_v57, %v5814_v40 }
 0xe2d   : > { %v13920_v42 = vadd.f32 %v8523_v52, %v5825_v37 }
 0xe2e   : > { %v13926_v29 = vadd.f32 %v8525_v15, %v5817_v33 }
 0xe2f   : > { %v5889_v31 = vpack.c.bf16 %v13920_v42, %v13929_v18 }
 0xe30   : > { %v5888_v9 = vpack.c.bf16 %v13926_v29, %v13923_v30 }
 0xe32   : > { %7299 = vmatprep.mubr.msk.bf16.mxu0 %vm607_vm1, %v5888_v9 }
 0xe33   : > { %7300 = vmatmul.mubr.msk.bf16.gmra.mrb[56].mxu0 %vm607_vm1, %v5889_v31 }
 0xe82   : > { %v7269_v34 = vpop.f32.mrb[28].mxu1 }
 0xe83   : > { %v5829_v26 = vpop.f32.mrb[29].mxu1  ;;  %v5838_v59 = vadd.f32 %v7269_v34, %v13778_v22 }
 0xe84   : > { %v5830_v28 = vadd.f32 %v13778_v22, %v5829_v26  ;;  %v7270_v60 = vpop.f32.mrb[30].mxu1 }
 0xe85   : > { %v5841_v62 = vadd.f32 %v7270_v60, %v13778_v22  ;;  %v5832_v49 = vpop.f32.mrb[31].mxu1  ;;  %v13951_v4 = vadd.f32 %v8530_v2, %v5838_v59 }
 0xe86   : > { %v5833_v23 = vadd.f32 %v13778_v22, %v5832_v49  ;;  %v13945_v7 = vadd.f32 %v8528_v50, %v5830_v28 }
 0xe87   : > { %v13942_v56 = vadd.f32 %v8527_v41, %v5841_v62 }
 0xe88   : > { %v13948_v55 = vadd.f32 %v8529_v3, %v5833_v23 }
 0xe89   : > { %v5891_v12 = vpack.c.bf16 %v13942_v56, %v13951_v4 }
 0xe8a   : > { %v5890_v27 = vpack.c.bf16 %v13948_v55, %v13945_v7 }
 0xe8b   : > { %v7277_v22 = vpop.f32.mrb[32].mxu0 }
 0xe8c   : > { %v5999_v36 = vadd.f32 %v7277_v22, %v13797_v21  ;;  %v5990_v24 = vpop.f32.mrb[33].mxu0  ;;  %7303 = vmatprep.mubr.msk.bf16.mxu0 %vm607_vm1, %v5890_v27 }
 0xe8d   : > { %v5991_v51 = vadd.f32 %v5990_v24, %v13791_v6  ;;  %v7278_v25 = vpop.f32.mrb[34].mxu0  ;;  %7304 = vmatmul.mubr.msk.bf16.gmra.mrb[60].mxu0 %vm607_vm1, %v5891_v12 }
 0xe8e   : > { %6119 = vst.msk [vmem:[%s9308_s28 + $0x10] sm:$0xff] %vm607_vm1, %v5999_v36  ;;  %v6002_v43 = vadd.f32 %v7278_v25, %v13788_v11  ;;  %v5993_v40 = vpop.f32.mrb[35].mxu0 }
 0xe8f   : > { %6117 = vst.msk [vmem:[%s9308_s28] sm:$0xff] %vm607_vm1, %v5991_v51  ;;  %v5994_v21 = vadd.f32 %v5993_v40, %v13794_v47 }
 0xe90   : > { %6120 = vst.msk [vmem:[%s9308_s28 + $0x18] sm:$0xff] %vm607_vm1, %v6002_v43 }
 0xe91   : > { %6118 = vst.msk [vmem:[%s9308_s28 + $0x8] sm:$0xff] %vm607_vm1, %v5994_v21 }
 0xe9b   : > { %v7281_v6 = vpop.f32.mrb[36].mxu0 }
 0xe9c   : > { %v6015_v63 = vadd.f32 %v7281_v6, %v13819_v10  ;;  %v6006_v61 = vpop.f32.mrb[37].mxu0 }
 0xe9d   : > { %v6007_v37 = vadd.f32 %v6006_v61, %v13813_v0  ;;  %v7282_v14 = vpop.f32.mrb[38].mxu0 }
 0xe9e   : > { %6123 = vst.msk [vmem:[%s9308_s28 + $0x30] sm:$0xff] %vm607_vm1, %v6015_v63  ;;  %v6018_v11 = vadd.f32 %v7282_v14, %v13810_v58  ;;  %v6009_v33 = vpop.f32.mrb[39].mxu0 }
 0xe9f   : > { %6121 = vst.msk [vmem:[%s9308_s28 + $0x20] sm:$0xff] %vm607_vm1, %v6007_v37  ;;  %v6010_v47 = vadd.f32 %v6009_v33, %v13816_v46 }
 0xea0   : > { %6124 = vst.msk [vmem:[%s9308_s28 + $0x38] sm:$0xff] %vm607_vm1, %v6018_v11 }
 0xea1   : > { %6122 = vst.msk [vmem:[%s9308_s28 + $0x28] sm:$0xff] %vm607_vm1, %v6010_v47 }
 0xec6   : > { %v7285_v10 = vpop.f32.mrb[40].mxu0 }
 0xec7   : > { %v6031_v0 = vadd.f32 %v7285_v10, %v13841_v20  ;;  %v6022_v52 = vpop.f32.mrb[41].mxu0 }
 0xec8   : > { %v6023_v57 = vadd.f32 %v6022_v52, %v13835_v35  ;;  %v7286_v15 = vpop.f32.mrb[42].mxu0 }
 0xec9   : > { %6127 = vst.msk [vmem:[%s9308_s28 + $0x50] sm:$0xff] %vm607_vm1, %v6031_v0  ;;  %v6034_v58 = vadd.f32 %v7286_v15, %v13832_v17  ;;  %v6025_v13 = vpop.f32.mrb[43].mxu0 }
 0xeca   : > { %6125 = vst.msk [vmem:[%s9308_s28 + $0x40] sm:$0xff] %vm607_vm1, %v6023_v57  ;;  %v6026_v46 = vadd.f32 %v6025_v13, %v13838_v54 }
 0xecb   : > { %6128 = vst.msk [vmem:[%s9308_s28 + $0x58] sm:$0xff] %vm607_vm1, %v6034_v58 }
 0xecc   : > { %6126 = vst.msk [vmem:[%s9308_s28 + $0x48] sm:$0xff] %vm607_vm1, %v6026_v46 }
 0xed6   : > { %v7289_v20 = vpop.f32.mrb[44].mxu0 }
 0xed7   : > { %v6047_v35 = vadd.f32 %v7289_v20, %v13863_v16  ;;  %v6038_v9 = vpop.f32.mrb[45].mxu0 }
 0xed8   : > { %v6039_v31 = vadd.f32 %v6038_v9, %v13857_v1  ;;  %v7290_v34 = vpop.f32.mrb[46].mxu0 }
 0xed9   : > { %6131 = vst.msk [vmem:[%s9308_s28 + $0x70] sm:$0xff] %vm607_vm1, %v6047_v35  ;;  %v6050_v17 = vadd.f32 %v7290_v34, %v13854_v8  ;;  %v6041_v26 = vpop.f32.mrb[47].mxu0 }
 0xeda   : > { %6129 = vst.msk [vmem:[%s9308_s28 + $0x60] sm:$0xff] %vm607_vm1, %v6039_v31  ;;  %v6042_v54 = vadd.f32 %v6041_v26, %v13860_v44 }
 0xedb   : > { %6132 = vst.msk [vmem:[%s9308_s28 + $0x78] sm:$0xff] %vm607_vm1, %v6050_v17 }
 0xedc   : > { %6130 = vst.msk [vmem:[%s9308_s28 + $0x68] sm:$0xff] %vm607_vm1, %v6042_v54 }
 0xee6   : > { %v7293_v16 = vpop.f32.mrb[48].mxu0 }
 0xee7   : > { %v6063_v1 = vadd.f32 %v7293_v16, %v13885_v19  ;;  %v6054_v28 = vpop.f32.mrb[49].mxu0 }
 0xee8   : > { %v6055_v60 = vadd.f32 %v6054_v28, %v13879_v32  ;;  %v7294_v59 = vpop.f32.mrb[50].mxu0 }
 0xee9   : > { %6135 = vst.msk [vmem:[%s9308_s28 + $0x90] sm:$0xff] %vm607_vm1, %v6063_v1  ;;  %v6066_v8 = vadd.f32 %v7294_v59, %v13876_v5  ;;  %v6057_v62 = vpop.f32.mrb[51].mxu0 }
 0xeea   : > { %6133 = vst.msk [vmem:[%s9308_s28 + $0x80] sm:$0xff] %vm607_vm1, %v6055_v60  ;;  %v6058_v44 = vadd.f32 %v6057_v62, %v13882_v48 }
 0xeeb   : > { %6136 = vst.msk [vmem:[%s9308_s28 + $0x98] sm:$0xff] %vm607_vm1, %v6066_v8 }
 0xeec   : > { %6134 = vst.msk [vmem:[%s9308_s28 + $0x88] sm:$0xff] %vm607_vm1, %v6058_v44 }
 0xef6   : > { %v7297_v19 = vpop.f32.mrb[52].mxu0 }
 0xef7   : > { %v6079_v32 = vadd.f32 %v7297_v19, %v13907_v39  ;;  %v6070_v49 = vpop.f32.mrb[53].mxu0 }
 0xef8   : > { %v6071_v23 = vadd.f32 %v6070_v49, %v13901_v53  ;;  %v7298_v41 = vpop.f32.mrb[54].mxu0 }
 0xef9   : > { %6139 = vst.msk [vmem:[%s9308_s28 + $0xb0] sm:$0xff] %vm607_vm1, %v6079_v32  ;;  %v6082_v5 = vadd.f32 %v7298_v41, %v13898_v45  ;;  %v6073_v50 = vpop.f32.mrb[55].mxu0 }
 0xefa   : > { %6137 = vst.msk [vmem:[%s9308_s28 + $0xa0] sm:$0xff] %vm607_vm1, %v6071_v23  ;;  %v6074_v48 = vadd.f32 %v6073_v50, %v13904_v38 }
 0xefb   : > { %6140 = vst.msk [vmem:[%s9308_s28 + $0xb8] sm:$0xff] %vm607_vm1, %v6082_v5 }
 0xefc   : > { %6138 = vst.msk [vmem:[%s9308_s28 + $0xa8] sm:$0xff] %vm607_vm1, %v6074_v48 }
 0xf06   : > { %v7301_v39 = vpop.f32.mrb[56].mxu0 }
 0xf07   : > { %v6095_v53 = vadd.f32 %v7301_v39, %v13929_v18  ;;  %v6086_v3 = vpop.f32.mrb[57].mxu0 }
 0xf08   : > { %v6087_v2 = vadd.f32 %v6086_v3, %v13923_v30  ;;  %v7302_v45 = vpop.f32.mrb[58].mxu0 }
 0xf09   : > { %6143 = vst.msk [vmem:[%s9308_s28 + $0xd0] sm:$0xff] %vm607_vm1, %v6095_v53  ;;  %v6098_v27 = vadd.f32 %v7302_v45, %v13920_v42  ;;  %v6089_v22 = vpop.f32.mrb[59].mxu0 }
 0xf0a   : > { %6141 = vst.msk [vmem:[%s9308_s28 + $0xc0] sm:$0xff] %vm607_vm1, %v6087_v2  ;;  %v6090_v38 = vadd.f32 %v6089_v22, %v13926_v29 }
 0xf0b   : > { %6144 = vst.msk [vmem:[%s9308_s28 + $0xd8] sm:$0xff] %vm607_vm1, %v6098_v27 }
 0xf0c   : > { %6142 = vst.msk [vmem:[%s9308_s28 + $0xc8] sm:$0xff] %vm607_vm1, %v6090_v38 }
 0xf60   : > { %v7305_v18 = vpop.f32.mrb[60].mxu0 }
 0xf61   : > { %v6111_v30 = vadd.f32 %v7305_v18, %v13951_v4  ;;  %v6102_v12 = vpop.f32.mrb[61].mxu0 }
 0xf62   : > { %v6103_v42 = vadd.f32 %v6102_v12, %v13945_v7  ;;  %v7306_v36 = vpop.f32.mrb[62].mxu0 }
 0xf63   : > { %6147 = vst.msk [vmem:[%s9308_s28 + $0xf0] sm:$0xff] %vm607_vm1, %v6111_v30  ;;  %v6114_v29 = vadd.f32 %v7306_v36, %v13942_v56  ;;  %v6105_v24 = vpop.f32.mrb[63].mxu0 }
 0xf64   : > { %6145 = vst.msk [vmem:[%s9308_s28 + $0xe0] sm:$0xff] %vm607_vm1, %v6103_v42  ;;  %v6106_v4 = vadd.f32 %v6105_v24, %v13948_v55 }
 0xf65   : > { %6148 = vst.msk [vmem:[%s9308_s28 + $0xf8] sm:$0xff] %vm607_vm1, %v6114_v29 }
 0xf66   : > { %6146 = vst.msk [vmem:[%s9308_s28 + $0xe8] sm:$0xff] %vm607_vm1, %v6106_v4 }
 0xf67   : > { %8724 = shalt.err (!%p8721_p3)
}
 0xf68   : > { %s8725_s28 = scalar_lea.hbm %s14053_s9, 4096  ;;  %s8729_s0 = scalar_lea.hbm %s15909_s15, 8192 }
 0xf69   : > { %p8726_p0 = scmp.ne.s32.totalorder %s14053_s9, %s8725_s28  ;;  %p8730_p11 = scmp.lt.u32.totalorder %s14053_s9, %s15909_s15 }
 0xf6a   : > { %p8731_p8 = scmp.lt.u32.totalorder %s8729_s0, %s8725_s28  ;;  %p8733_p7 = scmp.lt.u32.totalorder %s8725_s28, %s14053_s9 }
 0xf6b   : > { %p8727_p13 = pnand %p8726_p0, %p15910_p5 }
 0xf6c   : > { %p8732_p10 = por %p8731_p8, %p8730_p11 }
 0xf6d   : > { %p8728_p9 = pneg %p8727_p13 }
 0xf6e   : > { %p8734_p6 = por %p8733_p7, %p8732_p10 }
 0xf70   : > { %p8735_p4 = pnand %p8734_p6, %p8728_p9 }
 0xf72   : > { %8738 = shalt.err (!%p8735_p4)
}
 0xf73   : > { %s8872_s24 = smov 128  }
 0xf74   : > { %7351 = dma.vmem_to_hbm [thread:$0]  (%p15910_p5), %s14058_s3, 4096, %s14053_s9, %s6150_s14, %s8872_s24, %s8872_s24, %s8868_s26  }
 0xf75 PF: > { %s15911_s23 = sld [smem:[#allocation21_spill]]  ;;  %s15912_s11 = sld [smem:[#allocation33_spill]] }
 0xf76   : > { %p7377_p1 = scmp.ge.s32.totalorder %s8845_s7, 2 }
 0xf7b   : > { %s6178_s22 = sand.u32 1, %s15911_s23   ;;  %p15913_p2 = scmp.ne.s32.totalorder %s15912_s11, 0 }
 0xf7c   : > { %s6179_s1 = scalar_lea.sflag [#allocation4], %s6178_s22 }
 0xf7d   : > { %p7373_p12 = pnand %p7377_p1, %p15913_p2 }
 0xf7f   : > { %8800 = dma.done.wait (!%p7373_p12), %s6179_s1, 4096  }
 0xf80   : > { %8802 = vsyncadd (!%p7373_p12), %s6179_s1, 4294963200  ;;  %s31_s7 = sadd.s32 1, %s8845_s7   ;;  %s15914_s21 = sld [smem:[#allocation19_spill]] }
 0xf81   : > { %p28_p3 = scmp.ge.s32.totalorder %s31_s7, 6   ;;  %s15915_s22 = sld [smem:[#allocation20_spill]] }
 0xf82   : > { %s15916_s23 = sld [smem:[#allocation27_spill]]  ;;  %s15917_s27 = sld [smem:[#allocation22_spill]] }
 0xf83   : > { %s15918_s26 = sld [smem:[#allocation32_spill]]  ;;  %s15919_s28 = sld [smem:[#allocation25_spill]] }
 0xf84   : > { %s15920_s19 = sld [smem:[#allocation26_spill]]  ;;  %s15921_s30 = sld [smem:[#allocation30_spill]] }
 0xf85   : > { %s15922_s24 = smov %s8821_s25  ;;  %30 = sbr.rel (!%p28_p3) target bundleno = 20 (0x14), region = 154 }
 0xf88   : > { %s15923_s25 = smov %s15917_s27  ;;  %s15924_s27 = smov %s8837_s29 }
 0xf8a   : > { %s15925_s29 = smov %s15920_s19 }
 0xf8c   :  { %6184 = vsyncpa [#allocation3], 1 }
 0xf8d   :  { %6186 = vsyncpa [#allocation3 + $0x1], 1 }
 0xf8e   :  { %6187 = vsyncpa [#allocation6], 1 }
 0xf8f   :  { %6189 = vsyncpa [#allocation6 + $0x1], 1 }
 0xf90   :  { %6190 = vsyncpa [#allocation9], 1 }
 0xf91   :  { %6192 = vsyncpa [#allocation9 + $0x1], 1 }
 0xf92   :  { %6193 = vsyncpa [#allocation12], 1 }
 0xf93   :  { %6195 = vsyncpa [#allocation12 + $0x1], 1 }
 0xf94   :  { %6196 = vsyncpa [#allocation4], 1 }
 0xf95   :  { %6198 = vsyncpa [#allocation4 + $0x1], 1 }

</bundles_post_ra>
